<compile_context>
chip_gen: v7x
topology: tpu7x:2x2x1
jax: 0.10.0
libtpu: 0.0.40
codegen_flags: <defaults>
</compile_context>

<pallas_src>
import functools

import jax
import jax.numpy as jnp
from jax.experimental import pallas as pl
from jax.experimental.pallas import tpu as pltpu

LANE = 128                     # TPU lane width; all matmul N dims padded to this
MATMUL_DTYPE = jnp.bfloat16    # MXU input dtype (accumulation is always f32)
CONV1_OUT = 32
CONV2_OUT = 64
FC2_OUT = 10
NEG_BIG = -1e30                # padded-logit bias so log_softmax ignores pad lanes


# ---------------------------------------------------------------------------
# Pallas kernel: one fused  act(x @ w + b)  tile
# ---------------------------------------------------------------------------
def _linear_kernel(x_ref, w_ref, b_ref, o_ref, *, activation):
    """o = act(x @ w + b) for one (TM, K) x (K, Npad) tile.

    activation in {None, "relu", "log_softmax"}.  Accumulation and epilogue are
    f32 regardless of input dtype (v5e has no bf16 VPU/EUP path).
    """
    acc = jnp.dot(x_ref[...], w_ref[...], preferred_element_type=jnp.float32)
    acc = acc + b_ref[...]                       # (1, Npad) broadcast, once per tile
    if activation == "relu":
        acc = jnp.maximum(acc, 0.0)
    elif activation == "log_softmax":
        m = jnp.max(acc, axis=-1, keepdims=True)
        acc = acc - m
        acc = acc - jnp.log(jnp.sum(jnp.exp(acc), axis=-1, keepdims=True))
    o_ref[...] = acc.astype(o_ref.dtype)


def linear(x, w, b, activation=None, out_dtype=jnp.float32, tm_max=512):
    """act(x @ w + b): x (M, K), w (K, Npad), b (Npad,) -> (M, Npad).

    Tiled over M (auto double-buffered); K and Npad stay whole (small here).
    Npad must be a multiple of 128 so output stores are lane-dense.
    """
    M, K = x.shape
    K2, Np = w.shape
    assert K == K2 and Np % LANE == 0, (x.shape, w.shape)

    tm = min(tm_max, M)
    if tm < M:
        tm = max(16, (tm // 16) * 16)            # sublane-tile aligned (bf16: 16)
    grid = (pl.cdiv(M, tm),)

    return pl.pallas_call(
        functools.partial(_linear_kernel, activation=activation),
        out_shape=jax.ShapeDtypeStruct((M, Np), out_dtype),
        grid=grid,
        in_specs=[
            pl.BlockSpec((tm, K), lambda i: (i, 0)),   # activation stream (pipelined)
            pl.BlockSpec((K, Np), lambda i: (0, 0)),   # weights: resident across grid
            pl.BlockSpec((1, Np), lambda i: (0, 0)),   # bias
        ],
        out_specs=pl.BlockSpec((tm, Np), lambda i: (i, 0)),
        compiler_params=pltpu.CompilerParams(
            dimension_semantics=("parallel",),         # shard M across TCs on v7x
        ),
    )(x, w, b.reshape(1, Np))


# ---------------------------------------------------------------------------
# Glue (im2col / pooling / parameter prep) in plain JAX
# ---------------------------------------------------------------------------
def _im2col(x_nhwc, kh, kw):
    """Valid-conv patches; column order c*(kh*kw) + dy*kw + dx matches
    torch weight.reshape(O, C*KH*KW)."""
    N, H, W, C = x_nhwc.shape
    oh, ow = H - kh + 1, W - kw + 1
    views = jnp.stack(
        [x_nhwc[:, dy:dy + oh, dx:dx + ow, :] for dy in range(kh) for dx in range(kw)],
        axis=3,
    )                                                    # (N, oh, ow, kh*kw, C)
    patches = jnp.transpose(views, (0, 1, 2, 4, 3)).reshape(N * oh * ow, C * kh * kw)
    # TODO(synk): patches are still materialized in HBM (kh*kw read amplification);
    # an in-kernel shifted-window reduction axis (manual DMA of overlapping rows)
    # would remove that traffic.
    return patches, oh, ow


def conv2d_relu(x_nhwc, w_mat, b, out_dtype, kh=3, kw=3):
    """nn.Conv2d (stride 1, no padding) + fused ReLU via the Pallas matmul."""
    N = x_nhwc.shape[0]
    patches, oh, ow = _im2col(x_nhwc, kh, kw)
    out = linear(patches, w_mat, b, activation="relu", out_dtype=out_dtype)
    return out.reshape(N, oh, ow, w_mat.shape[1])


def max_pool_2x2(x_nhwc):
    """F.max_pool2d(x, 2) as a plain reshape+max (per perf review: no extra
    HBM copies, unlike the previous 4-strided-view Pallas kernel)."""
    N, H, W, C = x_nhwc.shape
    return x_nhwc.reshape(N, H // 2, 2, W // 2, 2, C).max(axis=(2, 4))


def init_params(key):
    """Deterministic synthetic init (PyTorch-like uniform(-1/sqrt(fan_in), .))
    in the original torch layouts."""
    ks = jax.random.split(key, 8)

    def u(k, shape, fan_in):
        bound = 1.0 / jnp.sqrt(jnp.float32(fan_in))
        return jax.random.uniform(k, shape, jnp.float32, -bound, bound)

    return {
        "conv1_w": u(ks[0], (32, 1, 3, 3), 1 * 9),
        "conv1_b": u(ks[1], (32,), 1 * 9),
        "conv2_w": u(ks[2], (64, 32, 3, 3), 32 * 9),
        "conv2_b": u(ks[3], (64,), 32 * 9),
        "fc1_w": u(ks[4], (128, 9216), 9216),
        "fc1_b": u(ks[5], (128,), 9216),
        "fc2_w": u(ks[6], (10, 128), 128),
        "fc2_b": u(ks[7], (10,), 128),
    }


def prepare_params(raw):
    """One-time conversion of torch-layout params to kernel-ready layout:
    pre-transposed, output dims zero-padded to 128 lanes, fc1 rows reordered to
    NHWC-flatten order (folds the runtime NCHW transpose into the weight)."""
    def pad_cols(w2d):
        return jnp.pad(w2d, ((0, 0), (0, LANE - w2d.shape[1])))

    def pad_vec(v):
        return jnp.pad(v, (0, LANE - v.shape[0]))

    # conv1: (32,1,3,3) -> (9, 32) -> (9, 128)
    w1 = pad_cols(raw["conv1_w"].reshape(CONV1_OUT, 9).T).astype(MATMUL_DTYPE)
    b1 = pad_vec(raw["conv1_b"]).astype(jnp.float32)

    # conv2: (64,32,3,3) -> (288, 64) -> (288, 128)
    w2 = pad_cols(
        raw["conv2_w"].reshape(CONV2_OUT, CONV1_OUT * 9).T).astype(MATMUL_DTYPE)
    b2 = pad_vec(raw["conv2_b"]).astype(jnp.float32)

    # fc1: torch (128, 9216) over NCHW-flatten (c*144 + h*12 + w)  ->
    #      (12*12*128, 128) over NHWC-flatten with channels zero-padded to 128.
    wf1 = raw["fc1_w"].reshape(128, CONV2_OUT, 12, 12)      # (out, c, h, w)
    wf1 = jnp.transpose(wf1, (2, 3, 1, 0))                  # (h, w, c, out)
    wf1 = jnp.pad(wf1, ((0, 0), (0, 0), (0, LANE - CONV2_OUT), (0, 0)))
    wf1 = wf1.reshape(12 * 12 * LANE, 128).astype(MATMUL_DTYPE)
    bf1 = raw["fc1_b"].astype(jnp.float32)

    # fc2: (10, 128) -> (128, 128); padded bias lanes = -1e30 so the fused
    # log_softmax treats them as probability zero.
    wf2 = pad_cols(raw["fc2_w"].T).astype(MATMUL_DTYPE)
    bf2 = jnp.concatenate(
        [raw["fc2_b"], jnp.full((LANE - FC2_OUT,), NEG_BIG, jnp.float32)]
    ).astype(jnp.float32)

    return {"conv1_w": w1, "conv1_b": b1, "conv2_w": w2, "conv2_b": b2,
            "fc1_w": wf1, "fc1_b": bf1, "fc2_w": wf2, "fc2_b": bf2}


# ---------------------------------------------------------------------------
# Forward pass
# ---------------------------------------------------------------------------
def net_forward(params, x_nchw):
    """Forward pass of Net (inference mode: dropout = identity)."""
    N = x_nchw.shape[0]
    x = jnp.transpose(x_nchw, (0, 2, 3, 1)).astype(MATMUL_DTYPE)   # NCHW -> NHWC

    # conv1 + ReLU (output padded to 128 lanes; only :CONV1_OUT are real)
    h = conv2d_relu(x, params["conv1_w"], params["conv1_b"], MATMUL_DTYPE)
    h = h[..., :CONV1_OUT]                 # drop pad channels before conv2 im2col

    # conv2 + ReLU (kept 128-wide; pad channels are exactly zero after ReLU)
    h = conv2d_relu(h, params["conv2_w"], params["conv2_b"], MATMUL_DTYPE)

    # 2x2 max-pool (pad channels stay zero)
    h = max_pool_2x2(h)                    # (N, 12, 12, 128)

    # dropout1(p=0.25): identity at inference.
    # TODO(synk): training-mode stochastic dropout not implemented.

    # torch.flatten(x, 1) is NCHW-order; that permutation (and the channel pad)
    # is folded into fc1's weight rows, so a free NHWC reshape suffices here.
    h = h.reshape(N, -1)                   # (N, 12*12*128)

    h = linear(h, params["fc1_w"], params["fc1_b"], activation="relu",
               out_dtype=MATMUL_DTYPE)     # (N, 128)

    # dropout2(p=0.5): identity at inference.

    out = linear(h, params["fc2_w"], params["fc2_b"], activation="log_softmax",
                 out_dtype=jnp.float32)    # (N, 128); lanes >= 10 are ~-1e30
    return out[:, :FC2_OUT]


if __name__ == "__main__":
    key = jax.random.PRNGKey(0)
    k_params, k_x = jax.random.split(key)

    params = prepare_params(init_params(k_params))
    # Input shape implied by fc1 = Linear(9216, 128): 1x28x28 images, batch=2.
    x = jax.random.normal(k_x, (2, 1, 28, 28), jnp.float32)

    out = jax.jit(net_forward)(params, x)
    out = jax.block_until_ready(out)

    assert out.shape == (2, 10), out.shape
    assert out.dtype == jnp.float32
    assert bool(jnp.all(jnp.isfinite(out)))
    # log_softmax rows must (approximately) sum to 1 in probability space.
    assert jnp.allclose(jnp.sum(jnp.exp(out), axis=1), 1.0, atol=1e-4)

    print("KERNEL_OK")
</pallas_src>

<mosaic_0001>
module attributes {stable_mosaic.version = 11 : i64} {
  func.func @_linear_kernel(%arg0: i32, %arg1: memref<512x9xbf16, #tpu.memory_space<vmem>>, %arg2: memref<9x128xbf16, #tpu.memory_space<vmem>>, %arg3: memref<1x128xf32, #tpu.memory_space<vmem>>, %arg4: memref<512x128xbf16, #tpu.memory_space<vmem>>) attributes {dimension_semantics = [#tpu.dimension_semantics<parallel>], iteration_bounds = array<i64: 3>, scalar_prefetch = 0 : i64, scratch_operands = 0 : i64, tpu.core_type = #tpu.core_type<tc>, window_params = [{transform_indices = @transform_0, window_bounds = array<i64: 512, 9>}, {pipeline_mode = #tpu.pipeline_mode<synchronous>, transform_indices = @transform_1, window_bounds = array<i64: 9, 128>}, {pipeline_mode = #tpu.pipeline_mode<synchronous>, transform_indices = @transform_2, window_bounds = array<i64: 1, 128>}, {transform_indices = @transform_3, window_bounds = array<i64: 512, 128>}]} {
    %c0 = arith.constant 0 : index
    %c0_0 = arith.constant 0 : index
    %0 = vector.load %arg1[%c0, %c0_0] : memref<512x9xbf16, #tpu.memory_space<vmem>>, vector<512x9xbf16>
    %c0_1 = arith.constant 0 : index
    %c0_2 = arith.constant 0 : index
    %1 = vector.load %arg2[%c0_1, %c0_2] : memref<9x128xbf16, #tpu.memory_space<vmem>>, vector<9x128xbf16>
    %cst = arith.constant dense<0.000000e+00> : vector<512x128xf32>
    %2 = tpu.matmul %0, %1, %cst {dimension_numbers = #tpu.dot_dimension_numbers<[1], [0], [0], [1], [0, 0, 1, 1], [], []>} : vector<512x9xbf16>, vector<9x128xbf16>, vector<512x128xf32> -> vector<512x128xf32>
    %c0_3 = arith.constant 0 : index
    %c0_4 = arith.constant 0 : index
    %3 = vector.load %arg3[%c0_3, %c0_4] : memref<1x128xf32, #tpu.memory_space<vmem>>, vector<1x128xf32>
    %4 = vector.broadcast %3 : vector<1x128xf32> to vector<512x128xf32>
    %5 = arith.addf %2, %4 : vector<512x128xf32>
    %cst_5 = arith.constant 0.000000e+00 : f32
    %6 = vector.broadcast %cst_5 : f32 to vector<512x128xf32>
    %7 = arith.maximumf %5, %6 : vector<512x128xf32>
    %8 = arith.truncf %7 : vector<512x128xf32> to vector<512x128xbf16>
    %c0_6 = arith.constant 0 : index
    %c0_7 = arith.constant 0 : index
    %9 = vector.load %arg4[%c0_6, %c0_7] : memref<512x128xbf16, #tpu.memory_space<vmem>>, vector<512x128xbf16>
    tpu.vector_store %arg4[%c0_6, %c0_7], %8 {strides = array<i32>} : memref<512x128xbf16, #tpu.memory_space<vmem>>, vector<512x128xbf16>,
    return
  }
  func.func @transform_0(%arg0: i32) -> (i32, i32) {
    %c0_i32 = arith.constant 0 : i32
    %c0_i32_0 = arith.constant 0 : i32
    return %arg0, %c0_i32 : i32, i32
  }
  func.func @transform_1(%arg0: i32) -> (i32, i32) {
    %c0_i32 = arith.constant 0 : i32
    %c0_i32_0 = arith.constant 0 : i32
    %c0_i32_1 = arith.constant 0 : i32
    return %c0_i32, %c0_i32_0 : i32, i32
  }
  func.func @transform_2(%arg0: i32) -> (i32, i32) {
    %c0_i32 = arith.constant 0 : i32
    %c0_i32_0 = arith.constant 0 : i32
    %c0_i32_1 = arith.constant 0 : i32
    return %c0_i32, %c0_i32_0 : i32, i32
  }
  func.func @transform_3(%arg0: i32) -> (i32, i32) {
    %c0_i32 = arith.constant 0 : i32
    %c0_i32_0 = arith.constant 0 : i32
    return %arg0, %c0_i32 : i32, i32
  }
}

module attributes {stable_mosaic.version = 11 : i64} {
  func.func @_linear_kernel(%arg0: i32, %arg1: memref<512x288xbf16, #tpu.memory_space<vmem>>, %arg2: memref<288x128xbf16, #tpu.memory_space<vmem>>, %arg3: memref<1x128xf32, #tpu.memory_space<vmem>>, %arg4: memref<512x128xbf16, #tpu.memory_space<vmem>>) attributes {dimension_semantics = [#tpu.dimension_semantics<parallel>], iteration_bounds = array<i64: 3>, scalar_prefetch = 0 : i64, scratch_operands = 0 : i64, tpu.core_type = #tpu.core_type<tc>, window_params = [{transform_indices = @transform_0, window_bounds = array<i64: 512, 288>}, {pipeline_mode = #tpu.pipeline_mode<synchronous>, transform_indices = @transform_1, window_bounds = array<i64: 288, 128>}, {pipeline_mode = #tpu.pipeline_mode<synchronous>, transform_indices = @transform_2, window_bounds = array<i64: 1, 128>}, {transform_indices = @transform_3, window_bounds = array<i64: 512, 128>}]} {
    %c0 = arith.constant 0 : index
    %c0_0 = arith.constant 0 : index
    %0 = vector.load %arg1[%c0, %c0_0] : memref<512x288xbf16, #tpu.memory_space<vmem>>, vector<512x288xbf16>
    %c0_1 = arith.constant 0 : index
    %c0_2 = arith.constant 0 : index
    %1 = vector.load %arg2[%c0_1, %c0_2] : memref<288x128xbf16, #tpu.memory_space<vmem>>, vector<288x128xbf16>
    %cst = arith.constant dense<0.000000e+00> : vector<512x128xf32>
    %2 = tpu.matmul %0, %1, %cst {dimension_numbers = #tpu.dot_dimension_numbers<[1], [0], [0], [1], [0, 0, 1, 1], [], []>} : vector<512x288xbf16>, vector<288x128xbf16>, vector<512x128xf32> -> vector<512x128xf32>
    %c0_3 = arith.constant 0 : index
    %c0_4 = arith.constant 0 : index
    %3 = vector.load %arg3[%c0_3, %c0_4] : memref<1x128xf32, #tpu.memory_space<vmem>>, vector<1x128xf32>
    %4 = vector.broadcast %3 : vector<1x128xf32> to vector<512x128xf32>
    %5 = arith.addf %2, %4 : vector<512x128xf32>
    %cst_5 = arith.constant 0.000000e+00 : f32
    %6 = vector.broadcast %cst_5 : f32 to vector<512x128xf32>
    %7 = arith.maximumf %5, %6 : vector<512x128xf32>
    %8 = arith.truncf %7 : vector<512x128xf32> to vector<512x128xbf16>
    %c0_6 = arith.constant 0 : index
    %c0_7 = arith.constant 0 : index
    %9 = vector.load %arg4[%c0_6, %c0_7] : memref<512x128xbf16, #tpu.memory_space<vmem>>, vector<512x128xbf16>
    tpu.vector_store %arg4[%c0_6, %c0_7], %8 {strides = array<i32>} : memref<512x128xbf16, #tpu.memory_space<vmem>>, vector<512x128xbf16>,
    return
  }
  func.func @transform_0(%arg0: i32) -> (i32, i32) {
    %c0_i32 = arith.constant 0 : i32
    %c0_i32_0 = arith.constant 0 : i32
    return %arg0, %c0_i32 : i32, i32
  }
  func.func @transform_1(%arg0: i32) -> (i32, i32) {
    %c0_i32 = arith.constant 0 : i32
    %c0_i32_0 = arith.constant 0 : i32
    %c0_i32_1 = arith.constant 0 : i32
    return %c0_i32, %c0_i32_0 : i32, i32
  }
  func.func @transform_2(%arg0: i32) -> (i32, i32) {
    %c0_i32 = arith.constant 0 : i32
    %c0_i32_0 = arith.constant 0 : i32
    %c0_i32_1 = arith.constant 0 : i32
    return %c0_i32, %c0_i32_0 : i32, i32
  }
  func.func @transform_3(%arg0: i32) -> (i32, i32) {
    %c0_i32 = arith.constant 0 : i32
    %c0_i32_0 = arith.constant 0 : i32
    return %arg0, %c0_i32 : i32, i32
  }
}

module attributes {stable_mosaic.version = 11 : i64} {
  func.func @_linear_kernel(%arg0: i32, %arg1: memref<2x18432xbf16, #tpu.memory_space<vmem>>, %arg2: memref<18432x128xbf16, #tpu.memory_space<vmem>>, %arg3: memref<1x128xf32, #tpu.memory_space<vmem>>, %arg4: memref<2x128xbf16, #tpu.memory_space<vmem>>) attributes {dimension_semantics = [#tpu.dimension_semantics<parallel>], iteration_bounds = array<i64: 1>, scalar_prefetch = 0 : i64, scratch_operands = 0 : i64, tpu.core_type = #tpu.core_type<tc>, window_params = [{transform_indices = @transform_0, window_bounds = array<i64: 2, 18432>}, {pipeline_mode = #tpu.pipeline_mode<synchronous>, transform_indices = @transform_1, window_bounds = array<i64: 18432, 128>}, {pipeline_mode = #tpu.pipeline_mode<synchronous>, transform_indices = @transform_2, window_bounds = array<i64: 1, 128>}, {transform_indices = @transform_3, window_bounds = array<i64: 2, 128>}]} {
    %c0 = arith.constant 0 : index
    %c0_0 = arith.constant 0 : index
    %0 = vector.load %arg1[%c0, %c0_0] : memref<2x18432xbf16, #tpu.memory_space<vmem>>, vector<2x18432xbf16>
    %c0_1 = arith.constant 0 : index
    %c0_2 = arith.constant 0 : index
    %1 = vector.load %arg2[%c0_1, %c0_2] : memref<18432x128xbf16, #tpu.memory_space<vmem>>, vector<18432x128xbf16>
    %cst = arith.constant dense<0.000000e+00> : vector<2x128xf32>
    %2 = tpu.matmul %0, %1, %cst {dimension_numbers = #tpu.dot_dimension_numbers<[1], [0], [0], [1], [0, 0, 1, 1], [], []>} : vector<2x18432xbf16>, vector<18432x128xbf16>, vector<2x128xf32> -> vector<2x128xf32>
    %c0_3 = arith.constant 0 : index
    %c0_4 = arith.constant 0 : index
    %3 = vector.load %arg3[%c0_3, %c0_4] : memref<1x128xf32, #tpu.memory_space<vmem>>, vector<1x128xf32>
    %4 = vector.broadcast %3 : vector<1x128xf32> to vector<2x128xf32>
    %5 = arith.addf %2, %4 : vector<2x128xf32>
    %cst_5 = arith.constant 0.000000e+00 : f32
    %6 = vector.broadcast %cst_5 : f32 to vector<2x128xf32>
    %7 = arith.maximumf %5, %6 : vector<2x128xf32>
    %8 = arith.truncf %7 : vector<2x128xf32> to vector<2x128xbf16>
    %c0_6 = arith.constant 0 : index
    %c0_7 = arith.constant 0 : index
    %9 = vector.load %arg4[%c0_6, %c0_7] : memref<2x128xbf16, #tpu.memory_space<vmem>>, vector<2x128xbf16>
    tpu.vector_store %arg4[%c0_6, %c0_7], %8 {strides = array<i32>} : memref<2x128xbf16, #tpu.memory_space<vmem>>, vector<2x128xbf16>,
    return
  }
  func.func @transform_0(%arg0: i32) -> (i32, i32) {
    %c0_i32 = arith.constant 0 : i32
    %c0_i32_0 = arith.constant 0 : i32
    return %arg0, %c0_i32 : i32, i32
  }
  func.func @transform_1(%arg0: i32) -> (i32, i32) {
    %c0_i32 = arith.constant 0 : i32
    %c0_i32_0 = arith.constant 0 : i32
    %c0_i32_1 = arith.constant 0 : i32
    return %c0_i32, %c0_i32_0 : i32, i32
  }
  func.func @transform_2(%arg0: i32) -> (i32, i32) {
    %c0_i32 = arith.constant 0 : i32
    %c0_i32_0 = arith.constant 0 : i32
    %c0_i32_1 = arith.constant 0 : i32
    return %c0_i32, %c0_i32_0 : i32, i32
  }
  func.func @transform_3(%arg0: i32) -> (i32, i32) {
    %c0_i32 = arith.constant 0 : i32
    %c0_i32_0 = arith.constant 0 : i32
    return %arg0, %c0_i32 : i32, i32
  }
}

module attributes {stable_mosaic.version = 11 : i64} {
  func.func @_linear_kernel(%arg0: i32, %arg1: memref<2x128xbf16, #tpu.memory_space<vmem>>, %arg2: memref<128x128xbf16, #tpu.memory_space<vmem>>, %arg3: memref<1x128xf32, #tpu.memory_space<vmem>>, %arg4: memref<2x128xf32, #tpu.memory_space<vmem>>) attributes {dimension_semantics = [#tpu.dimension_semantics<parallel>], iteration_bounds = array<i64: 1>, scalar_prefetch = 0 : i64, scratch_operands = 0 : i64, tpu.core_type = #tpu.core_type<tc>, window_params = [{transform_indices = @transform_0, window_bounds = array<i64: 2, 128>}, {pipeline_mode = #tpu.pipeline_mode<synchronous>, transform_indices = @transform_1, window_bounds = array<i64: 128, 128>}, {pipeline_mode = #tpu.pipeline_mode<synchronous>, transform_indices = @transform_2, window_bounds = array<i64: 1, 128>}, {transform_indices = @transform_3, window_bounds = array<i64: 2, 128>}]} {
    %c0 = arith.constant 0 : index
    %c0_0 = arith.constant 0 : index
    %0 = vector.load %arg1[%c0, %c0_0] : memref<2x128xbf16, #tpu.memory_space<vmem>>, vector<2x128xbf16>
    %c0_1 = arith.constant 0 : index
    %c0_2 = arith.constant 0 : index
    %1 = vector.load %arg2[%c0_1, %c0_2] : memref<128x128xbf16, #tpu.memory_space<vmem>>, vector<128x128xbf16>
    %cst = arith.constant dense<0.000000e+00> : vector<2x128xf32>
    %2 = tpu.matmul %0, %1, %cst {dimension_numbers = #tpu.dot_dimension_numbers<[1], [0], [0], [1], [0, 0, 1, 1], [], []>} : vector<2x128xbf16>, vector<128x128xbf16>, vector<2x128xf32> -> vector<2x128xf32>
    %c0_3 = arith.constant 0 : index
    %c0_4 = arith.constant 0 : index
    %3 = vector.load %arg3[%c0_3, %c0_4] : memref<1x128xf32, #tpu.memory_space<vmem>>, vector<1x128xf32>
    %4 = vector.broadcast %3 : vector<1x128xf32> to vector<2x128xf32>
    %5 = arith.addf %2, %4 : vector<2x128xf32>
    %cst_5 = arith.constant dense<0xFF800000> : vector<2xf32>
    %6 = vector.multi_reduction <maximumf>, %5, %cst_5 [1] : vector<2x128xf32> to vector<2xf32>
    %7 = vector.shape_cast %6 : vector<2xf32> to vector<2x1xf32>
    %8 = vector.broadcast %7 : vector<2x1xf32> to vector<2x128xf32>
    %9 = arith.subf %5, %8 : vector<2x128xf32>
    %10 = math.exp %9 : vector<2x128xf32>
    %cst_6 = arith.constant dense<0.000000e+00> : vector<2xf32>
    %11 = vector.multi_reduction <add>, %10, %cst_6 [1] : vector<2x128xf32> to vector<2xf32>
    %12 = vector.shape_cast %11 : vector<2xf32> to vector<2x1xf32>
    %13 = math.log %12 : vector<2x1xf32>
    %14 = vector.broadcast %13 : vector<2x1xf32> to vector<2x128xf32>
    %15 = arith.subf %9, %14 : vector<2x128xf32>
    %c0_7 = arith.constant 0 : index
    %c0_8 = arith.constant 0 : index
    %16 = vector.load %arg4[%c0_7, %c0_8] : memref<2x128xf32, #tpu.memory_space<vmem>>, vector<2x128xf32>
    tpu.vector_store %arg4[%c0_7, %c0_8], %15 {strides = array<i32>} : memref<2x128xf32, #tpu.memory_space<vmem>>, vector<2x128xf32>,
    return
  }
  func.func @transform_0(%arg0: i32) -> (i32, i32) {
    %c0_i32 = arith.constant 0 : i32
    %c0_i32_0 = arith.constant 0 : i32
    return %arg0, %c0_i32 : i32, i32
  }
  func.func @transform_1(%arg0: i32) -> (i32, i32) {
    %c0_i32 = arith.constant 0 : i32
    %c0_i32_0 = arith.constant 0 : i32
    %c0_i32_1 = arith.constant 0 : i32
    return %c0_i32, %c0_i32_0 : i32, i32
  }
  func.func @transform_2(%arg0: i32) -> (i32, i32) {
    %c0_i32 = arith.constant 0 : i32
    %c0_i32_0 = arith.constant 0 : i32
    %c0_i32_1 = arith.constant 0 : i32
    return %c0_i32, %c0_i32_0 : i32, i32
  }
  func.func @transform_3(%arg0: i32) -> (i32, i32) {
    %c0_i32 = arith.constant 0 : i32
    %c0_i32_0 = arith.constant 0 : i32
    return %arg0, %c0_i32 : i32, i32
  }
}

</mosaic_0001>

<bundles_post_ra>
// kernel: net_forward.4
= control target key start
LH: loop header
LB: loop body
LE: loop exit
PB: predicated region body
PF: predicated region fallthrough
CT: control target
= control target key end

     0   :  { %8 = vsyncpa [#allocation3], 0  ;;  %s3039_s0 = inlined_call_operand.vmem [shape: bf16[1352,9], index: 0, kind: input, shape index: {}]   ;;  %s3040_s1 = inlined_call_operand.hbm [shape: bf16[9,128], index: 1, kind: input, shape index: {}]   ;;  %s3041_s2 = inlined_call_operand.hbm [shape: f32[1,128], index: 2, kind: input, shape index: {}]   ;;  %s3042_s3 = inlined_call_operand.vmem [shape: bf16[1352,128], index: 3, kind: output, shape index: {}]  }
   0x1   :  { %9 = vsyncpa [#allocation5], 0  ;;  %s2563_s12 = smov 0   ;;  %s2565_s13 = smov 0  }
   0x2   :  { %s2567_s14 = smov 0  }
   0x3 LB: > { %s2576_s15 = sadd.s32 4294967295, %s2504_s14   ;;  %s2578_s16 = sadd.s32 1, %s2504_s14   ;;  %s2504_s14 = sphi %s2567_s14, %s3059_s14   ;;  %s2500_s13 = sphi %s2565_s13, %s3058_s13   ;;  %s2496_s12 = sphi %s2563_s12, %s3057_s12  }
   0x4   : > { %s87_s17 = ssub.s32 %s2504_s14, %s2578_s16  ;;  %s90_s18 = sadd.s32 1, %s2500_s13 }
   0x5   : > { %p88_p0 = scmp.eq.s32.totalorder %s87_s17, 0  ;;  %p100_p1 = scmp.ne.s32.totalorder %s2500_s13, %s2496_s12 }
   0x6   : > { %p101_p2 = scmp.eq.s32.totalorder %s2576_s15, 2  ;;  %p1725_p3 = scmp.ge.s32.totalorder %s2504_s14, 1 }
   0x7   : > { %s2586_s19 = scalar_select %p88_p0, %s2500_s13, %s90_s18  }
   0x8   : > { %p2588_p4 = por %p101_p2, %p100_p1  ;;  %p114_p5 = scmp.lt.s32.totalorder %s2504_s14, 4 }
   0x9   : > { %p3043_p6 = scmp.eq.s32.totalorder %s2576_s15, 0  ;;  %s2538_s22 = smov [#allocation2]  }
   0xa   : > { %s3045_s20 = scalar_select %p2588_p4, 1, 0 }
   0xb   : > { %p2593_p7 = pnand %p1725_p3, %p114_p5  ;;  %s126_s23 = sshll.u32 %s2538_s22, 4  ;;  %s127_s23 = int_to_ptr.vmem [resolvable:$true] %s126_s23 }
   0xc   : > { %s2539_s25 = smov [#allocation4]   ;;  %s2386_s29 = scalar_lea.hbm %s3040_s1, 128 }
   0xd   : > { %s3046_s21 = scalar_select %p2593_p7, 1, 0 }
   0xe   : > { %p2249_p8 = pneg %p2593_p7  ;;  %s140_s26 = sshll.u32 %s2539_s25, 4  ;;  %s2605_s26 = int_to_ptr.vmem [resolvable:$true] %s140_s26 }
   0xf   : > { %p2387_p10 = scmp.ne.s32.totalorder %s3040_s1, %s2386_s29  ;;  %p2393_p0 = scmp.lt.u32.totalorder %s2386_s29, %s3040_s1 }
  0x10   : > { %p2601_p9 = pnand %p3043_p6, %p2249_p8 }
  0x12   : > { %p2388_p11 = pneg %p2601_p9 }
  0x14   : > { %p2389_p12 = pnand %p2388_p11, %p2387_p10 }
  0x16   : > { %p2390_p13 = pneg %p2389_p12 }
  0x18   : > { %p2395_p1 = pnand %p2393_p0, %p2390_p13 }
  0x1a   : > { %2398 = shalt.err (!%p2395_p1)
}
  0x1b   : > { %s2399_s7 = scalar_lea.vmem %s127_s23, 128  ;;  %p2407_p8 = scmp.lt.s32.totalorder %s127_s23, %s127_s23 }
  0x1c   : > { %p2400_p2 = scmp.ne.s32.totalorder %s127_s23, %s2399_s7  ;;  %p2408_p6 = scmp.lt.s32.totalorder %s2399_s7, %s2399_s7 }
  0x1e   : > { %p2402_p3 = pnand %p2400_p2, %p2388_p11  ;;  %p2409_p4 = por %p2408_p6, %p2407_p8 }
  0x20   : > { %p2403_p5 = pneg %p2402_p3 }
  0x22   : > { %p2410_p7 = pnand %p2409_p4, %p2403_p5 }
  0x24   : > { %2413 = shalt.err (!%p2410_p7)
}
  0x25   : > { %s2540_s8 = smov 64   ;;  %s2541_s9 = smov 4  }
  0x26   : > { %2252 = dma.hbm_to_vmem [thread:$0]  (!%p2601_p9), %s3040_s1, 128, %s127_s23, [#allocation3], %s2540_s8, %s2540_s8, %s2541_s9  }
  0x27   : > { %s2414_s18 = scalar_lea.hbm %s3041_s2, 16 }
  0x28   : > { %p2415_p10 = scmp.ne.s32.totalorder %s3041_s2, %s2414_s18  ;;  %p2421_p7 = scmp.lt.u32.totalorder %s2414_s18, %s3041_s2 }
  0x2a   : > { %p2417_p4 = pnand %p2415_p10, %p2388_p11 }
  0x2c   : > { %p2418_p6 = pneg %p2417_p4 }
  0x2e   : > { %p2423_p12 = pnand %p2421_p7, %p2418_p6 }
  0x30   : > { %2426 = shalt.err (!%p2423_p12)
}
  0x31   : > { %s2427_s23 = scalar_lea.vmem %s2605_s26, 16  ;;  %s2434_s29 = scalar_lea.vmem %s2605_s26, 32 }
  0x32   : > { %p2428_p13 = scmp.ne.s32.totalorder %s2605_s26, %s2427_s23  ;;  %p2435_p2 = scmp.lt.s32.totalorder %s2605_s26, %s2605_s26 }
  0x33   : > { %p2436_p3 = scmp.lt.s32.totalorder %s2434_s29, %s2427_s23 }
  0x34   : > { %p2430_p0 = pnand %p2428_p13, %p2388_p11 }
  0x35   : > { %p2437_p5 = por %p2436_p3, %p2435_p2 }
  0x36   : > { %p2431_p1 = pneg %p2430_p0 }
  0x38   : > { %p2438_p8 = pnand %p2437_p5, %p2431_p1 }
  0x3a   : > { %2441 = shalt.err (!%p2438_p8)
}
  0x3b   : > { %2255 = dma.hbm_to_vmem [thread:$0]  (!%p2601_p9), %s3041_s2, 16, %s2605_s26, [#allocation5]  }
  0x3c   : > { %p3048_p10 = scmp.ne.s32.totalorder %s3046_s21, 0 }
  0x3d   : > { %p3049_p11 = scmp.eq.s32.totalorder (!%p3048_p10), %s2576_s15, 0 }
  0x3e   : > { %170 = sbr.rel (%p3048_p10) target bundleno = 453 (0x1c5), region = 32 }
  0x45   : > { %2487 = dma.done.wait (%p3049_p11), [#allocation3], 128   ;;  %p3050_p4 = pmov %p3049_p11 }
  0x47   : > { %2489 = vsyncadd (%p3050_p4), [#allocation3], 4294967168  ;;  %p3051_p6 = pmov %p3050_p4 }
  0x48   : > { %p3052_p7 = pmov %p3050_p4 }
  0x49   : > { %2491 = dma.done.wait (%p3051_p6), [#allocation5], 16  }
  0x4a   : > { %2493 = vsyncadd (%p3052_p7), [#allocation5], 4294967280  ;;  %vm556_vm0 = vcmask 1043456   ;;  %s2666_s24 = sshll.u32 %s2576_s15, 6  ;;  %vm557_vm1 = vcmask 1044480   ;;  %v2542_v0 = vmov 65535  }
  0x4b   : > { %p206_p9 = scmp.lt.s32.totalorder %s2666_s24, 168  ;;  %v558_v1 = vsel %vm556_vm0, 4294967295, %v2542_v0  ;;  %vm459_vm2 = vcmask 72704   ;;  %v2353_v3 = vld [vmem:[#allocation2] sm:$0x1f]   ;;  %s198_s8 = sand.u32 1, %s2496_s12  }
  0x4c   : > { %v559_v2 = vsel %vm557_vm1, %v558_v1, 0  ;;  %v2739_v37 = vld [vmem:[#allocation4] ss:$0 sm:$0xff]  ;;  %s1732_s9 = sshll.u32 %s198_s8, 8  ;;  %p3053_p12 = scmp.ne.s32.totalorder %s3045_s20, 0 }
  0x4d   : > { %s207_s21 = scalar_select %p206_p9, %s2666_s24, 168  ;;  %v561_v5 = vand.u32 %v2353_v3, %v559_v2 }
  0x4e   : > { %s2750_s12 = scalar_lea.vmem [#allocation6], %s1732_s9   ;;  %s1244_s10 = ssub.s32 (%p3053_p12), 169, %s2666_s24 }
  0x4f   : > { %s1734_s26 = sshll.u32 %s207_s21, 2  ;;  %2173 = vmatprep.subr.bf16.mxu0 %v561_v5  ;;  %2239 = vmatprep.subr.bf16.mxu1 %v561_v5  ;;  %s1946_s11 = sshll.u32 (%p3053_p12), %s2576_s15, 8 }
  0x50   : > { %s2673_s7 = scalar_lea.vmem %s3039_s0, %s1734_s26  ;;  %2174 = vmatpush3.bf16.msra.mxu0 %v561_v5  ;;  %2240 = vmatpush3.bf16.msra.mxu1 %v561_v5  ;;  %p1245_p13 = scmp.lt.s32.totalorder (%p3053_p12), %s1244_s10, 64 }
  0x51   : > { %v2354_v4 = vld [vmem:[%s2673_s7] sm:$0xff]   ;;  %v2356_v7 = vld [vmem:[%s2673_s7 + $0x8] sm:$0xff]   ;;  %v2358_v9 = vld [vmem:[%s2673_s7 + $0x10] sm:$0xff]   ;;  %s2847_s18 = scalar_lea.vmem (%p3053_p12), %s3042_s3, %s1946_s11  }
  0x52   : > { %v2355_v6 = vld [vmem:[%s2673_s7 + $0x80] sm:$0xff]   ;;  %2175 = vmatprep.mubr.msk.bf16.mxu0 %vm459_vm2, %v2354_v4  ;;  %v2357_v8 = vld [vmem:[%s2673_s7 + $0x88] sm:$0xff]   ;;  %v2359_v10 = vld [vmem:[%s2673_s7 + $0x90] sm:$0xff]  }
  0x53   : > { %2207 = vmatprep.mubr.msk.bf16.mxu1 %vm459_vm2, %v2355_v6  ;;  %2176 = vmatmul.mubr.msk.bf16.vlgmr.msra.gmra.mrb[0].mxu0 %vm459_vm2, %v2356_v7  ;;  %v2360_v11 = vld [vmem:[%s2673_s7 + $0x18] sm:$0xff]   ;;  %v2362_v13 = vld [vmem:[%s2673_s7 + $0x20] sm:$0xff]   ;;  %v2364_v15 = vld [vmem:[%s2673_s7 + $0x28] sm:$0xff]  }
  0x54   : > { %2208 = vmatmul.mubr.msk.bf16.vlgmr.msra.gmra.mrb[0].mxu1 %vm459_vm2, %v2357_v8  ;;  %2179 = vmatprep.mubr.msk.bf16.mxu0 %vm459_vm2, %v2358_v9  ;;  %v2361_v12 = vld [vmem:[%s2673_s7 + $0x98] sm:$0xff]   ;;  %v2363_v14 = vld [vmem:[%s2673_s7 + $0xa0] sm:$0xff]   ;;  %v2365_v16 = vld [vmem:[%s2673_s7 + $0xa8] sm:$0xff]  }
  0x55   : > { %2211 = vmatprep.mubr.msk.bf16.mxu1 %vm459_vm2, %v2359_v10  ;;  %v2366_v17 = vld [vmem:[%s2673_s7 + $0x30] sm:$0xff]   ;;  %v2368_v19 = vld [vmem:[%s2673_s7 + $0x38] sm:$0xff]   ;;  %v2370_v21 = vld [vmem:[%s2673_s7 + $0x40] sm:$0xff]  }
  0x56   : > { %v2367_v18 = vld [vmem:[%s2673_s7 + $0xb0] sm:$0xff]   ;;  %v2369_v20 = vld [vmem:[%s2673_s7 + $0xb8] sm:$0xff]   ;;  %v2371_v22 = vld [vmem:[%s2673_s7 + $0xc0] sm:$0xff]  }
  0x57   : > { %v2372_v23 = vld [vmem:[%s2673_s7 + $0x48] sm:$0xff]   ;;  %v2374_v25 = vld [vmem:[%s2673_s7 + $0x50] sm:$0xff]   ;;  %v2376_v27 = vld [vmem:[%s2673_s7 + $0x58] sm:$0xff]  }
  0x58   : > { %v2373_v24 = vld [vmem:[%s2673_s7 + $0xc8] sm:$0xff]   ;;  %v2375_v26 = vld [vmem:[%s2673_s7 + $0xd0] sm:$0xff]   ;;  %v2377_v28 = vld [vmem:[%s2673_s7 + $0xd8] sm:$0xff]  }
  0x59   : > { %v2378_v29 = vld [vmem:[%s2673_s7 + $0x60] sm:$0xff]   ;;  %v2380_v31 = vld [vmem:[%s2673_s7 + $0x68] sm:$0xff]   ;;  %v2382_v33 = vld [vmem:[%s2673_s7 + $0x70] sm:$0xff]  }
  0x5a   : > { %v2379_v30 = vld [vmem:[%s2673_s7 + $0xe0] sm:$0xff]   ;;  %v2381_v32 = vld [vmem:[%s2673_s7 + $0xe8] sm:$0xff]   ;;  %v2383_v34 = vld [vmem:[%s2673_s7 + $0xf0] sm:$0xff]  }
  0x5b   : > { %2180 = vmatmul.mubr.msk.bf16.gmra.mrb[4].mxu0 %vm459_vm2, %v2360_v11  ;;  %v2384_v35 = vld [vmem:[%s2673_s7 + $0x78] sm:$0xff]  }
  0x5c   : > { %2212 = vmatmul.mubr.msk.bf16.gmra.mrb[4].mxu1 %vm459_vm2, %v2361_v12  ;;  %2183 = vmatprep.mubr.msk.bf16.mxu0 %vm459_vm2, %v2362_v13  ;;  %v2385_v36 = vld [vmem:[%s2673_s7 + $0xf8] sm:$0xff]  }
  0x5d   : > { %2215 = vmatprep.mubr.msk.bf16.mxu1 %vm459_vm2, %v2363_v14 }
  0x63   : > { %2184 = vmatmul.mubr.msk.bf16.gmra.mrb[8].mxu0 %vm459_vm2, %v2364_v15 }
  0x64   : > { %2216 = vmatmul.mubr.msk.bf16.gmra.mrb[8].mxu1 %vm459_vm2, %v2365_v16  ;;  %2187 = vmatprep.mubr.msk.bf16.mxu0 %vm459_vm2, %v2366_v17 }
  0x65   : > { %2219 = vmatprep.mubr.msk.bf16.mxu1 %vm459_vm2, %v2367_v18 }
  0x6b   : > { %2188 = vmatmul.mubr.msk.bf16.gmra.mrb[12].mxu0 %vm459_vm2, %v2368_v19 }
  0x6c   : > { %2220 = vmatmul.mubr.msk.bf16.gmra.mrb[12].mxu1 %vm459_vm2, %v2369_v20  ;;  %2191 = vmatprep.mubr.msk.bf16.mxu0 %vm459_vm2, %v2370_v21 }
  0x6d   : > { %2223 = vmatprep.mubr.msk.bf16.mxu1 %vm459_vm2, %v2371_v22 }
  0x73   : > { %2192 = vmatmul.mubr.msk.bf16.gmra.mrb[16].mxu0 %vm459_vm2, %v2372_v23 }
  0x74   : > { %2224 = vmatmul.mubr.msk.bf16.gmra.mrb[16].mxu1 %vm459_vm2, %v2373_v24  ;;  %2195 = vmatprep.mubr.msk.bf16.mxu0 %vm459_vm2, %v2374_v25 }
  0x75   : > { %2227 = vmatprep.mubr.msk.bf16.mxu1 %vm459_vm2, %v2375_v26 }
  0x7b   : > { %2196 = vmatmul.mubr.msk.bf16.gmra.mrb[20].mxu0 %vm459_vm2, %v2376_v27 }
  0x7c   : > { %2228 = vmatmul.mubr.msk.bf16.gmra.mrb[20].mxu1 %vm459_vm2, %v2377_v28  ;;  %2199 = vmatprep.mubr.msk.bf16.mxu0 %vm459_vm2, %v2378_v29 }
  0x7d   : > { %2231 = vmatprep.mubr.msk.bf16.mxu1 %vm459_vm2, %v2379_v30 }
  0x83   : > { %2200 = vmatmul.mubr.msk.bf16.gmra.mrb[24].mxu0 %vm459_vm2, %v2380_v31 }
  0x84   : > { %2232 = vmatmul.mubr.msk.bf16.gmra.mrb[24].mxu1 %vm459_vm2, %v2381_v32  ;;  %2203 = vmatprep.mubr.msk.bf16.mxu0 %vm459_vm2, %v2382_v33 }
  0x85   : > { %2235 = vmatprep.mubr.msk.bf16.mxu1 %vm459_vm2, %v2383_v34 }
  0x8b   : > { %2204 = vmatmul.mubr.msk.bf16.gmra.mrb[28].mxu0 %vm459_vm2, %v2384_v35 }
  0x8c   : > { %2236 = vmatmul.mubr.msk.bf16.gmra.mrb[28].mxu1 %vm459_vm2, %v2385_v36 }
 0x126   : > { %v2177_v38 = vpop.f32.mrb[0].mxu0 }
 0x127   : > { %v2209_v39 = vpop.f32.mrb[0].mxu1  ;;  %v606_v40 = vadd.f32 %v2177_v38, %v2739_v37  ;;  %v597_v42 = vpop.f32.mrb[1].mxu0 }
 0x128   : > { %v734_v41 = vadd.f32 %v2209_v39, %v2739_v37  ;;  %v725_v43 = vpop.f32.mrb[1].mxu1  ;;  %v598_v44 = vadd.f32 %v2739_v37, %v597_v42  ;;  %v2178_v46 = vpop.f32.mrb[2].mxu0 }
 0x129   : > { %v726_v45 = vadd.f32 %v2739_v37, %v725_v43  ;;  %v2210_v47 = vpop.f32.mrb[2].mxu1  ;;  %v609_v48 = vadd.f32 %v2178_v46, %v2739_v37  ;;  %v600_v50 = vpop.f32.mrb[3].mxu0  ;;  %v854_v54 = vmax.f32 %v606_v40, 0.0 }
 0x12a   : > { %v737_v49 = vadd.f32 %v2210_v47, %v2739_v37  ;;  %v728_v51 = vpop.f32.mrb[3].mxu1  ;;  %v601_v52 = vadd.f32 %v2739_v37, %v600_v50  ;;  %v886_v55 = vmax.f32 %v734_v41, 0.0  ;;  %v852_v58 = vmax.f32 %v598_v44, 0.0 }
 0x12b   : > { %v729_v53 = vadd.f32 %v2739_v37, %v728_v51  ;;  %v855_v56 = vmax.f32 %v609_v48, 0.0  ;;  %v884_v59 = vmax.f32 %v726_v45, 0.0 }
 0x12c   : > { %v887_v57 = vmax.f32 %v737_v49, 0.0  ;;  %v853_v60 = vmax.f32 %v601_v52, 0.0 }
 0x12d   : > { %v885_v61 = vmax.f32 %v729_v53, 0.0  ;;  %v1957_v62 = vpack.c.bf16 %v855_v56, %v854_v54 }
 0x12e   : > { %v2037_v63 = vpack.c.bf16 %v887_v57, %v886_v55  ;;  %v1952_v0 = vpack.c.bf16 %v853_v60, %v852_v58  ;;  %v2181_v2 = vpop.f32.mrb[4].mxu0 }
 0x12f   : > { %v2032_v1 = vpack.c.bf16 %v885_v61, %v884_v59  ;;  %v2213_v3 = vpop.f32.mrb[4].mxu1  ;;  %2109 = vst [vmem:[%s2750_s12 + $0x8] sm:$0xff] %v1957_v62   ;;  %v622_v4 = vadd.f32 %v2181_v2, %v2739_v37  ;;  %v613_v6 = vpop.f32.mrb[5].mxu0 }
 0x130   : > { %2125 = vst [vmem:[%s2750_s12 + $0x88] sm:$0xff] %v2037_v63   ;;  %v750_v5 = vadd.f32 %v2213_v3, %v2739_v37  ;;  %v741_v7 = vpop.f32.mrb[5].mxu1  ;;  %1953 = vst [vmem:[%s2750_s12] sm:$0xff] %v1952_v0   ;;  %v614_v8 = vadd.f32 %v2739_v37, %v613_v6  ;;  %v2182_v10 = vpop.f32.mrb[6].mxu0 }
 0x131   : > { %2124 = vst [vmem:[%s2750_s12 + $0x80] sm:$0xff] %v2032_v1   ;;  %v742_v9 = vadd.f32 %v2739_v37, %v741_v7  ;;  %v2214_v11 = vpop.f32.mrb[6].mxu1  ;;  %v625_v12 = vadd.f32 %v2182_v10, %v2739_v37  ;;  %v616_v14 = vpop.f32.mrb[7].mxu0  ;;  %v858_v18 = vmax.f32 %v622_v4, 0.0 }
 0x132   : > { %v753_v13 = vadd.f32 %v2214_v11, %v2739_v37  ;;  %v744_v15 = vpop.f32.mrb[7].mxu1  ;;  %v617_v16 = vadd.f32 %v2739_v37, %v616_v14  ;;  %v890_v19 = vmax.f32 %v750_v5, 0.0  ;;  %v856_v22 = vmax.f32 %v614_v8, 0.0 }
 0x133   : > { %v745_v17 = vadd.f32 %v2739_v37, %v744_v15  ;;  %v859_v20 = vmax.f32 %v625_v12, 0.0  ;;  %v888_v23 = vmax.f32 %v742_v9, 0.0 }
 0x134   : > { %v891_v21 = vmax.f32 %v753_v13, 0.0  ;;  %v857_v24 = vmax.f32 %v617_v16, 0.0 }
 0x135   : > { %v889_v25 = vmax.f32 %v745_v17, 0.0  ;;  %v1967_v26 = vpack.c.bf16 %v859_v20, %v858_v18 }
 0x136   : > { %v2047_v27 = vpack.c.bf16 %v891_v21, %v890_v19  ;;  %v1962_v28 = vpack.c.bf16 %v857_v24, %v856_v22  ;;  %v2185_v30 = vpop.f32.mrb[8].mxu0 }
 0x137   : > { %v2042_v29 = vpack.c.bf16 %v889_v25, %v888_v23  ;;  %v2217_v31 = vpop.f32.mrb[8].mxu1  ;;  %2111 = vst [vmem:[%s2750_s12 + $0x18] sm:$0xff] %v1967_v26   ;;  %v638_v32 = vadd.f32 %v2185_v30, %v2739_v37  ;;  %v629_v34 = vpop.f32.mrb[9].mxu0 }
 0x138   : > { %2127 = vst [vmem:[%s2750_s12 + $0x98] sm:$0xff] %v2047_v27   ;;  %v766_v33 = vadd.f32 %v2217_v31, %v2739_v37  ;;  %v757_v35 = vpop.f32.mrb[9].mxu1  ;;  %2110 = vst [vmem:[%s2750_s12 + $0x10] sm:$0xff] %v1962_v28   ;;  %v630_v36 = vadd.f32 %v2739_v37, %v629_v34  ;;  %v2186_v39 = vpop.f32.mrb[10].mxu0 }
 0x139   : > { %2126 = vst [vmem:[%s2750_s12 + $0x90] sm:$0xff] %v2042_v29   ;;  %v758_v38 = vadd.f32 %v2739_v37, %v757_v35  ;;  %v2218_v40 = vpop.f32.mrb[10].mxu1  ;;  %v641_v41 = vadd.f32 %v2186_v39, %v2739_v37  ;;  %v632_v43 = vpop.f32.mrb[11].mxu0  ;;  %v862_v47 = vmax.f32 %v638_v32, 0.0 }
 0x13a   : > { %v769_v42 = vadd.f32 %v2218_v40, %v2739_v37  ;;  %v760_v44 = vpop.f32.mrb[11].mxu1  ;;  %v633_v45 = vadd.f32 %v2739_v37, %v632_v43  ;;  %v894_v48 = vmax.f32 %v766_v33, 0.0  ;;  %v860_v51 = vmax.f32 %v630_v36, 0.0 }
 0x13b   : > { %v761_v46 = vadd.f32 %v2739_v37, %v760_v44  ;;  %v863_v49 = vmax.f32 %v641_v41, 0.0  ;;  %v892_v52 = vmax.f32 %v758_v38, 0.0 }
 0x13c   : > { %v895_v50 = vmax.f32 %v769_v42, 0.0  ;;  %v861_v53 = vmax.f32 %v633_v45, 0.0 }
 0x13d   : > { %v893_v54 = vmax.f32 %v761_v46, 0.0  ;;  %v1977_v55 = vpack.c.bf16 %v863_v49, %v862_v47 }
 0x13e   : > { %v2057_v56 = vpack.c.bf16 %v895_v50, %v894_v48  ;;  %v1972_v57 = vpack.c.bf16 %v861_v53, %v860_v51  ;;  %v2189_v59 = vpop.f32.mrb[12].mxu0 }
 0x13f   : > { %v2052_v58 = vpack.c.bf16 %v893_v54, %v892_v52  ;;  %v2221_v60 = vpop.f32.mrb[12].mxu1  ;;  %2113 = vst [vmem:[%s2750_s12 + $0x28] sm:$0xff] %v1977_v55   ;;  %v654_v61 = vadd.f32 %v2189_v59, %v2739_v37  ;;  %v645_v63 = vpop.f32.mrb[13].mxu0 }
 0x140   : > { %2129 = vst [vmem:[%s2750_s12 + $0xa8] sm:$0xff] %v2057_v56   ;;  %v782_v62 = vadd.f32 %v2221_v60, %v2739_v37  ;;  %v773_v0 = vpop.f32.mrb[13].mxu1  ;;  %2112 = vst [vmem:[%s2750_s12 + $0x20] sm:$0xff] %v1972_v57   ;;  %v646_v1 = vadd.f32 %v2739_v37, %v645_v63  ;;  %v2190_v3 = vpop.f32.mrb[14].mxu0 }
 0x141   : > { %2128 = vst [vmem:[%s2750_s12 + $0xa0] sm:$0xff] %v2052_v58   ;;  %v774_v2 = vadd.f32 %v2739_v37, %v773_v0  ;;  %v2222_v4 = vpop.f32.mrb[14].mxu1  ;;  %v657_v5 = vadd.f32 %v2190_v3, %v2739_v37  ;;  %v648_v7 = vpop.f32.mrb[15].mxu0  ;;  %v866_v11 = vmax.f32 %v654_v61, 0.0 }
 0x142   : > { %v785_v6 = vadd.f32 %v2222_v4, %v2739_v37  ;;  %v776_v8 = vpop.f32.mrb[15].mxu1  ;;  %v649_v9 = vadd.f32 %v2739_v37, %v648_v7  ;;  %v898_v12 = vmax.f32 %v782_v62, 0.0  ;;  %v864_v15 = vmax.f32 %v646_v1, 0.0 }
 0x143   : > { %v777_v10 = vadd.f32 %v2739_v37, %v776_v8  ;;  %v867_v13 = vmax.f32 %v657_v5, 0.0  ;;  %v896_v16 = vmax.f32 %v774_v2, 0.0 }
 0x144   : > { %v899_v14 = vmax.f32 %v785_v6, 0.0  ;;  %v865_v17 = vmax.f32 %v649_v9, 0.0 }
 0x145   : > { %v897_v18 = vmax.f32 %v777_v10, 0.0  ;;  %v1987_v19 = vpack.c.bf16 %v867_v13, %v866_v11 }
 0x146   : > { %v2067_v20 = vpack.c.bf16 %v899_v14, %v898_v12  ;;  %v1982_v21 = vpack.c.bf16 %v865_v17, %v864_v15  ;;  %v2193_v23 = vpop.f32.mrb[16].mxu0 }
 0x147   : > { %v2062_v22 = vpack.c.bf16 %v897_v18, %v896_v16  ;;  %v2225_v24 = vpop.f32.mrb[16].mxu1  ;;  %2115 = vst [vmem:[%s2750_s12 + $0x38] sm:$0xff] %v1987_v19   ;;  %v670_v25 = vadd.f32 %v2193_v23, %v2739_v37  ;;  %v661_v27 = vpop.f32.mrb[17].mxu0 }
 0x148   : > { %2131 = vst [vmem:[%s2750_s12 + $0xb8] sm:$0xff] %v2067_v20   ;;  %v798_v26 = vadd.f32 %v2225_v24, %v2739_v37  ;;  %v789_v28 = vpop.f32.mrb[17].mxu1  ;;  %2114 = vst [vmem:[%s2750_s12 + $0x30] sm:$0xff] %v1982_v21   ;;  %v662_v29 = vadd.f32 %v2739_v37, %v661_v27  ;;  %v2194_v31 = vpop.f32.mrb[18].mxu0 }
 0x149   : > { %2130 = vst [vmem:[%s2750_s12 + $0xb0] sm:$0xff] %v2062_v22   ;;  %v790_v30 = vadd.f32 %v2739_v37, %v789_v28  ;;  %v2226_v32 = vpop.f32.mrb[18].mxu1  ;;  %v673_v33 = vadd.f32 %v2194_v31, %v2739_v37  ;;  %v664_v35 = vpop.f32.mrb[19].mxu0  ;;  %v870_v40 = vmax.f32 %v670_v25, 0.0 }
 0x14a   : > { %v801_v34 = vadd.f32 %v2226_v32, %v2739_v37  ;;  %v792_v36 = vpop.f32.mrb[19].mxu1  ;;  %v665_v38 = vadd.f32 %v2739_v37, %v664_v35  ;;  %v902_v41 = vmax.f32 %v798_v26, 0.0  ;;  %v868_v44 = vmax.f32 %v662_v29, 0.0 }
 0x14b   : > { %v793_v39 = vadd.f32 %v2739_v37, %v792_v36  ;;  %v871_v42 = vmax.f32 %v673_v33, 0.0  ;;  %v900_v45 = vmax.f32 %v790_v30, 0.0 }
 0x14c   : > { %v903_v43 = vmax.f32 %v801_v34, 0.0  ;;  %v869_v46 = vmax.f32 %v665_v38, 0.0 }
 0x14d   : > { %v901_v47 = vmax.f32 %v793_v39, 0.0  ;;  %v1997_v48 = vpack.c.bf16 %v871_v42, %v870_v40 }
 0x14e   : > { %v2077_v49 = vpack.c.bf16 %v903_v43, %v902_v41  ;;  %v1992_v50 = vpack.c.bf16 %v869_v46, %v868_v44  ;;  %v2197_v52 = vpop.f32.mrb[20].mxu0 }
 0x14f   : > { %v2072_v51 = vpack.c.bf16 %v901_v47, %v900_v45  ;;  %v2229_v53 = vpop.f32.mrb[20].mxu1  ;;  %2117 = vst [vmem:[%s2750_s12 + $0x48] sm:$0xff] %v1997_v48   ;;  %v686_v54 = vadd.f32 %v2197_v52, %v2739_v37  ;;  %v677_v56 = vpop.f32.mrb[21].mxu0 }
 0x150   : > { %2133 = vst [vmem:[%s2750_s12 + $0xc8] sm:$0xff] %v2077_v49   ;;  %v814_v55 = vadd.f32 %v2229_v53, %v2739_v37  ;;  %v805_v57 = vpop.f32.mrb[21].mxu1  ;;  %2116 = vst [vmem:[%s2750_s12 + $0x40] sm:$0xff] %v1992_v50   ;;  %v678_v58 = vadd.f32 %v2739_v37, %v677_v56  ;;  %v2198_v60 = vpop.f32.mrb[22].mxu0 }
 0x151   : > { %2132 = vst [vmem:[%s2750_s12 + $0xc0] sm:$0xff] %v2072_v51   ;;  %v806_v59 = vadd.f32 %v2739_v37, %v805_v57  ;;  %v2230_v61 = vpop.f32.mrb[22].mxu1  ;;  %v689_v62 = vadd.f32 %v2198_v60, %v2739_v37  ;;  %v680_v0 = vpop.f32.mrb[23].mxu0  ;;  %v874_v4 = vmax.f32 %v686_v54, 0.0 }
 0x152   : > { %v817_v63 = vadd.f32 %v2230_v61, %v2739_v37  ;;  %v808_v1 = vpop.f32.mrb[23].mxu1  ;;  %v681_v2 = vadd.f32 %v2739_v37, %v680_v0  ;;  %v906_v5 = vmax.f32 %v814_v55, 0.0  ;;  %v872_v8 = vmax.f32 %v678_v58, 0.0 }
 0x153   : > { %v809_v3 = vadd.f32 %v2739_v37, %v808_v1  ;;  %v875_v6 = vmax.f32 %v689_v62, 0.0  ;;  %v904_v9 = vmax.f32 %v806_v59, 0.0 }
 0x154   : > { %v907_v7 = vmax.f32 %v817_v63, 0.0  ;;  %v873_v10 = vmax.f32 %v681_v2, 0.0 }
 0x155   : > { %v905_v11 = vmax.f32 %v809_v3, 0.0  ;;  %v2007_v12 = vpack.c.bf16 %v875_v6, %v874_v4 }
 0x156   : > { %v2087_v13 = vpack.c.bf16 %v907_v7, %v906_v5  ;;  %v2002_v14 = vpack.c.bf16 %v873_v10, %v872_v8  ;;  %v2201_v16 = vpop.f32.mrb[24].mxu0 }
 0x157   : > { %v2082_v15 = vpack.c.bf16 %v905_v11, %v904_v9  ;;  %v2233_v17 = vpop.f32.mrb[24].mxu1  ;;  %2119 = vst [vmem:[%s2750_s12 + $0x58] sm:$0xff] %v2007_v12   ;;  %v702_v18 = vadd.f32 %v2201_v16, %v2739_v37  ;;  %v693_v20 = vpop.f32.mrb[25].mxu0 }
 0x158   : > { %2135 = vst [vmem:[%s2750_s12 + $0xd8] sm:$0xff] %v2087_v13   ;;  %v830_v19 = vadd.f32 %v2233_v17, %v2739_v37  ;;  %v821_v21 = vpop.f32.mrb[25].mxu1  ;;  %2118 = vst [vmem:[%s2750_s12 + $0x50] sm:$0xff] %v2002_v14   ;;  %v694_v22 = vadd.f32 %v2739_v37, %v693_v20  ;;  %v2202_v24 = vpop.f32.mrb[26].mxu0 }
 0x159   : > { %2134 = vst [vmem:[%s2750_s12 + $0xd0] sm:$0xff] %v2082_v15   ;;  %v822_v23 = vadd.f32 %v2739_v37, %v821_v21  ;;  %v2234_v25 = vpop.f32.mrb[26].mxu1  ;;  %v705_v26 = vadd.f32 %v2202_v24, %v2739_v37  ;;  %v696_v28 = vpop.f32.mrb[27].mxu0  ;;  %v878_v32 = vmax.f32 %v702_v18, 0.0 }
 0x15a   : > { %v833_v27 = vadd.f32 %v2234_v25, %v2739_v37  ;;  %v824_v29 = vpop.f32.mrb[27].mxu1  ;;  %v697_v30 = vadd.f32 %v2739_v37, %v696_v28  ;;  %v910_v33 = vmax.f32 %v830_v19, 0.0  ;;  %v876_v36 = vmax.f32 %v694_v22, 0.0 }
 0x15b   : > { %v825_v31 = vadd.f32 %v2739_v37, %v824_v29  ;;  %v879_v34 = vmax.f32 %v705_v26, 0.0  ;;  %v908_v38 = vmax.f32 %v822_v23, 0.0 }
 0x15c   : > { %v911_v35 = vmax.f32 %v833_v27, 0.0  ;;  %v877_v39 = vmax.f32 %v697_v30, 0.0 }
 0x15d   : > { %v909_v40 = vmax.f32 %v825_v31, 0.0  ;;  %v2017_v41 = vpack.c.bf16 %v879_v34, %v878_v32 }
 0x15e   : > { %v2097_v42 = vpack.c.bf16 %v911_v35, %v910_v33  ;;  %v2012_v43 = vpack.c.bf16 %v877_v39, %v876_v36  ;;  %v2205_v45 = vpop.f32.mrb[28].mxu0 }
 0x15f   : > { %v2092_v44 = vpack.c.bf16 %v909_v40, %v908_v38  ;;  %v2237_v46 = vpop.f32.mrb[28].mxu1  ;;  %2121 = vst [vmem:[%s2750_s12 + $0x68] sm:$0xff] %v2017_v41   ;;  %v718_v47 = vadd.f32 %v2205_v45, %v2739_v37  ;;  %v709_v49 = vpop.f32.mrb[29].mxu0 }
 0x160   : > { %2137 = vst [vmem:[%s2750_s12 + $0xe8] sm:$0xff] %v2097_v42   ;;  %v846_v48 = vadd.f32 %v2237_v46, %v2739_v37  ;;  %v837_v50 = vpop.f32.mrb[29].mxu1  ;;  %2120 = vst [vmem:[%s2750_s12 + $0x60] sm:$0xff] %v2012_v43   ;;  %v710_v51 = vadd.f32 %v2739_v37, %v709_v49  ;;  %v2206_v53 = vpop.f32.mrb[30].mxu0 }
 0x161   : > { %2136 = vst [vmem:[%s2750_s12 + $0xe0] sm:$0xff] %v2092_v44   ;;  %v838_v52 = vadd.f32 %v2739_v37, %v837_v50  ;;  %v2238_v54 = vpop.f32.mrb[30].mxu1  ;;  %v721_v55 = vadd.f32 %v2206_v53, %v2739_v37  ;;  %v712_v57 = vpop.f32.mrb[31].mxu0  ;;  %v882_v61 = vmax.f32 %v718_v47, 0.0 }
 0x162   : > { %v849_v56 = vadd.f32 %v2238_v54, %v2739_v37  ;;  %v840_v58 = vpop.f32.mrb[31].mxu1  ;;  %v713_v59 = vadd.f32 %v2739_v37, %v712_v57  ;;  %v914_v62 = vmax.f32 %v846_v48, 0.0  ;;  %v880_v1 = vmax.f32 %v710_v51, 0.0 }
 0x163   : > { %v841_v60 = vadd.f32 %v2739_v37, %v840_v58  ;;  %v883_v63 = vmax.f32 %v721_v55, 0.0  ;;  %v912_v2 = vmax.f32 %v838_v52, 0.0  ;;  %1242 = sbr.rel (!%p3053_p12) target bundleno = 453 (0x1c5), region = 44 }
 0x164   : > { %v915_v0 = vmax.f32 %v849_v56, 0.0  ;;  %v881_v3 = vmax.f32 %v713_v59, 0.0 }
 0x165   : > { %v913_v4 = vmax.f32 %v841_v60, 0.0  ;;  %v2027_v5 = vpack.c.bf16 %v883_v63, %v882_v61 }
 0x166   : > { %v2107_v6 = vpack.c.bf16 %v915_v0, %v914_v62  ;;  %v2022_v7 = vpack.c.bf16 %v881_v3, %v880_v1 }
 0x167   : > { %v2102_v8 = vpack.c.bf16 %v913_v4, %v912_v2  ;;  %2123 = vst [vmem:[%s2750_s12 + $0x78] sm:$0xff] %v2027_v5  }
 0x168   : > { %2139 = vst [vmem:[%s2750_s12 + $0xf8] sm:$0xff] %v2107_v6   ;;  %2122 = vst [vmem:[%s2750_s12 + $0x70] sm:$0xff] %v2022_v7  }
 0x169   : > { %2138 = vst [vmem:[%s2750_s12 + $0xf0] sm:$0xff] %v2102_v8  }
 0x16a   : > { %s3061_s10 = smov (!%p1245_p13, %s1244_s10), 64 }
 0x16b   : > { %s1867_s22 = sshll.u32 %s3061_s10, 6 }
 0x16c   : > { %p1870_p0 = scmp.eq.s32.totalorder %s1867_s22, 0 }
 0x16d   : > { %s2853_s25 = sshrl.u32 (!%p1870_p0), %s3061_s10, 6 }
 0x16e   : > { %1253 = sbr.rel (%p1870_p0) target bundleno = 453 (0x1c5), region = 48  ;;  %p1871_p1 = scmp.le.s32.totalorder (!%p1870_p0), %s2853_s25, 0 }
 0x175   : > { %1662 = sbr.rel (%p1871_p1) target bundleno = 432 (0x1b0), region = 121  ;;  %s3054_s15 = smov (!%p1871_p1), %s2847_s18 }
 0x176   : > { %s3055_s20 = smov (!%p1871_p1), %s2750_s12  ;;  %s2862_s27 = smov (!%p1871_p1), 0  }
 0x177   : > { %s2864_s28 = smov (!%p1871_p1), 0  }
 0x17c LB: >> { %v1269_v37 = vld [vmem:[%s2512_s20] sm:$0xf]  ;;  %v1271_v9 = vld [vmem:[%s2512_s20 + $0x4] sm:$0xf]  ;;  %v1273_v10 = vld [vmem:[%s2512_s20 + $0x8] sm:$0xf]  ;;  %s2520_s28 = sphi %s2864_s28, %s1263_s28   ;;  %s2516_s27 = sphi %s2862_s27, %s3056_s27   ;;  %s2512_s20 = sphi %s3055_s20, %s1402_s20   ;;  %s2508_s15 = sphi %s3054_s15, %s1403_s15  }
 0x17d   : >> { %1270 = vst [vmem:[%s2508_s15] sm:$0xf] %v1269_v37  ;;  %1272 = vst [vmem:[%s2508_s15 + $0x4] sm:$0xf] %v1271_v9  ;;  %v1275_v11 = vld [vmem:[%s2512_s20 + $0xc] sm:$0xf]  ;;  %s1397_s23 = sadd.s32 1, %s2516_s27 }
 0x17e   : >> { %1274 = vst [vmem:[%s2508_s15 + $0x8] sm:$0xf] %v1273_v10  ;;  %v1277_v12 = vld [vmem:[%s2512_s20 + $0x10] sm:$0xf]  ;;  %v1279_v13 = vld [vmem:[%s2512_s20 + $0x14] sm:$0xf]  ;;  %p1398_p2 = scmp.ge.s32.totalorder %s1397_s23, %s2853_s25 }
 0x17f   : >> { %1276 = vst [vmem:[%s2508_s15 + $0xc] sm:$0xf] %v1275_v11  ;;  %1278 = vst [vmem:[%s2508_s15 + $0x10] sm:$0xf] %v1277_v12  ;;  %v1281_v14 = vld [vmem:[%s2512_s20 + $0x18] sm:$0xf] }
 0x180   : >> { %1280 = vst [vmem:[%s2508_s15 + $0x14] sm:$0xf] %v1279_v13  ;;  %v1283_v15 = vld [vmem:[%s2512_s20 + $0x1c] sm:$0xf]  ;;  %v1285_v16 = vld [vmem:[%s2512_s20 + $0x20] sm:$0xf] }
 0x181   : >> { %1282 = vst [vmem:[%s2508_s15 + $0x18] sm:$0xf] %v1281_v14  ;;  %1284 = vst [vmem:[%s2508_s15 + $0x1c] sm:$0xf] %v1283_v15  ;;  %v1287_v17 = vld [vmem:[%s2512_s20 + $0x24] sm:$0xf] }
 0x182   : >> { %1286 = vst [vmem:[%s2508_s15 + $0x20] sm:$0xf] %v1285_v16  ;;  %v1289_v18 = vld [vmem:[%s2512_s20 + $0x28] sm:$0xf]  ;;  %v1291_v19 = vld [vmem:[%s2512_s20 + $0x2c] sm:$0xf] }
 0x183   : >> { %1288 = vst [vmem:[%s2508_s15 + $0x24] sm:$0xf] %v1287_v17  ;;  %1290 = vst [vmem:[%s2508_s15 + $0x28] sm:$0xf] %v1289_v18  ;;  %v1293_v20 = vld [vmem:[%s2512_s20 + $0x30] sm:$0xf] }
 0x184   : >> { %1292 = vst [vmem:[%s2508_s15 + $0x2c] sm:$0xf] %v1291_v19  ;;  %v1295_v21 = vld [vmem:[%s2512_s20 + $0x34] sm:$0xf]  ;;  %v1297_v22 = vld [vmem:[%s2512_s20 + $0x38] sm:$0xf] }
 0x185   : >> { %1294 = vst [vmem:[%s2508_s15 + $0x30] sm:$0xf] %v1293_v20  ;;  %1296 = vst [vmem:[%s2508_s15 + $0x34] sm:$0xf] %v1295_v21  ;;  %v1299_v23 = vld [vmem:[%s2512_s20 + $0x3c] sm:$0xf] }
 0x186   : >> { %1298 = vst [vmem:[%s2508_s15 + $0x38] sm:$0xf] %v1297_v22  ;;  %v1301_v24 = vld [vmem:[%s2512_s20 + $0x40] sm:$0xf]  ;;  %v1303_v25 = vld [vmem:[%s2512_s20 + $0x44] sm:$0xf] }
 0x187   : >> { %1300 = vst [vmem:[%s2508_s15 + $0x3c] sm:$0xf] %v1299_v23  ;;  %1302 = vst [vmem:[%s2508_s15 + $0x40] sm:$0xf] %v1301_v24  ;;  %v1305_v26 = vld [vmem:[%s2512_s20 + $0x48] sm:$0xf] }
 0x188   : >> { %1304 = vst [vmem:[%s2508_s15 + $0x44] sm:$0xf] %v1303_v25  ;;  %v1307_v27 = vld [vmem:[%s2512_s20 + $0x4c] sm:$0xf]  ;;  %v1309_v28 = vld [vmem:[%s2512_s20 + $0x50] sm:$0xf] }
 0x189   : >> { %1306 = vst [vmem:[%s2508_s15 + $0x48] sm:$0xf] %v1305_v26  ;;  %1308 = vst [vmem:[%s2508_s15 + $0x4c] sm:$0xf] %v1307_v27  ;;  %v1311_v29 = vld [vmem:[%s2512_s20 + $0x54] sm:$0xf] }
 0x18a   : >> { %1310 = vst [vmem:[%s2508_s15 + $0x50] sm:$0xf] %v1309_v28  ;;  %v1313_v30 = vld [vmem:[%s2512_s20 + $0x58] sm:$0xf]  ;;  %v1315_v31 = vld [vmem:[%s2512_s20 + $0x5c] sm:$0xf] }
 0x18b   : >> { %1312 = vst [vmem:[%s2508_s15 + $0x54] sm:$0xf] %v1311_v29  ;;  %1314 = vst [vmem:[%s2508_s15 + $0x58] sm:$0xf] %v1313_v30  ;;  %v1317_v32 = vld [vmem:[%s2512_s20 + $0x60] sm:$0xf] }
 0x18c   : >> { %1316 = vst [vmem:[%s2508_s15 + $0x5c] sm:$0xf] %v1315_v31  ;;  %v1319_v33 = vld [vmem:[%s2512_s20 + $0x64] sm:$0xf]  ;;  %v1321_v34 = vld [vmem:[%s2512_s20 + $0x68] sm:$0xf] }
 0x18d   : >> { %1318 = vst [vmem:[%s2508_s15 + $0x60] sm:$0xf] %v1317_v32  ;;  %1320 = vst [vmem:[%s2508_s15 + $0x64] sm:$0xf] %v1319_v33  ;;  %v1323_v35 = vld [vmem:[%s2512_s20 + $0x6c] sm:$0xf] }
 0x18e   : >> { %1322 = vst [vmem:[%s2508_s15 + $0x68] sm:$0xf] %v1321_v34  ;;  %v1325_v36 = vld [vmem:[%s2512_s20 + $0x70] sm:$0xf]  ;;  %v1327_v38 = vld [vmem:[%s2512_s20 + $0x74] sm:$0xf] }
 0x18f   : >> { %1324 = vst [vmem:[%s2508_s15 + $0x6c] sm:$0xf] %v1323_v35  ;;  %1326 = vst [vmem:[%s2508_s15 + $0x70] sm:$0xf] %v1325_v36  ;;  %v1329_v39 = vld [vmem:[%s2512_s20 + $0x78] sm:$0xf] }
 0x190   : >> { %1328 = vst [vmem:[%s2508_s15 + $0x74] sm:$0xf] %v1327_v38  ;;  %v1331_v40 = vld [vmem:[%s2512_s20 + $0x7c] sm:$0xf]  ;;  %v1333_v41 = vld [vmem:[%s2512_s20 + $0x80] sm:$0xf] }
 0x191   : >> { %1330 = vst [vmem:[%s2508_s15 + $0x78] sm:$0xf] %v1329_v39  ;;  %1332 = vst [vmem:[%s2508_s15 + $0x7c] sm:$0xf] %v1331_v40  ;;  %v1335_v42 = vld [vmem:[%s2512_s20 + $0x84] sm:$0xf] }
 0x192   : >> { %1334 = vst [vmem:[%s2508_s15 + $0x80] sm:$0xf] %v1333_v41  ;;  %v1337_v43 = vld [vmem:[%s2512_s20 + $0x88] sm:$0xf]  ;;  %v1339_v44 = vld [vmem:[%s2512_s20 + $0x8c] sm:$0xf] }
 0x193   : >> { %1336 = vst [vmem:[%s2508_s15 + $0x84] sm:$0xf] %v1335_v42  ;;  %1338 = vst [vmem:[%s2508_s15 + $0x88] sm:$0xf] %v1337_v43  ;;  %v1341_v45 = vld [vmem:[%s2512_s20 + $0x90] sm:$0xf] }
 0x194   : >> { %1340 = vst [vmem:[%s2508_s15 + $0x8c] sm:$0xf] %v1339_v44  ;;  %v1343_v46 = vld [vmem:[%s2512_s20 + $0x94] sm:$0xf]  ;;  %v1345_v47 = vld [vmem:[%s2512_s20 + $0x98] sm:$0xf] }
 0x195   : >> { %1342 = vst [vmem:[%s2508_s15 + $0x90] sm:$0xf] %v1341_v45  ;;  %1344 = vst [vmem:[%s2508_s15 + $0x94] sm:$0xf] %v1343_v46  ;;  %v1347_v48 = vld [vmem:[%s2512_s20 + $0x9c] sm:$0xf] }
 0x196   : >> { %1346 = vst [vmem:[%s2508_s15 + $0x98] sm:$0xf] %v1345_v47  ;;  %v1349_v49 = vld [vmem:[%s2512_s20 + $0xa0] sm:$0xf]  ;;  %v1351_v50 = vld [vmem:[%s2512_s20 + $0xa4] sm:$0xf] }
 0x197   : >> { %1348 = vst [vmem:[%s2508_s15 + $0x9c] sm:$0xf] %v1347_v48  ;;  %1350 = vst [vmem:[%s2508_s15 + $0xa0] sm:$0xf] %v1349_v49  ;;  %v1353_v51 = vld [vmem:[%s2512_s20 + $0xa8] sm:$0xf] }
 0x198   : >> { %1352 = vst [vmem:[%s2508_s15 + $0xa4] sm:$0xf] %v1351_v50  ;;  %v1355_v52 = vld [vmem:[%s2512_s20 + $0xac] sm:$0xf]  ;;  %v1357_v53 = vld [vmem:[%s2512_s20 + $0xb0] sm:$0xf] }
 0x199   : >> { %1354 = vst [vmem:[%s2508_s15 + $0xa8] sm:$0xf] %v1353_v51  ;;  %1356 = vst [vmem:[%s2508_s15 + $0xac] sm:$0xf] %v1355_v52  ;;  %v1359_v54 = vld [vmem:[%s2512_s20 + $0xb4] sm:$0xf] }
 0x19a   : >> { %1358 = vst [vmem:[%s2508_s15 + $0xb0] sm:$0xf] %v1357_v53  ;;  %v1361_v55 = vld [vmem:[%s2512_s20 + $0xb8] sm:$0xf]  ;;  %v1363_v56 = vld [vmem:[%s2512_s20 + $0xbc] sm:$0xf] }
 0x19b   : >> { %1360 = vst [vmem:[%s2508_s15 + $0xb4] sm:$0xf] %v1359_v54  ;;  %1362 = vst [vmem:[%s2508_s15 + $0xb8] sm:$0xf] %v1361_v55  ;;  %v1365_v57 = vld [vmem:[%s2512_s20 + $0xc0] sm:$0xf] }
 0x19c   : >> { %1364 = vst [vmem:[%s2508_s15 + $0xbc] sm:$0xf] %v1363_v56  ;;  %v1367_v58 = vld [vmem:[%s2512_s20 + $0xc4] sm:$0xf]  ;;  %v1369_v59 = vld [vmem:[%s2512_s20 + $0xc8] sm:$0xf] }
 0x19d   : >> { %1366 = vst [vmem:[%s2508_s15 + $0xc0] sm:$0xf] %v1365_v57  ;;  %1368 = vst [vmem:[%s2508_s15 + $0xc4] sm:$0xf] %v1367_v58  ;;  %v1371_v60 = vld [vmem:[%s2512_s20 + $0xcc] sm:$0xf] }
 0x19e   : >> { %1370 = vst [vmem:[%s2508_s15 + $0xc8] sm:$0xf] %v1369_v59  ;;  %v1373_v61 = vld [vmem:[%s2512_s20 + $0xd0] sm:$0xf]  ;;  %v1375_v62 = vld [vmem:[%s2512_s20 + $0xd4] sm:$0xf] }
 0x19f   : >> { %1372 = vst [vmem:[%s2508_s15 + $0xcc] sm:$0xf] %v1371_v60  ;;  %1374 = vst [vmem:[%s2508_s15 + $0xd0] sm:$0xf] %v1373_v61  ;;  %v1377_v63 = vld [vmem:[%s2512_s20 + $0xd8] sm:$0xf] }
 0x1a0   : >> { %1376 = vst [vmem:[%s2508_s15 + $0xd4] sm:$0xf] %v1375_v62  ;;  %v1379_v0 = vld [vmem:[%s2512_s20 + $0xdc] sm:$0xf]  ;;  %v1381_v1 = vld [vmem:[%s2512_s20 + $0xe0] sm:$0xf] }
 0x1a1   : >> { %1378 = vst [vmem:[%s2508_s15 + $0xd8] sm:$0xf] %v1377_v63  ;;  %1380 = vst [vmem:[%s2508_s15 + $0xdc] sm:$0xf] %v1379_v0  ;;  %v1383_v2 = vld [vmem:[%s2512_s20 + $0xe4] sm:$0xf] }
 0x1a2   : >> { %1382 = vst [vmem:[%s2508_s15 + $0xe0] sm:$0xf] %v1381_v1  ;;  %v1385_v3 = vld [vmem:[%s2512_s20 + $0xe8] sm:$0xf]  ;;  %v1387_v4 = vld [vmem:[%s2512_s20 + $0xec] sm:$0xf] }
 0x1a3   : >> { %1384 = vst [vmem:[%s2508_s15 + $0xe4] sm:$0xf] %v1383_v2  ;;  %1386 = vst [vmem:[%s2508_s15 + $0xe8] sm:$0xf] %v1385_v3  ;;  %v1389_v5 = vld [vmem:[%s2512_s20 + $0xf0] sm:$0xf] }
 0x1a4   : >> { %1388 = vst [vmem:[%s2508_s15 + $0xec] sm:$0xf] %v1387_v4  ;;  %v1391_v6 = vld [vmem:[%s2512_s20 + $0xf4] sm:$0xf]  ;;  %v1393_v7 = vld [vmem:[%s2512_s20 + $0xf8] sm:$0xf] }
 0x1a5   : >> { %1390 = vst [vmem:[%s2508_s15 + $0xf0] sm:$0xf] %v1389_v5  ;;  %1392 = vst [vmem:[%s2508_s15 + $0xf4] sm:$0xf] %v1391_v6  ;;  %v1395_v8 = vld [vmem:[%s2512_s20 + $0xfc] sm:$0xf] }
 0x1a6   : >> { %1394 = vst [vmem:[%s2508_s15 + $0xf8] sm:$0xf] %v1393_v7  ;;  %1396 = vst [vmem:[%s2508_s15 + $0xfc] sm:$0xf] %v1395_v8  ;;  %s3063_s23 = smov (%p1398_p2, %s1397_s23), 0  ;;  %s1263_s28 = sadd.s32 1, %s2520_s28  }
 0x1a7   : >> { %s1872_s29 = sshll.u32 %s3063_s23, 8  ;;  %p1262_p3 = scmp.ge.s32.totalorder %s1263_s28, %s2853_s25 }
 0x1a8   : >> { %s1402_s20 = scalar_lea.vmem %s2750_s12, %s1872_s29 [#allocation6]   ;;  %s1403_s15 = scalar_lea.vmem %s2847_s18, %s1872_s29  }
 0x1a9   : >> { %s3056_s27 = smov %s3063_s23  ;;  %1265 = sbr.rel (!%p1262_p3) target bundleno = 380 (0x17c), region = 127 }
 0x1b0 PF: > { %s3021_s30 = sand.u32 63, %s3061_s10   ;;  %s1947_s4 = sshll.u32 %s2853_s25, 8 }
 0x1b1   : > { %s1408_s24 = scalar_lea.vmem %s2750_s12, %s1947_s4 [#allocation6]   ;;  %s1410_s21 = scalar_lea.vmem %s2847_s18, %s1947_s4  }
 0x1b2   : > { %p1877_p5 = scmp.le.s32.totalorder %s3021_s30, 0 }
 0x1b3   : > { %s2522_s26 = smov (!%p1877_p5), %s1410_s21   ;;  %s2526_s5 = smov (!%p1877_p5), %s1408_s24  }
 0x1b4   : > { %1676 = sbr.rel (%p1877_p5) target bundleno = 453 (0x1c5), region = 132  ;;  %s2530_s6 = smov (!%p1877_p5), 0  }
 0x1b5   : > { %s2534_s7 = smov (!%p1877_p5), 0  }
 0x1bb LB: >> { %v1420_v37 = vld [vmem:[%s2528_s5] sm:$0xf]  ;;  %s1422_s8 = sadd.s32 1, %s2532_s6  ;;  %s1414_s7 = sadd.s32 1, %s2536_s7   ;;  %s2536_s7 = sphi %s2534_s7, %s1414_s7   ;;  %s2532_s6 = sphi %s2530_s6, %s2531_s6   ;;  %s2528_s5 = sphi %s2526_s5, %s1427_s5   ;;  %s2524_s26 = sphi %s2522_s26, %s1428_s26  }
 0x1bc   : >> { %1421 = vst [vmem:[%s2524_s26] sm:$0xf] %v1420_v37  ;;  %p1423_p8 = scmp.ge.s32.totalorder %s1422_s8, %s3021_s30  ;;  %p1413_p10 = scmp.ge.s32.totalorder %s1414_s7, %s3021_s30 }
 0x1be   : >> { %s3065_s8 = smov (%p1423_p8, %s1422_s8), 0  ;;  %1416 = sbr.rel (!%p1413_p10) target bundleno = 443 (0x1bb), region = 138 }
 0x1bf   : >> { %s1878_s9 = sshll.u32 %s3065_s8, 2  ;;  %s2531_s6 = smov %s3065_s8  }
 0x1c0   : >> { %s1427_s5 = scalar_lea.vmem %s1408_s24, %s1878_s9 [#allocation6]   ;;  %s1428_s26 = scalar_lea.vmem %s1410_s21, %s1878_s9  }
 0x1c5 PF: > { %p12_p11 = scmp.ge.s32.totalorder %s2578_s16, 5   ;;  %s3057_s12 = smov %s2500_s13 }
 0x1c6   : > { %s3058_s13 = smov %s2586_s19  ;;  %s3059_s14 = smov %s2578_s16 }
 0x1c7   :  { %14 = sbr.rel (!%p12_p11) target bundleno = 3 (0x3), region = 149 }
 0x1ce   :  { %1615 = vsyncpa [#allocation3], 1 }
 0x1cf   :  { %1617 = vsyncpa [#allocation3 + $0x1], 1 }
 0x1d0   :  { %1618 = vsyncpa [#allocation5], 1 }

// kernel: net_forward.5
= control target key start
LH: loop header
LB: loop body
LE: loop exit
PB: predicated region body
PF: predicated region fallthrough
CT: control target
= control target key end

     0   :  { %s3457_s12 = smov 0   ;;  %s3459_s13 = smov 0   ;;  %s4139_s0 = inlined_call_operand.vmem [shape: bf16[1152,288], index: 0, kind: input, shape index: {}]   ;;  %s4140_s1 = inlined_call_operand.vmem [shape: bf16[288,128], index: 1, kind: input, shape index: {}]   ;;  %s4141_s2 = inlined_call_operand.vmem [shape: f32[1,128], index: 2, kind: input, shape index: {}]   ;;  %s4142_s3 = inlined_call_operand.vmem [shape: bf16[1152,128], index: 3, kind: output, shape index: {}]  }
   0x1   :  { %s3461_s14 = smov 0  }
   0x2 LB: > { %s3470_s15 = sadd.s32 4294967295, %s3402_s14   ;;  %s3472_s16 = sadd.s32 1, %s3402_s14   ;;  %s3402_s14 = sphi %s3461_s14, %s4149_s14   ;;  %s3398_s13 = sphi %s3459_s13, %s4148_s13   ;;  %s3394_s12 = sphi %s3457_s12, %s4147_s12  }
   0x3   : > { %s85_s17 = ssub.s32 %s3402_s14, %s3472_s16  ;;  %s88_s18 = sadd.s32 1, %s3398_s13 }
   0x4   : > { %p86_p0 = scmp.eq.s32.totalorder %s85_s17, 0  ;;  %p98_p1 = scmp.ne.s32.totalorder %s3398_s13, %s3394_s12 }
   0x5   : > { %p99_p2 = scmp.eq.s32.totalorder %s3470_s15, 2  ;;  %p2488_p3 = scmp.ge.s32.totalorder %s3402_s14, 1 }
   0x6   : > { %s3480_s19 = scalar_select %p86_p0, %s3398_s13, %s88_s18  }
   0x7   : > { %p3482_p4 = por %p99_p2, %p98_p1  ;;  %p149_p5 = scmp.lt.s32.totalorder %s3402_s14, 4 }
   0x9   : > { %p150_p6 = pnand %p2488_p3, %p149_p5 }
   0xa   : > { %v3202_v0 = vld [vmem:[%s4140_s1] sm:$0xff] (!%p150_p6)   ;;  %v3436_v1 = vmov (!%p150_p6), 0   ;;  %s3492_s23 = sshll.u32 (!%p150_p6), %s3470_s15, 6  ;;  %v3203_v2 = vld [vmem:[%s4140_s1 + $0x8] sm:$0xff] (!%p150_p6)   ;;  %v3204_v3 = vld [vmem:[%s4140_s1 + $0x10] sm:$0xff] (!%p150_p6)   ;;  %vm960_vm0 = vcmask (!%p150_p6), 261120  }
   0xb   : > { %153 = sbr.rel (%p150_p6) target bundleno = 573 (0x23d), region = 32  ;;  %1057 = vmatprep.subr.bf16.mxu0 (!%p150_p6), %v3436_v1  ;;  %3080 = vmatprep.subr.bf16.mxu1 (!%p150_p6), %v3436_v1  ;;  %p184_p7 = scmp.lt.s32.totalorder (!%p150_p6), %s3492_s23, 143  ;;  %v3205_v4 = vld [vmem:[%s4140_s1 + $0x18] sm:$0xff] (!%p150_p6)   ;;  %v3206_v5 = vld [vmem:[%s4140_s1 + $0x20] sm:$0xff] (!%p150_p6)   ;;  %v3207_v7 = vld [vmem:[%s4140_s1 + $0x28] sm:$0xff] (!%p150_p6)  }
   0xc   : > { %1058 = vmatpush1.bf16.msra.mxu0 (!%p150_p6), %v3202_v0  ;;  %3096 = vmatpush1.bf16.msra.mxu1 (!%p150_p6), %v3202_v0  ;;  %v3208_v9 = vld [vmem:[%s4140_s1 + $0x30] sm:$0xff] (!%p150_p6)   ;;  %v3209_v10 = vld [vmem:[%s4140_s1 + $0x38] sm:$0xff] (!%p150_p6)   ;;  %v3210_v11 = vld [vmem:[%s4140_s1 + $0x40] sm:$0xff] (!%p150_p6)   ;;  %s175_s25 = sand.u32 (!%p150_p6), 1, %s3394_s12  }
   0xd   : > { %1059 = vmatprep.subr.bf16.mxu0 (!%p150_p6), %v3436_v1  ;;  %3081 = vmatprep.subr.bf16.mxu1 (!%p150_p6), %v3436_v1  ;;  %v3211_v12 = vld [vmem:[%s4140_s1 + $0x48] sm:$0xff] (!%p150_p6)   ;;  %v3212_v13 = vld [vmem:[%s4140_s1 + $0x50] sm:$0xff] (!%p150_p6)   ;;  %v3213_v14 = vld [vmem:[%s4140_s1 + $0x58] sm:$0xff] (!%p150_p6)   ;;  %s2489_s26 = sshll.u32 (!%p150_p6), %s175_s25, 8 }
   0xe   : > { %v3214_v15 = vld [vmem:[%s4140_s1 + $0x60] sm:$0xff] (!%p150_p6)   ;;  %v3215_v16 = vld [vmem:[%s4140_s1 + $0x68] sm:$0xff] (!%p150_p6)   ;;  %v3216_v17 = vld [vmem:[%s4140_s1 + $0x70] sm:$0xff] (!%p150_p6)   ;;  %s3794_s12 = scalar_lea.vmem (!%p150_p6), [#allocation2], %s2489_s26  }
   0xf   : > { %v3217_v18 = vld [vmem:[%s4140_s1 + $0x78] sm:$0xff] (!%p150_p6)   ;;  %v3224_v19 = vld [vmem:[%s4140_s1 + $0x80] sm:$0xff] (!%p150_p6)   ;;  %v3249_v24 = vld [vmem:[%s4140_s1 + $0x88] sm:$0xff] (!%p150_p6)  }
  0x10   : > { %1060 = vmatpush1.bf16.msra.mxu0 (!%p150_p6), %v3203_v2  ;;  %3097 = vmatpush1.bf16.msra.mxu1 (!%p150_p6), %v3203_v2 }
  0x11   : > { %1061 = vmatprep.subr.bf16.mxu0 (!%p150_p6), %v3436_v1  ;;  %3082 = vmatprep.subr.bf16.mxu1 (!%p150_p6), %v3436_v1 }
  0x12   : > { %s185_s28 = scalar_select %p184_p7, %s3492_s23, 143 }
  0x13   : > { %s2027_s27 = ssub.s32 (%p3482_p4), 144, %s3492_s23 }
  0x14   : > { %1062 = vmatpush1.bf16.msra.mxu0 %v3204_v3  ;;  %3098 = vmatpush1.bf16.msra.mxu1 %v3204_v3  ;;  %s3112_s4 = smul.u32 12, %s185_s28  ;;  %s2784_s28 = sshll.u32 (%p3482_p4), %s3470_s15, 8 }
  0x15   : > { %1063 = vmatprep.subr.bf16.mxu0 %v3436_v1  ;;  %3083 = vmatprep.subr.bf16.mxu1 %v3436_v1  ;;  %p2028_p8 = scmp.lt.s32.totalorder (%p3482_p4), %s2027_s27, 64 }
  0x16   : > { %s3517_s9 = scalar_lea.vmem %s4139_s0, %s3112_s4  ;;  %s3947_s4 = scalar_lea.vmem (%p3482_p4), %s4142_s3, %s2784_s28  }
  0x17   : > { %v3220_v6 = vld [vmem:[%s3517_s9 + $0x4] ss:$12 sps:$4 sm:$0xff]   ;;  %v3218_v20 = vld [vmem:[%s3517_s9] ss:$12 sps:$4 sm:$0xff]   ;;  %v3225_v22 = vld [vmem:[%s3517_s9 + $0x1c] ss:$12 sps:$4 sm:$0xff]  }
  0x18   : > { %1064 = vmatpush1.bf16.msra.mxu0 %v3205_v4  ;;  %3099 = vmatpush1.bf16.msra.mxu1 %v3205_v4  ;;  %v3223_v8 = vld [vmem:[%s3517_s9 + $0x244] ss:$12 sps:$4 sm:$0xff]   ;;  %v3221_v21 = vld [vmem:[%s3517_s9 + $0x240] ss:$12 sps:$4 sm:$0xff]   ;;  %v3227_v23 = vld [vmem:[%s3517_s9 + $0x25c] ss:$12 sps:$4 sm:$0xff]  }
  0x19   : > { %1065 = vmatprep.subr.bf16.mxu0 %v3436_v1  ;;  %3084 = vmatprep.subr.bf16.mxu1 %v3436_v1  ;;  %v3229_v25 = vld [vmem:[%s3517_s9 + $0x18] ss:$12 sps:$4 sm:$0xff]   ;;  %v3231_v27 = vld [vmem:[%s3517_s9 + $0x34] ss:$12 sps:$4 sm:$0xff]   ;;  %v3235_v29 = vld [vmem:[%s3517_s9 + $0x30] ss:$12 sps:$4 sm:$0xff]  }
  0x1a   : > { %1089 = vmatprep.mubr.bf16.mxu0 %v3220_v6  ;;  %1281 = vmatprep.mubr.bf16.mxu1 %v3223_v8  ;;  %v3230_v26 = vld [vmem:[%s3517_s9 + $0x258] ss:$12 sps:$4 sm:$0xff]   ;;  %v3233_v28 = vld [vmem:[%s3517_s9 + $0x274] ss:$12 sps:$4 sm:$0xff]   ;;  %v3236_v30 = vld [vmem:[%s3517_s9 + $0x270] ss:$12 sps:$4 sm:$0xff]  }
  0x1b   : > { %v3237_v31 = vld [vmem:[%s3517_s9 + $0x4c] ss:$12 sps:$4 sm:$0xff]   ;;  %v3241_v33 = vld [vmem:[%s3517_s9 + $0x48] ss:$12 sps:$4 sm:$0xff]   ;;  %v3243_v35 = vld [vmem:[%s3517_s9 + $0x64] ss:$12 sps:$4 sm:$0xff]  }
  0x1c   : > { %1066 = vmatpush1.bf16.msra.mxu0 %v3206_v5  ;;  %3100 = vmatpush1.bf16.msra.mxu1 %v3206_v5  ;;  %v3239_v32 = vld [vmem:[%s3517_s9 + $0x28c] ss:$12 sps:$4 sm:$0xff]   ;;  %v3242_v34 = vld [vmem:[%s3517_s9 + $0x288] ss:$12 sps:$4 sm:$0xff]   ;;  %v3245_v36 = vld [vmem:[%s3517_s9 + $0x2a4] ss:$12 sps:$4 sm:$0xff]  }
  0x1d   : > { %1067 = vmatprep.subr.bf16.mxu0 %v3436_v1  ;;  %3085 = vmatprep.subr.bf16.mxu1 %v3436_v1  ;;  %v3247_v37 = vld [vmem:[%s3517_s9 + $0x60] ss:$12 sps:$4 sm:$0xff]   ;;  %v3250_v39 = vld [vmem:[%s3517_s9 + $0x7c] ss:$12 sps:$4 sm:$0xff]   ;;  %v3254_v41 = vld [vmem:[%s3517_s9 + $0x78] ss:$12 sps:$4 sm:$0xff]  }
  0x1e   : > { %v3248_v38 = vld [vmem:[%s3517_s9 + $0x2a0] ss:$12 sps:$4 sm:$0xff]   ;;  %v3252_v40 = vld [vmem:[%s3517_s9 + $0x2bc] ss:$12 sps:$4 sm:$0xff]   ;;  %v3255_v42 = vld [vmem:[%s3517_s9 + $0x2b8] ss:$12 sps:$4 sm:$0xff]  }
  0x1f   : > { %v3256_v43 = vld [vmem:[%s3517_s9 + $0x94] ss:$12 sps:$4 sm:$0xff]   ;;  %v3260_v45 = vld [vmem:[%s3517_s9 + $0x90] ss:$12 sps:$4 sm:$0xff]   ;;  %v3262_v47 = vld [vmem:[%s3517_s9 + $0xac] ss:$12 sps:$4 sm:$0xff]  }
  0x20   : > { %1068 = vmatpush1.bf16.msra.mxu0 %v3207_v7  ;;  %3101 = vmatpush1.bf16.msra.mxu1 %v3207_v7  ;;  %v3258_v44 = vld [vmem:[%s3517_s9 + $0x2d4] ss:$12 sps:$4 sm:$0xff]   ;;  %v3261_v46 = vld [vmem:[%s3517_s9 + $0x2d0] ss:$12 sps:$4 sm:$0xff]   ;;  %v3264_v48 = vld [vmem:[%s3517_s9 + $0x2ec] ss:$12 sps:$4 sm:$0xff]  }
  0x21   : > { %1069 = vmatprep.subr.bf16.mxu0 %v3436_v1  ;;  %3086 = vmatprep.subr.bf16.mxu1 %v3436_v1  ;;  %v3266_v49 = vld [vmem:[%s3517_s9 + $0xa8] ss:$12 sps:$4 sm:$0xff]   ;;  %v3268_v51 = vld [vmem:[%s3517_s9 + $0xc4] ss:$12 sps:$4 sm:$0xff]   ;;  %v3271_v53 = vld [vmem:[%s3517_s9 + $0xc0] ss:$12 sps:$4 sm:$0xff]  }
  0x22   : > { %v3267_v50 = vld [vmem:[%s3517_s9 + $0x2e8] ss:$12 sps:$4 sm:$0xff]   ;;  %v3272_v54 = vld [vmem:[%s3517_s9 + $0x20] ss:$12 sps:$4 sm:$0xff]   ;;  %v3275_v56 = vld [vmem:[%s3517_s9 + $0x38] ss:$12 sps:$4 sm:$0xff]  }
  0x23   : > { %v3270_v52 = vld [vmem:[%s3517_s9 + $0x8] ss:$12 sps:$4 sm:$0xff]   ;;  %v3276_v57 = vld [vmem:[%s3517_s9 + $0xd8] ss:$12 sps:$4 sm:$0xff]   ;;  %v3277_v58 = vld [vmem:[%s3517_s9 + $0x50] ss:$12 sps:$4 sm:$0xff]  }
  0x24   : > { %1070 = vmatpush1.bf16.msra.mxu0 %v3208_v9  ;;  %3102 = vmatpush1.bf16.msra.mxu1 %v3208_v9  ;;  %v3273_v55 = vld [vmem:[%s3517_s9 + $0xdc] ss:$12 sps:$4 sm:$0xff]   ;;  %v3278_v59 = vld [vmem:[%s3517_s9 + $0xf4] ss:$12 sps:$4 sm:$0xff]   ;;  %v3283_v63 = vld [vmem:[%s3517_s9 + $0x10c] ss:$12 sps:$4 sm:$0xff]  }
  0x25   : > { %1071 = vmatprep.subr.bf16.mxu0 %v3436_v1  ;;  %3087 = vmatprep.subr.bf16.mxu1 %v3436_v1  ;;  %v3280_v60 = vld [vmem:[%s3517_s9 + $0x68] ss:$12 sps:$4 sm:$0xff]   ;;  %v3281_v61 = vld [vmem:[%s3517_s9 + $0xf0] ss:$12 sps:$4 sm:$0xff]   ;;  %v3282_v62 = vld [vmem:[%s3517_s9 + $0x80] ss:$12 sps:$4 sm:$0xff]  }
  0x26   : > { %v3285_v0 = vld [vmem:[%s3517_s9 + $0x98] ss:$12 sps:$4 sm:$0xff]   ;;  %v3287_v2 = vld [vmem:[%s3517_s9 + $0xb0] ss:$12 sps:$4 sm:$0xff]   ;;  %v3290_v4 = vld [vmem:[%s3517_s9 + $0xc8] ss:$12 sps:$4 sm:$0xff]  }
  0x27   : > { %v3288_v3 = vld [vmem:[%s3517_s9 + $0x124] ss:$12 sps:$4 sm:$0xff]   ;;  %v3291_v5 = vld [vmem:[%s3517_s9 + $0x120] ss:$12 sps:$4 sm:$0xff]   ;;  %v3293_v7 = vld [vmem:[%s3517_s9 + $0x13c] ss:$12 sps:$4 sm:$0xff]  }
  0x28   : > { %1072 = vmatpush1.bf16.msra.mxu0 %v3209_v10  ;;  %3103 = vmatpush1.bf16.msra.mxu1 %v3209_v10  ;;  %v3292_v6 = vld [vmem:[%s3517_s9 + $0xe0] ss:$12 sps:$4 sm:$0xff]   ;;  %v3295_v8 = vld [vmem:[%s3517_s9 + $0xf8] ss:$12 sps:$4 sm:$0xff]   ;;  %v3297_v10 = vld [vmem:[%s3517_s9 + $0x110] ss:$12 sps:$4 sm:$0xff]  }
  0x29   : > { %1073 = vmatprep.subr.bf16.mxu0 %v3436_v1  ;;  %3088 = vmatprep.subr.bf16.mxu1 %v3436_v1  ;;  %v3296_v9 = vld [vmem:[%s3517_s9 + $0x138] ss:$12 sps:$4 sm:$0xff]  }
  0x2c   : > { %1074 = vmatpush1.bf16.msra.mxu0 %v3210_v11  ;;  %3104 = vmatpush1.bf16.msra.mxu1 %v3210_v11  ;;  %v3298_v11 = vld [vmem:[%s3517_s9 + $0x154] ss:$12 sps:$4 sm:$0xff]  }
  0x2d   : > { %1075 = vmatprep.subr.bf16.mxu0 %v3436_v1  ;;  %3089 = vmatprep.subr.bf16.mxu1 %v3436_v1 }
  0x30   : > { %1076 = vmatpush1.bf16.msra.mxu0 %v3211_v12  ;;  %3105 = vmatpush1.bf16.msra.mxu1 %v3211_v12  ;;  %v3300_v12 = vld [vmem:[%s3517_s9 + $0x128] ss:$12 sps:$4 sm:$0xff]  }
  0x31   : > { %1077 = vmatprep.subr.bf16.mxu0 %v3436_v1  ;;  %3090 = vmatprep.subr.bf16.mxu1 %v3436_v1 }
  0x34   : > { %1078 = vmatpush1.bf16.msra.mxu0 %v3212_v13  ;;  %3106 = vmatpush1.bf16.msra.mxu1 %v3212_v13  ;;  %v3301_v13 = vld [vmem:[%s3517_s9 + $0x150] ss:$12 sps:$4 sm:$0xff]  }
  0x35   : > { %1079 = vmatprep.subr.bf16.mxu0 %v3436_v1  ;;  %3091 = vmatprep.subr.bf16.mxu1 %v3436_v1 }
  0x38   : > { %1080 = vmatpush1.bf16.msra.mxu0 %v3213_v14  ;;  %3107 = vmatpush1.bf16.msra.mxu1 %v3213_v14  ;;  %v3302_v14 = vld [vmem:[%s3517_s9 + $0x140] ss:$12 sps:$4 sm:$0xff]  }
  0x39   : > { %1081 = vmatprep.subr.bf16.mxu0 %v3436_v1  ;;  %3092 = vmatprep.subr.bf16.mxu1 %v3436_v1 }
  0x3c   : > { %1082 = vmatpush1.bf16.msra.mxu0 %v3214_v15  ;;  %3108 = vmatpush1.bf16.msra.mxu1 %v3214_v15  ;;  %v3303_v15 = vld [vmem:[%s3517_s9 + $0x16c] ss:$12 sps:$4 sm:$0xff]  }
  0x3d   : > { %1083 = vmatprep.subr.bf16.mxu0 %v3436_v1  ;;  %3093 = vmatprep.subr.bf16.mxu1 %v3436_v1 }
  0x40   : > { %1084 = vmatpush1.bf16.msra.mxu0 %v3215_v16  ;;  %3109 = vmatpush1.bf16.msra.mxu1 %v3215_v16  ;;  %v3305_v16 = vld [vmem:[%s3517_s9 + $0x158] ss:$12 sps:$4 sm:$0xff]  }
  0x41   : > { %1085 = vmatprep.subr.bf16.mxu0 %v3436_v1  ;;  %3094 = vmatprep.subr.bf16.mxu1 %v3436_v1 }
  0x44   : > { %1086 = vmatpush1.bf16.msra.mxu0 %v3216_v17  ;;  %3110 = vmatpush1.bf16.msra.mxu1 %v3216_v17  ;;  %v3306_v17 = vld [vmem:[%s3517_s9 + $0x168] ss:$12 sps:$4 sm:$0xff]  }
  0x45   : > { %1087 = vmatprep.subr.bf16.mxu0 %v3436_v1  ;;  %3095 = vmatprep.subr.bf16.mxu1 %v3436_v1  ;;  %v3286_v1 = vld [vmem:[%s3517_s9 + $0x108] ss:$12 sps:$4 sm:$0xff]  }
  0x48   : > { %1088 = vmatpush1.bf16.msra.mxu0 %v3217_v18  ;;  %3111 = vmatpush1.bf16.msra.mxu1 %v3217_v18  ;;  %v3307_v18 = vld [vmem:[%s3517_s9 + $0x170] ss:$12 sps:$4 sm:$0xff]  }
  0x49   : > { %3012 = vmatprep.subr.bf16.mxu1 %v3224_v19 }
  0x4b   : > { %1090 = vmatmul.mubr.bf16.vlgmr.msra.gmra.mrb[0].mxu0 %v3218_v20  ;;  %1282 = vmatmul.mubr.bf16.vlgmr.msra.gmra.mrb[0].mxu1 %v3221_v21  ;;  %v3310_v20 = vld [vmem:[%s3517_s9 + $0x188] ss:$12 sps:$4 sm:$0xff]   ;;  %v3311_v21 = vld [vmem:[%s3517_s9 + $0x180] ss:$12 sps:$4 sm:$0xff]  }
  0x4c   : > { %3013 = vmatpush3.bf16.msra.mxu1 %v3224_v19  ;;  %1097 = vmatprep.mubr.bf16.mxu0 %v3225_v22  ;;  %v3308_v19 = vld [vmem:[%s3517_s9 + $0x184] ss:$12 sps:$4 sm:$0xff]   ;;  %v3312_v22 = vld [vmem:[%s3517_s9 + $0x1a0] ss:$12 sps:$4 sm:$0xff]  }
  0x4d   : > { %1289 = vmatprep.mubr.bf16.mxu1 %v3227_v23  ;;  %3014 = vmatprep.subr.bf16.mxu1 %v3249_v24  ;;  %v3313_v23 = vld [vmem:[%s3517_s9 + $0x19c] ss:$12 sps:$4 sm:$0xff]  }
  0x50   : > { %3015 = vmatpush3.bf16.msra.mxu1 %v3249_v24  ;;  %v3315_v24 = vld [vmem:[%s3517_s9 + $0x1b8] ss:$12 sps:$4 sm:$0xff]  }
  0x53   : > { %1098 = vmatmul.mubr.bf16.gmra.mrb[4].mxu0 %v3229_v25  ;;  %1290 = vmatmul.mubr.bf16.gmra.mrb[4].mxu1 %v3230_v26  ;;  %v3316_v25 = vld [vmem:[%s3517_s9 + $0x198] ss:$12 sps:$4 sm:$0xff]   ;;  %v3317_v26 = vld [vmem:[%s3517_s9 + $0x1d0] ss:$12 sps:$4 sm:$0xff]  }
  0x54   : > { %1105 = vmatprep.mubr.bf16.mxu0 %v3231_v27  ;;  %1297 = vmatprep.mubr.bf16.mxu1 %v3233_v28  ;;  %v3318_v27 = vld [vmem:[%s3517_s9 + $0x1b4] ss:$12 sps:$4 sm:$0xff]  }
  0x55   : > { %v3320_v28 = vld [vmem:[%s3517_s9 + $0x1e8] ss:$12 sps:$4 sm:$0xff]  }
  0x5b   : > { %1106 = vmatmul.mubr.bf16.gmra.mrb[8].mxu0 %v3235_v29  ;;  %1298 = vmatmul.mubr.bf16.gmra.mrb[8].mxu1 %v3236_v30  ;;  %v3321_v29 = vld [vmem:[%s3517_s9 + $0x1b0] ss:$12 sps:$4 sm:$0xff]   ;;  %v3322_v30 = vld [vmem:[%s3517_s9 + $0x200] ss:$12 sps:$4 sm:$0xff]  }
  0x5c   : > { %1113 = vmatprep.mubr.bf16.mxu0 %v3237_v31  ;;  %1305 = vmatprep.mubr.bf16.mxu1 %v3239_v32  ;;  %v3323_v31 = vld [vmem:[%s3517_s9 + $0x1cc] ss:$12 sps:$4 sm:$0xff]  }
  0x5d   : > { %v3325_v32 = vld [vmem:[%s3517_s9 + $0x218] ss:$12 sps:$4 sm:$0xff]  }
  0x63   : > { %1114 = vmatmul.mubr.bf16.gmra.mrb[12].mxu0 %v3241_v33  ;;  %1306 = vmatmul.mubr.bf16.gmra.mrb[12].mxu1 %v3242_v34  ;;  %v3326_v33 = vld [vmem:[%s3517_s9 + $0x1c8] ss:$12 sps:$4 sm:$0xff]   ;;  %v3327_v34 = vld [vmem:[%s3517_s9 + $0x230] ss:$12 sps:$4 sm:$0xff]  }
  0x64   : > { %1121 = vmatprep.mubr.bf16.mxu0 %v3243_v35  ;;  %1313 = vmatprep.mubr.bf16.mxu1 %v3245_v36  ;;  %v3328_v35 = vld [vmem:[%s3517_s9 + $0x1e4] ss:$12 sps:$4 sm:$0xff]   ;;  %v3330_v36 = vld [vmem:[%s3517_s9 + $0x248] ss:$12 sps:$4 sm:$0xff]  }
  0x6b   : > { %1122 = vmatmul.mubr.bf16.gmra.mrb[16].mxu0 %v3247_v37  ;;  %1314 = vmatmul.mubr.bf16.gmra.mrb[16].mxu1 %v3248_v38  ;;  %v3331_v37 = vld [vmem:[%s3517_s9 + $0x1e0] ss:$12 sps:$4 sm:$0xff]  }
  0x6c   : > { %1129 = vmatprep.mubr.bf16.mxu0 %v3250_v39  ;;  %1321 = vmatprep.mubr.bf16.mxu1 %v3252_v40  ;;  %v3332_v38 = vld [vmem:[%s3517_s9 + $0x260] ss:$12 sps:$4 sm:$0xff]   ;;  %v3333_v39 = vld [vmem:[%s3517_s9 + $0x1fc] ss:$12 sps:$4 sm:$0xff]   ;;  %v3335_v40 = vld [vmem:[%s3517_s9 + $0x278] ss:$12 sps:$4 sm:$0xff]  }
  0x73   : > { %1130 = vmatmul.mubr.bf16.gmra.mrb[20].mxu0 %v3254_v41  ;;  %1322 = vmatmul.mubr.bf16.gmra.mrb[20].mxu1 %v3255_v42  ;;  %v3336_v41 = vld [vmem:[%s3517_s9 + $0x1f8] ss:$12 sps:$4 sm:$0xff]   ;;  %v3337_v42 = vld [vmem:[%s3517_s9 + $0x290] ss:$12 sps:$4 sm:$0xff]  }
  0x74   : > { %1137 = vmatprep.mubr.bf16.mxu0 %v3256_v43  ;;  %1329 = vmatprep.mubr.bf16.mxu1 %v3258_v44  ;;  %v3338_v43 = vld [vmem:[%s3517_s9 + $0x214] ss:$12 sps:$4 sm:$0xff]  }
  0x75   : > { %v3340_v44 = vld [vmem:[%s3517_s9 + $0x2a8] ss:$12 sps:$4 sm:$0xff]  }
  0x7b   : > { %1138 = vmatmul.mubr.bf16.gmra.mrb[24].mxu0 %v3260_v45  ;;  %1330 = vmatmul.mubr.bf16.gmra.mrb[24].mxu1 %v3261_v46  ;;  %v3341_v45 = vld [vmem:[%s3517_s9 + $0x210] ss:$12 sps:$4 sm:$0xff]   ;;  %v3342_v46 = vld [vmem:[%s3517_s9 + $0x2c0] ss:$12 sps:$4 sm:$0xff]  }
  0x7c   : > { %1145 = vmatprep.mubr.bf16.mxu0 %v3262_v47  ;;  %1337 = vmatprep.mubr.bf16.mxu1 %v3264_v48  ;;  %v3343_v47 = vld [vmem:[%s3517_s9 + $0x22c] ss:$12 sps:$4 sm:$0xff]  }
  0x7d   : > { %v3345_v48 = vld [vmem:[%s3517_s9 + $0x2d8] ss:$12 sps:$4 sm:$0xff]  }
  0x83   : > { %1146 = vmatmul.mubr.bf16.gmra.mrb[28].mxu0 %v3266_v49  ;;  %1338 = vmatmul.mubr.bf16.gmra.mrb[28].mxu1 %v3267_v50  ;;  %v3346_v49 = vld [vmem:[%s3517_s9 + $0x228] ss:$12 sps:$4 sm:$0xff]   ;;  %v3347_v50 = vld [vmem:[%s3517_s9 + $0x2f0] ss:$12 sps:$4 sm:$0xff]  }
  0x84   : > { %1153 = vmatprep.mubr.bf16.mxu0 %v3268_v51  ;;  %3016 = vmatprep.mubr.msk.bf16.mxu1 %vm960_vm0, %v3270_v52 }
  0x8b   : > { %1154 = vmatmul.mubr.bf16.gmra.mrb[32].mxu0 %v3271_v53  ;;  %3017 = vmatmul.mubr.msk.bf16.vlgmr.msra.gmra.mrb[32].mxu1 %vm960_vm0, %v3272_v54 }
  0x8c   : > { %1161 = vmatprep.mubr.bf16.mxu0 %v3273_v55  ;;  %3020 = vmatprep.mubr.msk.bf16.mxu1 %vm960_vm0, %v3275_v56 }
  0x93   : > { %1162 = vmatmul.mubr.bf16.gmra.mrb[36].mxu0 %v3276_v57  ;;  %3021 = vmatmul.mubr.msk.bf16.gmra.mrb[36].mxu1 %vm960_vm0, %v3277_v58 }
  0x94   : > { %1169 = vmatprep.mubr.bf16.mxu0 %v3278_v59  ;;  %3024 = vmatprep.mubr.msk.bf16.mxu1 %vm960_vm0, %v3280_v60 }
  0x9b   : > { %1170 = vmatmul.mubr.bf16.gmra.mrb[40].mxu0 %v3281_v61  ;;  %3025 = vmatmul.mubr.msk.bf16.gmra.mrb[40].mxu1 %vm960_vm0, %v3282_v62 }
  0x9c   : > { %1177 = vmatprep.mubr.bf16.mxu0 %v3283_v63  ;;  %3028 = vmatprep.mubr.msk.bf16.mxu1 %vm960_vm0, %v3285_v0 }
  0xa3   : > { %1178 = vmatmul.mubr.bf16.gmra.mrb[44].mxu0 %v3286_v1  ;;  %3029 = vmatmul.mubr.msk.bf16.gmra.mrb[44].mxu1 %vm960_vm0, %v3287_v2 }
  0xa4   : > { %1185 = vmatprep.mubr.bf16.mxu0 %v3288_v3  ;;  %3032 = vmatprep.mubr.msk.bf16.mxu1 %vm960_vm0, %v3290_v4 }
  0xab   : > { %1186 = vmatmul.mubr.bf16.gmra.mrb[48].mxu0 %v3291_v5  ;;  %3033 = vmatmul.mubr.msk.bf16.gmra.mrb[48].mxu1 %vm960_vm0, %v3292_v6 }
  0xac   : > { %1193 = vmatprep.mubr.bf16.mxu0 %v3293_v7  ;;  %3036 = vmatprep.mubr.msk.bf16.mxu1 %vm960_vm0, %v3295_v8 }
  0xb3   : > { %1194 = vmatmul.mubr.bf16.gmra.mrb[52].mxu0 %v3296_v9  ;;  %3037 = vmatmul.mubr.msk.bf16.gmra.mrb[52].mxu1 %vm960_vm0, %v3297_v10 }
  0xb4   : > { %1201 = vmatprep.mubr.bf16.mxu0 %v3298_v11  ;;  %3040 = vmatprep.mubr.msk.bf16.mxu1 %vm960_vm0, %v3300_v12 }
  0xbb   : > { %1202 = vmatmul.mubr.bf16.gmra.mrb[56].mxu0 %v3301_v13  ;;  %3041 = vmatmul.mubr.msk.bf16.gmra.mrb[56].mxu1 %vm960_vm0, %v3302_v14 }
  0xbc   : > { %1209 = vmatprep.mubr.bf16.mxu0 %v3303_v15  ;;  %3044 = vmatprep.mubr.msk.bf16.mxu1 %vm960_vm0, %v3305_v16 }
  0xc3   : > { %1210 = vmatmul.mubr.bf16.gmra.mrb[60].mxu0 %v3306_v17  ;;  %3045 = vmatmul.mubr.msk.bf16.gmra.mrb[60].mxu1 %vm960_vm0, %v3307_v18 }
  0xc4   : > { %1217 = vmatprep.mubr.bf16.mxu0 %v3308_v19  ;;  %3048 = vmatprep.mubr.msk.bf16.mxu1 %vm960_vm0, %v3310_v20 }
  0xcb   : > { %1218 = vmatmul.mubr.bf16.gmra.mrb[64].mxu0 %v3311_v21  ;;  %3049 = vmatmul.mubr.msk.bf16.gmra.mrb[64].mxu1 %vm960_vm0, %v3312_v22 }
  0xcc   : > { %1225 = vmatprep.mubr.bf16.mxu0 %v3313_v23  ;;  %3052 = vmatprep.mubr.msk.bf16.mxu1 %vm960_vm0, %v3315_v24 }
  0xd3   : > { %1226 = vmatmul.mubr.bf16.gmra.mrb[68].mxu0 %v3316_v25  ;;  %3053 = vmatmul.mubr.msk.bf16.gmra.mrb[68].mxu1 %vm960_vm0, %v3317_v26 }
  0xd4   : > { %1233 = vmatprep.mubr.bf16.mxu0 %v3318_v27  ;;  %3056 = vmatprep.mubr.msk.bf16.mxu1 %vm960_vm0, %v3320_v28 }
  0xdb   : > { %1234 = vmatmul.mubr.bf16.gmra.mrb[72].mxu0 %v3321_v29  ;;  %3057 = vmatmul.mubr.msk.bf16.gmra.mrb[72].mxu1 %vm960_vm0, %v3322_v30 }
  0xdc   : > { %1241 = vmatprep.mubr.bf16.mxu0 %v3323_v31  ;;  %3060 = vmatprep.mubr.msk.bf16.mxu1 %vm960_vm0, %v3325_v32 }
  0xe3   : > { %1242 = vmatmul.mubr.bf16.gmra.mrb[76].mxu0 %v3326_v33  ;;  %3061 = vmatmul.mubr.msk.bf16.gmra.mrb[76].mxu1 %vm960_vm0, %v3327_v34 }
  0xe4   : > { %1249 = vmatprep.mubr.bf16.mxu0 %v3328_v35  ;;  %3064 = vmatprep.mubr.msk.bf16.mxu1 %vm960_vm0, %v3330_v36 }
  0xeb   : > { %1250 = vmatmul.mubr.bf16.gmra.mrb[80].mxu0 %v3331_v37  ;;  %3065 = vmatmul.mubr.msk.bf16.gmra.mrb[80].mxu1 %vm960_vm0, %v3332_v38 }
  0xec   : > { %1257 = vmatprep.mubr.bf16.mxu0 %v3333_v39  ;;  %3068 = vmatprep.mubr.msk.bf16.mxu1 %vm960_vm0, %v3335_v40 }
  0xf3   : > { %1258 = vmatmul.mubr.bf16.gmra.mrb[84].mxu0 %v3336_v41  ;;  %3069 = vmatmul.mubr.msk.bf16.gmra.mrb[84].mxu1 %vm960_vm0, %v3337_v42 }
  0xf4   : > { %1265 = vmatprep.mubr.bf16.mxu0 %v3338_v43  ;;  %3072 = vmatprep.mubr.msk.bf16.mxu1 %vm960_vm0, %v3340_v44 }
  0xfb   : > { %1266 = vmatmul.mubr.bf16.gmra.mrb[88].mxu0 %v3341_v45  ;;  %3073 = vmatmul.mubr.msk.bf16.gmra.mrb[88].mxu1 %vm960_vm0, %v3342_v46 }
  0xfc   : > { %1273 = vmatprep.mubr.bf16.mxu0 %v3343_v47  ;;  %3076 = vmatprep.mubr.msk.bf16.mxu1 %vm960_vm0, %v3345_v48 }
 0x103   : > { %1274 = vmatmul.mubr.bf16.gmra.mrb[92].mxu0 %v3346_v49  ;;  %3077 = vmatmul.mubr.msk.bf16.gmra.mrb[92].mxu1 %vm960_vm0, %v3347_v50 }
 0x11e   : > { %v3710_v51 = vpop.f32.mrb[0].mxu0  ;;  %v3712_v52 = vpop.f32.mrb[0].mxu1 }
 0x11f   : > { %v1093_v53 = vpop.f32.mrb[1].mxu0  ;;  %v1285_v54 = vpop.f32.mrb[1].mxu1 }
 0x120   : > { %v3714_v55 = vpop.f32.mrb[2].mxu0  ;;  %v3716_v56 = vpop.f32.mrb[2].mxu1  ;;  %v3773_v53 = vld [vmem:[%s4141_s2] ss:$0 sm:$0xff] }
 0x121   : > { %v1096_v57 = vpop.f32.mrb[3].mxu0  ;;  %v1288_v58 = vpop.f32.mrb[3].mxu1 }
 0x122   : > { %v1092_v57 = vadd.f32 %v3773_v53, %v3710_v51 }
 0x126   : > { %v1099_v59 = vpop.f32.mrb[4].mxu0  ;;  %v3718_v60 = vpop.f32.mrb[4].mxu1 }
 0x127   : > { %v1101_v61 = vpop.f32.mrb[5].mxu0  ;;  %v1293_v62 = vpop.f32.mrb[5].mxu1  ;;  %v1100_v54 = vadd.f32 %v3773_v53, %v1099_v59 }
 0x128   : > { %v1102_v63 = vpop.f32.mrb[6].mxu0  ;;  %v3720_v0 = vpop.f32.mrb[6].mxu1 }
 0x129   : > { %v1104_v1 = vpop.f32.mrb[7].mxu0  ;;  %v1296_v2 = vpop.f32.mrb[7].mxu1  ;;  %v1103_v62 = vadd.f32 %v3773_v53, %v1102_v63 }
 0x12e   : > { %v3722_v3 = vpop.f32.mrb[8].mxu0  ;;  %v3724_v4 = vpop.f32.mrb[8].mxu1 }
 0x12f   : > { %v1109_v5 = vpop.f32.mrb[9].mxu0  ;;  %v1301_v6 = vpop.f32.mrb[9].mxu1 }
 0x130   : > { %v3726_v7 = vpop.f32.mrb[10].mxu0  ;;  %v3728_v8 = vpop.f32.mrb[10].mxu1  ;;  %v1095_v6 = vadd.f32 %v3773_v53, %v3714_v55  ;;  %v1108_v55 = vadd.f32 %v3773_v53, %v3722_v3 }
 0x131   : > { %v1112_v9 = vpop.f32.mrb[11].mxu0  ;;  %v1304_v10 = vpop.f32.mrb[11].mxu1 }
 0x136   : > { %v3730_v11 = vpop.f32.mrb[12].mxu0  ;;  %v3732_v12 = vpop.f32.mrb[12].mxu1 }
 0x137   : > { %v1117_v13 = vpop.f32.mrb[13].mxu0  ;;  %v1309_v14 = vpop.f32.mrb[13].mxu1  ;;  %v1116_v63 = vadd.f32 %v3773_v53, %v3730_v11  ;;  %v1111_v11 = vadd.f32 %v3773_v53, %v3726_v7 }
 0x138   : > { %v3734_v15 = vpop.f32.mrb[14].mxu0  ;;  %v3736_v16 = vpop.f32.mrb[14].mxu1 }
 0x139   : > { %v1120_v17 = vpop.f32.mrb[15].mxu0  ;;  %v1312_v18 = vpop.f32.mrb[15].mxu1 }
 0x13e   : > { %v3738_v19 = vpop.f32.mrb[16].mxu0  ;;  %v3740_v20 = vpop.f32.mrb[16].mxu1 }
 0x13f   : > { %v1125_v21 = vpop.f32.mrb[17].mxu0  ;;  %v1317_v22 = vpop.f32.mrb[17].mxu1  ;;  %v1124_v7 = vadd.f32 %v3773_v53, %v3738_v19 }
 0x140   : > { %v3742_v23 = vpop.f32.mrb[18].mxu0  ;;  %v3744_v24 = vpop.f32.mrb[18].mxu1 }
 0x141   : > { %v1128_v25 = vpop.f32.mrb[19].mxu0  ;;  %v1320_v26 = vpop.f32.mrb[19].mxu1 }
 0x146   : > { %v3746_v27 = vpop.f32.mrb[20].mxu0  ;;  %v3748_v28 = vpop.f32.mrb[20].mxu1 }
 0x147   : > { %v1133_v29 = vpop.f32.mrb[21].mxu0  ;;  %v1325_v30 = vpop.f32.mrb[21].mxu1 }
 0x148   : > { %v3750_v31 = vpop.f32.mrb[22].mxu0  ;;  %v3752_v32 = vpop.f32.mrb[22].mxu1 }
 0x149   : > { %v1136_v33 = vpop.f32.mrb[23].mxu0  ;;  %v1328_v34 = vpop.f32.mrb[23].mxu1 }
 0x14a   : > { %v1119_v34 = vadd.f32 %v3773_v53, %v3734_v15 }
 0x14e   : > { %v3754_v35 = vpop.f32.mrb[24].mxu0  ;;  %v3756_v36 = vpop.f32.mrb[24].mxu1 }
 0x14f   : > { %v1141_v37 = vpop.f32.mrb[25].mxu0  ;;  %v1333_v38 = vpop.f32.mrb[25].mxu1 }
 0x150   : > { %v3758_v39 = vpop.f32.mrb[26].mxu0  ;;  %v3760_v40 = vpop.f32.mrb[26].mxu1 }
 0x151   : > { %v1144_v41 = vpop.f32.mrb[27].mxu0  ;;  %v1336_v42 = vpop.f32.mrb[27].mxu1 }
 0x156   : > { %v3762_v43 = vpop.f32.mrb[28].mxu0  ;;  %v3764_v44 = vpop.f32.mrb[28].mxu1 }
 0x157   : > { %v1149_v45 = vpop.f32.mrb[29].mxu0  ;;  %v1341_v46 = vpop.f32.mrb[29].mxu1 }
 0x158   : > { %v3766_v47 = vpop.f32.mrb[30].mxu0  ;;  %v3768_v48 = vpop.f32.mrb[30].mxu1 }
 0x159   : > { %v1152_v49 = vpop.f32.mrb[31].mxu0  ;;  %v1344_v50 = vpop.f32.mrb[31].mxu1 }
 0x15e   : > { %v3778_v58 = vpop.f32.mrb[32].mxu0  ;;  %v3018_v61 = vpop.f32.mrb[32].mxu1 }
 0x15f   : > { %v1389_v1 = vadd.f32 %v3018_v61, %v1100_v54  ;;  %v1157_v2 = vpop.f32.mrb[33].mxu0  ;;  %v1380_v5 = vpop.f32.mrb[33].mxu1 }
 0x160   : > { %v1381_v9 = vadd.f32 %v1380_v5, %v1092_v57  ;;  %v3784_v10 = vpop.f32.mrb[34].mxu0  ;;  %v3019_v13 = vpop.f32.mrb[34].mxu1 }
 0x161   : > { %v1392_v59 = vadd.f32 %v3019_v13, %v1103_v62  ;;  %v1160_v14 = vpop.f32.mrb[35].mxu0  ;;  %v1383_v51 = vpop.f32.mrb[35].mxu1  ;;  %v1637_v18 = vmax.f32 %v1389_v1, 0.0  ;;  %v1132_v1 = vadd.f32 %v3773_v53, %v3746_v27  ;;  %v1135_v13 = vadd.f32 %v3773_v53, %v3750_v31 }
 0x162   : > { %v1384_v17 = vadd.f32 %v1383_v51, %v1095_v6  ;;  %v1635_v22 = vmax.f32 %v1381_v9, 0.0 }
 0x163   : > { %v1638_v21 = vmax.f32 %v1392_v59, 0.0 }
 0x164   : > { %v1636_v25 = vmax.f32 %v1384_v17, 0.0  ;;  %v1127_v17 = vadd.f32 %v3773_v53, %v3742_v23  ;;  %v1140_v23 = vadd.f32 %v3773_v53, %v3754_v35 }
 0x165   : > { %v2795_v26 = vpack.c.bf16 %v1638_v21, %v1637_v18 }
 0x166   : > { %v2790_v29 = vpack.c.bf16 %v1636_v25, %v1635_v22  ;;  %v3790_v30 = vpop.f32.mrb[36].mxu0  ;;  %v3022_v33 = vpop.f32.mrb[36].mxu1 }
 0x167   : > { %2947 = vst [vmem:[%s3794_s12 + $0x8] sm:$0xff] %v2795_v26   ;;  %v1405_v37 = vadd.f32 %v3022_v33, %v1116_v63  ;;  %v1165_v38 = vpop.f32.mrb[37].mxu0  ;;  %v1396_v41 = vpop.f32.mrb[37].mxu1  ;;  %v1148_v33 = vadd.f32 %v3773_v53, %v3762_v43 }
 0x168   : > { %2791 = vst [vmem:[%s3794_s12] sm:$0xff] %v2790_v29   ;;  %v1397_v3 = vadd.f32 %v1396_v41, %v1108_v55  ;;  %v3800_v42 = vpop.f32.mrb[38].mxu0  ;;  %v3023_v45 = vpop.f32.mrb[38].mxu1 }
 0x169   : > { %v1408_v46 = vadd.f32 %v3023_v45, %v1119_v34  ;;  %v1168_v49 = vpop.f32.mrb[39].mxu0  ;;  %v1399_v15 = vpop.f32.mrb[39].mxu1  ;;  %v1641_v54 = vmax.f32 %v1405_v37, 0.0 }
 0x16a   : > { %v1400_v50 = vadd.f32 %v1399_v15, %v1111_v11  ;;  %v1639_v61 = vmax.f32 %v1397_v3, 0.0  ;;  %v1151_v11 = vadd.f32 %v3773_v53, %v3766_v47  ;;  %v1143_v49 = vadd.f32 %v3773_v53, %v3758_v39 }
 0x16b   : > { %v1642_v57 = vmax.f32 %v1408_v46, 0.0  ;;  %v1156_v39 = vadd.f32 %v3773_v53, %v3778_v58 }
 0x16c   : > { %v1640_v62 = vmax.f32 %v1400_v50, 0.0 }
 0x16d   : > { %v2805_v2 = vpack.c.bf16 %v1642_v57, %v1641_v54 }
 0x16e   : > { %v2800_v5 = vpack.c.bf16 %v1640_v62, %v1639_v61  ;;  %v3806_v6 = vpop.f32.mrb[40].mxu0  ;;  %v3026_v9 = vpop.f32.mrb[40].mxu1 }
 0x16f   : > { %2949 = vst [vmem:[%s3794_s12 + $0x18] sm:$0xff] %v2805_v2   ;;  %v1421_v59 = vadd.f32 %v3026_v9, %v1132_v1  ;;  %v1173_v14 = vpop.f32.mrb[41].mxu0  ;;  %v1412_v51 = vpop.f32.mrb[41].mxu1 }
 0x170   : > { %2948 = vst [vmem:[%s3794_s12 + $0x10] sm:$0xff] %v2800_v5   ;;  %v1413_v27 = vadd.f32 %v1412_v51, %v1124_v7  ;;  %v3814_v18 = vpop.f32.mrb[42].mxu0  ;;  %v3027_v21 = vpop.f32.mrb[42].mxu1  ;;  %v1164_v7 = vadd.f32 %v3773_v53, %v3790_v30  ;;  %v1167_v14 = vadd.f32 %v3773_v53, %v3800_v42 }
 0x171   : > { %v1424_v19 = vadd.f32 %v3027_v21, %v1135_v13  ;;  %v1176_v22 = vpop.f32.mrb[43].mxu0  ;;  %v1415_v25 = vpop.f32.mrb[43].mxu1  ;;  %v1645_v26 = vmax.f32 %v1421_v59, 0.0  ;;  %v1159_v21 = vadd.f32 %v3773_v53, %v3784_v10  ;;  %v1172_v10 = vadd.f32 %v3773_v53, %v3806_v6 }
 0x172   : > { %v1416_v63 = vadd.f32 %v1415_v25, %v1127_v17  ;;  %v1643_v55 = vmax.f32 %v1413_v27, 0.0 }
 0x173   : > { %v1646_v31 = vmax.f32 %v1424_v19, 0.0 }
 0x174   : > { %v1644_v29 = vmax.f32 %v1416_v63, 0.0 }
 0x175   : > { %v2815_v34 = vpack.c.bf16 %v1646_v31, %v1645_v26 }
 0x176   : > { %v2810_v37 = vpack.c.bf16 %v1644_v29, %v1643_v55  ;;  %v1179_v38 = vpop.f32.mrb[44].mxu0  ;;  %v3030_v41 = vpop.f32.mrb[44].mxu1 }
 0x177   : > { %2951 = vst [vmem:[%s3794_s12 + $0x28] sm:$0xff] %v2815_v34   ;;  %v1437_v3 = vadd.f32 %v3030_v41, %v1148_v33  ;;  %v1181_v45 = vpop.f32.mrb[45].mxu0  ;;  %v1428_v46 = vpop.f32.mrb[45].mxu1  ;;  %v1180_v33 = vadd.f32 %v3773_v53, %v1179_v38 }
 0x178   : > { %2950 = vst [vmem:[%s3794_s12 + $0x20] sm:$0xff] %v2810_v37   ;;  %v1429_v15 = vadd.f32 %v1428_v46, %v1140_v23  ;;  %v1182_v43 = vpop.f32.mrb[46].mxu0  ;;  %v3031_v50 = vpop.f32.mrb[46].mxu1 }
 0x179   : > { %v1440_v54 = vadd.f32 %v3031_v50, %v1151_v11  ;;  %v1184_v35 = vpop.f32.mrb[47].mxu0  ;;  %v1431_v57 = vpop.f32.mrb[47].mxu1  ;;  %v1649_v62 = vmax.f32 %v1437_v3, 0.0  ;;  %v1183_v11 = vadd.f32 %v3773_v53, %v1182_v43 }
 0x17a   : > { %v1432_v61 = vadd.f32 %v1431_v57, %v1143_v49  ;;  %v1647_v47 = vmax.f32 %v1429_v15, 0.0  ;;  %v1175_v49 = vadd.f32 %v3773_v53, %v3814_v18 }
 0x17b   : > { %v1650_v1 = vmax.f32 %v1440_v54, 0.0 }
 0x17c   : > { %v1648_v2 = vmax.f32 %v1432_v61, 0.0 }
 0x17d   : > { %v2825_v5 = vpack.c.bf16 %v1650_v1, %v1649_v62 }
 0x17e   : > { %v2820_v9 = vpack.c.bf16 %v1648_v2, %v1647_v47  ;;  %v1187_v13 = vpop.f32.mrb[48].mxu0  ;;  %v3034_v59 = vpop.f32.mrb[48].mxu1 }
 0x17f   : > { %2953 = vst [vmem:[%s3794_s12 + $0x38] sm:$0xff] %v2825_v5   ;;  %v1453_v51 = vadd.f32 %v3034_v59, %v1164_v7  ;;  %v1189_v17 = vpop.f32.mrb[49].mxu0  ;;  %v1444_v27 = vpop.f32.mrb[49].mxu1  ;;  %v1188_v7 = vadd.f32 %v3773_v53, %v1187_v13 }
 0x180   : > { %2952 = vst [vmem:[%s3794_s12 + $0x30] sm:$0xff] %v2820_v9   ;;  %v1445_v19 = vadd.f32 %v1444_v27, %v1156_v39  ;;  %v1190_v30 = vpop.f32.mrb[50].mxu0  ;;  %v3035_v22 = vpop.f32.mrb[50].mxu1 }
 0x181   : > { %v1456_v25 = vadd.f32 %v3035_v22, %v1167_v14  ;;  %v1192_v58 = vpop.f32.mrb[51].mxu0  ;;  %v1447_v63 = vpop.f32.mrb[51].mxu1  ;;  %v1653_v31 = vmax.f32 %v1453_v51, 0.0  ;;  %v1191_v17 = vadd.f32 %v3773_v53, %v1190_v30 }
 0x182   : > { %v1448_v26 = vadd.f32 %v1447_v63, %v1159_v21  ;;  %v1651_v42 = vmax.f32 %v1445_v19, 0.0 }
 0x183   : > { %v1654_v55 = vmax.f32 %v1456_v25, 0.0 }
 0x184   : > { %v1652_v29 = vmax.f32 %v1448_v26, 0.0 }
 0x185   : > { %v2835_v34 = vpack.c.bf16 %v1654_v55, %v1653_v31 }
 0x186   : > { %v2830_v23 = vpack.c.bf16 %v1652_v29, %v1651_v42  ;;  %v1195_v37 = vpop.f32.mrb[52].mxu0  ;;  %v3038_v41 = vpop.f32.mrb[52].mxu1 }
 0x187   : > { %2955 = vst [vmem:[%s3794_s12 + $0x48] sm:$0xff] %v2835_v34   ;;  %v1469_v3 = vadd.f32 %v3038_v41, %v1180_v33  ;;  %v1197_v45 = vpop.f32.mrb[53].mxu0  ;;  %v1460_v46 = vpop.f32.mrb[53].mxu1  ;;  %v1196_v47 = vadd.f32 %v3773_v53, %v1195_v37 }
 0x188   : > { %2954 = vst [vmem:[%s3794_s12 + $0x40] sm:$0xff] %v2830_v23   ;;  %v1461_v15 = vadd.f32 %v1460_v46, %v1172_v10  ;;  %v1198_v50 = vpop.f32.mrb[54].mxu0  ;;  %v3039_v38 = vpop.f32.mrb[54].mxu1 }
 0x189   : > { %v1472_v54 = vadd.f32 %v3039_v38, %v1183_v11  ;;  %v1200_v35 = vpop.f32.mrb[55].mxu0  ;;  %v1463_v6 = vpop.f32.mrb[55].mxu1  ;;  %v1657_v61 = vmax.f32 %v1469_v3, 0.0  ;;  %v1199_v9 = vadd.f32 %v3773_v53, %v1198_v50 }
 0x18a   : > { %v1464_v57 = vadd.f32 %v1463_v6, %v1175_v49  ;;  %v1655_v43 = vmax.f32 %v1461_v15, 0.0 }
 0x18b   : > { %v1658_v62 = vmax.f32 %v1472_v54, 0.0 }
 0x18c   : > { %v1656_v1 = vmax.f32 %v1464_v57, 0.0 }
 0x18d   : > { %v2845_v2 = vpack.c.bf16 %v1658_v62, %v1657_v61 }
 0x18e   : > { %v2840_v18 = vpack.c.bf16 %v1656_v1, %v1655_v43  ;;  %v1203_v5 = vpop.f32.mrb[56].mxu0  ;;  %v3042_v39 = vpop.f32.mrb[56].mxu1 }
 0x18f   : > { %2957 = vst [vmem:[%s3794_s12 + $0x58] sm:$0xff] %v2845_v2   ;;  %v1485_v59 = vadd.f32 %v3042_v39, %v1196_v47  ;;  %v1205_v14 = vpop.f32.mrb[57].mxu0  ;;  %v1476_v51 = vpop.f32.mrb[57].mxu1  ;;  %v1204_v29 = vadd.f32 %v3773_v53, %v1203_v5 }
 0x190   : > { %2956 = vst [vmem:[%s3794_s12 + $0x50] sm:$0xff] %v2840_v18   ;;  %v1477_v27 = vadd.f32 %v1476_v51, %v1188_v7  ;;  %v1206_v21 = vpop.f32.mrb[58].mxu0  ;;  %v3043_v19 = vpop.f32.mrb[58].mxu1 }
 0x191   : > { %v1488_v22 = vadd.f32 %v3043_v19, %v1199_v9  ;;  %v1208_v25 = vpop.f32.mrb[59].mxu0  ;;  %v1479_v58 = vpop.f32.mrb[59].mxu1  ;;  %v1661_v63 = vmax.f32 %v1485_v59, 0.0  ;;  %v1207_v41 = vadd.f32 %v3773_v53, %v1206_v21 }
 0x192   : > { %v1480_v13 = vadd.f32 %v1479_v58, %v1191_v17  ;;  %v1659_v31 = vmax.f32 %v1477_v27, 0.0 }
 0x193   : > { %v1662_v26 = vmax.f32 %v1488_v22, 0.0 }
 0x194   : > { %v1660_v55 = vmax.f32 %v1480_v13, 0.0 }
 0x195   : > { %v2855_v42 = vpack.c.bf16 %v1662_v26, %v1661_v63 }
 0x196   : > { %v2850_v33 = vpack.c.bf16 %v1660_v55, %v1659_v31  ;;  %v1211_v34 = vpop.f32.mrb[60].mxu0  ;;  %v3046_v30 = vpop.f32.mrb[60].mxu1 }
 0x197   : > { %2959 = vst [vmem:[%s3794_s12 + $0x68] sm:$0xff] %v2855_v42   ;;  %v1212_v10 = vadd.f32 %v3773_v53, %v1211_v34  ;;  %v1213_v23 = vpop.f32.mrb[61].mxu0  ;;  %v1492_v37 = vpop.f32.mrb[61].mxu1 }
 0x198   : > { %2958 = vst [vmem:[%s3794_s12 + $0x60] sm:$0xff] %v2850_v33   ;;  %v1493_v11 = vadd.f32 %v1492_v37, %v1204_v29  ;;  %v1214_v3 = vpop.f32.mrb[62].mxu0  ;;  %v3047_v45 = vpop.f32.mrb[62].mxu1 }
 0x199   : > { %v1501_v46 = vadd.f32 %v3046_v30, %v1212_v10  ;;  %v1215_v49 = vadd.f32 %v3773_v53, %v1214_v3  ;;  %v1216_v15 = vpop.f32.mrb[63].mxu0  ;;  %v1495_v50 = vpop.f32.mrb[63].mxu1 }
 0x19a   : > { %v1496_v38 = vadd.f32 %v1495_v50, %v1207_v41  ;;  %v1663_v35 = vmax.f32 %v1493_v11, 0.0 }
 0x19b   : > { %v1504_v54 = vadd.f32 %v3047_v45, %v1215_v49  ;;  %v1665_v57 = vmax.f32 %v1501_v46, 0.0 }
 0x19c   : > { %v1664_v6 = vmax.f32 %v1496_v38, 0.0 }
 0x19d   : > { %v1666_v61 = vmax.f32 %v1504_v54, 0.0 }
 0x19e   : > { %v2860_v62 = vpack.c.bf16 %v1664_v6, %v1663_v35  ;;  %v1219_v43 = vpop.f32.mrb[64].mxu0  ;;  %v3050_v1 = vpop.f32.mrb[64].mxu1 }
 0x19f   : > { %v2865_v47 = vpack.c.bf16 %v1666_v61, %v1665_v57  ;;  %v1220_v2 = vadd.f32 %v3773_v53, %v1219_v43  ;;  %v1221_v7 = vpop.f32.mrb[65].mxu0  ;;  %v1508_v18 = vpop.f32.mrb[65].mxu1 }
 0x1a0   : > { %2960 = vst [vmem:[%s3794_s12 + $0x70] sm:$0xff] %v2860_v62   ;;  %v1222_v5 = vpop.f32.mrb[66].mxu0  ;;  %v3051_v39 = vpop.f32.mrb[66].mxu1 }
 0x1a1   : > { %2961 = vst [vmem:[%s3794_s12 + $0x78] sm:$0xff] %v2865_v47   ;;  %v1509_v9 = vadd.f32 %v1508_v18, %v1220_v2  ;;  %v1223_v59 = vadd.f32 %v3773_v53, %v1222_v5  ;;  %v1224_v14 = vpop.f32.mrb[67].mxu0  ;;  %v1511_v51 = vpop.f32.mrb[67].mxu1 }
 0x1a3   : > { %v1512_v17 = vadd.f32 %v1511_v51, %v1223_v59  ;;  %v1667_v27 = vmax.f32 %v1509_v9, 0.0  ;;  %v1292_v51 = vadd.f32 %v3773_v53, %v3718_v60  ;;  %v1287_v60 = vadd.f32 %v3773_v53, %v3716_v56 }
 0x1a4   : > { %v1308_v56 = vadd.f32 %v3773_v53, %v3732_v12 }
 0x1a5   : > { %v1668_v21 = vmax.f32 %v1512_v17, 0.0 }
 0x1a6   : > { %v1227_v19 = vpop.f32.mrb[68].mxu0  ;;  %v3054_v22 = vpop.f32.mrb[68].mxu1 }
 0x1a7   : > { %v2870_v25 = vpack.c.bf16 %v1668_v21, %v1667_v27  ;;  %v1228_v58 = vadd.f32 %v3773_v53, %v1227_v19  ;;  %v1229_v13 = vpop.f32.mrb[69].mxu0  ;;  %v1524_v63 = vpop.f32.mrb[69].mxu1  ;;  %v1284_v21 = vadd.f32 %v3773_v53, %v3712_v52 }
 0x1a8   : > { %v1230_v26 = vpop.f32.mrb[70].mxu0  ;;  %v3055_v31 = vpop.f32.mrb[70].mxu1 }
 0x1a9   : > { %2962 = vst [vmem:[%s3794_s12 + $0x80] sm:$0xff] %v2870_v25   ;;  %v1517_v55 = vadd.f32 %v3050_v1, %v1228_v58  ;;  %v1231_v42 = vadd.f32 %v3773_v53, %v1230_v26  ;;  %v1232_v29 = vpop.f32.mrb[71].mxu0  ;;  %v1527_v33 = vpop.f32.mrb[71].mxu1 }
 0x1ab   : > { %v1520_v34 = vadd.f32 %v3051_v39, %v1231_v42  ;;  %v1669_v30 = vmax.f32 %v1517_v55, 0.0 }
 0x1ad   : > { %v1670_v10 = vmax.f32 %v1520_v34, 0.0 }
 0x1ae   : > { %v1235_v23 = vpop.f32.mrb[72].mxu0  ;;  %v3863_v37 = vpop.f32.mrb[72].mxu1 }
 0x1af   : > { %v2875_v41 = vpack.c.bf16 %v1670_v10, %v1669_v30  ;;  %v1236_v11 = vadd.f32 %v3773_v53, %v1235_v23  ;;  %v1237_v3 = vpop.f32.mrb[73].mxu0  ;;  %v1540_v45 = vpop.f32.mrb[73].mxu1 }
 0x1b0   : > { %v1238_v46 = vpop.f32.mrb[74].mxu0  ;;  %v3866_v49 = vpop.f32.mrb[74].mxu1 }
 0x1b1   : > { %2963 = vst [vmem:[%s3794_s12 + $0x88] sm:$0xff] %v2875_v41   ;;  %v1525_v15 = vadd.f32 %v1524_v63, %v1236_v11  ;;  %v1239_v50 = vadd.f32 %v3773_v53, %v1238_v46  ;;  %v1240_v38 = vpop.f32.mrb[75].mxu0  ;;  %v1543_v54 = vpop.f32.mrb[75].mxu1 }
 0x1b3   : > { %v1528_v35 = vadd.f32 %v1527_v33, %v1239_v50  ;;  %v1671_v6 = vmax.f32 %v1525_v15, 0.0 }
 0x1b5   : > { %v1672_v57 = vmax.f32 %v1528_v35, 0.0 }
 0x1b6   : > { %v1243_v61 = vpop.f32.mrb[76].mxu0  ;;  %v3870_v62 = vpop.f32.mrb[76].mxu1 }
 0x1b7   : > { %v2880_v43 = vpack.c.bf16 %v1672_v57, %v1671_v6  ;;  %v1244_v1 = vadd.f32 %v3773_v53, %v1243_v61  ;;  %v1245_v47 = vpop.f32.mrb[77].mxu0  ;;  %v3873_v2 = vpop.f32.mrb[77].mxu1 }
 0x1b8   : > { %v1246_v7 = vpop.f32.mrb[78].mxu0  ;;  %v3875_v18 = vpop.f32.mrb[78].mxu1 }
 0x1b9   : > { %2964 = vst [vmem:[%s3794_s12 + $0x90] sm:$0xff] %v2880_v43   ;;  %v1533_v5 = vadd.f32 %v3054_v22, %v1244_v1  ;;  %v1247_v39 = vadd.f32 %v3773_v53, %v1246_v7  ;;  %v1248_v9 = vpop.f32.mrb[79].mxu0  ;;  %v3879_v59 = vpop.f32.mrb[79].mxu1  ;;  %v1295_v22 = vadd.f32 %v3773_v53, %v3720_v0  ;;  %v1303_v7 = vadd.f32 %v3773_v53, %v3728_v8 }
 0x1bb   : > { %v1536_v14 = vadd.f32 %v3055_v31, %v1247_v39  ;;  %v1673_v17 = vmax.f32 %v1533_v5, 0.0 }
 0x1bd   : > { %v1674_v27 = vmax.f32 %v1536_v14, 0.0 }
 0x1be   : > { %v1251_v19 = vpop.f32.mrb[80].mxu0  ;;  %v3066_v25 = vpop.f32.mrb[80].mxu1 }
 0x1bf   : > { %v2885_v58 = vpack.c.bf16 %v1674_v27, %v1673_v17  ;;  %v1252_v13 = vadd.f32 %v3773_v53, %v1251_v19  ;;  %v1581_v63 = vadd.f32 %v3066_v25, %v1292_v51  ;;  %v1253_v26 = vpop.f32.mrb[81].mxu0  ;;  %v1572_v31 = vpop.f32.mrb[81].mxu1 }
 0x1c0   : > { %v1573_v55 = vadd.f32 %v1572_v31, %v1284_v21  ;;  %v1254_v42 = vpop.f32.mrb[82].mxu0  ;;  %v3067_v29 = vpop.f32.mrb[82].mxu1  ;;  %v1316_v26 = vadd.f32 %v3773_v53, %v3740_v20 }
 0x1c1   : > { %2965 = vst [vmem:[%s3794_s12 + $0x98] sm:$0xff] %v2885_v58   ;;  %v1541_v33 = vadd.f32 %v1540_v45, %v1252_v13  ;;  %v1255_v52 = vadd.f32 %v3773_v53, %v1254_v42  ;;  %v1584_v34 = vadd.f32 %v3067_v29, %v1295_v22  ;;  %v1256_v30 = vpop.f32.mrb[83].mxu0  ;;  %v1575_v10 = vpop.f32.mrb[83].mxu1  ;;  %v1685_v23 = vmax.f32 %v1581_v63, 0.0 }
 0x1c2   : > { %v1576_v0 = vadd.f32 %v1575_v10, %v1287_v60  ;;  %v1683_v3 = vmax.f32 %v1573_v55, 0.0  ;;  %v1300_v45 = vadd.f32 %v3773_v53, %v3724_v4  ;;  %v1324_v58 = vadd.f32 %v3773_v53, %v3748_v28 }
 0x1c3   : > { %v1544_v41 = vadd.f32 %v1543_v54, %v1255_v52  ;;  %v1686_v11 = vmax.f32 %v1584_v34, 0.0  ;;  %v1675_v15 = vmax.f32 %v1541_v33, 0.0  ;;  %v1311_v54 = vadd.f32 %v3773_v53, %v3736_v16 }
 0x1c4   : > { %v1684_v46 = vmax.f32 %v1576_v0, 0.0  ;;  %v1319_v34 = vadd.f32 %v3773_v53, %v3744_v24 }
 0x1c5   : > { %v1676_v50 = vmax.f32 %v1544_v41, 0.0  ;;  %v2915_v38 = vpack.c.bf16 %v1686_v11, %v1685_v23 }
 0x1c6   : > { %v2910_v35 = vpack.c.bf16 %v1684_v46, %v1683_v3  ;;  %v1259_v6 = vpop.f32.mrb[84].mxu0  ;;  %v3070_v57 = vpop.f32.mrb[84].mxu1 }
 0x1c7   : > { %v2890_v61 = vpack.c.bf16 %v1676_v50, %v1675_v15  ;;  %2971 = vst [vmem:[%s3794_s12 + $0xc8] sm:$0xff] %v2915_v38   ;;  %v1260_v43 = vadd.f32 %v3773_v53, %v1259_v6  ;;  %v1597_v1 = vadd.f32 %v3070_v57, %v1308_v56  ;;  %v1261_v12 = vpop.f32.mrb[85].mxu0  ;;  %v1588_v47 = vpop.f32.mrb[85].mxu1  ;;  %v1340_v38 = vadd.f32 %v3773_v53, %v3764_v44 }
 0x1c8   : > { %2970 = vst [vmem:[%s3794_s12 + $0xc0] sm:$0xff] %v2910_v35   ;;  %v1589_v5 = vadd.f32 %v1588_v47, %v1300_v45  ;;  %v1262_v4 = vpop.f32.mrb[86].mxu0  ;;  %v3071_v39 = vpop.f32.mrb[86].mxu1  ;;  %v1332_v6 = vadd.f32 %v3773_v53, %v3756_v36 }
 0x1c9   : > { %2966 = vst [vmem:[%s3794_s12 + $0xa0] sm:$0xff] %v2890_v61   ;;  %v1549_v9 = vadd.f32 %v3863_v37, %v1260_v43  ;;  %v1263_v14 = vadd.f32 %v3773_v53, %v1262_v4  ;;  %v1600_v16 = vadd.f32 %v3071_v39, %v1311_v54  ;;  %v1264_v51 = vpop.f32.mrb[87].mxu0  ;;  %v1591_v17 = vpop.f32.mrb[87].mxu1  ;;  %v1689_v21 = vmax.f32 %v1597_v1, 0.0 }
 0x1ca   : > { %v1592_v27 = vadd.f32 %v1591_v17, %v1303_v7  ;;  %v1687_v22 = vmax.f32 %v1589_v5, 0.0  ;;  %v1335_v7 = vadd.f32 %v3773_v53, %v3760_v40 }
 0x1cb   : > { %v1552_v19 = vadd.f32 %v3866_v49, %v1263_v14  ;;  %v1690_v25 = vmax.f32 %v1600_v16, 0.0  ;;  %v1677_v13 = vmax.f32 %v1549_v9, 0.0  ;;  %v1327_v49 = vadd.f32 %v3773_v53, %v3752_v32 }
 0x1cc   : > { %v1688_v8 = vmax.f32 %v1592_v27, 0.0 }
 0x1cd   : > { %v1678_v63 = vmax.f32 %v1552_v19, 0.0  ;;  %v2925_v37 = vpack.c.bf16 %v1690_v25, %v1689_v21 }
 0x1ce   : > { %v2920_v31 = vpack.c.bf16 %v1688_v8, %v1687_v22  ;;  %v1267_v60 = vpop.f32.mrb[88].mxu0  ;;  %v3074_v55 = vpop.f32.mrb[88].mxu1 }
 0x1cf   : > { %v2895_v42 = vpack.c.bf16 %v1678_v63, %v1677_v13  ;;  %2973 = vst [vmem:[%s3794_s12 + $0xd8] sm:$0xff] %v2925_v37   ;;  %v1268_v29 = vadd.f32 %v3773_v53, %v1267_v60  ;;  %v1613_v33 = vadd.f32 %v3074_v55, %v1324_v58  ;;  %v1269_v28 = vpop.f32.mrb[89].mxu0  ;;  %v1604_v52 = vpop.f32.mrb[89].mxu1 }
 0x1d0   : > { %2972 = vst [vmem:[%s3794_s12 + $0xd0] sm:$0xff] %v2920_v31   ;;  %v1605_v30 = vadd.f32 %v1604_v52, %v1316_v26  ;;  %v1270_v20 = vpop.f32.mrb[90].mxu0  ;;  %v3075_v10 = vpop.f32.mrb[90].mxu1 }
 0x1d1   : > { %2967 = vst [vmem:[%s3794_s12 + $0xa8] sm:$0xff] %v2895_v42   ;;  %v1557_v0 = vadd.f32 %v3873_v2, %v1268_v29  ;;  %v1271_v23 = vadd.f32 %v3773_v53, %v1270_v20  ;;  %v1616_v32 = vadd.f32 %v3075_v10, %v1327_v49  ;;  %v1272_v41 = vpop.f32.mrb[91].mxu0  ;;  %v1607_v11 = vpop.f32.mrb[91].mxu1  ;;  %v1693_v46 = vmax.f32 %v1613_v33, 0.0 }
 0x1d2   : > { %v1608_v3 = vadd.f32 %v1607_v11, %v1319_v34  ;;  %v1691_v50 = vmax.f32 %v1605_v30, 0.0 }
 0x1d3   : > { %v1560_v56 = vadd.f32 %v3879_v59, %v1271_v23  ;;  %v1694_v15 = vmax.f32 %v1616_v32, 0.0  ;;  %v1679_v45 = vmax.f32 %v1557_v0, 0.0  ;;  %v1343_v59 = vadd.f32 %v3773_v53, %v3768_v48 }
 0x1d4   : > { %v1692_v24 = vmax.f32 %v1608_v3, 0.0 }
 0x1d5   : > { %v1680_v35 = vmax.f32 %v1560_v56, 0.0  ;;  %v2935_v2 = vpack.c.bf16 %v1694_v15, %v1693_v46 }
 0x1d6   : > { %v2930_v57 = vpack.c.bf16 %v1692_v24, %v1691_v50  ;;  %v1275_v54 = vpop.f32.mrb[92].mxu0  ;;  %v3078_v61 = vpop.f32.mrb[92].mxu1 }
 0x1d7   : > { %v2900_v43 = vpack.c.bf16 %v1680_v35, %v1679_v45  ;;  %2975 = vst [vmem:[%s3794_s12 + $0xe8] sm:$0xff] %v2935_v2   ;;  %v1276_v1 = vadd.f32 %v3773_v53, %v1275_v54  ;;  %v1629_v12 = vadd.f32 %v3078_v61, %v1340_v38  ;;  %v1277_v44 = vpop.f32.mrb[93].mxu0  ;;  %v1620_v47 = vpop.f32.mrb[93].mxu1 }
 0x1d8   : > { %2974 = vst [vmem:[%s3794_s12 + $0xe0] sm:$0xff] %v2930_v57   ;;  %v1621_v5 = vadd.f32 %v1620_v47, %v1332_v6  ;;  %v1278_v36 = vpop.f32.mrb[94].mxu0  ;;  %v3079_v4 = vpop.f32.mrb[94].mxu1 }
 0x1d9   : > { %2968 = vst [vmem:[%s3794_s12 + $0xb0] sm:$0xff] %v2900_v43   ;;  %v1565_v39 = vadd.f32 %v3870_v62, %v1276_v1  ;;  %v1279_v48 = vadd.f32 %v3773_v53, %v1278_v36  ;;  %v1632_v9 = vadd.f32 %v3079_v4, %v1343_v59  ;;  %v1280_v14 = vpop.f32.mrb[95].mxu0  ;;  %v1623_v16 = vpop.f32.mrb[95].mxu1  ;;  %v1697_v17 = vmax.f32 %v1629_v12, 0.0 }
 0x1da   : > { %v1624_v51 = vadd.f32 %v1623_v16, %v1335_v7  ;;  %v1695_v21 = vmax.f32 %v1621_v5, 0.0 }
 0x1db   : > { %v1568_v27 = vadd.f32 %v3875_v18, %v1279_v48  ;;  %v1698_v40 = vmax.f32 %v1632_v9, 0.0  ;;  %v1681_v25 = vmax.f32 %v1565_v39, 0.0  ;;  %2025 = sbr.rel (!%p3482_p4) target bundleno = 573 (0x23d), region = 36 }
 0x1dc   : > { %v1696_v19 = vmax.f32 %v1624_v51, 0.0 }
 0x1dd   : > { %v1682_v22 = vmax.f32 %v1568_v27, 0.0  ;;  %v2945_v8 = vpack.c.bf16 %v1698_v40, %v1697_v17 }
 0x1de   : > { %v2940_v58 = vpack.c.bf16 %v1696_v19, %v1695_v21 }
 0x1df   : > { %v2905_v62 = vpack.c.bf16 %v1682_v22, %v1681_v25  ;;  %2977 = vst [vmem:[%s3794_s12 + $0xf8] sm:$0xff] %v2945_v8  }
 0x1e0   : > { %2976 = vst [vmem:[%s3794_s12 + $0xf0] sm:$0xff] %v2940_v58  }
 0x1e1   : > { %2969 = vst [vmem:[%s3794_s12 + $0xb8] sm:$0xff] %v2905_v62  }
 0x1e2   : > { %s4151_s27 = smov (!%p2028_p8, %s2027_s27), 64 }
 0x1e3   : > { %s2705_s5 = sshll.u32 %s4151_s27, 6 }
 0x1e4   : > { %p2708_p9 = scmp.eq.s32.totalorder %s2705_s5, 0 }
 0x1e5   : > { %s3953_s6 = sshrl.u32 (!%p2708_p9), %s4151_s27, 6 }
 0x1e6   : > { %2036 = sbr.rel (%p2708_p9) target bundleno = 573 (0x23d), region = 40  ;;  %p2709_p10 = scmp.le.s32.totalorder (!%p2708_p9), %s3953_s6, 0 }
 0x1ed   : > { %2441 = sbr.rel (%p2709_p10) target bundleno = 552 (0x228), region = 112  ;;  %s4144_s15 = smov (!%p2709_p10), %s3947_s4 }
 0x1ee   : > { %s4145_s20 = smov (!%p2709_p10), %s3794_s12  ;;  %s3962_s23 = smov (!%p2709_p10), 0  }
 0x1ef   : > { %s3964_s7 = smov (!%p2709_p10), 0  }
 0x1f4 LB: >> { %v2052_v53 = vld [vmem:[%s3410_s20] sm:$0xf]  ;;  %v2054_v18 = vld [vmem:[%s3410_s20 + $0x4] sm:$0xf]  ;;  %v2056_v13 = vld [vmem:[%s3410_s20 + $0x8] sm:$0xf]  ;;  %s3418_s7 = sphi %s3964_s7, %s2046_s7   ;;  %s3414_s23 = sphi %s3962_s23, %s4146_s23   ;;  %s3410_s20 = sphi %s4145_s20, %s2185_s20   ;;  %s3406_s15 = sphi %s4144_s15, %s2186_s15  }
 0x1f5   : >> { %2053 = vst [vmem:[%s3406_s15] sm:$0xf] %v2052_v53  ;;  %2055 = vst [vmem:[%s3406_s15 + $0x4] sm:$0xf] %v2054_v18  ;;  %v2058_v63 = vld [vmem:[%s3410_s20 + $0xc] sm:$0xf]  ;;  %s2180_s8 = sadd.s32 1, %s3414_s23 }
 0x1f6   : >> { %2057 = vst [vmem:[%s3406_s15 + $0x8] sm:$0xf] %v2056_v13  ;;  %v2060_v37 = vld [vmem:[%s3410_s20 + $0x10] sm:$0xf]  ;;  %v2062_v26 = vld [vmem:[%s3410_s20 + $0x14] sm:$0xf]  ;;  %p2181_p11 = scmp.ge.s32.totalorder %s2180_s8, %s3953_s6 }
 0x1f7   : >> { %2059 = vst [vmem:[%s3406_s15 + $0xc] sm:$0xf] %v2058_v63  ;;  %2061 = vst [vmem:[%s3406_s15 + $0x10] sm:$0xf] %v2060_v37  ;;  %v2064_v31 = vld [vmem:[%s3410_s20 + $0x18] sm:$0xf] }
 0x1f8   : >> { %2063 = vst [vmem:[%s3406_s15 + $0x14] sm:$0xf] %v2062_v26  ;;  %v2066_v60 = vld [vmem:[%s3410_s20 + $0x1c] sm:$0xf]  ;;  %v2068_v55 = vld [vmem:[%s3410_s20 + $0x20] sm:$0xf] }
 0x1f9   : >> { %2065 = vst [vmem:[%s3406_s15 + $0x18] sm:$0xf] %v2064_v31  ;;  %2067 = vst [vmem:[%s3406_s15 + $0x1c] sm:$0xf] %v2066_v60  ;;  %v2070_v49 = vld [vmem:[%s3410_s20 + $0x24] sm:$0xf] }
 0x1fa   : >> { %2069 = vst [vmem:[%s3406_s15 + $0x20] sm:$0xf] %v2068_v55  ;;  %v2072_v42 = vld [vmem:[%s3410_s20 + $0x28] sm:$0xf]  ;;  %v2074_v29 = vld [vmem:[%s3410_s20 + $0x2c] sm:$0xf] }
 0x1fb   : >> { %2071 = vst [vmem:[%s3406_s15 + $0x24] sm:$0xf] %v2070_v49  ;;  %2073 = vst [vmem:[%s3406_s15 + $0x28] sm:$0xf] %v2072_v42  ;;  %v2076_v33 = vld [vmem:[%s3410_s20 + $0x30] sm:$0xf] }
 0x1fc   : >> { %2075 = vst [vmem:[%s3406_s15 + $0x2c] sm:$0xf] %v2074_v29  ;;  %v2078_v28 = vld [vmem:[%s3410_s20 + $0x34] sm:$0xf]  ;;  %v2080_v52 = vld [vmem:[%s3410_s20 + $0x38] sm:$0xf] }
 0x1fd   : >> { %2077 = vst [vmem:[%s3406_s15 + $0x30] sm:$0xf] %v2076_v33  ;;  %2079 = vst [vmem:[%s3406_s15 + $0x34] sm:$0xf] %v2078_v28  ;;  %v2082_v34 = vld [vmem:[%s3410_s20 + $0x3c] sm:$0xf] }
 0x1fe   : >> { %2081 = vst [vmem:[%s3406_s15 + $0x38] sm:$0xf] %v2080_v52  ;;  %v2084_v30 = vld [vmem:[%s3410_s20 + $0x40] sm:$0xf]  ;;  %v2086_v20 = vld [vmem:[%s3410_s20 + $0x44] sm:$0xf] }
 0x1ff   : >> { %2083 = vst [vmem:[%s3406_s15 + $0x3c] sm:$0xf] %v2082_v34  ;;  %2085 = vst [vmem:[%s3406_s15 + $0x40] sm:$0xf] %v2084_v30  ;;  %v2088_v10 = vld [vmem:[%s3410_s20 + $0x48] sm:$0xf] }
 0x200   : >> { %2087 = vst [vmem:[%s3406_s15 + $0x44] sm:$0xf] %v2086_v20  ;;  %v2090_v0 = vld [vmem:[%s3410_s20 + $0x4c] sm:$0xf]  ;;  %v2092_v23 = vld [vmem:[%s3410_s20 + $0x50] sm:$0xf] }
 0x201   : >> { %2089 = vst [vmem:[%s3406_s15 + $0x48] sm:$0xf] %v2088_v10  ;;  %2091 = vst [vmem:[%s3406_s15 + $0x4c] sm:$0xf] %v2090_v0  ;;  %v2094_v32 = vld [vmem:[%s3410_s20 + $0x54] sm:$0xf] }
 0x202   : >> { %2093 = vst [vmem:[%s3406_s15 + $0x50] sm:$0xf] %v2092_v23  ;;  %v2096_v41 = vld [vmem:[%s3410_s20 + $0x58] sm:$0xf]  ;;  %v2098_v11 = vld [vmem:[%s3410_s20 + $0x5c] sm:$0xf] }
 0x203   : >> { %2095 = vst [vmem:[%s3406_s15 + $0x54] sm:$0xf] %v2094_v32  ;;  %2097 = vst [vmem:[%s3406_s15 + $0x58] sm:$0xf] %v2096_v41  ;;  %v2100_v3 = vld [vmem:[%s3410_s20 + $0x60] sm:$0xf] }
 0x204   : >> { %2099 = vst [vmem:[%s3406_s15 + $0x5c] sm:$0xf] %v2098_v11  ;;  %v2102_v46 = vld [vmem:[%s3410_s20 + $0x64] sm:$0xf]  ;;  %v2104_v56 = vld [vmem:[%s3410_s20 + $0x68] sm:$0xf] }
 0x205   : >> { %2101 = vst [vmem:[%s3406_s15 + $0x60] sm:$0xf] %v2100_v3  ;;  %2103 = vst [vmem:[%s3406_s15 + $0x64] sm:$0xf] %v2102_v46  ;;  %v2106_v15 = vld [vmem:[%s3410_s20 + $0x6c] sm:$0xf] }
 0x206   : >> { %2105 = vst [vmem:[%s3406_s15 + $0x68] sm:$0xf] %v2104_v56  ;;  %v2108_v50 = vld [vmem:[%s3410_s20 + $0x70] sm:$0xf]  ;;  %v2110_v24 = vld [vmem:[%s3410_s20 + $0x74] sm:$0xf] }
 0x207   : >> { %2107 = vst [vmem:[%s3406_s15 + $0x6c] sm:$0xf] %v2106_v15  ;;  %2109 = vst [vmem:[%s3406_s15 + $0x70] sm:$0xf] %v2108_v50  ;;  %v2112_v38 = vld [vmem:[%s3410_s20 + $0x78] sm:$0xf] }
 0x208   : >> { %2111 = vst [vmem:[%s3406_s15 + $0x74] sm:$0xf] %v2110_v24  ;;  %v2114_v45 = vld [vmem:[%s3410_s20 + $0x7c] sm:$0xf]  ;;  %v2116_v35 = vld [vmem:[%s3410_s20 + $0x80] sm:$0xf] }
 0x209   : >> { %2113 = vst [vmem:[%s3406_s15 + $0x78] sm:$0xf] %v2112_v38  ;;  %2115 = vst [vmem:[%s3406_s15 + $0x7c] sm:$0xf] %v2114_v45  ;;  %v2118_v2 = vld [vmem:[%s3410_s20 + $0x84] sm:$0xf] }
 0x20a   : >> { %2117 = vst [vmem:[%s3406_s15 + $0x80] sm:$0xf] %v2116_v35  ;;  %v2120_v6 = vld [vmem:[%s3410_s20 + $0x88] sm:$0xf]  ;;  %v2122_v57 = vld [vmem:[%s3410_s20 + $0x8c] sm:$0xf] }
 0x20b   : >> { %2119 = vst [vmem:[%s3406_s15 + $0x84] sm:$0xf] %v2118_v2  ;;  %2121 = vst [vmem:[%s3406_s15 + $0x88] sm:$0xf] %v2120_v6  ;;  %v2124_v54 = vld [vmem:[%s3410_s20 + $0x90] sm:$0xf] }
 0x20c   : >> { %2123 = vst [vmem:[%s3406_s15 + $0x8c] sm:$0xf] %v2122_v57  ;;  %v2126_v61 = vld [vmem:[%s3410_s20 + $0x94] sm:$0xf]  ;;  %v2128_v59 = vld [vmem:[%s3410_s20 + $0x98] sm:$0xf] }
 0x20d   : >> { %2125 = vst [vmem:[%s3406_s15 + $0x90] sm:$0xf] %v2124_v54  ;;  %2127 = vst [vmem:[%s3406_s15 + $0x94] sm:$0xf] %v2126_v61  ;;  %v2130_v43 = vld [vmem:[%s3410_s20 + $0x9c] sm:$0xf] }
 0x20e   : >> { %2129 = vst [vmem:[%s3406_s15 + $0x98] sm:$0xf] %v2128_v59  ;;  %v2132_v1 = vld [vmem:[%s3410_s20 + $0xa0] sm:$0xf]  ;;  %v2134_v12 = vld [vmem:[%s3410_s20 + $0xa4] sm:$0xf] }
 0x20f   : >> { %2131 = vst [vmem:[%s3406_s15 + $0x9c] sm:$0xf] %v2130_v43  ;;  %2133 = vst [vmem:[%s3406_s15 + $0xa0] sm:$0xf] %v2132_v1  ;;  %v2136_v44 = vld [vmem:[%s3410_s20 + $0xa8] sm:$0xf] }
 0x210   : >> { %2135 = vst [vmem:[%s3406_s15 + $0xa4] sm:$0xf] %v2134_v12  ;;  %v2138_v47 = vld [vmem:[%s3410_s20 + $0xac] sm:$0xf]  ;;  %v2140_v7 = vld [vmem:[%s3410_s20 + $0xb0] sm:$0xf] }
 0x211   : >> { %2137 = vst [vmem:[%s3406_s15 + $0xa8] sm:$0xf] %v2136_v44  ;;  %2139 = vst [vmem:[%s3406_s15 + $0xac] sm:$0xf] %v2138_v47  ;;  %v2142_v5 = vld [vmem:[%s3410_s20 + $0xb4] sm:$0xf] }
 0x212   : >> { %2141 = vst [vmem:[%s3406_s15 + $0xb0] sm:$0xf] %v2140_v7  ;;  %v2144_v36 = vld [vmem:[%s3410_s20 + $0xb8] sm:$0xf]  ;;  %v2146_v4 = vld [vmem:[%s3410_s20 + $0xbc] sm:$0xf] }
 0x213   : >> { %2143 = vst [vmem:[%s3406_s15 + $0xb4] sm:$0xf] %v2142_v5  ;;  %2145 = vst [vmem:[%s3406_s15 + $0xb8] sm:$0xf] %v2144_v36  ;;  %v2148_v39 = vld [vmem:[%s3410_s20 + $0xc0] sm:$0xf] }
 0x214   : >> { %2147 = vst [vmem:[%s3406_s15 + $0xbc] sm:$0xf] %v2146_v4  ;;  %v2150_v48 = vld [vmem:[%s3410_s20 + $0xc4] sm:$0xf]  ;;  %v2152_v9 = vld [vmem:[%s3410_s20 + $0xc8] sm:$0xf] }
 0x215   : >> { %2149 = vst [vmem:[%s3406_s15 + $0xc0] sm:$0xf] %v2148_v39  ;;  %2151 = vst [vmem:[%s3406_s15 + $0xc4] sm:$0xf] %v2150_v48  ;;  %v2154_v14 = vld [vmem:[%s3410_s20 + $0xcc] sm:$0xf] }
 0x216   : >> { %2153 = vst [vmem:[%s3406_s15 + $0xc8] sm:$0xf] %v2152_v9  ;;  %v2156_v16 = vld [vmem:[%s3410_s20 + $0xd0] sm:$0xf]  ;;  %v2158_v51 = vld [vmem:[%s3410_s20 + $0xd4] sm:$0xf] }
 0x217   : >> { %2155 = vst [vmem:[%s3406_s15 + $0xcc] sm:$0xf] %v2154_v14  ;;  %2157 = vst [vmem:[%s3406_s15 + $0xd0] sm:$0xf] %v2156_v16  ;;  %v2160_v17 = vld [vmem:[%s3410_s20 + $0xd8] sm:$0xf] }
 0x218   : >> { %2159 = vst [vmem:[%s3406_s15 + $0xd4] sm:$0xf] %v2158_v51  ;;  %v2162_v27 = vld [vmem:[%s3410_s20 + $0xdc] sm:$0xf]  ;;  %v2164_v40 = vld [vmem:[%s3410_s20 + $0xe0] sm:$0xf] }
 0x219   : >> { %2161 = vst [vmem:[%s3406_s15 + $0xd8] sm:$0xf] %v2160_v17  ;;  %2163 = vst [vmem:[%s3406_s15 + $0xdc] sm:$0xf] %v2162_v27  ;;  %v2166_v21 = vld [vmem:[%s3410_s20 + $0xe4] sm:$0xf] }
 0x21a   : >> { %2165 = vst [vmem:[%s3406_s15 + $0xe0] sm:$0xf] %v2164_v40  ;;  %v2168_v19 = vld [vmem:[%s3410_s20 + $0xe8] sm:$0xf]  ;;  %v2170_v25 = vld [vmem:[%s3410_s20 + $0xec] sm:$0xf] }
 0x21b   : >> { %2167 = vst [vmem:[%s3406_s15 + $0xe4] sm:$0xf] %v2166_v21  ;;  %2169 = vst [vmem:[%s3406_s15 + $0xe8] sm:$0xf] %v2168_v19  ;;  %v2172_v22 = vld [vmem:[%s3410_s20 + $0xf0] sm:$0xf] }
 0x21c   : >> { %2171 = vst [vmem:[%s3406_s15 + $0xec] sm:$0xf] %v2170_v25  ;;  %v2174_v8 = vld [vmem:[%s3410_s20 + $0xf4] sm:$0xf]  ;;  %v2176_v58 = vld [vmem:[%s3410_s20 + $0xf8] sm:$0xf] }
 0x21d   : >> { %2173 = vst [vmem:[%s3406_s15 + $0xf0] sm:$0xf] %v2172_v22  ;;  %2175 = vst [vmem:[%s3406_s15 + $0xf4] sm:$0xf] %v2174_v8  ;;  %v2178_v62 = vld [vmem:[%s3410_s20 + $0xfc] sm:$0xf] }
 0x21e   : >> { %2177 = vst [vmem:[%s3406_s15 + $0xf8] sm:$0xf] %v2176_v58  ;;  %2179 = vst [vmem:[%s3406_s15 + $0xfc] sm:$0xf] %v2178_v62  ;;  %s4153_s8 = smov (%p2181_p11, %s2180_s8), 0  ;;  %s2046_s7 = sadd.s32 1, %s3418_s7  }
 0x21f   : >> { %s2710_s10 = sshll.u32 %s4153_s8, 8  ;;  %p2045_p12 = scmp.ge.s32.totalorder %s2046_s7, %s3953_s6 }
 0x220   : >> { %s2185_s20 = scalar_lea.vmem %s3794_s12, %s2710_s10 [#allocation2]   ;;  %s2186_s15 = scalar_lea.vmem %s3947_s4, %s2710_s10  }
 0x221   : >> { %s4146_s23 = smov %s4153_s8  ;;  %2048 = sbr.rel (!%p2045_p12) target bundleno = 500 (0x1f4), region = 118 }
 0x228 PF: > { %s4121_s11 = sand.u32 63, %s4151_s27   ;;  %s2785_s14 = sshll.u32 %s3953_s6, 8 }
 0x229   : > { %s2191_s17 = scalar_lea.vmem %s3794_s12, %s2785_s14 [#allocation2]   ;;  %s2193_s18 = scalar_lea.vmem %s3947_s4, %s2785_s14  }
 0x22a   : > { %p2715_p13 = scmp.le.s32.totalorder %s4121_s11, 0 }
 0x22b   : > { %s3420_s21 = smov (!%p2715_p13), %s2193_s18   ;;  %s3424_s22 = smov (!%p2715_p13), %s2191_s17  }
 0x22c   : > { %2455 = sbr.rel (%p2715_p13) target bundleno = 573 (0x23d), region = 123  ;;  %s3428_s9 = smov (!%p2715_p13), 0  }
 0x22d   : > { %s3432_s24 = smov (!%p2715_p13), 0  }
 0x233 LB: >> { %v2203_v53 = vld [vmem:[%s3426_s22] sm:$0xf]  ;;  %s2205_s25 = sadd.s32 1, %s3430_s9  ;;  %s2197_s24 = sadd.s32 1, %s3434_s24   ;;  %s3434_s24 = sphi %s3432_s24, %s2197_s24   ;;  %s3430_s9 = sphi %s3428_s9, %s3429_s9   ;;  %s3426_s22 = sphi %s3424_s22, %s2210_s22   ;;  %s3422_s21 = sphi %s3420_s21, %s2211_s21  }
 0x234   : >> { %2204 = vst [vmem:[%s3422_s21] sm:$0xf] %v2203_v53  ;;  %p2206_p0 = scmp.ge.s32.totalorder %s2205_s25, %s4121_s11  ;;  %p2196_p1 = scmp.ge.s32.totalorder %s2197_s24, %s4121_s11 }
 0x236   : >> { %s4155_s25 = smov (%p2206_p0, %s2205_s25), 0  ;;  %2199 = sbr.rel (!%p2196_p1) target bundleno = 563 (0x233), region = 129 }
 0x237   : >> { %s2716_s26 = sshll.u32 %s4155_s25, 2  ;;  %s3429_s9 = smov %s4155_s25  }
 0x238   : >> { %s2210_s22 = scalar_lea.vmem %s2191_s17, %s2716_s26 [#allocation2]   ;;  %s2211_s21 = scalar_lea.vmem %s2193_s18, %s2716_s26  }
 0x23d PF: > { %p10_p2 = scmp.ge.s32.totalorder %s3472_s16, 5   ;;  %s4147_s12 = smov %s3398_s13 }
 0x23e   : > { %s4148_s13 = smov %s3480_s19  ;;  %s4149_s14 = smov %s3472_s16 }
 0x23f   :  { %12 = sbr.rel (!%p10_p2) target bundleno = 2 (0x2), region = 140 }

// kernel: net_forward.7
= control target key start
LH: loop header
LB: loop body
LE: loop exit
PB: predicated region body
PF: predicated region fallthrough
CT: control target
= control target key end

     0   :  { %v233_v1 = vmov 0.0   ;;  %vm234_vm0 = vmmov 0   ;;  %s298_s0 = inlined_call_operand.vmem [shape: bf16[2,128], index: 0, kind: input, shape index: {}]   ;;  %s299_s1 = inlined_call_operand.vmem [shape: bf16[128,128], index: 1, kind: input, shape index: {}]   ;;  %s300_s2 = inlined_call_operand.vmem [shape: f32[1,128], index: 2, kind: input, shape index: {}]   ;;  %s301_s3 = inlined_call_operand.hbm [shape: f32[2,128], index: 3, kind: output, shape index: {}]  }
   0x1   :  { %v197_v0 = vld [vmem:[%s299_s1] sm:$0xff]   ;;  %174 = vmatprep.subr.bf16.mxu0 %v233_v1  ;;  %v198_v2 = vld [vmem:[%s299_s1 + $0x8] sm:$0xff]   ;;  %190 = vmatprep.mubr.msk.bf16.mxu0 %vm234_vm0, %v233_v1  ;;  %v199_v3 = vld [vmem:[%s299_s1 + $0x10] sm:$0xff]  }
   0x2   :  { %175 = vmatpush3.bf16.msra.mxu0 %v197_v0 }
   0x3   :  { %176 = vmatprep.subr.bf16.mxu0 %v233_v1 }
   0x6   :  { %177 = vmatpush3.bf16.msra.mxu0 %v198_v2 }
   0x7   :  { %178 = vmatprep.subr.bf16.mxu0 %v233_v1 }
   0x8   :  { %8 = vsyncpa [#allocation3], 0  ;;  %v200_v4 = vld [vmem:[%s299_s1 + $0x18] sm:$0xff]   ;;  %v201_v5 = vld [vmem:[%s299_s1 + $0x20] sm:$0xff]   ;;  %vm128_vm1 = vcmask 1041408  }
   0x9   :  { %v202_v6 = vld [vmem:[%s299_s1 + $0x28] sm:$0xff]   ;;  %v203_v7 = vld [vmem:[%s299_s1 + $0x30] sm:$0xff]   ;;  %v204_v8 = vld [vmem:[%s299_s1 + $0x38] sm:$0xff]  }
   0xa   :  { %179 = vmatpush3.bf16.msra.mxu0 %v199_v3  ;;  %v16_v9 = vld [vmem:[%s298_s0] sm:$0x1]  ;;  %s235_s0 = smov [#allocation2]  }
   0xb   :  { %180 = vmatprep.subr.bf16.mxu0 %v233_v1  ;;  %v156_v10 = vld [vmem:[%s300_s2] ss:$0 sm:$0xff]  ;;  %s148_s1 = sshll.u32 %s235_s0, 4  ;;  %s149_s1 = int_to_ptr.vmem [resolvable:$true] %s148_s1 }
   0xc   :  { %s209_s2 = scalar_lea.vmem %s149_s1, 32  ;;  %p214_p1 = scmp.lt.s32.totalorder %s149_s1, %s149_s1 }
   0xd   :  { %p210_p0 = scmp.ne.s32.totalorder %s149_s1, %s209_s2  ;;  %p215_p2 = scmp.lt.s32.totalorder %s209_s2, %s209_s2 }
   0xe   :  { %181 = vmatpush3.bf16.msra.mxu0 %v200_v4 }
   0xf   :  { %182 = vmatprep.subr.bf16.mxu0 %v233_v1  ;;  %p216_p3 = por %p215_p2, %p214_p1 }
  0x11   :  { %p217_p4 = pnand %p216_p3, %p210_p0 }
  0x12   :  { %183 = vmatpush3.bf16.msra.mxu0 %v201_v5 }
  0x13   :  { %184 = vmatprep.subr.bf16.mxu0 %v233_v1 }
  0x16   :  { %185 = vmatpush3.bf16.msra.mxu0 %v202_v6 }
  0x17   :  { %186 = vmatprep.subr.bf16.mxu0 %v233_v1 }
  0x1a   :  { %187 = vmatpush3.bf16.msra.mxu0 %v203_v7 }
  0x1b   :  { %188 = vmatprep.subr.bf16.mxu0 %v233_v1 }
  0x1e   :  { %189 = vmatpush3.bf16.msra.mxu0 %v204_v8 }
  0x21   :  { %191 = vmatmul.mubr.bf16.vlgmr.msra.gmra.mrb[0].mxu0 %v16_v9 }
  0xf4   :  { %v122_v11 = vpop.f32.mrb[0].mxu0 }
  0xf5   :  { %v123_v12 = vadd.f32 %v156_v10, %v122_v11  ;;  %v192_v13 = vpop.f32.mrb[1].mxu0 }
  0xf6   :  { %v125_v14 = vpop.f32.mrb[2].mxu0 }
  0xf7   :  { %v193_v15 = vpop.f32.mrb[3].mxu0  ;;  %v129_v16 = vsel %vm128_vm1, %v123_v12, -inf }
  0xf8   :  { %130 = vmax.xlane.f32.xlu0 %v129_v16 }
 0x185   :  { %v131_v17 = vpop.xlane.xlu0 %130 }
 0x186   :  { %v132_v18 = vsub.f32 %v123_v12, %v131_v17 }
 0x188   :  { %v133_v19 = vmul.f32 1.442695, %v132_v18 }
 0x18a   :  { %205 = vpow2.f32 %v133_v19 }
 0x194   :  { %v206_v20 = vpop.eup %205 }
 0x195   :  { %v135_v21 = vsel %vm128_vm1, %v206_v20, 0.0 }
 0x196   :  { %136 = vadd.xlane.f32.xlu0 %v135_v21 }
 0x223   :  { %v137_v22 = vpop.xlane.xlu0 %136 }
 0x224   :  { %207 = vlog2.f32 %v137_v22 }
 0x22e   :  { %v208_v23 = vpop.eup %207 }
 0x22f   :  { %v139_v24 = vmul.f32 0.6931472, %v208_v23 }
 0x231   :  { %v140_v25 = vsub.f32 %v132_v18, %v139_v24 }
 0x233   :  { %141 = vst [vmem:[#allocation2] sm:$0x3] %v140_v25 }
 0x234   :  { %220 = shalt.err (!%p217_p4)
}
 0x235   :  { %s221_s7 = scalar_lea.hbm %s301_s3, 32 }
 0x236   :  { %p222_p5 = scmp.ne.s32.totalorder %s301_s3, %s221_s7  ;;  %p225_p6 = scmp.lt.u32.totalorder %s221_s7, %s301_s3 }
 0x238   :  { %p227_p7 = pnand %p225_p6, %p222_p5 }
 0x23a   :  { %230 = shalt.err (!%p227_p7)
}
 0x23b   :  { %151 = dma.vmem_to_hbm [thread:$0]  %s149_s1, 32, %s301_s3, [#allocation3]  }
 0x23c   :  { %231 = dma.done.wait [#allocation3], 32  }
 0x23d   :  { %232 = vsyncadd [#allocation3], 4294967264 }
 0x23e   :  { %155 = vsyncpa [#allocation3], 1 }

// kernel: net_forward.6
= control target key start
LH: loop header
LB: loop body
LE: loop exit
PB: predicated region body
PF: predicated region fallthrough
CT: control target
= control target key end

     0   :  { %v17095_v22 = vmov 1966171168   ;;  %v2366_v24 = vlaneseq  ;;  %s20916_s1 = inlined_call_operand.vmem [shape: bf16[18432,128], index: 1, kind: input, shape index: {}]   ;;  %s20917_s0 = inlined_call_operand.vmem [shape: bf16[2,18432], index: 0, kind: input, shape index: {}]   ;;  %s20918_s2 = inlined_call_operand.vmem [shape: f32[1,128], index: 2, kind: input, shape index: {}]   ;;  %s20919_s3 = inlined_call_operand.vmem [shape: bf16[2,128], index: 3, kind: output, shape index: {}]  }
   0x1   :  { %v15925_v0 = vld [vmem:[%s20916_s1 + $0x40] sm:$0xff]   ;;  %v15929_v4 = vld [vmem:[%s20916_s1 + $0x48] sm:$0xff]   ;;  %v15933_v8 = vld [vmem:[%s20916_s1 + $0x50] sm:$0xff]   ;;  %v2364_v23 = vunpack.c.l.s4 %v17095_v22 }
   0x2   :  { %v15926_v1 = vld [vmem:[%s20916_s1 + $0xc0] sm:$0xff]   ;;  %14340 = vmatprep.subr.bf16.mxu0 %v15925_v0  ;;  %v15930_v5 = vld [vmem:[%s20916_s1 + $0xc8] sm:$0xff]   ;;  %v15934_v9 = vld [vmem:[%s20916_s1 + $0xd0] sm:$0xff]   ;;  %v2367_v30 = vshrl.u32 %v2366_v24, 7 }
   0x3   :  { %v15927_v2 = vld [vmem:[%s20916_s1] sm:$0xff]   ;;  %14362 = vmatprep.subr.bf16.mxu1 %v15926_v1  ;;  %v15931_v6 = vld [vmem:[%s20916_s1 + $0x8] sm:$0xff]   ;;  %v15935_v10 = vld [vmem:[%s20916_s1 + $0x10] sm:$0xff]   ;;  %v2365_v29 = vunpack.c.0.s8 %v2364_v23 }
   0x4   :  { %v15928_v3 = vld [vmem:[%s20916_s1 + $0x80] sm:$0xff]   ;;  %14341 = vmatpush3.bf16.msra.mxu0 %v15927_v2  ;;  %v15932_v7 = vld [vmem:[%s20916_s1 + $0x88] sm:$0xff]   ;;  %v15936_v11 = vld [vmem:[%s20916_s1 + $0x90] sm:$0xff]  }
   0x5   :  { %14363 = vmatpush3.bf16.msra.mxu1 %v15928_v3  ;;  %14342 = vmatprep.subr.bf16.mxu0 %v15929_v4  ;;  %v15937_v12 = vld [vmem:[%s20916_s1 + $0x58] sm:$0xff]   ;;  %v15941_v16 = vld [vmem:[%s20916_s1 + $0x60] sm:$0xff]   ;;  %v15945_v20 = vld [vmem:[%s20916_s1 + $0x68] sm:$0xff]   ;;  %v17206_v35 = vsub.s32 %v2365_v29, %v2367_v30 }
   0x6   :  { %14364 = vmatprep.subr.bf16.mxu1 %v15930_v5  ;;  %v15938_v13 = vld [vmem:[%s20916_s1 + $0xd8] sm:$0xff]   ;;  %v15942_v17 = vld [vmem:[%s20916_s1 + $0xe0] sm:$0xff]   ;;  %v15946_v21 = vld [vmem:[%s20916_s1 + $0xe8] sm:$0xff]  }
   0x7   :  { %v15939_v14 = vld [vmem:[%s20916_s1 + $0x18] sm:$0xff]   ;;  %v15943_v18 = vld [vmem:[%s20916_s1 + $0x20] sm:$0xff]   ;;  %v15947_v25 = vld [vmem:[%s20916_s1 + $0x28] sm:$0xff]  }
   0x8   :  { %14343 = vmatpush3.bf16.msra.mxu0 %v15931_v6  ;;  %v15940_v15 = vld [vmem:[%s20916_s1 + $0x98] sm:$0xff]   ;;  %v15944_v19 = vld [vmem:[%s20916_s1 + $0xa0] sm:$0xff]   ;;  %v15948_v26 = vld [vmem:[%s20916_s1 + $0xa8] sm:$0xff]  }
   0x9   :  { %14365 = vmatpush3.bf16.msra.mxu1 %v15932_v7  ;;  %14344 = vmatprep.subr.bf16.mxu0 %v15933_v8  ;;  %v15949_v27 = vld [vmem:[%s20916_s1 + $0x70] sm:$0xff]   ;;  %v15953_v33 = vld [vmem:[%s20916_s1 + $0x78] sm:$0xff]   ;;  %v15_v38 = vld [vmem:[%s20917_s0] sm:$0xff] }
   0xa   :  { %14366 = vmatprep.subr.bf16.mxu1 %v15934_v9  ;;  %v15950_v28 = vld [vmem:[%s20916_s1 + $0xf0] sm:$0xff]   ;;  %v15954_v34 = vld [vmem:[%s20916_s1 + $0xf8] sm:$0xff]   ;;  %v2362_v39 = vcombine.high %v15_v38, %v15_v38  ;;  %v2369_v40 = vrot.slane %v15_v38, %v17206_v35  ;;  %v15958_v41 = vld [vmem:[%s20916_s1 + $0x140] sm:$0xff]  }
   0xb   :  { %v15951_v31 = vld [vmem:[%s20916_s1 + $0x30] sm:$0xff]   ;;  %v15955_v36 = vld [vmem:[%s20916_s1 + $0x38] sm:$0xff]   ;;  %v15959_v42 = vld [vmem:[%s20916_s1 + $0x1c0] sm:$0xff]  }
   0xc   :  { %14345 = vmatpush3.bf16.msra.mxu0 %v15935_v10  ;;  %v15952_v32 = vld [vmem:[%s20916_s1 + $0xb0] sm:$0xff]   ;;  %v15956_v37 = vld [vmem:[%s20916_s1 + $0xb8] sm:$0xff]   ;;  %v2377_v43 = vcombine.high %v2369_v40, %v2369_v40  ;;  %v2385_v44 = vrot.slane %v2369_v40, %v17206_v35  ;;  %v17226_v45 = vrot.slane %v2362_v39, %v17206_v35  ;;  %v15960_v46 = vld [vmem:[%s20916_s1 + $0x100] sm:$0xff]  }
   0xd   :  { %14367 = vmatpush3.bf16.msra.mxu1 %v15936_v11  ;;  %14346 = vmatprep.subr.bf16.mxu0 %v15937_v12  ;;  %v15961_v48 = vld [vmem:[%s20916_s1 + $0x180] sm:$0xff]   ;;  %v15962_v51 = vld [vmem:[%s20916_s1 + $0x148] sm:$0xff]   ;;  %v15966_v58 = vld [vmem:[%s20916_s1 + $0x150] sm:$0xff]  }
   0xe   :  { %14368 = vmatprep.subr.bf16.mxu1 %v15938_v13  ;;  %v2399_v47 = vrot.slane %v2377_v43, %v17206_v35  ;;  %v2378_v49 = vcombine.high %v17226_v45, %v17226_v45  ;;  %v2407_v50 = vcombine.high %v2385_v44, %v2385_v44  ;;  %v15963_v53 = vld [vmem:[%s20916_s1 + $0x1c8] sm:$0xff]   ;;  %v15967_v59 = vld [vmem:[%s20916_s1 + $0x1d0] sm:$0xff]   ;;  %v15970_v62 = vld [vmem:[%s20916_s1 + $0x158] sm:$0xff]  }
   0xf   :  { %v15964_v55 = vld [vmem:[%s20916_s1 + $0x108] sm:$0xff]   ;;  %v15968_v60 = vld [vmem:[%s20916_s1 + $0x110] sm:$0xff]   ;;  %v15971_v63 = vld [vmem:[%s20916_s1 + $0x1d8] sm:$0xff]  }
  0x10   :  { %14347 = vmatpush3.bf16.msra.mxu0 %v15939_v14  ;;  %10332 = vmatprep.mubr.bf16.mxu0 %v2399_v47  ;;  %v2409_v52 = vcombine.high %v2399_v47, %v2399_v47  ;;  %v2406_v54 = vrot.slane %v2378_v49, %v17206_v35  ;;  %v15965_v56 = vld [vmem:[%s20916_s1 + $0x188] sm:$0xff]   ;;  %v15969_v61 = vld [vmem:[%s20916_s1 + $0x190] sm:$0xff]   ;;  %v15972_v0 = vld [vmem:[%s20916_s1 + $0x118] sm:$0xff]  }
  0x11   :  { %14369 = vmatpush3.bf16.msra.mxu1 %v15940_v15  ;;  %14348 = vmatprep.subr.bf16.mxu0 %v15941_v16  ;;  %v15973_v1 = vld [vmem:[%s20916_s1 + $0x198] sm:$0xff]   ;;  %v15974_v2 = vld [vmem:[%s20916_s1 + $0x160] sm:$0xff]   ;;  %v15978_v6 = vld [vmem:[%s20916_s1 + $0x168] sm:$0xff]  }
  0x12   :  { %14370 = vmatprep.subr.bf16.mxu1 %v15942_v17  ;;  %10372 = vmatprep.mubr.bf16.mxu1 %v2409_v52  ;;  %v2410_v57 = vcombine.high %v2406_v54, %v2406_v54  ;;  %v15975_v3 = vld [vmem:[%s20916_s1 + $0x1e0] sm:$0xff]   ;;  %v15979_v7 = vld [vmem:[%s20916_s1 + $0x1e8] sm:$0xff]   ;;  %v15982_v10 = vld [vmem:[%s20916_s1 + $0x170] sm:$0xff]  }
  0x13   :  { %v15976_v4 = vld [vmem:[%s20916_s1 + $0x120] sm:$0xff]   ;;  %v15980_v8 = vld [vmem:[%s20916_s1 + $0x128] sm:$0xff]   ;;  %v15983_v11 = vld [vmem:[%s20916_s1 + $0x1f0] sm:$0xff]  }
  0x14   :  { %14349 = vmatpush3.bf16.msra.mxu0 %v15943_v18  ;;  %v15977_v5 = vld [vmem:[%s20916_s1 + $0x1a0] sm:$0xff]   ;;  %v15981_v9 = vld [vmem:[%s20916_s1 + $0x1a8] sm:$0xff]   ;;  %v15984_v12 = vld [vmem:[%s20916_s1 + $0x130] sm:$0xff]   ;;  %v2392_v18 = vrot.slane %v17226_v45, %v17206_v35 }
  0x15   :  { %14371 = vmatpush3.bf16.msra.mxu1 %v15944_v19  ;;  %14350 = vmatprep.subr.bf16.mxu0 %v15945_v20  ;;  %v15985_v13 = vld [vmem:[%s20916_s1 + $0x1b0] sm:$0xff]   ;;  %v15986_v14 = vld [vmem:[%s20916_s1 + $0x178] sm:$0xff]   ;;  %v15990_v19 = vld [vmem:[%s20916_s1 + $0x240] sm:$0xff]  }
  0x16   :  { %14372 = vmatprep.subr.bf16.mxu1 %v15946_v21  ;;  %v15987_v15 = vld [vmem:[%s20916_s1 + $0x1f8] sm:$0xff]   ;;  %v15991_v20 = vld [vmem:[%s20916_s1 + $0x2c0] sm:$0xff]   ;;  %v2408_v23 = vcombine.high %v2392_v18, %v2392_v18  ;;  %v15994_v24 = vld [vmem:[%s20916_s1 + $0x248] sm:$0xff]  }
  0x17   :  { %v15988_v16 = vld [vmem:[%s20916_s1 + $0x138] sm:$0xff]   ;;  %v15992_v21 = vld [vmem:[%s20916_s1 + $0x200] sm:$0xff]   ;;  %v15999_v29 = vld [vmem:[%s20916_s1 + $0x2d0] sm:$0xff]  }
  0x18   :  { %14351 = vmatpush3.bf16.msra.mxu0 %v15947_v25  ;;  %v15989_v17 = vld [vmem:[%s20916_s1 + $0x1b8] sm:$0xff]   ;;  %v15993_v22 = vld [vmem:[%s20916_s1 + $0x280] sm:$0xff]   ;;  %v15995_v25 = vld [vmem:[%s20916_s1 + $0x2c8] sm:$0xff]  }
  0x19   :  { %14373 = vmatpush3.bf16.msra.mxu1 %v15948_v26  ;;  %14352 = vmatprep.subr.bf16.mxu0 %v15949_v27  ;;  %v15996_v26 = vld [vmem:[%s20916_s1 + $0x208] sm:$0xff]   ;;  %v16000_v30 = vld [vmem:[%s20916_s1 + $0x210] sm:$0xff]   ;;  %v16007_v38 = vld [vmem:[%s20916_s1 + $0x2e0] sm:$0xff]  }
  0x1a   :  { %14374 = vmatprep.subr.bf16.mxu1 %v15950_v28  ;;  %v15997_v27 = vld [vmem:[%s20916_s1 + $0x288] sm:$0xff]   ;;  %v15998_v28 = vld [vmem:[%s20916_s1 + $0x250] sm:$0xff]   ;;  %v16008_v39 = vld [vmem:[%s20916_s1 + $0x220] sm:$0xff]  }
  0x1b   :  { %v16009_v40 = vld [vmem:[%s20916_s1 + $0x2a0] sm:$0xff]   ;;  %v16012_v43 = vld [vmem:[%s20916_s1 + $0x228] sm:$0xff]   ;;  %v16014_v45 = vld [vmem:[%s20916_s1 + $0x270] sm:$0xff]  }
  0x1c   :  { %14353 = vmatpush3.bf16.msra.mxu0 %v15951_v31  ;;  %v16001_v31 = vld [vmem:[%s20916_s1 + $0x290] sm:$0xff]   ;;  %v16018_v49 = vld [vmem:[%s20916_s1 + $0x278] sm:$0xff]   ;;  %v16_v52 = vld [vmem:[%s20917_s0 + $0x8] sm:$0xff] }
  0x1d   :  { %14375 = vmatpush3.bf16.msra.mxu1 %v15952_v32  ;;  %14354 = vmatprep.subr.bf16.mxu0 %v15953_v33  ;;  %v16002_v32 = vld [vmem:[%s20916_s1 + $0x258] sm:$0xff]   ;;  %v16016_v47 = vld [vmem:[%s20916_s1 + $0x230] sm:$0xff]  }
  0x1e   :  { %14376 = vmatprep.subr.bf16.mxu1 %v15954_v34  ;;  %v16003_v33 = vld [vmem:[%s20916_s1 + $0x2d8] sm:$0xff]  }
  0x1f   :  { %v16004_v34 = vld [vmem:[%s20916_s1 + $0x218] sm:$0xff]  }
  0x20   :  { %14355 = vmatpush3.bf16.msra.mxu0 %v15955_v36  ;;  %v16005_v36 = vld [vmem:[%s20916_s1 + $0x298] sm:$0xff]  }
  0x21   :  { %14377 = vmatpush3.bf16.msra.mxu1 %v15956_v37  ;;  %14384 = vmatprep.subr.bf16.mxu0 %v15958_v41  ;;  %v16006_v37 = vld [vmem:[%s20916_s1 + $0x260] sm:$0xff]   ;;  %v16010_v41 = vld [vmem:[%s20916_s1 + $0x268] sm:$0xff]  }
  0x22   :  { %14406 = vmatprep.subr.bf16.mxu1 %v15959_v42  ;;  %v16011_v42 = vld [vmem:[%s20916_s1 + $0x2e8] sm:$0xff]  }
  0x23   :  { %10333 = vmatmul.mubr.bf16.vlgmr.msra.gmra.mrb[0].mxu0 %v2385_v44  ;;  %v16013_v44 = vld [vmem:[%s20916_s1 + $0x2a8] sm:$0xff]  }
  0x24   :  { %14385 = vmatpush3.bf16.msra.mxu0 %v15960_v46  ;;  %10373 = vmatmul.mubr.bf16.vlgmr.msra.gmra.mrb[0].mxu1 %v2407_v50  ;;  %v16015_v46 = vld [vmem:[%s20916_s1 + $0x2f0] sm:$0xff]   ;;  %v16019_v50 = vld [vmem:[%s20916_s1 + $0x2f8] sm:$0xff]  }
  0x25   :  { %14386 = vmatprep.subr.bf16.mxu0 %v15962_v51  ;;  %14407 = vmatpush3.bf16.msra.mxu1 %v15961_v48  ;;  %v16017_v48 = vld [vmem:[%s20916_s1 + $0x2b0] sm:$0xff]   ;;  %v16020_v51 = vld [vmem:[%s20916_s1 + $0x238] sm:$0xff]  }
  0x26   :  { %10412 = vmatprep.mubr.bf16.mxu0 %v2406_v54  ;;  %14408 = vmatprep.subr.bf16.mxu1 %v15963_v53  ;;  %v16021_v53 = vld [vmem:[%s20916_s1 + $0x2b8] sm:$0xff]   ;;  %v2418_v54 = vrot.slane %v16_v52, %v17206_v35 }
  0x27   :  { %10452 = vmatprep.mubr.bf16.mxu1 %v2410_v57 }
  0x28   :  { %14387 = vmatpush3.bf16.msra.mxu0 %v15964_v55  ;;  %v2411_v55 = vcombine.high %v16_v52, %v16_v52  ;;  %v2426_v57 = vcombine.high %v2418_v54, %v2418_v54  ;;  %v16071_v52 = vld [vmem:[%s20916_s1 + $0x460] sm:$0xff]  }
  0x29   :  { %14388 = vmatprep.subr.bf16.mxu0 %v15966_v58  ;;  %14409 = vmatpush3.bf16.msra.mxu1 %v15965_v56  ;;  %v16022_v56 = vld [vmem:[%s20916_s1 + $0x340] sm:$0xff]   ;;  %v2434_v58 = vrot.slane %v2418_v54, %v17206_v35 }
  0x2a   :  { %14410 = vmatprep.subr.bf16.mxu1 %v15967_v59  ;;  %v16023_v59 = vld [vmem:[%s20916_s1 + $0x3c0] sm:$0xff]  }
  0x2b   :  { %v16073_v54 = vld [vmem:[%s20916_s1 + $0x420] sm:$0xff]  }
  0x2c   :  { %14389 = vmatpush3.bf16.msra.mxu0 %v15968_v60  ;;  %v17432_v60 = vrot.slane %v2411_v55, %v17206_v35  ;;  %v16074_v55 = vld [vmem:[%s20916_s1 + $0x4a0] sm:$0xff]  }
  0x2d   :  { %14390 = vmatprep.subr.bf16.mxu0 %v15970_v62  ;;  %14411 = vmatpush3.bf16.msra.mxu1 %v15969_v61  ;;  %v16024_v61 = vld [vmem:[%s20916_s1 + $0x300] sm:$0xff]   ;;  %v2448_v62 = vrot.slane %v2426_v57, %v17206_v35  ;;  %v16076_v57 = vld [vmem:[%s20916_s1 + $0x4e8] sm:$0xff]  }
  0x2e   :  { %14412 = vmatprep.subr.bf16.mxu1 %v15971_v63  ;;  %v16025_v63 = vld [vmem:[%s20916_s1 + $0x380] sm:$0xff]  }
  0x30   :  { %14391 = vmatpush3.bf16.msra.mxu0 %v15972_v0  ;;  %v2427_v0 = vcombine.high %v17432_v60, %v17432_v60 }
  0x31   :  { %14392 = vmatprep.subr.bf16.mxu0 %v15974_v2  ;;  %14413 = vmatpush3.bf16.msra.mxu1 %v15973_v1  ;;  %v2456_v1 = vcombine.high %v2434_v58, %v2434_v58  ;;  %v16026_v2 = vld [vmem:[%s20916_s1 + $0x348] sm:$0xff]  }
  0x32   :  { %14414 = vmatprep.subr.bf16.mxu1 %v15975_v3  ;;  %v2458_v3 = vcombine.high %v2448_v62, %v2448_v62 }
  0x34   :  { %14393 = vmatpush3.bf16.msra.mxu0 %v15976_v4  ;;  %v16027_v4 = vld [vmem:[%s20916_s1 + $0x3c8] sm:$0xff]  }
  0x35   :  { %14394 = vmatprep.subr.bf16.mxu0 %v15978_v6  ;;  %14415 = vmatpush3.bf16.msra.mxu1 %v15977_v5  ;;  %v2455_v5 = vrot.slane %v2427_v0, %v17206_v35  ;;  %v16028_v6 = vld [vmem:[%s20916_s1 + $0x308] sm:$0xff]   ;;  %v16083_v0 = vld [vmem:[%s20916_s1 + $0x478] sm:$0xff]  }
  0x36   :  { %14416 = vmatprep.subr.bf16.mxu1 %v15979_v7  ;;  %v16029_v7 = vld [vmem:[%s20916_s1 + $0x388] sm:$0xff]  }
  0x38   :  { %14395 = vmatpush3.bf16.msra.mxu0 %v15980_v8  ;;  %v2459_v8 = vcombine.high %v2455_v5, %v2455_v5 }
  0x39   :  { %14396 = vmatprep.subr.bf16.mxu0 %v15982_v10  ;;  %14417 = vmatpush3.bf16.msra.mxu1 %v15981_v9  ;;  %v16030_v9 = vld [vmem:[%s20916_s1 + $0x350] sm:$0xff]  }
  0x3a   :  { %14418 = vmatprep.subr.bf16.mxu1 %v15983_v11  ;;  %v16031_v10 = vld [vmem:[%s20916_s1 + $0x3d0] sm:$0xff]  }
  0x3b   :  { %v16032_v11 = vld [vmem:[%s20916_s1 + $0x310] sm:$0xff]  }
  0x3c   :  { %14397 = vmatpush3.bf16.msra.mxu0 %v15984_v12  ;;  %v16033_v12 = vld [vmem:[%s20916_s1 + $0x390] sm:$0xff]  }
  0x3d   :  { %14398 = vmatprep.subr.bf16.mxu0 %v15986_v14  ;;  %14419 = vmatpush3.bf16.msra.mxu1 %v15985_v13  ;;  %v16034_v13 = vld [vmem:[%s20916_s1 + $0x358] sm:$0xff]  }
  0x3e   :  { %14420 = vmatprep.subr.bf16.mxu1 %v15987_v15  ;;  %v16035_v14 = vld [vmem:[%s20916_s1 + $0x3d8] sm:$0xff]  }
  0x3f   :  { %v16036_v15 = vld [vmem:[%s20916_s1 + $0x318] sm:$0xff]  }
  0x40   :  { %14399 = vmatpush3.bf16.msra.mxu0 %v15988_v16  ;;  %v16037_v16 = vld [vmem:[%s20916_s1 + $0x398] sm:$0xff]  }
  0x41   :  { %14428 = vmatprep.subr.bf16.mxu0 %v15990_v19  ;;  %14421 = vmatpush3.bf16.msra.mxu1 %v15989_v17  ;;  %v16038_v17 = vld [vmem:[%s20916_s1 + $0x360] sm:$0xff]  }
  0x42   :  { %14450 = vmatprep.subr.bf16.mxu1 %v15991_v20  ;;  %v16040_v19 = vld [vmem:[%s20916_s1 + $0x320] sm:$0xff]  }
  0x43   :  { %10413 = vmatmul.mubr.bf16.vlgmr.msra.gmra.mrb[4].mxu0 %v2392_v18  ;;  %v16039_v18 = vld [vmem:[%s20916_s1 + $0x3e0] sm:$0xff]  }
  0x44   :  { %14429 = vmatpush3.bf16.msra.mxu0 %v15992_v21  ;;  %10453 = vmatmul.mubr.bf16.vlgmr.msra.gmra.mrb[4].mxu1 %v2408_v23  ;;  %v16041_v20 = vld [vmem:[%s20916_s1 + $0x3a0] sm:$0xff]   ;;  %v16042_v21 = vld [vmem:[%s20916_s1 + $0x368] sm:$0xff]  }
  0x45   :  { %14430 = vmatprep.subr.bf16.mxu0 %v15994_v24  ;;  %14451 = vmatpush3.bf16.msra.mxu1 %v15993_v22  ;;  %v16043_v22 = vld [vmem:[%s20916_s1 + $0x3e8] sm:$0xff]  }
  0x46   :  { %14452 = vmatprep.subr.bf16.mxu1 %v15995_v25  ;;  %10492 = vmatprep.mubr.bf16.mxu0 %v2448_v62  ;;  %v16044_v23 = vld [vmem:[%s20916_s1 + $0x328] sm:$0xff]   ;;  %v16046_v25 = vld [vmem:[%s20916_s1 + $0x370] sm:$0xff]  }
  0x47   :  { %10532 = vmatprep.mubr.bf16.mxu1 %v2458_v3  ;;  %v16045_v24 = vld [vmem:[%s20916_s1 + $0x3a8] sm:$0xff]   ;;  %v16081_v62 = vld [vmem:[%s20916_s1 + $0x430] sm:$0xff]  }
  0x48   :  { %14431 = vmatpush3.bf16.msra.mxu0 %v15996_v26  ;;  %v16047_v26 = vld [vmem:[%s20916_s1 + $0x3f0] sm:$0xff]  }
  0x49   :  { %14432 = vmatprep.subr.bf16.mxu0 %v15998_v28  ;;  %14453 = vmatpush3.bf16.msra.mxu1 %v15997_v27  ;;  %v16048_v27 = vld [vmem:[%s20916_s1 + $0x330] sm:$0xff]  }
  0x4a   :  { %14454 = vmatprep.subr.bf16.mxu1 %v15999_v29  ;;  %v16049_v28 = vld [vmem:[%s20916_s1 + $0x3b0] sm:$0xff]   ;;  %v16050_v29 = vld [vmem:[%s20916_s1 + $0x378] sm:$0xff]  }
  0x4b   :  { %v17_v3 = vld [vmem:[%s20917_s0 + $0x10] sm:$0xff] }
  0x4c   :  { %14433 = vmatpush3.bf16.msra.mxu0 %v16000_v30  ;;  %v16051_v30 = vld [vmem:[%s20916_s1 + $0x3f8] sm:$0xff]  }
  0x4d   :  { %14434 = vmatprep.subr.bf16.mxu0 %v16002_v32  ;;  %14455 = vmatpush3.bf16.msra.mxu1 %v16001_v31  ;;  %v16052_v31 = vld [vmem:[%s20916_s1 + $0x338] sm:$0xff]  }
  0x4e   :  { %14456 = vmatprep.subr.bf16.mxu1 %v16003_v33  ;;  %v16053_v32 = vld [vmem:[%s20916_s1 + $0x3b8] sm:$0xff]   ;;  %v2441_v33 = vrot.slane %v17432_v60, %v17206_v35  ;;  %v16079_v60 = vld [vmem:[%s20916_s1 + $0x470] sm:$0xff]  }
  0x50   :  { %14435 = vmatpush3.bf16.msra.mxu0 %v16004_v34  ;;  %v16055_v34 = vld [vmem:[%s20916_s1 + $0x440] sm:$0xff]  }
  0x51   :  { %14436 = vmatprep.subr.bf16.mxu0 %v16006_v37  ;;  %14457 = vmatpush3.bf16.msra.mxu1 %v16005_v36  ;;  %v16056_v36 = vld [vmem:[%s20916_s1 + $0x4c0] sm:$0xff]  }
  0x52   :  { %14458 = vmatprep.subr.bf16.mxu1 %v16007_v38  ;;  %v16057_v37 = vld [vmem:[%s20916_s1 + $0x400] sm:$0xff]  }
  0x53   :  { %v16058_v38 = vld [vmem:[%s20916_s1 + $0x480] sm:$0xff]  }
  0x54   :  { %14437 = vmatpush3.bf16.msra.mxu0 %v16008_v39  ;;  %v2457_v39 = vcombine.high %v2441_v33, %v2441_v33 }
  0x55   :  { %14438 = vmatprep.subr.bf16.mxu0 %v16010_v41  ;;  %14459 = vmatpush3.bf16.msra.mxu1 %v16009_v40  ;;  %v16059_v40 = vld [vmem:[%s20916_s1 + $0x448] sm:$0xff]  }
  0x56   :  { %14460 = vmatprep.subr.bf16.mxu1 %v16011_v42  ;;  %v16060_v41 = vld [vmem:[%s20916_s1 + $0x4c8] sm:$0xff]  }
  0x57   :  { %v16061_v42 = vld [vmem:[%s20916_s1 + $0x408] sm:$0xff]  }
  0x58   :  { %14439 = vmatpush3.bf16.msra.mxu0 %v16012_v43  ;;  %v16062_v43 = vld [vmem:[%s20916_s1 + $0x488] sm:$0xff]  }
  0x59   :  { %14440 = vmatprep.subr.bf16.mxu0 %v16014_v45  ;;  %14461 = vmatpush3.bf16.msra.mxu1 %v16013_v44  ;;  %v16063_v44 = vld [vmem:[%s20916_s1 + $0x450] sm:$0xff]  }
  0x5a   :  { %14462 = vmatprep.subr.bf16.mxu1 %v16015_v46  ;;  %v16064_v45 = vld [vmem:[%s20916_s1 + $0x4d0] sm:$0xff]  }
  0x5b   :  { %v16065_v46 = vld [vmem:[%s20916_s1 + $0x410] sm:$0xff]  }
  0x5c   :  { %14441 = vmatpush3.bf16.msra.mxu0 %v16016_v47  ;;  %v16066_v47 = vld [vmem:[%s20916_s1 + $0x490] sm:$0xff]  }
  0x5d   :  { %14442 = vmatprep.subr.bf16.mxu0 %v16018_v49  ;;  %14463 = vmatpush3.bf16.msra.mxu1 %v16017_v48  ;;  %v16067_v48 = vld [vmem:[%s20916_s1 + $0x458] sm:$0xff]  }
  0x5e   :  { %14464 = vmatprep.subr.bf16.mxu1 %v16019_v50  ;;  %v16068_v49 = vld [vmem:[%s20916_s1 + $0x4d8] sm:$0xff]  }
  0x5f   :  { %v16069_v50 = vld [vmem:[%s20916_s1 + $0x418] sm:$0xff]  }
  0x60   :  { %14443 = vmatpush3.bf16.msra.mxu0 %v16020_v51  ;;  %v16070_v51 = vld [vmem:[%s20916_s1 + $0x498] sm:$0xff]  }
  0x61   :  { %14472 = vmatprep.subr.bf16.mxu0 %v16022_v56  ;;  %14465 = vmatpush3.bf16.msra.mxu1 %v16021_v53  ;;  %v16072_v53 = vld [vmem:[%s20916_s1 + $0x4e0] sm:$0xff]   ;;  %v16075_v56 = vld [vmem:[%s20916_s1 + $0x468] sm:$0xff]  }
  0x62   :  { %14494 = vmatprep.subr.bf16.mxu1 %v16023_v59  ;;  %v16078_v59 = vld [vmem:[%s20916_s1 + $0x4a8] sm:$0xff]  }
  0x63   :  { %10493 = vmatmul.mubr.bf16.vlgmr.msra.gmra.mrb[8].mxu0 %v2434_v58  ;;  %v16077_v58 = vld [vmem:[%s20916_s1 + $0x428] sm:$0xff]  }
  0x64   :  { %14473 = vmatpush3.bf16.msra.mxu0 %v16024_v61  ;;  %10533 = vmatmul.mubr.bf16.vlgmr.msra.gmra.mrb[8].mxu1 %v2456_v1  ;;  %v16080_v61 = vld [vmem:[%s20916_s1 + $0x4f0] sm:$0xff]   ;;  %v16084_v1 = vld [vmem:[%s20916_s1 + $0x4f8] sm:$0xff]  }
  0x65   :  { %14474 = vmatprep.subr.bf16.mxu0 %v16026_v2  ;;  %14495 = vmatpush3.bf16.msra.mxu1 %v16025_v63  ;;  %v16082_v63 = vld [vmem:[%s20916_s1 + $0x4b0] sm:$0xff]   ;;  %v16085_v2 = vld [vmem:[%s20916_s1 + $0x438] sm:$0xff]  }
  0x66   :  { %10572 = vmatprep.mubr.bf16.mxu0 %v2455_v5  ;;  %14496 = vmatprep.subr.bf16.mxu1 %v16027_v4  ;;  %v16086_v4 = vld [vmem:[%s20916_s1 + $0x4b8] sm:$0xff]   ;;  %v2467_v5 = vrot.slane %v17_v3, %v17206_v35 }
  0x67   :  { %10612 = vmatprep.mubr.bf16.mxu1 %v2459_v8 }
  0x68   :  { %14475 = vmatpush3.bf16.msra.mxu0 %v16028_v6  ;;  %v2460_v6 = vcombine.high %v17_v3, %v17_v3  ;;  %v2475_v8 = vcombine.high %v2467_v5, %v2467_v5  ;;  %v16136_v3 = vld [vmem:[%s20916_s1 + $0x660] sm:$0xff]  }
  0x69   :  { %14476 = vmatprep.subr.bf16.mxu0 %v16030_v9  ;;  %14497 = vmatpush3.bf16.msra.mxu1 %v16029_v7  ;;  %v16087_v7 = vld [vmem:[%s20916_s1 + $0x540] sm:$0xff]   ;;  %v2483_v9 = vrot.slane %v2467_v5, %v17206_v35 }
  0x6a   :  { %14498 = vmatprep.subr.bf16.mxu1 %v16031_v10  ;;  %v16088_v10 = vld [vmem:[%s20916_s1 + $0x5c0] sm:$0xff]  }
  0x6b   :  { %v16138_v5 = vld [vmem:[%s20916_s1 + $0x620] sm:$0xff]  }
  0x6c   :  { %14477 = vmatpush3.bf16.msra.mxu0 %v16032_v11  ;;  %v17638_v11 = vrot.slane %v2460_v6, %v17206_v35  ;;  %v16139_v6 = vld [vmem:[%s20916_s1 + $0x6a0] sm:$0xff]  }
  0x6d   :  { %14478 = vmatprep.subr.bf16.mxu0 %v16034_v13  ;;  %14499 = vmatpush3.bf16.msra.mxu1 %v16033_v12  ;;  %v16089_v12 = vld [vmem:[%s20916_s1 + $0x500] sm:$0xff]   ;;  %v2497_v13 = vrot.slane %v2475_v8, %v17206_v35  ;;  %v16141_v8 = vld [vmem:[%s20916_s1 + $0x6e8] sm:$0xff]  }
  0x6e   :  { %14500 = vmatprep.subr.bf16.mxu1 %v16035_v14  ;;  %v16090_v14 = vld [vmem:[%s20916_s1 + $0x580] sm:$0xff]  }
  0x70   :  { %14479 = vmatpush3.bf16.msra.mxu0 %v16036_v15  ;;  %v2476_v15 = vcombine.high %v17638_v11, %v17638_v11 }
  0x71   :  { %14480 = vmatprep.subr.bf16.mxu0 %v16038_v17  ;;  %14501 = vmatpush3.bf16.msra.mxu1 %v16037_v16  ;;  %v2505_v16 = vcombine.high %v2483_v9, %v2483_v9  ;;  %v16091_v17 = vld [vmem:[%s20916_s1 + $0x548] sm:$0xff]  }
  0x72   :  { %14502 = vmatprep.subr.bf16.mxu1 %v16039_v18  ;;  %v2507_v18 = vcombine.high %v2497_v13, %v2497_v13 }
  0x74   :  { %14481 = vmatpush3.bf16.msra.mxu0 %v16040_v19  ;;  %v16092_v19 = vld [vmem:[%s20916_s1 + $0x5c8] sm:$0xff]  }
  0x75   :  { %14482 = vmatprep.subr.bf16.mxu0 %v16042_v21  ;;  %14503 = vmatpush3.bf16.msra.mxu1 %v16041_v20  ;;  %v2504_v20 = vrot.slane %v2476_v15, %v17206_v35  ;;  %v16093_v21 = vld [vmem:[%s20916_s1 + $0x508] sm:$0xff]   ;;  %v16148_v15 = vld [vmem:[%s20916_s1 + $0x678] sm:$0xff]  }
  0x76   :  { %14504 = vmatprep.subr.bf16.mxu1 %v16043_v22  ;;  %v16094_v22 = vld [vmem:[%s20916_s1 + $0x588] sm:$0xff]  }
  0x78   :  { %14483 = vmatpush3.bf16.msra.mxu0 %v16044_v23  ;;  %v2508_v23 = vcombine.high %v2504_v20, %v2504_v20 }
  0x79   :  { %14484 = vmatprep.subr.bf16.mxu0 %v16046_v25  ;;  %14505 = vmatpush3.bf16.msra.mxu1 %v16045_v24  ;;  %v16095_v24 = vld [vmem:[%s20916_s1 + $0x550] sm:$0xff]  }
  0x7a   :  { %14506 = vmatprep.subr.bf16.mxu1 %v16047_v26  ;;  %v16096_v25 = vld [vmem:[%s20916_s1 + $0x5d0] sm:$0xff]  }
  0x7b   :  { %v16097_v26 = vld [vmem:[%s20916_s1 + $0x510] sm:$0xff]  }
  0x7c   :  { %14485 = vmatpush3.bf16.msra.mxu0 %v16048_v27  ;;  %v16098_v27 = vld [vmem:[%s20916_s1 + $0x590] sm:$0xff]  }
  0x7d   :  { %14486 = vmatprep.subr.bf16.mxu0 %v16050_v29  ;;  %14507 = vmatpush3.bf16.msra.mxu1 %v16049_v28  ;;  %v16099_v28 = vld [vmem:[%s20916_s1 + $0x558] sm:$0xff]  }
  0x7e   :  { %14508 = vmatprep.subr.bf16.mxu1 %v16051_v30  ;;  %v16100_v29 = vld [vmem:[%s20916_s1 + $0x5d8] sm:$0xff]  }
  0x7f   :  { %v16101_v30 = vld [vmem:[%s20916_s1 + $0x518] sm:$0xff]  }
  0x80   :  { %14487 = vmatpush3.bf16.msra.mxu0 %v16052_v31  ;;  %v16102_v31 = vld [vmem:[%s20916_s1 + $0x598] sm:$0xff]  }
  0x81   :  { %14516 = vmatprep.subr.bf16.mxu0 %v16055_v34  ;;  %14509 = vmatpush3.bf16.msra.mxu1 %v16053_v32  ;;  %v16103_v32 = vld [vmem:[%s20916_s1 + $0x560] sm:$0xff]  }
  0x82   :  { %14538 = vmatprep.subr.bf16.mxu1 %v16056_v36  ;;  %v16105_v34 = vld [vmem:[%s20916_s1 + $0x520] sm:$0xff]  }
  0x83   :  { %10573 = vmatmul.mubr.bf16.vlgmr.msra.gmra.mrb[12].mxu0 %v2441_v33  ;;  %v16104_v33 = vld [vmem:[%s20916_s1 + $0x5e0] sm:$0xff]  }
  0x84   :  { %14517 = vmatpush3.bf16.msra.mxu0 %v16057_v37  ;;  %10613 = vmatmul.mubr.bf16.vlgmr.msra.gmra.mrb[12].mxu1 %v2457_v39  ;;  %v16106_v36 = vld [vmem:[%s20916_s1 + $0x5a0] sm:$0xff]   ;;  %v16107_v37 = vld [vmem:[%s20916_s1 + $0x568] sm:$0xff]  }
  0x85   :  { %14518 = vmatprep.subr.bf16.mxu0 %v16059_v40  ;;  %14539 = vmatpush3.bf16.msra.mxu1 %v16058_v38  ;;  %v16108_v38 = vld [vmem:[%s20916_s1 + $0x5e8] sm:$0xff]  }
  0x86   :  { %14540 = vmatprep.subr.bf16.mxu1 %v16060_v41  ;;  %10652 = vmatprep.mubr.bf16.mxu0 %v2497_v13  ;;  %v16109_v39 = vld [vmem:[%s20916_s1 + $0x528] sm:$0xff]   ;;  %v16111_v41 = vld [vmem:[%s20916_s1 + $0x570] sm:$0xff]  }
  0x87   :  { %10692 = vmatprep.mubr.bf16.mxu1 %v2507_v18  ;;  %v16110_v40 = vld [vmem:[%s20916_s1 + $0x5a8] sm:$0xff]   ;;  %v16146_v13 = vld [vmem:[%s20916_s1 + $0x630] sm:$0xff]   ;;  %v18_v18 = vld [vmem:[%s20917_s0 + $0x18] sm:$0xff] }
  0x88   :  { %14519 = vmatpush3.bf16.msra.mxu0 %v16061_v42  ;;  %v16112_v42 = vld [vmem:[%s20916_s1 + $0x5f0] sm:$0xff]  }
  0x89   :  { %14520 = vmatprep.subr.bf16.mxu0 %v16063_v44  ;;  %14541 = vmatpush3.bf16.msra.mxu1 %v16062_v43  ;;  %v16113_v43 = vld [vmem:[%s20916_s1 + $0x530] sm:$0xff]  }
  0x8a   :  { %14542 = vmatprep.subr.bf16.mxu1 %v16064_v45  ;;  %v16114_v44 = vld [vmem:[%s20916_s1 + $0x5b0] sm:$0xff]   ;;  %v16115_v45 = vld [vmem:[%s20916_s1 + $0x578] sm:$0xff]  }
  0x8c   :  { %14521 = vmatpush3.bf16.msra.mxu0 %v16065_v46  ;;  %v16116_v46 = vld [vmem:[%s20916_s1 + $0x5f8] sm:$0xff]  }
  0x8d   :  { %14522 = vmatprep.subr.bf16.mxu0 %v16067_v48  ;;  %14543 = vmatpush3.bf16.msra.mxu1 %v16066_v47  ;;  %v16117_v47 = vld [vmem:[%s20916_s1 + $0x538] sm:$0xff]  }
  0x8e   :  { %14544 = vmatprep.subr.bf16.mxu1 %v16068_v49  ;;  %v16118_v48 = vld [vmem:[%s20916_s1 + $0x5b8] sm:$0xff]   ;;  %v2490_v49 = vrot.slane %v17638_v11, %v17206_v35  ;;  %v16144_v11 = vld [vmem:[%s20916_s1 + $0x670] sm:$0xff]  }
  0x90   :  { %14523 = vmatpush3.bf16.msra.mxu0 %v16069_v50  ;;  %v16120_v50 = vld [vmem:[%s20916_s1 + $0x640] sm:$0xff]  }
  0x91   :  { %14524 = vmatprep.subr.bf16.mxu0 %v16071_v52  ;;  %14545 = vmatpush3.bf16.msra.mxu1 %v16070_v51  ;;  %v16121_v51 = vld [vmem:[%s20916_s1 + $0x6c0] sm:$0xff]  }
  0x92   :  { %14546 = vmatprep.subr.bf16.mxu1 %v16072_v53  ;;  %v16122_v52 = vld [vmem:[%s20916_s1 + $0x600] sm:$0xff]  }
  0x93   :  { %v16123_v53 = vld [vmem:[%s20916_s1 + $0x680] sm:$0xff]  }
  0x94   :  { %14525 = vmatpush3.bf16.msra.mxu0 %v16073_v54  ;;  %v2506_v54 = vcombine.high %v2490_v49, %v2490_v49 }
  0x95   :  { %14526 = vmatprep.subr.bf16.mxu0 %v16075_v56  ;;  %14547 = vmatpush3.bf16.msra.mxu1 %v16074_v55  ;;  %v16124_v55 = vld [vmem:[%s20916_s1 + $0x648] sm:$0xff]  }
  0x96   :  { %14548 = vmatprep.subr.bf16.mxu1 %v16076_v57  ;;  %v16125_v56 = vld [vmem:[%s20916_s1 + $0x6c8] sm:$0xff]  }
  0x97   :  { %v16126_v57 = vld [vmem:[%s20916_s1 + $0x608] sm:$0xff]  }
  0x98   :  { %14527 = vmatpush3.bf16.msra.mxu0 %v16077_v58  ;;  %v16127_v58 = vld [vmem:[%s20916_s1 + $0x688] sm:$0xff]  }
  0x99   :  { %14528 = vmatprep.subr.bf16.mxu0 %v16079_v60  ;;  %14549 = vmatpush3.bf16.msra.mxu1 %v16078_v59  ;;  %v16128_v59 = vld [vmem:[%s20916_s1 + $0x650] sm:$0xff]  }
  0x9a   :  { %14550 = vmatprep.subr.bf16.mxu1 %v16080_v61  ;;  %v16129_v60 = vld [vmem:[%s20916_s1 + $0x6d0] sm:$0xff]  }
  0x9b   :  { %v16130_v61 = vld [vmem:[%s20916_s1 + $0x610] sm:$0xff]  }
  0x9c   :  { %14529 = vmatpush3.bf16.msra.mxu0 %v16081_v62  ;;  %v16131_v62 = vld [vmem:[%s20916_s1 + $0x690] sm:$0xff]  }
  0x9d   :  { %14530 = vmatprep.subr.bf16.mxu0 %v16083_v0  ;;  %14551 = vmatpush3.bf16.msra.mxu1 %v16082_v63  ;;  %v16132_v63 = vld [vmem:[%s20916_s1 + $0x658] sm:$0xff]  }
  0x9e   :  { %14552 = vmatprep.subr.bf16.mxu1 %v16084_v1  ;;  %v16133_v0 = vld [vmem:[%s20916_s1 + $0x6d8] sm:$0xff]  }
  0x9f   :  { %v16134_v1 = vld [vmem:[%s20916_s1 + $0x618] sm:$0xff]  }
  0xa0   :  { %14531 = vmatpush3.bf16.msra.mxu0 %v16085_v2  ;;  %v16135_v2 = vld [vmem:[%s20916_s1 + $0x698] sm:$0xff]  }
  0xa1   :  { %14560 = vmatprep.subr.bf16.mxu0 %v16087_v7  ;;  %14553 = vmatpush3.bf16.msra.mxu1 %v16086_v4  ;;  %v16137_v4 = vld [vmem:[%s20916_s1 + $0x6e0] sm:$0xff]   ;;  %v16140_v7 = vld [vmem:[%s20916_s1 + $0x668] sm:$0xff]  }
  0xa2   :  { %14582 = vmatprep.subr.bf16.mxu1 %v16088_v10  ;;  %v16143_v10 = vld [vmem:[%s20916_s1 + $0x6a8] sm:$0xff]  }
  0xa3   :  { %10653 = vmatmul.mubr.bf16.vlgmr.msra.gmra.mrb[16].mxu0 %v2483_v9  ;;  %v16142_v9 = vld [vmem:[%s20916_s1 + $0x628] sm:$0xff]  }
  0xa4   :  { %14561 = vmatpush3.bf16.msra.mxu0 %v16089_v12  ;;  %10693 = vmatmul.mubr.bf16.vlgmr.msra.gmra.mrb[16].mxu1 %v2505_v16  ;;  %v16145_v12 = vld [vmem:[%s20916_s1 + $0x6f0] sm:$0xff]   ;;  %v16149_v16 = vld [vmem:[%s20916_s1 + $0x6f8] sm:$0xff]  }
  0xa5   :  { %14562 = vmatprep.subr.bf16.mxu0 %v16091_v17  ;;  %14583 = vmatpush3.bf16.msra.mxu1 %v16090_v14  ;;  %v16147_v14 = vld [vmem:[%s20916_s1 + $0x6b0] sm:$0xff]   ;;  %v16150_v17 = vld [vmem:[%s20916_s1 + $0x638] sm:$0xff]  }
  0xa6   :  { %10732 = vmatprep.mubr.bf16.mxu0 %v2504_v20  ;;  %14584 = vmatprep.subr.bf16.mxu1 %v16092_v19  ;;  %v2516_v19 = vrot.slane %v18_v18, %v17206_v35  ;;  %v16152_v20 = vld [vmem:[%s20916_s1 + $0x740] sm:$0xff]  }
  0xa7   :  { %10772 = vmatprep.mubr.bf16.mxu1 %v2508_v23 }
  0xa8   :  { %14563 = vmatpush3.bf16.msra.mxu0 %v16093_v21  ;;  %v2509_v21 = vcombine.high %v18_v18, %v18_v18  ;;  %v2524_v23 = vcombine.high %v2516_v19, %v2516_v19 }
  0xa9   :  { %14564 = vmatprep.subr.bf16.mxu0 %v16095_v24  ;;  %14585 = vmatpush3.bf16.msra.mxu1 %v16094_v22  ;;  %v16151_v22 = vld [vmem:[%s20916_s1 + $0x6b8] sm:$0xff]   ;;  %v2532_v24 = vrot.slane %v2516_v19, %v17206_v35  ;;  %v16189_v19 = vld [vmem:[%s20916_s1 + $0x848] sm:$0xff]  }
  0xaa   :  { %14586 = vmatprep.subr.bf16.mxu1 %v16096_v25  ;;  %v16153_v25 = vld [vmem:[%s20916_s1 + $0x7c0] sm:$0xff]  }
  0xac   :  { %14565 = vmatpush3.bf16.msra.mxu0 %v16097_v26  ;;  %v17844_v26 = vrot.slane %v2509_v21, %v17206_v35  ;;  %v16191_v21 = vld [vmem:[%s20916_s1 + $0x808] sm:$0xff]  }
  0xad   :  { %14566 = vmatprep.subr.bf16.mxu0 %v16099_v28  ;;  %14587 = vmatpush3.bf16.msra.mxu1 %v16098_v27  ;;  %v2546_v27 = vrot.slane %v2524_v23, %v17206_v35  ;;  %v16154_v28 = vld [vmem:[%s20916_s1 + $0x700] sm:$0xff]   ;;  %v16193_v23 = vld [vmem:[%s20916_s1 + $0x850] sm:$0xff]  }
  0xae   :  { %14588 = vmatprep.subr.bf16.mxu1 %v16100_v29  ;;  %v2525_v29 = vcombine.high %v17844_v26, %v17844_v26 }
  0xb0   :  { %14567 = vmatpush3.bf16.msra.mxu0 %v16101_v30  ;;  %v2554_v30 = vcombine.high %v2532_v24, %v2532_v24 }
  0xb1   :  { %14568 = vmatprep.subr.bf16.mxu0 %v16103_v32  ;;  %14589 = vmatpush3.bf16.msra.mxu1 %v16102_v31  ;;  %v16156_v31 = vld [vmem:[%s20916_s1 + $0x748] sm:$0xff]   ;;  %v2556_v32 = vcombine.high %v2546_v27, %v2546_v27 }
  0xb2   :  { %14590 = vmatprep.subr.bf16.mxu1 %v16104_v33  ;;  %v16155_v33 = vld [vmem:[%s20916_s1 + $0x780] sm:$0xff]  }
  0xb4   :  { %14569 = vmatpush3.bf16.msra.mxu0 %v16105_v34  ;;  %v2553_v34 = vrot.slane %v2525_v29, %v17206_v35  ;;  %v16199_v29 = vld [vmem:[%s20916_s1 + $0x818] sm:$0xff]  }
  0xb5   :  { %14570 = vmatprep.subr.bf16.mxu0 %v16107_v37  ;;  %14591 = vmatpush3.bf16.msra.mxu1 %v16106_v36  ;;  %v16157_v36 = vld [vmem:[%s20916_s1 + $0x7c8] sm:$0xff]  }
  0xb6   :  { %14592 = vmatprep.subr.bf16.mxu1 %v16108_v38  ;;  %v16158_v37 = vld [vmem:[%s20916_s1 + $0x708] sm:$0xff]   ;;  %v2557_v38 = vcombine.high %v2553_v34, %v2553_v34 }
  0xb8   :  { %14571 = vmatpush3.bf16.msra.mxu0 %v16109_v39  ;;  %v16160_v39 = vld [vmem:[%s20916_s1 + $0x750] sm:$0xff]  }
  0xb9   :  { %14572 = vmatprep.subr.bf16.mxu0 %v16111_v41  ;;  %14593 = vmatpush3.bf16.msra.mxu1 %v16110_v40  ;;  %v16159_v40 = vld [vmem:[%s20916_s1 + $0x788] sm:$0xff]   ;;  %v16161_v41 = vld [vmem:[%s20916_s1 + $0x7d0] sm:$0xff]  }
  0xba   :  { %14594 = vmatprep.subr.bf16.mxu1 %v16112_v42  ;;  %v16162_v42 = vld [vmem:[%s20916_s1 + $0x710] sm:$0xff]  }
  0xbc   :  { %14573 = vmatpush3.bf16.msra.mxu0 %v16113_v43  ;;  %v16164_v43 = vld [vmem:[%s20916_s1 + $0x758] sm:$0xff]  }
  0xbd   :  { %14574 = vmatprep.subr.bf16.mxu0 %v16115_v45  ;;  %14595 = vmatpush3.bf16.msra.mxu1 %v16114_v44  ;;  %v16163_v44 = vld [vmem:[%s20916_s1 + $0x790] sm:$0xff]   ;;  %v16165_v45 = vld [vmem:[%s20916_s1 + $0x7d8] sm:$0xff]  }
  0xbe   :  { %14596 = vmatprep.subr.bf16.mxu1 %v16116_v46  ;;  %v16166_v46 = vld [vmem:[%s20916_s1 + $0x718] sm:$0xff]  }
  0xc0   :  { %14575 = vmatpush3.bf16.msra.mxu0 %v16117_v47  ;;  %v16168_v47 = vld [vmem:[%s20916_s1 + $0x760] sm:$0xff]  }
  0xc1   :  { %14604 = vmatprep.subr.bf16.mxu0 %v16120_v50  ;;  %14597 = vmatpush3.bf16.msra.mxu1 %v16118_v48  ;;  %v16167_v48 = vld [vmem:[%s20916_s1 + $0x798] sm:$0xff]   ;;  %v16170_v50 = vld [vmem:[%s20916_s1 + $0x720] sm:$0xff]  }
  0xc2   :  { %14626 = vmatprep.subr.bf16.mxu1 %v16121_v51  ;;  %v16172_v51 = vld [vmem:[%s20916_s1 + $0x768] sm:$0xff]  }
  0xc3   :  { %10733 = vmatmul.mubr.bf16.vlgmr.msra.gmra.mrb[20].mxu0 %v2490_v49  ;;  %v16169_v49 = vld [vmem:[%s20916_s1 + $0x7e0] sm:$0xff]  }
  0xc4   :  { %14605 = vmatpush3.bf16.msra.mxu0 %v16122_v52  ;;  %10773 = vmatmul.mubr.bf16.vlgmr.msra.gmra.mrb[20].mxu1 %v2506_v54  ;;  %v16171_v52 = vld [vmem:[%s20916_s1 + $0x7a0] sm:$0xff]  }
  0xc5   :  { %14606 = vmatprep.subr.bf16.mxu0 %v16124_v55  ;;  %14627 = vmatpush3.bf16.msra.mxu1 %v16123_v53  ;;  %v16173_v53 = vld [vmem:[%s20916_s1 + $0x7e8] sm:$0xff]   ;;  %v13187_v54 = vld [vmem:[%s20918_s2] ss:$0 sm:$0xff] }
  0xc6   :  { %14628 = vmatprep.subr.bf16.mxu1 %v16125_v56  ;;  %10812 = vmatprep.mubr.bf16.mxu0 %v2546_v27  ;;  %v16174_v55 = vld [vmem:[%s20916_s1 + $0x728] sm:$0xff]   ;;  %v16197_v27 = vld [vmem:[%s20916_s1 + $0x858] sm:$0xff]  }
  0xc7   :  { %10852 = vmatprep.mubr.bf16.mxu1 %v2556_v32  ;;  %v16202_v32 = vld [vmem:[%s20916_s1 + $0x8e0] sm:$0xff]  }
  0xc8   :  { %14607 = vmatpush3.bf16.msra.mxu0 %v16126_v57  ;;  %v16176_v57 = vld [vmem:[%s20916_s1 + $0x770] sm:$0xff]  }
  0xc9   :  { %14608 = vmatprep.subr.bf16.mxu0 %v16128_v59  ;;  %14629 = vmatpush3.bf16.msra.mxu1 %v16127_v58  ;;  %v16175_v59 = vld [vmem:[%s20916_s1 + $0x7a8] sm:$0xff]  }
  0xca   :  { %14630 = vmatprep.subr.bf16.mxu1 %v16129_v60 }
  0xcc   :  { %14609 = vmatpush3.bf16.msra.mxu0 %v16130_v61 }
  0xcd   :  { %14610 = vmatprep.subr.bf16.mxu0 %v16132_v63  ;;  %14631 = vmatpush3.bf16.msra.mxu1 %v16131_v62  ;;  %v16177_v63 = vld [vmem:[%s20916_s1 + $0x7f0] sm:$0xff]  }
  0xce   :  { %14632 = vmatprep.subr.bf16.mxu1 %v16133_v0  ;;  %v16178_v0 = vld [vmem:[%s20916_s1 + $0x730] sm:$0xff]  }
  0xd0   :  { %14611 = vmatpush3.bf16.msra.mxu0 %v16134_v1 }
  0xd1   :  { %14612 = vmatprep.subr.bf16.mxu0 %v16136_v3  ;;  %14633 = vmatpush3.bf16.msra.mxu1 %v16135_v2  ;;  %v16179_v3 = vld [vmem:[%s20916_s1 + $0x7b0] sm:$0xff]  }
  0xd2   :  { %14634 = vmatprep.subr.bf16.mxu1 %v16137_v4 }
  0xd4   :  { %14613 = vmatpush3.bf16.msra.mxu0 %v16138_v5 }
  0xd5   :  { %14614 = vmatprep.subr.bf16.mxu0 %v16140_v7  ;;  %14635 = vmatpush3.bf16.msra.mxu1 %v16139_v6  ;;  %v16180_v7 = vld [vmem:[%s20916_s1 + $0x778] sm:$0xff]  }
  0xd6   :  { %14636 = vmatprep.subr.bf16.mxu1 %v16141_v8 }
  0xd8   :  { %14615 = vmatpush3.bf16.msra.mxu0 %v16142_v9  ;;  %v16181_v9 = vld [vmem:[%s20916_s1 + $0x7f8] sm:$0xff]  }
  0xd9   :  { %14616 = vmatprep.subr.bf16.mxu0 %v16144_v11  ;;  %14637 = vmatpush3.bf16.msra.mxu1 %v16143_v10  ;;  %v16182_v11 = vld [vmem:[%s20916_s1 + $0x738] sm:$0xff]  }
  0xda   :  { %14638 = vmatprep.subr.bf16.mxu1 %v16145_v12  ;;  %v16183_v12 = vld [vmem:[%s20916_s1 + $0x7b8] sm:$0xff]  }
  0xdc   :  { %14617 = vmatpush3.bf16.msra.mxu0 %v16146_v13  ;;  %v2539_v13 = vrot.slane %v17844_v26, %v17206_v35  ;;  %v16196_v26 = vld [vmem:[%s20916_s1 + $0x890] sm:$0xff]  }
  0xdd   :  { %14618 = vmatprep.subr.bf16.mxu0 %v16148_v15  ;;  %14639 = vmatpush3.bf16.msra.mxu1 %v16147_v14  ;;  %v16185_v14 = vld [vmem:[%s20916_s1 + $0x840] sm:$0xff]  }
  0xde   :  { %14640 = vmatprep.subr.bf16.mxu1 %v16149_v16  ;;  %v16186_v15 = vld [vmem:[%s20916_s1 + $0x8c0] sm:$0xff]   ;;  %v2555_v18 = vcombine.high %v2539_v13, %v2539_v13 }
  0xdf   :  { %v16187_v16 = vld [vmem:[%s20916_s1 + $0x800] sm:$0xff]  }
  0xe0   :  { %14619 = vmatpush3.bf16.msra.mxu0 %v16150_v17  ;;  %v16188_v17 = vld [vmem:[%s20916_s1 + $0x880] sm:$0xff]  }
  0xe1   :  { %14648 = vmatprep.subr.bf16.mxu0 %v16152_v20  ;;  %14641 = vmatpush3.bf16.msra.mxu1 %v16151_v22  ;;  %v16190_v20 = vld [vmem:[%s20916_s1 + $0x8c8] sm:$0xff]  }
  0xe2   :  { %14670 = vmatprep.subr.bf16.mxu1 %v16153_v25  ;;  %v16192_v22 = vld [vmem:[%s20916_s1 + $0x888] sm:$0xff]   ;;  %v16195_v25 = vld [vmem:[%s20916_s1 + $0x810] sm:$0xff]  }
  0xe3   :  { %10813 = vmatmul.mubr.bf16.vlgmr.msra.gmra.mrb[24].mxu0 %v2532_v24  ;;  %v16194_v24 = vld [vmem:[%s20916_s1 + $0x8d0] sm:$0xff]  }
  0xe4   :  { %14649 = vmatpush3.bf16.msra.mxu0 %v16154_v28  ;;  %10853 = vmatmul.mubr.bf16.vlgmr.msra.gmra.mrb[24].mxu1 %v2554_v30  ;;  %v16198_v28 = vld [vmem:[%s20916_s1 + $0x8d8] sm:$0xff]  }
  0xe5   :  { %14650 = vmatprep.subr.bf16.mxu0 %v16156_v31  ;;  %14671 = vmatpush3.bf16.msra.mxu1 %v16155_v33  ;;  %v16200_v30 = vld [vmem:[%s20916_s1 + $0x898] sm:$0xff]   ;;  %v16201_v31 = vld [vmem:[%s20916_s1 + $0x860] sm:$0xff]  }
  0xe6   :  { %10892 = vmatprep.mubr.bf16.mxu0 %v2553_v34  ;;  %14672 = vmatprep.subr.bf16.mxu1 %v16157_v36  ;;  %v16203_v33 = vld [vmem:[%s20916_s1 + $0x820] sm:$0xff]   ;;  %v16205_v36 = vld [vmem:[%s20916_s1 + $0x868] sm:$0xff]  }
  0xe7   :  { %10932 = vmatprep.mubr.bf16.mxu1 %v2557_v38  ;;  %v16204_v34 = vld [vmem:[%s20916_s1 + $0x8a0] sm:$0xff]   ;;  %v16207_v38 = vld [vmem:[%s20916_s1 + $0x828] sm:$0xff]  }
  0xe8   :  { %14651 = vmatpush3.bf16.msra.mxu0 %v16158_v37  ;;  %v16206_v37 = vld [vmem:[%s20916_s1 + $0x8e8] sm:$0xff]  }
  0xe9   :  { %14652 = vmatprep.subr.bf16.mxu0 %v16160_v39  ;;  %14673 = vmatpush3.bf16.msra.mxu1 %v16159_v40  ;;  %v16208_v39 = vld [vmem:[%s20916_s1 + $0x8a8] sm:$0xff]  }
  0xea   :  { %14674 = vmatprep.subr.bf16.mxu1 %v16161_v41  ;;  %v16209_v41 = vld [vmem:[%s20916_s1 + $0x870] sm:$0xff]  }
  0xec   :  { %14653 = vmatpush3.bf16.msra.mxu0 %v16162_v42 }
  0xed   :  { %14654 = vmatprep.subr.bf16.mxu0 %v16164_v43  ;;  %14675 = vmatpush3.bf16.msra.mxu1 %v16163_v44  ;;  %v16210_v43 = vld [vmem:[%s20916_s1 + $0x8f0] sm:$0xff]  }
  0xee   :  { %14676 = vmatprep.subr.bf16.mxu1 %v16165_v45 }
  0xf0   :  { %14655 = vmatpush3.bf16.msra.mxu0 %v16166_v46 }
  0xf1   :  { %14656 = vmatprep.subr.bf16.mxu0 %v16168_v47  ;;  %14677 = vmatpush3.bf16.msra.mxu1 %v16167_v48 }
  0xf2   :  { %14678 = vmatprep.subr.bf16.mxu1 %v16169_v49  ;;  %v16211_v49 = vld [vmem:[%s20916_s1 + $0x830] sm:$0xff]  }
  0xf4   :  { %14657 = vmatpush3.bf16.msra.mxu0 %v16170_v50  ;;  %v16212_v50 = vld [vmem:[%s20916_s1 + $0x8b0] sm:$0xff]  }
  0xf5   :  { %14658 = vmatprep.subr.bf16.mxu0 %v16172_v51  ;;  %14679 = vmatpush3.bf16.msra.mxu1 %v16171_v52 }
  0xf6   :  { %v14356_v56 = vpop.f32.mrb[0].mxu0  ;;  %14680 = vmatprep.subr.bf16.mxu1 %v16173_v53 }
  0xf7   :  { %v14357_v58 = vpop.f32.mrb[1].mxu0  ;;  %v14378_v60 = vpop.f32.mrb[0].mxu1 }
  0xf8   :  { %v14358_v61 = vadd.f32 %v14357_v58, %v14356_v56  ;;  %v14359_v62 = vpop.f32.mrb[2].mxu0  ;;  %v14379_v1 = vpop.f32.mrb[1].mxu1  ;;  %14659 = vmatpush3.bf16.msra.mxu0 %v16174_v55  ;;  %v16214_v56 = vld [vmem:[%s20916_s1 + $0x8f8] sm:$0xff]  }
  0xf9   :  { %v14360_v2 = vpop.f32.mrb[3].mxu0  ;;  %v14380_v5 = vadd.f32 %v14379_v1, %v14378_v60  ;;  %v14381_v6 = vpop.f32.mrb[2].mxu1  ;;  %14660 = vmatprep.subr.bf16.mxu0 %v16176_v57  ;;  %14681 = vmatpush3.bf16.msra.mxu1 %v16175_v59  ;;  %v16215_v58 = vld [vmem:[%s20916_s1 + $0x838] sm:$0xff]   ;;  %v19_v59 = vld [vmem:[%s20917_s0 + $0x20] sm:$0xff] }
  0xfa   :  { %v10335_v4 = vadd.f32 %v14358_v61, %v13187_v54  ;;  %v14382_v8 = vpop.f32.mrb[3].mxu1  ;;  %14682 = vmatprep.subr.bf16.mxu1 %v16177_v63  ;;  %v16213_v54 = vld [vmem:[%s20916_s1 + $0x878] sm:$0xff]   ;;  %v2565_v60 = vrot.slane %v19_v59, %v17206_v35  ;;  %v16217_v61 = vld [vmem:[%s20916_s1 + $0x940] sm:$0xff]   ;;  %v2558_v62 = vcombine.high %v19_v59, %v19_v59  ;;  %v16254_v59 = vld [vmem:[%s20916_s1 + $0xa48] sm:$0xff]  }
  0xfb   :  { %v16216_v63 = vld [vmem:[%s20916_s1 + $0x8b8] sm:$0xff]   ;;  %v16218_v2 = vld [vmem:[%s20916_s1 + $0x9c0] sm:$0xff]  }
  0xfc   :  { %v17937_v10 = vadd.f32 %v14380_v5, %v10335_v4  ;;  %14661 = vmatpush3.bf16.msra.mxu0 %v16178_v0  ;;  %v2573_v0 = vcombine.high %v2565_v60, %v2565_v60  ;;  %v2581_v1 = vrot.slane %v2565_v60, %v17206_v35  ;;  %v16219_v4 = vld [vmem:[%s20916_s1 + $0x900] sm:$0xff]   ;;  %v16255_v60 = vld [vmem:[%s20916_s1 + $0xac8] sm:$0xff]  }
  0xfd   :  { %14662 = vmatprep.subr.bf16.mxu0 %v16180_v7  ;;  %14683 = vmatpush3.bf16.msra.mxu1 %v16179_v3  ;;  %v18058_v3 = vrot.slane %v2558_v62, %v17206_v35  ;;  %v16220_v6 = vld [vmem:[%s20916_s1 + $0x980] sm:$0xff]   ;;  %v16257_v62 = vld [vmem:[%s20916_s1 + $0xa88] sm:$0xff]  }
  0xfe   :  { %14684 = vmatprep.subr.bf16.mxu1 %v16181_v9  ;;  %v2595_v5 = vrot.slane %v2573_v0, %v17206_v35  ;;  %v2603_v8 = vcombine.high %v2581_v1, %v2581_v1  ;;  %v16221_v9 = vld [vmem:[%s20916_s1 + $0x948] sm:$0xff]   ;;  %v16259_v0 = vld [vmem:[%s20916_s1 + $0xad0] sm:$0xff]  }
  0xff   :  { %v2574_v7 = vcombine.high %v18058_v3, %v18058_v3 }
 0x100   :  { %14663 = vmatpush3.bf16.msra.mxu0 %v16182_v11  ;;  %v16222_v11 = vld [vmem:[%s20916_s1 + $0x9c8] sm:$0xff]  }
 0x101   :  { %14692 = vmatprep.subr.bf16.mxu0 %v16185_v14  ;;  %14685 = vmatpush3.bf16.msra.mxu1 %v16183_v12  ;;  %v2602_v12 = vrot.slane %v2574_v7, %v17206_v35  ;;  %v16224_v14 = vld [vmem:[%s20916_s1 + $0x988] sm:$0xff]   ;;  %v16266_v7 = vld [vmem:[%s20916_s1 + $0xa60] sm:$0xff]  }
 0x102   :  { %14714 = vmatprep.subr.bf16.mxu1 %v16186_v15 }
 0x103   :  { %10893 = vmatmul.mubr.bf16.vlgmr.msra.gmra.mrb[28].mxu0 %v2539_v13  ;;  %v16223_v13 = vld [vmem:[%s20916_s1 + $0x908] sm:$0xff]   ;;  %v2606_v15 = vcombine.high %v2602_v12, %v2602_v12 }
 0x104   :  { %14693 = vmatpush3.bf16.msra.mxu0 %v16187_v16  ;;  %10933 = vmatmul.mubr.bf16.vlgmr.msra.gmra.mrb[28].mxu1 %v2555_v18  ;;  %v16225_v16 = vld [vmem:[%s20916_s1 + $0x950] sm:$0xff]  }
 0x105   :  { %14694 = vmatprep.subr.bf16.mxu0 %v16189_v19  ;;  %14715 = vmatpush3.bf16.msra.mxu1 %v16188_v17  ;;  %v16226_v17 = vld [vmem:[%s20916_s1 + $0x9d0] sm:$0xff]  }
 0x106   :  { %14716 = vmatprep.subr.bf16.mxu1 %v16190_v20  ;;  %10972 = vmatprep.mubr.bf16.mxu0 %v2595_v5  ;;  %v16227_v18 = vld [vmem:[%s20916_s1 + $0x910] sm:$0xff]   ;;  %v16229_v20 = vld [vmem:[%s20916_s1 + $0x958] sm:$0xff]  }
 0x107   :  { %v16228_v19 = vld [vmem:[%s20916_s1 + $0x990] sm:$0xff]  }
 0x108   :  { %14695 = vmatpush3.bf16.msra.mxu0 %v16191_v21  ;;  %v16230_v21 = vld [vmem:[%s20916_s1 + $0x9d8] sm:$0xff]  }
 0x109   :  { %14696 = vmatprep.subr.bf16.mxu0 %v16193_v23  ;;  %14717 = vmatpush3.bf16.msra.mxu1 %v16192_v22  ;;  %v16231_v22 = vld [vmem:[%s20916_s1 + $0x918] sm:$0xff]  }
 0x10a   :  { %14718 = vmatprep.subr.bf16.mxu1 %v16194_v24  ;;  %v16232_v23 = vld [vmem:[%s20916_s1 + $0x998] sm:$0xff]   ;;  %v16233_v24 = vld [vmem:[%s20916_s1 + $0x960] sm:$0xff]  }
 0x10c   :  { %14697 = vmatpush3.bf16.msra.mxu0 %v16195_v25  ;;  %v16234_v25 = vld [vmem:[%s20916_s1 + $0x9e0] sm:$0xff]  }
 0x10d   :  { %14698 = vmatprep.subr.bf16.mxu0 %v16197_v27  ;;  %14719 = vmatpush3.bf16.msra.mxu1 %v16196_v26  ;;  %v16235_v26 = vld [vmem:[%s20916_s1 + $0x920] sm:$0xff]  }
 0x10e   :  { %14720 = vmatprep.subr.bf16.mxu1 %v16198_v28  ;;  %v16236_v27 = vld [vmem:[%s20916_s1 + $0x9a0] sm:$0xff]   ;;  %v16237_v28 = vld [vmem:[%s20916_s1 + $0x968] sm:$0xff]  }
 0x110   :  { %14699 = vmatpush3.bf16.msra.mxu0 %v16199_v29  ;;  %v16238_v29 = vld [vmem:[%s20916_s1 + $0x9e8] sm:$0xff]  }
 0x111   :  { %14700 = vmatprep.subr.bf16.mxu0 %v16201_v31  ;;  %14721 = vmatpush3.bf16.msra.mxu1 %v16200_v30  ;;  %v16239_v30 = vld [vmem:[%s20916_s1 + $0x928] sm:$0xff]  }
 0x112   :  { %14722 = vmatprep.subr.bf16.mxu1 %v16202_v32  ;;  %v16240_v32 = vld [vmem:[%s20916_s1 + $0x9a8] sm:$0xff]  }
 0x114   :  { %14701 = vmatpush3.bf16.msra.mxu0 %v16203_v33 }
 0x115   :  { %14702 = vmatprep.subr.bf16.mxu0 %v16205_v36  ;;  %14723 = vmatpush3.bf16.msra.mxu1 %v16204_v34  ;;  %v16241_v34 = vld [vmem:[%s20916_s1 + $0x970] sm:$0xff]  }
 0x116   :  { %v14400_v40 = vpop.f32.mrb[4].mxu0  ;;  %14724 = vmatprep.subr.bf16.mxu1 %v16206_v37 }
 0x117   :  { %v14401_v42 = vpop.f32.mrb[5].mxu0  ;;  %v14422_v44 = vpop.f32.mrb[4].mxu1 }
 0x118   :  { %v14402_v45 = vadd.f32 %v14401_v42, %v14400_v40  ;;  %v14403_v46 = vpop.f32.mrb[6].mxu0  ;;  %v14423_v47 = vpop.f32.mrb[5].mxu1  ;;  %14703 = vmatpush3.bf16.msra.mxu0 %v16207_v38  ;;  %v16243_v40 = vld [vmem:[%s20916_s1 + $0x930] sm:$0xff]  }
 0x119   :  { %v14404_v48 = vpop.f32.mrb[7].mxu0  ;;  %v14424_v52 = vadd.f32 %v14423_v47, %v14422_v44  ;;  %v14425_v53 = vpop.f32.mrb[6].mxu1  ;;  %14704 = vmatprep.subr.bf16.mxu0 %v16209_v41  ;;  %14725 = vmatpush3.bf16.msra.mxu1 %v16208_v39  ;;  %v16242_v39 = vld [vmem:[%s20916_s1 + $0x9f0] sm:$0xff]  }
 0x11a   :  { %v10415_v51 = vadd.f32 %v14402_v45, %v17937_v10  ;;  %v14426_v55 = vpop.f32.mrb[7].mxu1  ;;  %14726 = vmatprep.subr.bf16.mxu1 %v16210_v43  ;;  %v2605_v10 = vcombine.high %v2595_v5, %v2595_v5  ;;  %v16244_v46 = vld [vmem:[%s20916_s1 + $0x9b0] sm:$0xff]   ;;  %v16245_v48 = vld [vmem:[%s20916_s1 + $0x978] sm:$0xff]   ;;  %v2588_v53 = vrot.slane %v18058_v3, %v17206_v35 }
 0x11b   :  { %v16251_v55 = vld [vmem:[%s20916_s1 + $0xac0] sm:$0xff]   ;;  %v16262_v3 = vld [vmem:[%s20916_s1 + $0xa58] sm:$0xff]  }
 0x11c   :  { %v18038_v57 = vadd.f32 %v14424_v52, %v10415_v51  ;;  %14705 = vmatpush3.bf16.msra.mxu0 %v16211_v49  ;;  %11012 = vmatprep.mubr.bf16.mxu1 %v2605_v10  ;;  %v16247_v51 = vld [vmem:[%s20916_s1 + $0x938] sm:$0xff]   ;;  %v16269_v10 = vld [vmem:[%s20916_s1 + $0xaa0] sm:$0xff]  }
 0x11d   :  { %14706 = vmatprep.subr.bf16.mxu0 %v16213_v54  ;;  %14727 = vmatpush3.bf16.msra.mxu1 %v16212_v50  ;;  %v16246_v50 = vld [vmem:[%s20916_s1 + $0x9f8] sm:$0xff]   ;;  %v16250_v54 = vld [vmem:[%s20916_s1 + $0xa40] sm:$0xff]  }
 0x11e   :  { %14728 = vmatprep.subr.bf16.mxu1 %v16214_v56  ;;  %v16248_v52 = vld [vmem:[%s20916_s1 + $0x9b8] sm:$0xff]   ;;  %v16252_v56 = vld [vmem:[%s20916_s1 + $0xa00] sm:$0xff]  }
 0x11f   :  { %v16264_v5 = vld [vmem:[%s20916_s1 + $0xa18] sm:$0xff]  }
 0x120   :  { %14707 = vmatpush3.bf16.msra.mxu0 %v16215_v58  ;;  %v2604_v58 = vcombine.high %v2588_v53, %v2588_v53 }
 0x121   :  { %14736 = vmatprep.subr.bf16.mxu0 %v16217_v61  ;;  %14729 = vmatpush3.bf16.msra.mxu1 %v16216_v63  ;;  %v16256_v61 = vld [vmem:[%s20916_s1 + $0xa08] sm:$0xff]   ;;  %v16258_v63 = vld [vmem:[%s20916_s1 + $0xa50] sm:$0xff]  }
 0x122   :  { %14758 = vmatprep.subr.bf16.mxu1 %v16218_v2  ;;  %v16261_v2 = vld [vmem:[%s20916_s1 + $0xa90] sm:$0xff]  }
 0x123   :  { %10973 = vmatmul.mubr.bf16.vlgmr.msra.gmra.mrb[32].mxu0 %v2581_v1  ;;  %v16260_v1 = vld [vmem:[%s20916_s1 + $0xa10] sm:$0xff]  }
 0x124   :  { %14737 = vmatpush3.bf16.msra.mxu0 %v16219_v4  ;;  %11013 = vmatmul.mubr.bf16.vlgmr.msra.gmra.mrb[32].mxu1 %v2603_v8  ;;  %v16263_v4 = vld [vmem:[%s20916_s1 + $0xad8] sm:$0xff]   ;;  %v16267_v8 = vld [vmem:[%s20916_s1 + $0xae0] sm:$0xff]  }
 0x125   :  { %14738 = vmatprep.subr.bf16.mxu0 %v16221_v9  ;;  %14759 = vmatpush3.bf16.msra.mxu1 %v16220_v6  ;;  %v16265_v6 = vld [vmem:[%s20916_s1 + $0xa98] sm:$0xff]   ;;  %v16268_v9 = vld [vmem:[%s20916_s1 + $0xa20] sm:$0xff]  }
 0x126   :  { %11052 = vmatprep.mubr.bf16.mxu0 %v2602_v12  ;;  %14760 = vmatprep.subr.bf16.mxu1 %v16222_v11  ;;  %v16270_v11 = vld [vmem:[%s20916_s1 + $0xa68] sm:$0xff]  }
 0x127   :  { %11092 = vmatprep.mubr.bf16.mxu1 %v2606_v15  ;;  %v16271_v12 = vld [vmem:[%s20916_s1 + $0xae8] sm:$0xff]  }
 0x128   :  { %14739 = vmatpush3.bf16.msra.mxu0 %v16223_v13  ;;  %v16272_v13 = vld [vmem:[%s20916_s1 + $0xa28] sm:$0xff]  }
 0x129   :  { %14740 = vmatprep.subr.bf16.mxu0 %v16225_v16  ;;  %14761 = vmatpush3.bf16.msra.mxu1 %v16224_v14  ;;  %v16273_v15 = vld [vmem:[%s20916_s1 + $0xaa8] sm:$0xff]  }
 0x12a   :  { %14762 = vmatprep.subr.bf16.mxu1 %v16226_v17  ;;  %v16274_v17 = vld [vmem:[%s20916_s1 + $0xa70] sm:$0xff]  }
 0x12c   :  { %14741 = vmatpush3.bf16.msra.mxu0 %v16227_v18 }
 0x12d   :  { %14742 = vmatprep.subr.bf16.mxu0 %v16229_v20  ;;  %14763 = vmatpush3.bf16.msra.mxu1 %v16228_v19 }
 0x12e   :  { %14764 = vmatprep.subr.bf16.mxu1 %v16230_v21 }
 0x130   :  { %14743 = vmatpush3.bf16.msra.mxu0 %v16231_v22 }
 0x131   :  { %14744 = vmatprep.subr.bf16.mxu0 %v16233_v24  ;;  %14765 = vmatpush3.bf16.msra.mxu1 %v16232_v23  ;;  %v16275_v23 = vld [vmem:[%s20916_s1 + $0xaf0] sm:$0xff]  }
 0x132   :  { %14766 = vmatprep.subr.bf16.mxu1 %v16234_v25  ;;  %v16276_v24 = vld [vmem:[%s20916_s1 + $0xa30] sm:$0xff]  }
 0x134   :  { %14745 = vmatpush3.bf16.msra.mxu0 %v16235_v26 }
 0x135   :  { %14746 = vmatprep.subr.bf16.mxu0 %v16237_v28  ;;  %14767 = vmatpush3.bf16.msra.mxu1 %v16236_v27  ;;  %v16277_v28 = vld [vmem:[%s20916_s1 + $0xab0] sm:$0xff]  }
 0x136   :  { %v14444_v31 = vpop.f32.mrb[8].mxu0  ;;  %14768 = vmatprep.subr.bf16.mxu1 %v16238_v29 }
 0x137   :  { %v14445_v33 = vpop.f32.mrb[9].mxu0  ;;  %v14466_v36 = vpop.f32.mrb[8].mxu1 }
 0x138   :  { %v14446_v37 = vadd.f32 %v14445_v33, %v14444_v31  ;;  %v14447_v38 = vpop.f32.mrb[10].mxu0  ;;  %v14467_v41 = vpop.f32.mrb[9].mxu1  ;;  %14747 = vmatpush3.bf16.msra.mxu0 %v16239_v30  ;;  %v16278_v30 = vld [vmem:[%s20916_s1 + $0xa78] sm:$0xff]  }
 0x139   :  { %v14448_v42 = vpop.f32.mrb[11].mxu0  ;;  %v14468_v44 = vadd.f32 %v14467_v41, %v14466_v36  ;;  %v14469_v45 = vpop.f32.mrb[10].mxu1  ;;  %14748 = vmatprep.subr.bf16.mxu0 %v16241_v34  ;;  %14769 = vmatpush3.bf16.msra.mxu1 %v16240_v32  ;;  %v16279_v32 = vld [vmem:[%s20916_s1 + $0xaf8] sm:$0xff]   ;;  %v20_v34 = vld [vmem:[%s20917_s0 + $0x28] sm:$0xff] }
 0x13a   :  { %v10495_v43 = vadd.f32 %v14446_v37, %v18038_v57  ;;  %v14470_v47 = vpop.f32.mrb[11].mxu1  ;;  %14770 = vmatprep.subr.bf16.mxu1 %v16242_v39  ;;  %v16253_v57 = vld [vmem:[%s20916_s1 + $0xa80] sm:$0xff]   ;;  %v16280_v33 = vld [vmem:[%s20916_s1 + $0xa38] sm:$0xff]   ;;  %v2614_v36 = vrot.slane %v20_v34, %v17206_v35  ;;  %v2607_v38 = vcombine.high %v20_v34, %v20_v34  ;;  %v16319_v34 = vld [vmem:[%s20916_s1 + $0xc48] sm:$0xff]  }
 0x13b   :  { %v16282_v37 = vld [vmem:[%s20916_s1 + $0xb40] sm:$0xff]   ;;  %v16281_v39 = vld [vmem:[%s20916_s1 + $0xab8] sm:$0xff]  }
 0x13c   :  { %v18146_v49 = vadd.f32 %v14468_v44, %v10495_v43  ;;  %14749 = vmatpush3.bf16.msra.mxu0 %v16243_v40  ;;  %v2622_v40 = vcombine.high %v2614_v36, %v2614_v36  ;;  %v2630_v41 = vrot.slane %v2614_v36, %v17206_v35  ;;  %v16283_v42 = vld [vmem:[%s20916_s1 + $0xbc0] sm:$0xff]   ;;  %v18270_v43 = vrot.slane %v2607_v38, %v17206_v35  ;;  %v16320_v36 = vld [vmem:[%s20916_s1 + $0xcc8] sm:$0xff]  }
 0x13d   :  { %14750 = vmatprep.subr.bf16.mxu0 %v16245_v48  ;;  %14771 = vmatpush3.bf16.msra.mxu1 %v16244_v46  ;;  %v16284_v44 = vld [vmem:[%s20916_s1 + $0xb00] sm:$0xff]   ;;  %v16322_v38 = vld [vmem:[%s20916_s1 + $0xc88] sm:$0xff]  }
 0x13e   :  { %14772 = vmatprep.subr.bf16.mxu1 %v16246_v50  ;;  %v2644_v45 = vrot.slane %v2622_v40, %v17206_v35  ;;  %v16285_v46 = vld [vmem:[%s20916_s1 + $0xb80] sm:$0xff]   ;;  %v2623_v47 = vcombine.high %v18270_v43, %v18270_v43  ;;  %v2652_v48 = vcombine.high %v2630_v41, %v2630_v41  ;;  %v16324_v40 = vld [vmem:[%s20916_s1 + $0xcd0] sm:$0xff]  }
 0x140   :  { %14751 = vmatpush3.bf16.msra.mxu0 %v16247_v51  ;;  %v2654_v50 = vcombine.high %v2644_v45, %v2644_v45  ;;  %v16287_v51 = vld [vmem:[%s20916_s1 + $0xbc8] sm:$0xff]  }
 0x141   :  { %14780 = vmatprep.subr.bf16.mxu0 %v16250_v54  ;;  %14773 = vmatpush3.bf16.msra.mxu1 %v16248_v52  ;;  %v2651_v52 = vrot.slane %v2623_v47, %v17206_v35  ;;  %v16289_v54 = vld [vmem:[%s20916_s1 + $0xb88] sm:$0xff]   ;;  %v16331_v47 = vld [vmem:[%s20916_s1 + $0xc60] sm:$0xff]  }
 0x142   :  { %14802 = vmatprep.subr.bf16.mxu1 %v16251_v55 }
 0x143   :  { %11053 = vmatmul.mubr.bf16.vlgmr.msra.gmra.mrb[36].mxu0 %v2588_v53  ;;  %v16288_v53 = vld [vmem:[%s20916_s1 + $0xb08] sm:$0xff]   ;;  %v2655_v55 = vcombine.high %v2651_v52, %v2651_v52 }
 0x144   :  { %14781 = vmatpush3.bf16.msra.mxu0 %v16252_v56  ;;  %11093 = vmatmul.mubr.bf16.vlgmr.msra.gmra.mrb[36].mxu1 %v2604_v58  ;;  %v16290_v56 = vld [vmem:[%s20916_s1 + $0xb50] sm:$0xff]  }
 0x145   :  { %14782 = vmatprep.subr.bf16.mxu0 %v16254_v59  ;;  %14803 = vmatpush3.bf16.msra.mxu1 %v16253_v57  ;;  %v16291_v57 = vld [vmem:[%s20916_s1 + $0xbd0] sm:$0xff]  }
 0x146   :  { %14804 = vmatprep.subr.bf16.mxu1 %v16255_v60  ;;  %11132 = vmatprep.mubr.bf16.mxu0 %v2644_v45  ;;  %v16292_v58 = vld [vmem:[%s20916_s1 + $0xb10] sm:$0xff]   ;;  %v16294_v60 = vld [vmem:[%s20916_s1 + $0xb58] sm:$0xff]  }
 0x147   :  { %11172 = vmatprep.mubr.bf16.mxu1 %v2654_v50  ;;  %v16293_v59 = vld [vmem:[%s20916_s1 + $0xb90] sm:$0xff]   ;;  %v16329_v45 = vld [vmem:[%s20916_s1 + $0xc18] sm:$0xff]   ;;  %v16334_v50 = vld [vmem:[%s20916_s1 + $0xca0] sm:$0xff]  }
 0x148   :  { %14783 = vmatpush3.bf16.msra.mxu0 %v16256_v61  ;;  %v16295_v61 = vld [vmem:[%s20916_s1 + $0xbd8] sm:$0xff]  }
 0x149   :  { %14784 = vmatprep.subr.bf16.mxu0 %v16258_v63  ;;  %14805 = vmatpush3.bf16.msra.mxu1 %v16257_v62  ;;  %v16296_v62 = vld [vmem:[%s20916_s1 + $0xb18] sm:$0xff]  }
 0x14a   :  { %14806 = vmatprep.subr.bf16.mxu1 %v16259_v0  ;;  %v16297_v63 = vld [vmem:[%s20916_s1 + $0xb98] sm:$0xff]   ;;  %v16298_v0 = vld [vmem:[%s20916_s1 + $0xb60] sm:$0xff]  }
 0x14c   :  { %14785 = vmatpush3.bf16.msra.mxu0 %v16260_v1  ;;  %v16299_v1 = vld [vmem:[%s20916_s1 + $0xbe0] sm:$0xff]  }
 0x14d   :  { %14786 = vmatprep.subr.bf16.mxu0 %v16262_v3  ;;  %14807 = vmatpush3.bf16.msra.mxu1 %v16261_v2  ;;  %v16300_v2 = vld [vmem:[%s20916_s1 + $0xb20] sm:$0xff]  }
 0x14e   :  { %14808 = vmatprep.subr.bf16.mxu1 %v16263_v4  ;;  %v16301_v3 = vld [vmem:[%s20916_s1 + $0xba0] sm:$0xff]   ;;  %v16302_v4 = vld [vmem:[%s20916_s1 + $0xb68] sm:$0xff]  }
 0x150   :  { %14787 = vmatpush3.bf16.msra.mxu0 %v16264_v5  ;;  %v16303_v5 = vld [vmem:[%s20916_s1 + $0xbe8] sm:$0xff]  }
 0x151   :  { %14788 = vmatprep.subr.bf16.mxu0 %v16266_v7  ;;  %14809 = vmatpush3.bf16.msra.mxu1 %v16265_v6  ;;  %v16304_v7 = vld [vmem:[%s20916_s1 + $0xb28] sm:$0xff]  }
 0x152   :  { %14810 = vmatprep.subr.bf16.mxu1 %v16267_v8 }
 0x154   :  { %14789 = vmatpush3.bf16.msra.mxu0 %v16268_v9  ;;  %v16305_v9 = vld [vmem:[%s20916_s1 + $0xba8] sm:$0xff]  }
 0x155   :  { %14790 = vmatprep.subr.bf16.mxu0 %v16270_v11  ;;  %14811 = vmatpush3.bf16.msra.mxu1 %v16269_v10 }
 0x156   :  { %v14488_v14 = vpop.f32.mrb[12].mxu0  ;;  %14812 = vmatprep.subr.bf16.mxu1 %v16271_v12 }
 0x157   :  { %v14489_v16 = vpop.f32.mrb[13].mxu0  ;;  %v14510_v18 = vpop.f32.mrb[12].mxu1 }
 0x158   :  { %v14490_v19 = vadd.f32 %v14489_v16, %v14488_v14  ;;  %v14491_v20 = vpop.f32.mrb[14].mxu0  ;;  %v14511_v21 = vpop.f32.mrb[13].mxu1  ;;  %14791 = vmatpush3.bf16.msra.mxu0 %v16272_v13  ;;  %v16306_v13 = vld [vmem:[%s20916_s1 + $0xb70] sm:$0xff]  }
 0x159   :  { %v14492_v22 = vpop.f32.mrb[15].mxu0  ;;  %v14512_v26 = vadd.f32 %v14511_v21, %v14510_v18  ;;  %v14513_v27 = vpop.f32.mrb[14].mxu1  ;;  %14792 = vmatprep.subr.bf16.mxu0 %v16274_v17  ;;  %14813 = vmatpush3.bf16.msra.mxu1 %v16273_v15  ;;  %v16307_v14 = vld [vmem:[%s20916_s1 + $0xbf0] sm:$0xff]  }
 0x15a   :  { %v10575_v25 = vadd.f32 %v14490_v19, %v18146_v49  ;;  %v14514_v29 = vpop.f32.mrb[15].mxu1  ;;  %14814 = vmatprep.subr.bf16.mxu1 %v16275_v23  ;;  %v16286_v49 = vld [vmem:[%s20916_s1 + $0xb48] sm:$0xff]   ;;  %v16308_v20 = vld [vmem:[%s20916_s1 + $0xb30] sm:$0xff]   ;;  %v16313_v27 = vld [vmem:[%s20916_s1 + $0xbb8] sm:$0xff]  }
 0x15b   :  { %v16309_v22 = vld [vmem:[%s20916_s1 + $0xbb0] sm:$0xff]   ;;  %v16315_v29 = vld [vmem:[%s20916_s1 + $0xc40] sm:$0xff]  }
 0x15c   :  { %v18247_v31 = vadd.f32 %v14512_v26, %v10575_v25  ;;  %14793 = vmatpush3.bf16.msra.mxu0 %v16276_v24  ;;  %v16310_v24 = vld [vmem:[%s20916_s1 + $0xb78] sm:$0xff]  }
 0x15d   :  { %14794 = vmatprep.subr.bf16.mxu0 %v16278_v30  ;;  %14815 = vmatpush3.bf16.msra.mxu1 %v16277_v28  ;;  %v16311_v25 = vld [vmem:[%s20916_s1 + $0xbf8] sm:$0xff]   ;;  %v2637_v28 = vrot.slane %v18270_v43, %v17206_v35  ;;  %v16316_v30 = vld [vmem:[%s20916_s1 + $0xcc0] sm:$0xff]  }
 0x15e   :  { %14816 = vmatprep.subr.bf16.mxu1 %v16279_v32  ;;  %v16312_v26 = vld [vmem:[%s20916_s1 + $0xb38] sm:$0xff]   ;;  %v16318_v32 = vld [vmem:[%s20916_s1 + $0xc80] sm:$0xff]  }
 0x15f   :  { %v16327_v43 = vld [vmem:[%s20916_s1 + $0xc58] sm:$0xff]  }
 0x160   :  { %14795 = vmatpush3.bf16.msra.mxu0 %v16280_v33  ;;  %v2653_v33 = vcombine.high %v2637_v28, %v2637_v28 }
 0x161   :  { %14824 = vmatprep.subr.bf16.mxu0 %v16282_v37  ;;  %14817 = vmatpush3.bf16.msra.mxu1 %v16281_v39  ;;  %v16321_v37 = vld [vmem:[%s20916_s1 + $0xc08] sm:$0xff]   ;;  %v16323_v39 = vld [vmem:[%s20916_s1 + $0xc50] sm:$0xff]  }
 0x162   :  { %14846 = vmatprep.subr.bf16.mxu1 %v16283_v42  ;;  %v16326_v42 = vld [vmem:[%s20916_s1 + $0xc90] sm:$0xff]  }
 0x163   :  { %11133 = vmatmul.mubr.bf16.vlgmr.msra.gmra.mrb[40].mxu0 %v2630_v41  ;;  %v16325_v41 = vld [vmem:[%s20916_s1 + $0xc10] sm:$0xff]  }
 0x164   :  { %14825 = vmatpush3.bf16.msra.mxu0 %v16284_v44  ;;  %11173 = vmatmul.mubr.bf16.vlgmr.msra.gmra.mrb[40].mxu1 %v2652_v48  ;;  %v16328_v44 = vld [vmem:[%s20916_s1 + $0xcd8] sm:$0xff]   ;;  %v16332_v48 = vld [vmem:[%s20916_s1 + $0xce0] sm:$0xff]  }
 0x165   :  { %14826 = vmatprep.subr.bf16.mxu0 %v16286_v49  ;;  %14847 = vmatpush3.bf16.msra.mxu1 %v16285_v46  ;;  %v16330_v46 = vld [vmem:[%s20916_s1 + $0xc98] sm:$0xff]   ;;  %v16333_v49 = vld [vmem:[%s20916_s1 + $0xc20] sm:$0xff]  }
 0x166   :  { %11212 = vmatprep.mubr.bf16.mxu0 %v2651_v52  ;;  %14848 = vmatprep.subr.bf16.mxu1 %v16287_v51  ;;  %v16335_v51 = vld [vmem:[%s20916_s1 + $0xc68] sm:$0xff]  }
 0x167   :  { %11252 = vmatprep.mubr.bf16.mxu1 %v2655_v55  ;;  %v16336_v52 = vld [vmem:[%s20916_s1 + $0xce8] sm:$0xff]  }
 0x168   :  { %14827 = vmatpush3.bf16.msra.mxu0 %v16288_v53 }
 0x169   :  { %14828 = vmatprep.subr.bf16.mxu0 %v16290_v56  ;;  %14849 = vmatpush3.bf16.msra.mxu1 %v16289_v54  ;;  %v16337_v54 = vld [vmem:[%s20916_s1 + $0xc28] sm:$0xff]   ;;  %v16339_v56 = vld [vmem:[%s20916_s1 + $0xc70] sm:$0xff]  }
 0x16a   :  { %14850 = vmatprep.subr.bf16.mxu1 %v16291_v57 }
 0x16c   :  { %14829 = vmatpush3.bf16.msra.mxu0 %v16292_v58 }
 0x16d   :  { %14830 = vmatprep.subr.bf16.mxu0 %v16294_v60  ;;  %14851 = vmatpush3.bf16.msra.mxu1 %v16293_v59 }
 0x16e   :  { %14852 = vmatprep.subr.bf16.mxu1 %v16295_v61  ;;  %v16338_v61 = vld [vmem:[%s20916_s1 + $0xca8] sm:$0xff]  }
 0x170   :  { %14831 = vmatpush3.bf16.msra.mxu0 %v16296_v62 }
 0x171   :  { %14832 = vmatprep.subr.bf16.mxu0 %v16298_v0  ;;  %14853 = vmatpush3.bf16.msra.mxu1 %v16297_v63  ;;  %v16340_v63 = vld [vmem:[%s20916_s1 + $0xcf0] sm:$0xff]  }
 0x172   :  { %14854 = vmatprep.subr.bf16.mxu1 %v16299_v1 }
 0x174   :  { %14833 = vmatpush3.bf16.msra.mxu0 %v16300_v2 }
 0x175   :  { %14834 = vmatprep.subr.bf16.mxu0 %v16302_v4  ;;  %14855 = vmatpush3.bf16.msra.mxu1 %v16301_v3  ;;  %v16341_v3 = vld [vmem:[%s20916_s1 + $0xc30] sm:$0xff]  }
 0x176   :  { %v14532_v6 = vpop.f32.mrb[16].mxu0  ;;  %14856 = vmatprep.subr.bf16.mxu1 %v16303_v5  ;;  %v16343_v5 = vld [vmem:[%s20916_s1 + $0xc78] sm:$0xff]  }
 0x177   :  { %v14533_v8 = vpop.f32.mrb[17].mxu0  ;;  %v14554_v10 = vpop.f32.mrb[16].mxu1 }
 0x178   :  { %v14534_v11 = vadd.f32 %v14533_v8, %v14532_v6  ;;  %v14535_v12 = vpop.f32.mrb[18].mxu0  ;;  %v14555_v15 = vpop.f32.mrb[17].mxu1  ;;  %14835 = vmatpush3.bf16.msra.mxu0 %v16304_v7  ;;  %v16342_v7 = vld [vmem:[%s20916_s1 + $0xcb0] sm:$0xff]   ;;  %v16344_v8 = vld [vmem:[%s20916_s1 + $0xcf8] sm:$0xff]  }
 0x179   :  { %v14536_v16 = vpop.f32.mrb[19].mxu0  ;;  %v14556_v18 = vadd.f32 %v14555_v15, %v14554_v10  ;;  %v14557_v19 = vpop.f32.mrb[18].mxu1  ;;  %14836 = vmatprep.subr.bf16.mxu0 %v16306_v13  ;;  %14857 = vmatpush3.bf16.msra.mxu1 %v16305_v9  ;;  %v16345_v9 = vld [vmem:[%s20916_s1 + $0xc38] sm:$0xff]   ;;  %v21_v10 = vld [vmem:[%s20917_s0 + $0x30] sm:$0xff]  ;;  %v16347_v12 = vld [vmem:[%s20916_s1 + $0xd40] sm:$0xff]  }
 0x17a   :  { %v10655_v17 = vadd.f32 %v14534_v11, %v18247_v31  ;;  %v14558_v21 = vpop.f32.mrb[19].mxu1  ;;  %14858 = vmatprep.subr.bf16.mxu1 %v16307_v14  ;;  %v16317_v31 = vld [vmem:[%s20916_s1 + $0xc00] sm:$0xff]   ;;  %v2663_v11 = vrot.slane %v21_v10, %v17206_v35  ;;  %v2656_v13 = vcombine.high %v21_v10, %v21_v10  ;;  %v16346_v14 = vld [vmem:[%s20916_s1 + $0xcb8] sm:$0xff]   ;;  %v16384_v10 = vld [vmem:[%s20916_s1 + $0xe48] sm:$0xff]  }
 0x17b   :  { %v16349_v19 = vld [vmem:[%s20916_s1 + $0xd00] sm:$0xff]  }
 0x17c   :  { %v18355_v23 = vadd.f32 %v14556_v18, %v10655_v17  ;;  %14837 = vmatpush3.bf16.msra.mxu0 %v16308_v20  ;;  %v2671_v15 = vcombine.high %v2663_v11, %v2663_v11  ;;  %v2679_v16 = vrot.slane %v2663_v11, %v17206_v35  ;;  %v16348_v17 = vld [vmem:[%s20916_s1 + $0xdc0] sm:$0xff]   ;;  %v18482_v18 = vrot.slane %v2656_v13, %v17206_v35  ;;  %v16385_v11 = vld [vmem:[%s20916_s1 + $0xec8] sm:$0xff]  }
 0x17d   :  { %14838 = vmatprep.subr.bf16.mxu0 %v16310_v24  ;;  %14859 = vmatpush3.bf16.msra.mxu1 %v16309_v22  ;;  %v16350_v21 = vld [vmem:[%s20916_s1 + $0xd80] sm:$0xff]   ;;  %v16351_v24 = vld [vmem:[%s20916_s1 + $0xd48] sm:$0xff]  }
 0x17e   :  { %14860 = vmatprep.subr.bf16.mxu1 %v16311_v25  ;;  %v2693_v20 = vrot.slane %v2671_v15, %v17206_v35  ;;  %v2672_v22 = vcombine.high %v18482_v18, %v18482_v18  ;;  %v16387_v13 = vld [vmem:[%s20916_s1 + $0xe88] sm:$0xff]   ;;  %v16389_v15 = vld [vmem:[%s20916_s1 + $0xed0] sm:$0xff]  }
 0x180   :  { %14839 = vmatpush3.bf16.msra.mxu0 %v16312_v26  ;;  %v2703_v25 = vcombine.high %v2693_v20, %v2693_v20  ;;  %v16352_v26 = vld [vmem:[%s20916_s1 + $0xdc8] sm:$0xff]  }
 0x181   :  { %14868 = vmatprep.subr.bf16.mxu0 %v16315_v29  ;;  %14861 = vmatpush3.bf16.msra.mxu1 %v16313_v27  ;;  %v2700_v27 = vrot.slane %v2672_v22, %v17206_v35  ;;  %v16354_v29 = vld [vmem:[%s20916_s1 + $0xd88] sm:$0xff]   ;;  %v16396_v22 = vld [vmem:[%s20916_s1 + $0xe60] sm:$0xff]  }
 0x182   :  { %14890 = vmatprep.subr.bf16.mxu1 %v16316_v30 }
 0x183   :  { %11213 = vmatmul.mubr.bf16.vlgmr.msra.gmra.mrb[44].mxu0 %v2637_v28  ;;  %v16353_v28 = vld [vmem:[%s20916_s1 + $0xd08] sm:$0xff]   ;;  %v2704_v30 = vcombine.high %v2700_v27, %v2700_v27 }
 0x184   :  { %14869 = vmatpush3.bf16.msra.mxu0 %v16317_v31  ;;  %11253 = vmatmul.mubr.bf16.vlgmr.msra.gmra.mrb[44].mxu1 %v2653_v33  ;;  %v16355_v31 = vld [vmem:[%s20916_s1 + $0xd50] sm:$0xff]  }
 0x185   :  { %14870 = vmatprep.subr.bf16.mxu0 %v16319_v34  ;;  %14891 = vmatpush3.bf16.msra.mxu1 %v16318_v32  ;;  %v16356_v32 = vld [vmem:[%s20916_s1 + $0xdd0] sm:$0xff]  }
 0x186   :  { %14892 = vmatprep.subr.bf16.mxu1 %v16320_v36  ;;  %11292 = vmatprep.mubr.bf16.mxu0 %v2693_v20  ;;  %v16357_v33 = vld [vmem:[%s20916_s1 + $0xd10] sm:$0xff]   ;;  %v16359_v36 = vld [vmem:[%s20916_s1 + $0xd58] sm:$0xff]  }
 0x187   :  { %11332 = vmatprep.mubr.bf16.mxu1 %v2703_v25  ;;  %v16358_v34 = vld [vmem:[%s20916_s1 + $0xd90] sm:$0xff]   ;;  %v16394_v20 = vld [vmem:[%s20916_s1 + $0xe18] sm:$0xff]   ;;  %v16399_v25 = vld [vmem:[%s20916_s1 + $0xea0] sm:$0xff]  }
 0x188   :  { %14871 = vmatpush3.bf16.msra.mxu0 %v16321_v37  ;;  %v16360_v37 = vld [vmem:[%s20916_s1 + $0xdd8] sm:$0xff]  }
 0x189   :  { %14872 = vmatprep.subr.bf16.mxu0 %v16323_v39  ;;  %14893 = vmatpush3.bf16.msra.mxu1 %v16322_v38  ;;  %v16361_v38 = vld [vmem:[%s20916_s1 + $0xd18] sm:$0xff]  }
 0x18a   :  { %14894 = vmatprep.subr.bf16.mxu1 %v16324_v40  ;;  %v16362_v39 = vld [vmem:[%s20916_s1 + $0xd98] sm:$0xff]   ;;  %v16363_v40 = vld [vmem:[%s20916_s1 + $0xd60] sm:$0xff]  }
 0x18c   :  { %14873 = vmatpush3.bf16.msra.mxu0 %v16325_v41  ;;  %v16364_v41 = vld [vmem:[%s20916_s1 + $0xde0] sm:$0xff]  }
 0x18d   :  { %14874 = vmatprep.subr.bf16.mxu0 %v16327_v43  ;;  %14895 = vmatpush3.bf16.msra.mxu1 %v16326_v42  ;;  %v16365_v42 = vld [vmem:[%s20916_s1 + $0xd20] sm:$0xff]  }
 0x18e   :  { %14896 = vmatprep.subr.bf16.mxu1 %v16328_v44  ;;  %v16366_v43 = vld [vmem:[%s20916_s1 + $0xda0] sm:$0xff]   ;;  %v16367_v44 = vld [vmem:[%s20916_s1 + $0xd68] sm:$0xff]  }
 0x190   :  { %14875 = vmatpush3.bf16.msra.mxu0 %v16329_v45  ;;  %v16368_v45 = vld [vmem:[%s20916_s1 + $0xde8] sm:$0xff]  }
 0x191   :  { %14876 = vmatprep.subr.bf16.mxu0 %v16331_v47  ;;  %14897 = vmatpush3.bf16.msra.mxu1 %v16330_v46  ;;  %v16369_v47 = vld [vmem:[%s20916_s1 + $0xd28] sm:$0xff]  }
 0x192   :  { %14898 = vmatprep.subr.bf16.mxu1 %v16332_v48 }
 0x194   :  { %14877 = vmatpush3.bf16.msra.mxu0 %v16333_v49  ;;  %v16370_v49 = vld [vmem:[%s20916_s1 + $0xda8] sm:$0xff]  }
 0x195   :  { %14878 = vmatprep.subr.bf16.mxu0 %v16335_v51  ;;  %14899 = vmatpush3.bf16.msra.mxu1 %v16334_v50 }
 0x196   :  { %v14576_v53 = vpop.f32.mrb[20].mxu0  ;;  %14900 = vmatprep.subr.bf16.mxu1 %v16336_v52 }
 0x197   :  { %v14577_v55 = vpop.f32.mrb[21].mxu0  ;;  %v14598_v57 = vpop.f32.mrb[20].mxu1 }
 0x198   :  { %v14578_v58 = vadd.f32 %v14577_v55, %v14576_v53  ;;  %v14579_v59 = vpop.f32.mrb[22].mxu0  ;;  %v14599_v60 = vpop.f32.mrb[21].mxu1  ;;  %14879 = vmatpush3.bf16.msra.mxu0 %v16337_v54  ;;  %v16371_v53 = vld [vmem:[%s20916_s1 + $0xd70] sm:$0xff]  }
 0x199   :  { %v14580_v62 = vpop.f32.mrb[23].mxu0  ;;  %v14600_v1 = vadd.f32 %v14599_v60, %v14598_v57  ;;  %v14601_v2 = vpop.f32.mrb[22].mxu1  ;;  %14880 = vmatprep.subr.bf16.mxu0 %v16339_v56  ;;  %14901 = vmatpush3.bf16.msra.mxu1 %v16338_v61  ;;  %v16372_v54 = vld [vmem:[%s20916_s1 + $0xdf0] sm:$0xff]  }
 0x19a   :  { %v10735_v0 = vadd.f32 %v14578_v58, %v18355_v23  ;;  %v14602_v4 = vpop.f32.mrb[23].mxu1  ;;  %14902 = vmatprep.subr.bf16.mxu1 %v16340_v63  ;;  %v2701_v23 = vcombine.high %v2679_v16, %v2679_v16  ;;  %v16373_v60 = vld [vmem:[%s20916_s1 + $0xd30] sm:$0xff]   ;;  %v16377_v2 = vld [vmem:[%s20916_s1 + $0xd38] sm:$0xff]  }
 0x19b   :  { %v16374_v62 = vld [vmem:[%s20916_s1 + $0xdb0] sm:$0xff]   ;;  %v2686_v4 = vrot.slane %v18482_v18, %v17206_v35  ;;  %v16392_v18 = vld [vmem:[%s20916_s1 + $0xe58] sm:$0xff]  }
 0x19c   :  { %v18456_v6 = vadd.f32 %v14600_v1, %v10735_v0  ;;  %14881 = vmatpush3.bf16.msra.mxu0 %v16341_v3  ;;  %v16375_v0 = vld [vmem:[%s20916_s1 + $0xd78] sm:$0xff]  }
 0x19d   :  { %14882 = vmatprep.subr.bf16.mxu0 %v16343_v5  ;;  %14903 = vmatpush3.bf16.msra.mxu1 %v16342_v7  ;;  %v16376_v1 = vld [vmem:[%s20916_s1 + $0xdf8] sm:$0xff]   ;;  %v16380_v5 = vld [vmem:[%s20916_s1 + $0xe40] sm:$0xff]  }
 0x19e   :  { %14904 = vmatprep.subr.bf16.mxu1 %v16344_v8  ;;  %v16378_v3 = vld [vmem:[%s20916_s1 + $0xdb8] sm:$0xff]   ;;  %v16382_v7 = vld [vmem:[%s20916_s1 + $0xe00] sm:$0xff]  }
 0x19f   :  { %v16383_v8 = vld [vmem:[%s20916_s1 + $0xe80] sm:$0xff]  }
 0x1a0   :  { %14883 = vmatpush3.bf16.msra.mxu0 %v16345_v9  ;;  %v2702_v9 = vcombine.high %v2686_v4, %v2686_v4 }
 0x1a1   :  { %14912 = vmatprep.subr.bf16.mxu0 %v16347_v12  ;;  %14905 = vmatpush3.bf16.msra.mxu1 %v16346_v14  ;;  %v16386_v12 = vld [vmem:[%s20916_s1 + $0xe08] sm:$0xff]   ;;  %v16388_v14 = vld [vmem:[%s20916_s1 + $0xe50] sm:$0xff]  }
 0x1a2   :  { %14934 = vmatprep.subr.bf16.mxu1 %v16348_v17  ;;  %v16391_v17 = vld [vmem:[%s20916_s1 + $0xe90] sm:$0xff]  }
 0x1a3   :  { %11293 = vmatmul.mubr.bf16.vlgmr.msra.gmra.mrb[48].mxu0 %v2679_v16  ;;  %v16390_v16 = vld [vmem:[%s20916_s1 + $0xe10] sm:$0xff]  }
 0x1a4   :  { %14913 = vmatpush3.bf16.msra.mxu0 %v16349_v19  ;;  %11333 = vmatmul.mubr.bf16.vlgmr.msra.gmra.mrb[48].mxu1 %v2701_v23  ;;  %v16393_v19 = vld [vmem:[%s20916_s1 + $0xed8] sm:$0xff]   ;;  %v16397_v23 = vld [vmem:[%s20916_s1 + $0xee0] sm:$0xff]  }
 0x1a5   :  { %14914 = vmatprep.subr.bf16.mxu0 %v16351_v24  ;;  %14935 = vmatpush3.bf16.msra.mxu1 %v16350_v21  ;;  %v16395_v21 = vld [vmem:[%s20916_s1 + $0xe98] sm:$0xff]   ;;  %v16398_v24 = vld [vmem:[%s20916_s1 + $0xe20] sm:$0xff]  }
 0x1a6   :  { %11372 = vmatprep.mubr.bf16.mxu0 %v2700_v27  ;;  %14936 = vmatprep.subr.bf16.mxu1 %v16352_v26  ;;  %v16400_v26 = vld [vmem:[%s20916_s1 + $0xe68] sm:$0xff]  }
 0x1a7   :  { %11412 = vmatprep.mubr.bf16.mxu1 %v2704_v30  ;;  %v16401_v27 = vld [vmem:[%s20916_s1 + $0xee8] sm:$0xff]  }
 0x1a8   :  { %14915 = vmatpush3.bf16.msra.mxu0 %v16353_v28 }
 0x1a9   :  { %14916 = vmatprep.subr.bf16.mxu0 %v16355_v31  ;;  %14937 = vmatpush3.bf16.msra.mxu1 %v16354_v29  ;;  %v16402_v29 = vld [vmem:[%s20916_s1 + $0xe28] sm:$0xff]   ;;  %v16404_v31 = vld [vmem:[%s20916_s1 + $0xe70] sm:$0xff]  }
 0x1aa   :  { %14938 = vmatprep.subr.bf16.mxu1 %v16356_v32 }
 0x1ac   :  { %14917 = vmatpush3.bf16.msra.mxu0 %v16357_v33 }
 0x1ad   :  { %14918 = vmatprep.subr.bf16.mxu0 %v16359_v36  ;;  %14939 = vmatpush3.bf16.msra.mxu1 %v16358_v34 }
 0x1ae   :  { %14940 = vmatprep.subr.bf16.mxu1 %v16360_v37  ;;  %v16403_v37 = vld [vmem:[%s20916_s1 + $0xea8] sm:$0xff]  }
 0x1b0   :  { %14919 = vmatpush3.bf16.msra.mxu0 %v16361_v38 }
 0x1b1   :  { %14920 = vmatprep.subr.bf16.mxu0 %v16363_v40  ;;  %14941 = vmatpush3.bf16.msra.mxu1 %v16362_v39  ;;  %v16405_v39 = vld [vmem:[%s20916_s1 + $0xef0] sm:$0xff]  }
 0x1b2   :  { %14942 = vmatprep.subr.bf16.mxu1 %v16364_v41 }
 0x1b4   :  { %14921 = vmatpush3.bf16.msra.mxu0 %v16365_v42 }
 0x1b5   :  { %14922 = vmatprep.subr.bf16.mxu0 %v16367_v44  ;;  %14943 = vmatpush3.bf16.msra.mxu1 %v16366_v43  ;;  %v16406_v43 = vld [vmem:[%s20916_s1 + $0xe30] sm:$0xff]  }
 0x1b6   :  { %v14620_v46 = vpop.f32.mrb[24].mxu0  ;;  %14944 = vmatprep.subr.bf16.mxu1 %v16368_v45  ;;  %v16408_v45 = vld [vmem:[%s20916_s1 + $0xe78] sm:$0xff]  }
 0x1b7   :  { %v14621_v48 = vpop.f32.mrb[25].mxu0  ;;  %v14642_v50 = vpop.f32.mrb[24].mxu1 }
 0x1b8   :  { %v14622_v51 = vadd.f32 %v14621_v48, %v14620_v46  ;;  %v14623_v52 = vpop.f32.mrb[26].mxu0  ;;  %v14643_v55 = vpop.f32.mrb[25].mxu1  ;;  %14923 = vmatpush3.bf16.msra.mxu0 %v16369_v47  ;;  %v16407_v47 = vld [vmem:[%s20916_s1 + $0xeb0] sm:$0xff]   ;;  %v16409_v48 = vld [vmem:[%s20916_s1 + $0xef8] sm:$0xff]  }
 0x1b9   :  { %v14624_v56 = vpop.f32.mrb[27].mxu0  ;;  %v14644_v58 = vadd.f32 %v14643_v55, %v14642_v50  ;;  %v14645_v59 = vpop.f32.mrb[26].mxu1  ;;  %14924 = vmatprep.subr.bf16.mxu0 %v16371_v53  ;;  %14945 = vmatpush3.bf16.msra.mxu1 %v16370_v49  ;;  %v16410_v49 = vld [vmem:[%s20916_s1 + $0xe38] sm:$0xff]   ;;  %v16412_v52 = vld [vmem:[%s20916_s1 + $0xf40] sm:$0xff]  }
 0x1ba   :  { %v10815_v57 = vadd.f32 %v14622_v51, %v18456_v6  ;;  %v14646_v61 = vpop.f32.mrb[27].mxu1  ;;  %14946 = vmatprep.subr.bf16.mxu1 %v16372_v54  ;;  %v16381_v6 = vld [vmem:[%s20916_s1 + $0xec0] sm:$0xff]   ;;  %v22_v50 = vld [vmem:[%s20917_s0 + $0x38] sm:$0xff] }
 0x1bb   :  { %v2712_v51 = vrot.slane %v22_v50, %v17206_v35  ;;  %v2705_v53 = vcombine.high %v22_v50, %v22_v50  ;;  %v16411_v54 = vld [vmem:[%s20916_s1 + $0xeb8] sm:$0xff]   ;;  %v16414_v59 = vld [vmem:[%s20916_s1 + $0xf00] sm:$0xff]   ;;  %v16449_v50 = vld [vmem:[%s20916_s1 + $0x1048] sm:$0xff]  }
 0x1bc   :  { %v18567_v63 = vadd.f32 %v14644_v58, %v10815_v57  ;;  %14925 = vmatpush3.bf16.msra.mxu0 %v16373_v60  ;;  %v16413_v57 = vld [vmem:[%s20916_s1 + $0xfc0] sm:$0xff]  }
 0x1bd   :  { %14926 = vmatprep.subr.bf16.mxu0 %v16375_v0  ;;  %14947 = vmatpush3.bf16.msra.mxu1 %v16374_v62  ;;  %v2720_v55 = vcombine.high %v2712_v51, %v2712_v51  ;;  %v2728_v56 = vrot.slane %v2712_v51, %v17206_v35  ;;  %v18694_v58 = vrot.slane %v2705_v53, %v17206_v35  ;;  %v16415_v61 = vld [vmem:[%s20916_s1 + $0xf80] sm:$0xff]   ;;  %v16416_v0 = vld [vmem:[%s20916_s1 + $0xf48] sm:$0xff]  }
 0x1be   :  { %14948 = vmatprep.subr.bf16.mxu1 %v16376_v1  ;;  %v16450_v51 = vld [vmem:[%s20916_s1 + $0x10c8] sm:$0xff]  }
 0x1bf   :  { %v2742_v60 = vrot.slane %v2720_v55, %v17206_v35  ;;  %v2721_v62 = vcombine.high %v18694_v58, %v18694_v58  ;;  %v16452_v53 = vld [vmem:[%s20916_s1 + $0x1088] sm:$0xff]   ;;  %v16454_v55 = vld [vmem:[%s20916_s1 + $0x10d0] sm:$0xff]  }
 0x1c0   :  { %14927 = vmatpush3.bf16.msra.mxu0 %v16377_v2  ;;  %v16417_v2 = vld [vmem:[%s20916_s1 + $0xfc8] sm:$0xff]  }
 0x1c1   :  { %14956 = vmatprep.subr.bf16.mxu0 %v16380_v5  ;;  %14949 = vmatpush3.bf16.msra.mxu1 %v16378_v3  ;;  %v2752_v1 = vcombine.high %v2742_v60, %v2742_v60  ;;  %v2749_v3 = vrot.slane %v2721_v62, %v17206_v35  ;;  %v16419_v5 = vld [vmem:[%s20916_s1 + $0xf88] sm:$0xff]   ;;  %v16461_v62 = vld [vmem:[%s20916_s1 + $0x1060] sm:$0xff]  }
 0x1c2   :  { %14978 = vmatprep.subr.bf16.mxu1 %v16381_v6 }
 0x1c3   :  { %11373 = vmatmul.mubr.bf16.vlgmr.msra.gmra.mrb[52].mxu0 %v2686_v4  ;;  %v16418_v4 = vld [vmem:[%s20916_s1 + $0xf08] sm:$0xff]   ;;  %v2753_v6 = vcombine.high %v2749_v3, %v2749_v3 }
 0x1c4   :  { %14957 = vmatpush3.bf16.msra.mxu0 %v16382_v7  ;;  %11413 = vmatmul.mubr.bf16.vlgmr.msra.gmra.mrb[52].mxu1 %v2702_v9  ;;  %v16420_v7 = vld [vmem:[%s20916_s1 + $0xf50] sm:$0xff]  }
 0x1c5   :  { %14958 = vmatprep.subr.bf16.mxu0 %v16384_v10  ;;  %14979 = vmatpush3.bf16.msra.mxu1 %v16383_v8  ;;  %v16421_v8 = vld [vmem:[%s20916_s1 + $0xfd0] sm:$0xff]  }
 0x1c6   :  { %14980 = vmatprep.subr.bf16.mxu1 %v16385_v11  ;;  %11452 = vmatprep.mubr.bf16.mxu0 %v2742_v60  ;;  %v16422_v9 = vld [vmem:[%s20916_s1 + $0xf10] sm:$0xff]   ;;  %v16424_v11 = vld [vmem:[%s20916_s1 + $0xf58] sm:$0xff]  }
 0x1c7   :  { %11492 = vmatprep.mubr.bf16.mxu1 %v2752_v1  ;;  %v16423_v10 = vld [vmem:[%s20916_s1 + $0xf90] sm:$0xff]   ;;  %v16459_v60 = vld [vmem:[%s20916_s1 + $0x1018] sm:$0xff]   ;;  %v16464_v1 = vld [vmem:[%s20916_s1 + $0x10a0] sm:$0xff]  }
 0x1c8   :  { %14959 = vmatpush3.bf16.msra.mxu0 %v16386_v12  ;;  %v16425_v12 = vld [vmem:[%s20916_s1 + $0xfd8] sm:$0xff]  }
 0x1c9   :  { %14960 = vmatprep.subr.bf16.mxu0 %v16388_v14  ;;  %14981 = vmatpush3.bf16.msra.mxu1 %v16387_v13  ;;  %v16426_v13 = vld [vmem:[%s20916_s1 + $0xf18] sm:$0xff]  }
 0x1ca   :  { %14982 = vmatprep.subr.bf16.mxu1 %v16389_v15  ;;  %v16427_v14 = vld [vmem:[%s20916_s1 + $0xf98] sm:$0xff]   ;;  %v16428_v15 = vld [vmem:[%s20916_s1 + $0xf60] sm:$0xff]  }
 0x1cc   :  { %14961 = vmatpush3.bf16.msra.mxu0 %v16390_v16  ;;  %v16429_v16 = vld [vmem:[%s20916_s1 + $0xfe0] sm:$0xff]  }
 0x1cd   :  { %14962 = vmatprep.subr.bf16.mxu0 %v16392_v18  ;;  %14983 = vmatpush3.bf16.msra.mxu1 %v16391_v17  ;;  %v16430_v17 = vld [vmem:[%s20916_s1 + $0xf20] sm:$0xff]  }
 0x1ce   :  { %14984 = vmatprep.subr.bf16.mxu1 %v16393_v19  ;;  %v16431_v18 = vld [vmem:[%s20916_s1 + $0xfa0] sm:$0xff]   ;;  %v16432_v19 = vld [vmem:[%s20916_s1 + $0xf68] sm:$0xff]  }
 0x1d0   :  { %14963 = vmatpush3.bf16.msra.mxu0 %v16394_v20  ;;  %v16433_v20 = vld [vmem:[%s20916_s1 + $0xfe8] sm:$0xff]  }
 0x1d1   :  { %14964 = vmatprep.subr.bf16.mxu0 %v16396_v22  ;;  %14985 = vmatpush3.bf16.msra.mxu1 %v16395_v21  ;;  %v16434_v22 = vld [vmem:[%s20916_s1 + $0xf28] sm:$0xff]  }
 0x1d2   :  { %14986 = vmatprep.subr.bf16.mxu1 %v16397_v23 }
 0x1d4   :  { %14965 = vmatpush3.bf16.msra.mxu0 %v16398_v24  ;;  %v16435_v24 = vld [vmem:[%s20916_s1 + $0xfa8] sm:$0xff]  }
 0x1d5   :  { %14966 = vmatprep.subr.bf16.mxu0 %v16400_v26  ;;  %14987 = vmatpush3.bf16.msra.mxu1 %v16399_v25 }
 0x1d6   :  { %v14664_v28 = vpop.f32.mrb[28].mxu0  ;;  %14988 = vmatprep.subr.bf16.mxu1 %v16401_v27 }
 0x1d7   :  { %v14665_v30 = vpop.f32.mrb[29].mxu0  ;;  %v14686_v32 = vpop.f32.mrb[28].mxu1 }
 0x1d8   :  { %v14666_v33 = vadd.f32 %v14665_v30, %v14664_v28  ;;  %v14667_v34 = vpop.f32.mrb[30].mxu0  ;;  %v14687_v36 = vpop.f32.mrb[29].mxu1  ;;  %14967 = vmatpush3.bf16.msra.mxu0 %v16402_v29  ;;  %v16436_v28 = vld [vmem:[%s20916_s1 + $0xf70] sm:$0xff]  }
 0x1d9   :  { %v14668_v38 = vpop.f32.mrb[31].mxu0  ;;  %v14688_v41 = vadd.f32 %v14687_v36, %v14686_v32  ;;  %v14689_v42 = vpop.f32.mrb[30].mxu1  ;;  %14968 = vmatprep.subr.bf16.mxu0 %v16404_v31  ;;  %14989 = vmatpush3.bf16.msra.mxu1 %v16403_v37  ;;  %v16437_v29 = vld [vmem:[%s20916_s1 + $0xff0] sm:$0xff]  }
 0x1da   :  { %v10895_v40 = vadd.f32 %v14666_v33, %v18567_v63  ;;  %v14690_v44 = vpop.f32.mrb[31].mxu1  ;;  %14990 = vmatprep.subr.bf16.mxu1 %v16405_v39  ;;  %v2750_v63 = vcombine.high %v2728_v56, %v2728_v56  ;;  %v16438_v36 = vld [vmem:[%s20916_s1 + $0xf30] sm:$0xff]   ;;  %v16442_v42 = vld [vmem:[%s20916_s1 + $0xf38] sm:$0xff]  }
 0x1db   :  { %v16439_v38 = vld [vmem:[%s20916_s1 + $0xfb0] sm:$0xff]   ;;  %v2735_v44 = vrot.slane %v18694_v58, %v17206_v35  ;;  %v16457_v58 = vld [vmem:[%s20916_s1 + $0x1058] sm:$0xff]  }
 0x1dc   :  { %v18668_v46 = vadd.f32 %v14688_v41, %v10895_v40  ;;  %14969 = vmatpush3.bf16.msra.mxu0 %v16406_v43  ;;  %v16440_v40 = vld [vmem:[%s20916_s1 + $0xf78] sm:$0xff]  }
 0x1dd   :  { %14970 = vmatprep.subr.bf16.mxu0 %v16408_v45  ;;  %14991 = vmatpush3.bf16.msra.mxu1 %v16407_v47  ;;  %v16441_v41 = vld [vmem:[%s20916_s1 + $0xff8] sm:$0xff]   ;;  %v16445_v45 = vld [vmem:[%s20916_s1 + $0x1040] sm:$0xff]  }
 0x1de   :  { %14992 = vmatprep.subr.bf16.mxu1 %v16409_v48  ;;  %v16443_v43 = vld [vmem:[%s20916_s1 + $0xfb8] sm:$0xff]   ;;  %v16447_v47 = vld [vmem:[%s20916_s1 + $0x1000] sm:$0xff]  }
 0x1df   :  { %v16448_v48 = vld [vmem:[%s20916_s1 + $0x1080] sm:$0xff]  }
 0x1e0   :  { %14971 = vmatpush3.bf16.msra.mxu0 %v16410_v49  ;;  %v2751_v49 = vcombine.high %v2735_v44, %v2735_v44 }
 0x1e1   :  { %15000 = vmatprep.subr.bf16.mxu0 %v16412_v52  ;;  %14993 = vmatpush3.bf16.msra.mxu1 %v16411_v54  ;;  %v16451_v52 = vld [vmem:[%s20916_s1 + $0x1008] sm:$0xff]   ;;  %v16453_v54 = vld [vmem:[%s20916_s1 + $0x1050] sm:$0xff]  }
 0x1e2   :  { %15022 = vmatprep.subr.bf16.mxu1 %v16413_v57  ;;  %v16456_v57 = vld [vmem:[%s20916_s1 + $0x1090] sm:$0xff]  }
 0x1e3   :  { %11453 = vmatmul.mubr.bf16.vlgmr.msra.gmra.mrb[56].mxu0 %v2728_v56  ;;  %v16455_v56 = vld [vmem:[%s20916_s1 + $0x1010] sm:$0xff]  }
 0x1e4   :  { %15001 = vmatpush3.bf16.msra.mxu0 %v16414_v59  ;;  %11493 = vmatmul.mubr.bf16.vlgmr.msra.gmra.mrb[56].mxu1 %v2750_v63  ;;  %v16458_v59 = vld [vmem:[%s20916_s1 + $0x10d8] sm:$0xff]   ;;  %v16462_v63 = vld [vmem:[%s20916_s1 + $0x10e0] sm:$0xff]  }
 0x1e5   :  { %15002 = vmatprep.subr.bf16.mxu0 %v16416_v0  ;;  %15023 = vmatpush3.bf16.msra.mxu1 %v16415_v61  ;;  %v16460_v61 = vld [vmem:[%s20916_s1 + $0x1098] sm:$0xff]   ;;  %v16463_v0 = vld [vmem:[%s20916_s1 + $0x1020] sm:$0xff]  }
 0x1e6   :  { %11532 = vmatprep.mubr.bf16.mxu0 %v2749_v3  ;;  %15024 = vmatprep.subr.bf16.mxu1 %v16417_v2  ;;  %v16465_v2 = vld [vmem:[%s20916_s1 + $0x1068] sm:$0xff]  }
 0x1e7   :  { %11572 = vmatprep.mubr.bf16.mxu1 %v2753_v6  ;;  %v16466_v3 = vld [vmem:[%s20916_s1 + $0x10e8] sm:$0xff]  }
 0x1e8   :  { %15003 = vmatpush3.bf16.msra.mxu0 %v16418_v4 }
 0x1e9   :  { %15004 = vmatprep.subr.bf16.mxu0 %v16420_v7  ;;  %15025 = vmatpush3.bf16.msra.mxu1 %v16419_v5  ;;  %v16467_v5 = vld [vmem:[%s20916_s1 + $0x1028] sm:$0xff]   ;;  %v16469_v7 = vld [vmem:[%s20916_s1 + $0x1070] sm:$0xff]  }
 0x1ea   :  { %15026 = vmatprep.subr.bf16.mxu1 %v16421_v8 }
 0x1ec   :  { %15005 = vmatpush3.bf16.msra.mxu0 %v16422_v9 }
 0x1ed   :  { %15006 = vmatprep.subr.bf16.mxu0 %v16424_v11  ;;  %15027 = vmatpush3.bf16.msra.mxu1 %v16423_v10 }
 0x1ee   :  { %15028 = vmatprep.subr.bf16.mxu1 %v16425_v12  ;;  %v16468_v12 = vld [vmem:[%s20916_s1 + $0x10a8] sm:$0xff]  }
 0x1f0   :  { %15007 = vmatpush3.bf16.msra.mxu0 %v16426_v13 }
 0x1f1   :  { %15008 = vmatprep.subr.bf16.mxu0 %v16428_v15  ;;  %15029 = vmatpush3.bf16.msra.mxu1 %v16427_v14  ;;  %v16470_v14 = vld [vmem:[%s20916_s1 + $0x10f0] sm:$0xff]  }
 0x1f2   :  { %15030 = vmatprep.subr.bf16.mxu1 %v16429_v16 }
 0x1f4   :  { %15009 = vmatpush3.bf16.msra.mxu0 %v16430_v17 }
 0x1f5   :  { %15010 = vmatprep.subr.bf16.mxu0 %v16432_v19  ;;  %15031 = vmatpush3.bf16.msra.mxu1 %v16431_v18  ;;  %v16471_v18 = vld [vmem:[%s20916_s1 + $0x1030] sm:$0xff]  }
 0x1f6   :  { %v14708_v21 = vpop.f32.mrb[32].mxu0  ;;  %15032 = vmatprep.subr.bf16.mxu1 %v16433_v20  ;;  %v16473_v20 = vld [vmem:[%s20916_s1 + $0x1078] sm:$0xff]  }
 0x1f7   :  { %v14709_v23 = vpop.f32.mrb[33].mxu0  ;;  %v14730_v25 = vpop.f32.mrb[32].mxu1 }
 0x1f8   :  { %v14710_v26 = vadd.f32 %v14709_v23, %v14708_v21  ;;  %v14711_v27 = vpop.f32.mrb[34].mxu0  ;;  %v14731_v30 = vpop.f32.mrb[33].mxu1  ;;  %15011 = vmatpush3.bf16.msra.mxu0 %v16434_v22  ;;  %v16472_v22 = vld [vmem:[%s20916_s1 + $0x10b0] sm:$0xff]   ;;  %v16474_v23 = vld [vmem:[%s20916_s1 + $0x10f8] sm:$0xff]  }
 0x1f9   :  { %v14712_v31 = vpop.f32.mrb[35].mxu0  ;;  %v14732_v33 = vadd.f32 %v14731_v30, %v14730_v25  ;;  %v14733_v34 = vpop.f32.mrb[34].mxu1  ;;  %15012 = vmatprep.subr.bf16.mxu0 %v16436_v28  ;;  %15033 = vmatpush3.bf16.msra.mxu1 %v16435_v24  ;;  %v16475_v24 = vld [vmem:[%s20916_s1 + $0x1038] sm:$0xff]   ;;  %v23_v25 = vld [vmem:[%s20917_s0 + $0x40] sm:$0xff] }
 0x1fa   :  { %v10975_v32 = vadd.f32 %v14710_v26, %v18668_v46  ;;  %v14734_v37 = vpop.f32.mrb[35].mxu1  ;;  %15034 = vmatprep.subr.bf16.mxu1 %v16437_v29  ;;  %v16446_v46 = vld [vmem:[%s20916_s1 + $0x10c0] sm:$0xff]   ;;  %v2761_v26 = vrot.slane %v23_v25, %v17206_v35  ;;  %v2754_v28 = vcombine.high %v23_v25, %v23_v25  ;;  %v16476_v29 = vld [vmem:[%s20916_s1 + $0x10b8] sm:$0xff]   ;;  %v16514_v25 = vld [vmem:[%s20916_s1 + $0x1248] sm:$0xff]  }
 0x1fb   :  { %v16477_v27 = vld [vmem:[%s20916_s1 + $0x1140] sm:$0xff]  }
 0x1fc   :  { %v18779_v39 = vadd.f32 %v14732_v33, %v10975_v32  ;;  %15013 = vmatpush3.bf16.msra.mxu0 %v16438_v36  ;;  %v2769_v30 = vcombine.high %v2761_v26, %v2761_v26  ;;  %v2777_v31 = vrot.slane %v2761_v26, %v17206_v35  ;;  %v16478_v32 = vld [vmem:[%s20916_s1 + $0x11c0] sm:$0xff]   ;;  %v18906_v33 = vrot.slane %v2754_v28, %v17206_v35  ;;  %v16515_v26 = vld [vmem:[%s20916_s1 + $0x12c8] sm:$0xff]  }
 0x1fd   :  { %15014 = vmatprep.subr.bf16.mxu0 %v16440_v40  ;;  %15035 = vmatpush3.bf16.msra.mxu1 %v16439_v38  ;;  %v16479_v34 = vld [vmem:[%s20916_s1 + $0x1100] sm:$0xff]   ;;  %v16481_v40 = vld [vmem:[%s20916_s1 + $0x1148] sm:$0xff]  }
 0x1fe   :  { %15036 = vmatprep.subr.bf16.mxu1 %v16441_v41  ;;  %v2791_v36 = vrot.slane %v2769_v30, %v17206_v35  ;;  %v16480_v37 = vld [vmem:[%s20916_s1 + $0x1180] sm:$0xff]   ;;  %v2770_v38 = vcombine.high %v18906_v33, %v18906_v33  ;;  %v16517_v28 = vld [vmem:[%s20916_s1 + $0x1288] sm:$0xff]   ;;  %v16519_v30 = vld [vmem:[%s20916_s1 + $0x12d0] sm:$0xff]  }
 0x200   :  { %15015 = vmatpush3.bf16.msra.mxu0 %v16442_v42  ;;  %v2801_v41 = vcombine.high %v2791_v36, %v2791_v36  ;;  %v16482_v42 = vld [vmem:[%s20916_s1 + $0x11c8] sm:$0xff]  }
 0x201   :  { %15044 = vmatprep.subr.bf16.mxu0 %v16445_v45  ;;  %15037 = vmatpush3.bf16.msra.mxu1 %v16443_v43  ;;  %v2798_v43 = vrot.slane %v2770_v38, %v17206_v35  ;;  %v16484_v45 = vld [vmem:[%s20916_s1 + $0x1188] sm:$0xff]   ;;  %v16526_v38 = vld [vmem:[%s20916_s1 + $0x1260] sm:$0xff]  }
 0x202   :  { %15066 = vmatprep.subr.bf16.mxu1 %v16446_v46 }
 0x203   :  { %11533 = vmatmul.mubr.bf16.vlgmr.msra.gmra.mrb[60].mxu0 %v2735_v44  ;;  %v16483_v44 = vld [vmem:[%s20916_s1 + $0x1108] sm:$0xff]   ;;  %v2802_v46 = vcombine.high %v2798_v43, %v2798_v43 }
 0x204   :  { %15045 = vmatpush3.bf16.msra.mxu0 %v16447_v47  ;;  %11573 = vmatmul.mubr.bf16.vlgmr.msra.gmra.mrb[60].mxu1 %v2751_v49  ;;  %v16485_v47 = vld [vmem:[%s20916_s1 + $0x1150] sm:$0xff]  }
 0x205   :  { %15046 = vmatprep.subr.bf16.mxu0 %v16449_v50  ;;  %15067 = vmatpush3.bf16.msra.mxu1 %v16448_v48  ;;  %v16486_v48 = vld [vmem:[%s20916_s1 + $0x11d0] sm:$0xff]  }
 0x206   :  { %15068 = vmatprep.subr.bf16.mxu1 %v16450_v51  ;;  %11612 = vmatprep.mubr.bf16.mxu0 %v2791_v36  ;;  %v16487_v49 = vld [vmem:[%s20916_s1 + $0x1110] sm:$0xff]   ;;  %v16489_v51 = vld [vmem:[%s20916_s1 + $0x1158] sm:$0xff]  }
 0x207   :  { %11652 = vmatprep.mubr.bf16.mxu1 %v2801_v41  ;;  %v16488_v50 = vld [vmem:[%s20916_s1 + $0x1190] sm:$0xff]   ;;  %v16524_v36 = vld [vmem:[%s20916_s1 + $0x1218] sm:$0xff]   ;;  %v16529_v41 = vld [vmem:[%s20916_s1 + $0x12a0] sm:$0xff]  }
 0x208   :  { %15047 = vmatpush3.bf16.msra.mxu0 %v16451_v52  ;;  %v16490_v52 = vld [vmem:[%s20916_s1 + $0x11d8] sm:$0xff]  }
 0x209   :  { %15048 = vmatprep.subr.bf16.mxu0 %v16453_v54  ;;  %15069 = vmatpush3.bf16.msra.mxu1 %v16452_v53  ;;  %v16491_v53 = vld [vmem:[%s20916_s1 + $0x1118] sm:$0xff]  }
 0x20a   :  { %15070 = vmatprep.subr.bf16.mxu1 %v16454_v55  ;;  %v16492_v54 = vld [vmem:[%s20916_s1 + $0x1198] sm:$0xff]   ;;  %v16493_v55 = vld [vmem:[%s20916_s1 + $0x1160] sm:$0xff]  }
 0x20c   :  { %15049 = vmatpush3.bf16.msra.mxu0 %v16455_v56  ;;  %v16494_v56 = vld [vmem:[%s20916_s1 + $0x11e0] sm:$0xff]  }
 0x20d   :  { %15050 = vmatprep.subr.bf16.mxu0 %v16457_v58  ;;  %15071 = vmatpush3.bf16.msra.mxu1 %v16456_v57  ;;  %v16495_v57 = vld [vmem:[%s20916_s1 + $0x1120] sm:$0xff]  }
 0x20e   :  { %15072 = vmatprep.subr.bf16.mxu1 %v16458_v59  ;;  %v16496_v58 = vld [vmem:[%s20916_s1 + $0x11a0] sm:$0xff]   ;;  %v16497_v59 = vld [vmem:[%s20916_s1 + $0x1168] sm:$0xff]  }
 0x210   :  { %15051 = vmatpush3.bf16.msra.mxu0 %v16459_v60  ;;  %v16498_v60 = vld [vmem:[%s20916_s1 + $0x11e8] sm:$0xff]  }
 0x211   :  { %15052 = vmatprep.subr.bf16.mxu0 %v16461_v62  ;;  %15073 = vmatpush3.bf16.msra.mxu1 %v16460_v61  ;;  %v16499_v62 = vld [vmem:[%s20916_s1 + $0x1128] sm:$0xff]  }
 0x212   :  { %15074 = vmatprep.subr.bf16.mxu1 %v16462_v63 }
 0x214   :  { %15053 = vmatpush3.bf16.msra.mxu0 %v16463_v0  ;;  %v16500_v0 = vld [vmem:[%s20916_s1 + $0x11a8] sm:$0xff]  }
 0x215   :  { %15054 = vmatprep.subr.bf16.mxu0 %v16465_v2  ;;  %15075 = vmatpush3.bf16.msra.mxu1 %v16464_v1 }
 0x216   :  { %v14752_v4 = vpop.f32.mrb[36].mxu0  ;;  %15076 = vmatprep.subr.bf16.mxu1 %v16466_v3 }
 0x217   :  { %v14753_v6 = vpop.f32.mrb[37].mxu0  ;;  %v14774_v8 = vpop.f32.mrb[36].mxu1 }
 0x218   :  { %v14754_v9 = vadd.f32 %v14753_v6, %v14752_v4  ;;  %v14755_v10 = vpop.f32.mrb[38].mxu0  ;;  %v14775_v11 = vpop.f32.mrb[37].mxu1  ;;  %15055 = vmatpush3.bf16.msra.mxu0 %v16467_v5  ;;  %v16501_v4 = vld [vmem:[%s20916_s1 + $0x1170] sm:$0xff]  }
 0x219   :  { %v14756_v13 = vpop.f32.mrb[39].mxu0  ;;  %v14776_v16 = vadd.f32 %v14775_v11, %v14774_v8  ;;  %v14777_v17 = vpop.f32.mrb[38].mxu1  ;;  %15056 = vmatprep.subr.bf16.mxu0 %v16469_v7  ;;  %15077 = vmatpush3.bf16.msra.mxu1 %v16468_v12  ;;  %v16502_v5 = vld [vmem:[%s20916_s1 + $0x11f0] sm:$0xff]  }
 0x21a   :  { %v11055_v15 = vadd.f32 %v14754_v9, %v18779_v39  ;;  %v14778_v19 = vpop.f32.mrb[39].mxu1  ;;  %15078 = vmatprep.subr.bf16.mxu1 %v16470_v14  ;;  %v2799_v39 = vcombine.high %v2777_v31, %v2777_v31  ;;  %v16503_v11 = vld [vmem:[%s20916_s1 + $0x1130] sm:$0xff]   ;;  %v16507_v17 = vld [vmem:[%s20916_s1 + $0x1138] sm:$0xff]  }
 0x21b   :  { %v16504_v13 = vld [vmem:[%s20916_s1 + $0x11b0] sm:$0xff]   ;;  %v2784_v19 = vrot.slane %v18906_v33, %v17206_v35  ;;  %v16522_v33 = vld [vmem:[%s20916_s1 + $0x1258] sm:$0xff]  }
 0x21c   :  { %v18880_v21 = vadd.f32 %v14776_v16, %v11055_v15  ;;  %15057 = vmatpush3.bf16.msra.mxu0 %v16471_v18  ;;  %v16505_v15 = vld [vmem:[%s20916_s1 + $0x1178] sm:$0xff]  }
 0x21d   :  { %15058 = vmatprep.subr.bf16.mxu0 %v16473_v20  ;;  %15079 = vmatpush3.bf16.msra.mxu1 %v16472_v22  ;;  %v16506_v16 = vld [vmem:[%s20916_s1 + $0x11f8] sm:$0xff]   ;;  %v16510_v20 = vld [vmem:[%s20916_s1 + $0x1240] sm:$0xff]  }
 0x21e   :  { %15080 = vmatprep.subr.bf16.mxu1 %v16474_v23  ;;  %v16508_v18 = vld [vmem:[%s20916_s1 + $0x11b8] sm:$0xff]   ;;  %v16512_v22 = vld [vmem:[%s20916_s1 + $0x1200] sm:$0xff]  }
 0x21f   :  { %v16513_v23 = vld [vmem:[%s20916_s1 + $0x1280] sm:$0xff]  }
 0x220   :  { %15059 = vmatpush3.bf16.msra.mxu0 %v16475_v24  ;;  %v2800_v24 = vcombine.high %v2784_v19, %v2784_v19 }
 0x221   :  { %15088 = vmatprep.subr.bf16.mxu0 %v16477_v27  ;;  %15081 = vmatpush3.bf16.msra.mxu1 %v16476_v29  ;;  %v16516_v27 = vld [vmem:[%s20916_s1 + $0x1208] sm:$0xff]   ;;  %v16518_v29 = vld [vmem:[%s20916_s1 + $0x1250] sm:$0xff]  }
 0x222   :  { %15110 = vmatprep.subr.bf16.mxu1 %v16478_v32  ;;  %v16521_v32 = vld [vmem:[%s20916_s1 + $0x1290] sm:$0xff]  }
 0x223   :  { %11613 = vmatmul.mubr.bf16.vlgmr.msra.gmra.mrb[64].mxu0 %v2777_v31  ;;  %v16520_v31 = vld [vmem:[%s20916_s1 + $0x1210] sm:$0xff]  }
 0x224   :  { %15089 = vmatpush3.bf16.msra.mxu0 %v16479_v34  ;;  %11653 = vmatmul.mubr.bf16.vlgmr.msra.gmra.mrb[64].mxu1 %v2799_v39  ;;  %v16523_v34 = vld [vmem:[%s20916_s1 + $0x12d8] sm:$0xff]   ;;  %v16527_v39 = vld [vmem:[%s20916_s1 + $0x12e0] sm:$0xff]  }
 0x225   :  { %15090 = vmatprep.subr.bf16.mxu0 %v16481_v40  ;;  %15111 = vmatpush3.bf16.msra.mxu1 %v16480_v37  ;;  %v16525_v37 = vld [vmem:[%s20916_s1 + $0x1298] sm:$0xff]   ;;  %v16528_v40 = vld [vmem:[%s20916_s1 + $0x1220] sm:$0xff]  }
 0x226   :  { %11692 = vmatprep.mubr.bf16.mxu0 %v2798_v43  ;;  %15112 = vmatprep.subr.bf16.mxu1 %v16482_v42  ;;  %v16530_v42 = vld [vmem:[%s20916_s1 + $0x1268] sm:$0xff]  }
 0x227   :  { %11732 = vmatprep.mubr.bf16.mxu1 %v2802_v46  ;;  %v16531_v43 = vld [vmem:[%s20916_s1 + $0x12e8] sm:$0xff]  }
 0x228   :  { %15091 = vmatpush3.bf16.msra.mxu0 %v16483_v44 }
 0x229   :  { %15092 = vmatprep.subr.bf16.mxu0 %v16485_v47  ;;  %15113 = vmatpush3.bf16.msra.mxu1 %v16484_v45  ;;  %v16532_v45 = vld [vmem:[%s20916_s1 + $0x1228] sm:$0xff]   ;;  %v16534_v47 = vld [vmem:[%s20916_s1 + $0x1270] sm:$0xff]  }
 0x22a   :  { %15114 = vmatprep.subr.bf16.mxu1 %v16486_v48 }
 0x22c   :  { %15093 = vmatpush3.bf16.msra.mxu0 %v16487_v49 }
 0x22d   :  { %15094 = vmatprep.subr.bf16.mxu0 %v16489_v51  ;;  %15115 = vmatpush3.bf16.msra.mxu1 %v16488_v50 }
 0x22e   :  { %15116 = vmatprep.subr.bf16.mxu1 %v16490_v52  ;;  %v16533_v52 = vld [vmem:[%s20916_s1 + $0x12a8] sm:$0xff]  }
 0x230   :  { %15095 = vmatpush3.bf16.msra.mxu0 %v16491_v53 }
 0x231   :  { %15096 = vmatprep.subr.bf16.mxu0 %v16493_v55  ;;  %15117 = vmatpush3.bf16.msra.mxu1 %v16492_v54  ;;  %v16535_v54 = vld [vmem:[%s20916_s1 + $0x12f0] sm:$0xff]  }
 0x232   :  { %15118 = vmatprep.subr.bf16.mxu1 %v16494_v56 }
 0x234   :  { %15097 = vmatpush3.bf16.msra.mxu0 %v16495_v57 }
 0x235   :  { %15098 = vmatprep.subr.bf16.mxu0 %v16497_v59  ;;  %15119 = vmatpush3.bf16.msra.mxu1 %v16496_v58  ;;  %v16536_v58 = vld [vmem:[%s20916_s1 + $0x1230] sm:$0xff]  }
 0x236   :  { %v14796_v61 = vpop.f32.mrb[40].mxu0  ;;  %15120 = vmatprep.subr.bf16.mxu1 %v16498_v60  ;;  %v16538_v60 = vld [vmem:[%s20916_s1 + $0x1278] sm:$0xff]  }
 0x237   :  { %v14797_v63 = vpop.f32.mrb[41].mxu0  ;;  %v14818_v1 = vpop.f32.mrb[40].mxu1 }
 0x238   :  { %v14798_v2 = vadd.f32 %v14797_v63, %v14796_v61  ;;  %v14799_v3 = vpop.f32.mrb[42].mxu0  ;;  %v14819_v6 = vpop.f32.mrb[41].mxu1  ;;  %15099 = vmatpush3.bf16.msra.mxu0 %v16499_v62  ;;  %v16537_v62 = vld [vmem:[%s20916_s1 + $0x12b0] sm:$0xff]   ;;  %v16539_v63 = vld [vmem:[%s20916_s1 + $0x12f8] sm:$0xff]  }
 0x239   :  { %v14800_v7 = vpop.f32.mrb[43].mxu0  ;;  %v14820_v9 = vadd.f32 %v14819_v6, %v14818_v1  ;;  %v14821_v10 = vpop.f32.mrb[42].mxu1  ;;  %15100 = vmatprep.subr.bf16.mxu0 %v16501_v4  ;;  %15121 = vmatpush3.bf16.msra.mxu1 %v16500_v0  ;;  %v16540_v0 = vld [vmem:[%s20916_s1 + $0x1238] sm:$0xff]   ;;  %v24_v1 = vld [vmem:[%s20917_s0 + $0x48] sm:$0xff]  ;;  %v16542_v3 = vld [vmem:[%s20916_s1 + $0x1340] sm:$0xff]  }
 0x23a   :  { %v11135_v8 = vadd.f32 %v14798_v2, %v18880_v21  ;;  %v14822_v12 = vpop.f32.mrb[43].mxu1  ;;  %15122 = vmatprep.subr.bf16.mxu1 %v16502_v5  ;;  %v16511_v21 = vld [vmem:[%s20916_s1 + $0x12c0] sm:$0xff]   ;;  %v2810_v2 = vrot.slane %v24_v1, %v17206_v35  ;;  %v2803_v4 = vcombine.high %v24_v1, %v24_v1  ;;  %v16541_v5 = vld [vmem:[%s20916_s1 + $0x12b8] sm:$0xff]   ;;  %v16579_v1 = vld [vmem:[%s20916_s1 + $0x1448] sm:$0xff]  }
 0x23b   :  { %v16544_v10 = vld [vmem:[%s20916_s1 + $0x1300] sm:$0xff]  }
 0x23c   :  { %v18991_v14 = vadd.f32 %v14820_v9, %v11135_v8  ;;  %15101 = vmatpush3.bf16.msra.mxu0 %v16503_v11  ;;  %v2818_v6 = vcombine.high %v2810_v2, %v2810_v2  ;;  %v2826_v7 = vrot.slane %v2810_v2, %v17206_v35  ;;  %v16543_v8 = vld [vmem:[%s20916_s1 + $0x13c0] sm:$0xff]   ;;  %v19118_v9 = vrot.slane %v2803_v4, %v17206_v35  ;;  %v16580_v2 = vld [vmem:[%s20916_s1 + $0x14c8] sm:$0xff]  }
 0x23d   :  { %15102 = vmatprep.subr.bf16.mxu0 %v16505_v15  ;;  %15123 = vmatpush3.bf16.msra.mxu1 %v16504_v13  ;;  %v16545_v12 = vld [vmem:[%s20916_s1 + $0x1380] sm:$0xff]   ;;  %v16546_v15 = vld [vmem:[%s20916_s1 + $0x1348] sm:$0xff]  }
 0x23e   :  { %15124 = vmatprep.subr.bf16.mxu1 %v16506_v16  ;;  %v2840_v11 = vrot.slane %v2818_v6, %v17206_v35  ;;  %v2819_v13 = vcombine.high %v19118_v9, %v19118_v9  ;;  %v16582_v4 = vld [vmem:[%s20916_s1 + $0x1488] sm:$0xff]   ;;  %v16584_v6 = vld [vmem:[%s20916_s1 + $0x14d0] sm:$0xff]  }
 0x240   :  { %15103 = vmatpush3.bf16.msra.mxu0 %v16507_v17  ;;  %v2850_v16 = vcombine.high %v2840_v11, %v2840_v11  ;;  %v16547_v17 = vld [vmem:[%s20916_s1 + $0x13c8] sm:$0xff]  }
 0x241   :  { %15132 = vmatprep.subr.bf16.mxu0 %v16510_v20  ;;  %15125 = vmatpush3.bf16.msra.mxu1 %v16508_v18  ;;  %v2847_v18 = vrot.slane %v2819_v13, %v17206_v35  ;;  %v16549_v20 = vld [vmem:[%s20916_s1 + $0x1388] sm:$0xff]   ;;  %v16591_v13 = vld [vmem:[%s20916_s1 + $0x1460] sm:$0xff]  }
 0x242   :  { %15154 = vmatprep.subr.bf16.mxu1 %v16511_v21 }
 0x243   :  { %11693 = vmatmul.mubr.bf16.vlgmr.msra.gmra.mrb[68].mxu0 %v2784_v19  ;;  %v16548_v19 = vld [vmem:[%s20916_s1 + $0x1308] sm:$0xff]   ;;  %v2851_v21 = vcombine.high %v2847_v18, %v2847_v18 }
 0x244   :  { %15133 = vmatpush3.bf16.msra.mxu0 %v16512_v22  ;;  %11733 = vmatmul.mubr.bf16.vlgmr.msra.gmra.mrb[68].mxu1 %v2800_v24  ;;  %v16550_v22 = vld [vmem:[%s20916_s1 + $0x1350] sm:$0xff]  }
 0x245   :  { %15134 = vmatprep.subr.bf16.mxu0 %v16514_v25  ;;  %15155 = vmatpush3.bf16.msra.mxu1 %v16513_v23  ;;  %v16551_v23 = vld [vmem:[%s20916_s1 + $0x13d0] sm:$0xff]  }
 0x246   :  { %15156 = vmatprep.subr.bf16.mxu1 %v16515_v26  ;;  %11772 = vmatprep.mubr.bf16.mxu0 %v2840_v11  ;;  %v16552_v24 = vld [vmem:[%s20916_s1 + $0x1310] sm:$0xff]   ;;  %v16554_v26 = vld [vmem:[%s20916_s1 + $0x1358] sm:$0xff]  }
 0x247   :  { %11812 = vmatprep.mubr.bf16.mxu1 %v2850_v16  ;;  %v16553_v25 = vld [vmem:[%s20916_s1 + $0x1390] sm:$0xff]   ;;  %v16589_v11 = vld [vmem:[%s20916_s1 + $0x1418] sm:$0xff]   ;;  %v16594_v16 = vld [vmem:[%s20916_s1 + $0x14a0] sm:$0xff]  }
 0x248   :  { %15135 = vmatpush3.bf16.msra.mxu0 %v16516_v27  ;;  %v16555_v27 = vld [vmem:[%s20916_s1 + $0x13d8] sm:$0xff]  }
 0x249   :  { %15136 = vmatprep.subr.bf16.mxu0 %v16518_v29  ;;  %15157 = vmatpush3.bf16.msra.mxu1 %v16517_v28  ;;  %v16556_v28 = vld [vmem:[%s20916_s1 + $0x1318] sm:$0xff]  }
 0x24a   :  { %15158 = vmatprep.subr.bf16.mxu1 %v16519_v30  ;;  %v16557_v29 = vld [vmem:[%s20916_s1 + $0x1398] sm:$0xff]   ;;  %v16558_v30 = vld [vmem:[%s20916_s1 + $0x1360] sm:$0xff]  }
 0x24c   :  { %15137 = vmatpush3.bf16.msra.mxu0 %v16520_v31  ;;  %v16559_v31 = vld [vmem:[%s20916_s1 + $0x13e0] sm:$0xff]  }
 0x24d   :  { %15138 = vmatprep.subr.bf16.mxu0 %v16522_v33  ;;  %15159 = vmatpush3.bf16.msra.mxu1 %v16521_v32  ;;  %v16560_v32 = vld [vmem:[%s20916_s1 + $0x1320] sm:$0xff]  }
 0x24e   :  { %15160 = vmatprep.subr.bf16.mxu1 %v16523_v34  ;;  %v16561_v33 = vld [vmem:[%s20916_s1 + $0x13a0] sm:$0xff]   ;;  %v16562_v34 = vld [vmem:[%s20916_s1 + $0x1368] sm:$0xff]  }
 0x250   :  { %15139 = vmatpush3.bf16.msra.mxu0 %v16524_v36  ;;  %v16563_v36 = vld [vmem:[%s20916_s1 + $0x13e8] sm:$0xff]  }
 0x251   :  { %15140 = vmatprep.subr.bf16.mxu0 %v16526_v38  ;;  %15161 = vmatpush3.bf16.msra.mxu1 %v16525_v37  ;;  %v16564_v38 = vld [vmem:[%s20916_s1 + $0x1328] sm:$0xff]  }
 0x252   :  { %15162 = vmatprep.subr.bf16.mxu1 %v16527_v39 }
 0x254   :  { %15141 = vmatpush3.bf16.msra.mxu0 %v16528_v40  ;;  %v16565_v40 = vld [vmem:[%s20916_s1 + $0x13a8] sm:$0xff]  }
 0x255   :  { %15142 = vmatprep.subr.bf16.mxu0 %v16530_v42  ;;  %15163 = vmatpush3.bf16.msra.mxu1 %v16529_v41 }
 0x256   :  { %v14840_v44 = vpop.f32.mrb[44].mxu0  ;;  %15164 = vmatprep.subr.bf16.mxu1 %v16531_v43 }
 0x257   :  { %v14841_v46 = vpop.f32.mrb[45].mxu0  ;;  %v14862_v48 = vpop.f32.mrb[44].mxu1 }
 0x258   :  { %v14842_v49 = vadd.f32 %v14841_v46, %v14840_v44  ;;  %v14843_v50 = vpop.f32.mrb[46].mxu0  ;;  %v14863_v51 = vpop.f32.mrb[45].mxu1  ;;  %15143 = vmatpush3.bf16.msra.mxu0 %v16532_v45  ;;  %v16566_v44 = vld [vmem:[%s20916_s1 + $0x1370] sm:$0xff]  }
 0x259   :  { %v14844_v53 = vpop.f32.mrb[47].mxu0  ;;  %v14864_v56 = vadd.f32 %v14863_v51, %v14862_v48  ;;  %v14865_v57 = vpop.f32.mrb[46].mxu1  ;;  %15144 = vmatprep.subr.bf16.mxu0 %v16534_v47  ;;  %15165 = vmatpush3.bf16.msra.mxu1 %v16533_v52  ;;  %v16567_v45 = vld [vmem:[%s20916_s1 + $0x13f0] sm:$0xff]  }
 0x25a   :  { %v11215_v55 = vadd.f32 %v14842_v49, %v18991_v14  ;;  %v14866_v59 = vpop.f32.mrb[47].mxu1  ;;  %15166 = vmatprep.subr.bf16.mxu1 %v16535_v54  ;;  %v2848_v14 = vcombine.high %v2826_v7, %v2826_v7  ;;  %v16568_v51 = vld [vmem:[%s20916_s1 + $0x1330] sm:$0xff]   ;;  %v16572_v57 = vld [vmem:[%s20916_s1 + $0x1338] sm:$0xff]  }
 0x25b   :  { %v16569_v53 = vld [vmem:[%s20916_s1 + $0x13b0] sm:$0xff]   ;;  %v2833_v59 = vrot.slane %v19118_v9, %v17206_v35  ;;  %v16587_v9 = vld [vmem:[%s20916_s1 + $0x1458] sm:$0xff]  }
 0x25c   :  { %v19092_v61 = vadd.f32 %v14864_v56, %v11215_v55  ;;  %15145 = vmatpush3.bf16.msra.mxu0 %v16536_v58  ;;  %v16570_v55 = vld [vmem:[%s20916_s1 + $0x1378] sm:$0xff]  }
 0x25d   :  { %15146 = vmatprep.subr.bf16.mxu0 %v16538_v60  ;;  %15167 = vmatpush3.bf16.msra.mxu1 %v16537_v62  ;;  %v16571_v56 = vld [vmem:[%s20916_s1 + $0x13f8] sm:$0xff]   ;;  %v16575_v60 = vld [vmem:[%s20916_s1 + $0x1440] sm:$0xff]  }
 0x25e   :  { %15168 = vmatprep.subr.bf16.mxu1 %v16539_v63  ;;  %v16573_v58 = vld [vmem:[%s20916_s1 + $0x13b8] sm:$0xff]   ;;  %v16577_v62 = vld [vmem:[%s20916_s1 + $0x1400] sm:$0xff]  }
 0x25f   :  { %v16578_v63 = vld [vmem:[%s20916_s1 + $0x1480] sm:$0xff]  }
 0x260   :  { %15147 = vmatpush3.bf16.msra.mxu0 %v16540_v0  ;;  %v2849_v0 = vcombine.high %v2833_v59, %v2833_v59 }
 0x261   :  { %15176 = vmatprep.subr.bf16.mxu0 %v16542_v3  ;;  %15169 = vmatpush3.bf16.msra.mxu1 %v16541_v5  ;;  %v16581_v3 = vld [vmem:[%s20916_s1 + $0x1408] sm:$0xff]   ;;  %v16583_v5 = vld [vmem:[%s20916_s1 + $0x1450] sm:$0xff]  }
 0x262   :  { %15198 = vmatprep.subr.bf16.mxu1 %v16543_v8  ;;  %v16586_v8 = vld [vmem:[%s20916_s1 + $0x1490] sm:$0xff]  }
 0x263   :  { %11773 = vmatmul.mubr.bf16.vlgmr.msra.gmra.mrb[72].mxu0 %v2826_v7  ;;  %v16585_v7 = vld [vmem:[%s20916_s1 + $0x1410] sm:$0xff]  }
 0x264   :  { %15177 = vmatpush3.bf16.msra.mxu0 %v16544_v10  ;;  %11813 = vmatmul.mubr.bf16.vlgmr.msra.gmra.mrb[72].mxu1 %v2848_v14  ;;  %v16588_v10 = vld [vmem:[%s20916_s1 + $0x14d8] sm:$0xff]   ;;  %v16592_v14 = vld [vmem:[%s20916_s1 + $0x14e0] sm:$0xff]  }
 0x265   :  { %15178 = vmatprep.subr.bf16.mxu0 %v16546_v15  ;;  %15199 = vmatpush3.bf16.msra.mxu1 %v16545_v12  ;;  %v16590_v12 = vld [vmem:[%s20916_s1 + $0x1498] sm:$0xff]   ;;  %v16593_v15 = vld [vmem:[%s20916_s1 + $0x1420] sm:$0xff]  }
 0x266   :  { %11852 = vmatprep.mubr.bf16.mxu0 %v2847_v18  ;;  %15200 = vmatprep.subr.bf16.mxu1 %v16547_v17  ;;  %v16595_v17 = vld [vmem:[%s20916_s1 + $0x1468] sm:$0xff]  }
 0x267   :  { %11892 = vmatprep.mubr.bf16.mxu1 %v2851_v21  ;;  %v16596_v18 = vld [vmem:[%s20916_s1 + $0x14e8] sm:$0xff]  }
 0x268   :  { %15179 = vmatpush3.bf16.msra.mxu0 %v16548_v19 }
 0x269   :  { %15180 = vmatprep.subr.bf16.mxu0 %v16550_v22  ;;  %15201 = vmatpush3.bf16.msra.mxu1 %v16549_v20  ;;  %v16597_v20 = vld [vmem:[%s20916_s1 + $0x1428] sm:$0xff]   ;;  %v16599_v22 = vld [vmem:[%s20916_s1 + $0x1470] sm:$0xff]  }
 0x26a   :  { %15202 = vmatprep.subr.bf16.mxu1 %v16551_v23 }
 0x26c   :  { %15181 = vmatpush3.bf16.msra.mxu0 %v16552_v24 }
 0x26d   :  { %15182 = vmatprep.subr.bf16.mxu0 %v16554_v26  ;;  %15203 = vmatpush3.bf16.msra.mxu1 %v16553_v25 }
 0x26e   :  { %15204 = vmatprep.subr.bf16.mxu1 %v16555_v27  ;;  %v16598_v27 = vld [vmem:[%s20916_s1 + $0x14a8] sm:$0xff]  }
 0x270   :  { %15183 = vmatpush3.bf16.msra.mxu0 %v16556_v28 }
 0x271   :  { %15184 = vmatprep.subr.bf16.mxu0 %v16558_v30  ;;  %15205 = vmatpush3.bf16.msra.mxu1 %v16557_v29  ;;  %v16600_v29 = vld [vmem:[%s20916_s1 + $0x14f0] sm:$0xff]  }
 0x272   :  { %15206 = vmatprep.subr.bf16.mxu1 %v16559_v31 }
 0x274   :  { %15185 = vmatpush3.bf16.msra.mxu0 %v16560_v32 }
 0x275   :  { %15186 = vmatprep.subr.bf16.mxu0 %v16562_v34  ;;  %15207 = vmatpush3.bf16.msra.mxu1 %v16561_v33  ;;  %v16601_v33 = vld [vmem:[%s20916_s1 + $0x1430] sm:$0xff]  }
 0x276   :  { %v14884_v37 = vpop.f32.mrb[48].mxu0  ;;  %15208 = vmatprep.subr.bf16.mxu1 %v16563_v36  ;;  %v16603_v36 = vld [vmem:[%s20916_s1 + $0x1478] sm:$0xff]  }
 0x277   :  { %v14885_v39 = vpop.f32.mrb[49].mxu0  ;;  %v14906_v41 = vpop.f32.mrb[48].mxu1 }
 0x278   :  { %v14886_v42 = vadd.f32 %v14885_v39, %v14884_v37  ;;  %v14887_v43 = vpop.f32.mrb[50].mxu0  ;;  %v14907_v46 = vpop.f32.mrb[49].mxu1  ;;  %15187 = vmatpush3.bf16.msra.mxu0 %v16564_v38  ;;  %v16602_v38 = vld [vmem:[%s20916_s1 + $0x14b0] sm:$0xff]   ;;  %v16604_v39 = vld [vmem:[%s20916_s1 + $0x14f8] sm:$0xff]  }
 0x279   :  { %v14888_v47 = vpop.f32.mrb[51].mxu0  ;;  %v14908_v49 = vadd.f32 %v14907_v46, %v14906_v41  ;;  %v14909_v50 = vpop.f32.mrb[50].mxu1  ;;  %15188 = vmatprep.subr.bf16.mxu0 %v16566_v44  ;;  %15209 = vmatpush3.bf16.msra.mxu1 %v16565_v40  ;;  %v16605_v40 = vld [vmem:[%s20916_s1 + $0x1438] sm:$0xff]   ;;  %v25_v41 = vld [vmem:[%s20917_s0 + $0x50] sm:$0xff]  ;;  %v16607_v43 = vld [vmem:[%s20916_s1 + $0x1540] sm:$0xff]  }
 0x27a   :  { %v11295_v48 = vadd.f32 %v14886_v42, %v19092_v61  ;;  %v14910_v52 = vpop.f32.mrb[51].mxu1  ;;  %15210 = vmatprep.subr.bf16.mxu1 %v16567_v45  ;;  %v16576_v61 = vld [vmem:[%s20916_s1 + $0x14c0] sm:$0xff]   ;;  %v2859_v42 = vrot.slane %v25_v41, %v17206_v35  ;;  %v2852_v44 = vcombine.high %v25_v41, %v25_v41  ;;  %v16606_v45 = vld [vmem:[%s20916_s1 + $0x14b8] sm:$0xff]   ;;  %v16644_v41 = vld [vmem:[%s20916_s1 + $0x1648] sm:$0xff]  }
 0x27b   :  { %v16609_v50 = vld [vmem:[%s20916_s1 + $0x1500] sm:$0xff]  }
 0x27c   :  { %v19203_v54 = vadd.f32 %v14908_v49, %v11295_v48  ;;  %15189 = vmatpush3.bf16.msra.mxu0 %v16568_v51  ;;  %v2867_v46 = vcombine.high %v2859_v42, %v2859_v42  ;;  %v2875_v47 = vrot.slane %v2859_v42, %v17206_v35  ;;  %v16608_v48 = vld [vmem:[%s20916_s1 + $0x15c0] sm:$0xff]   ;;  %v19330_v49 = vrot.slane %v2852_v44, %v17206_v35  ;;  %v16645_v42 = vld [vmem:[%s20916_s1 + $0x16c8] sm:$0xff]  }
 0x27d   :  { %15190 = vmatprep.subr.bf16.mxu0 %v16570_v55  ;;  %15211 = vmatpush3.bf16.msra.mxu1 %v16569_v53  ;;  %v16610_v52 = vld [vmem:[%s20916_s1 + $0x1580] sm:$0xff]   ;;  %v16611_v55 = vld [vmem:[%s20916_s1 + $0x1548] sm:$0xff]  }
 0x27e   :  { %15212 = vmatprep.subr.bf16.mxu1 %v16571_v56  ;;  %v2889_v51 = vrot.slane %v2867_v46, %v17206_v35  ;;  %v2868_v53 = vcombine.high %v19330_v49, %v19330_v49  ;;  %v16647_v44 = vld [vmem:[%s20916_s1 + $0x1688] sm:$0xff]   ;;  %v16649_v46 = vld [vmem:[%s20916_s1 + $0x16d0] sm:$0xff]  }
 0x280   :  { %15191 = vmatpush3.bf16.msra.mxu0 %v16572_v57  ;;  %v2899_v56 = vcombine.high %v2889_v51, %v2889_v51  ;;  %v16612_v57 = vld [vmem:[%s20916_s1 + $0x15c8] sm:$0xff]  }
 0x281   :  { %15220 = vmatprep.subr.bf16.mxu0 %v16575_v60  ;;  %15213 = vmatpush3.bf16.msra.mxu1 %v16573_v58  ;;  %v2896_v58 = vrot.slane %v2868_v53, %v17206_v35  ;;  %v16614_v60 = vld [vmem:[%s20916_s1 + $0x1588] sm:$0xff]   ;;  %v16656_v53 = vld [vmem:[%s20916_s1 + $0x1660] sm:$0xff]  }
 0x282   :  { %15242 = vmatprep.subr.bf16.mxu1 %v16576_v61 }
 0x283   :  { %11853 = vmatmul.mubr.bf16.vlgmr.msra.gmra.mrb[76].mxu0 %v2833_v59  ;;  %v16613_v59 = vld [vmem:[%s20916_s1 + $0x1508] sm:$0xff]   ;;  %v2900_v61 = vcombine.high %v2896_v58, %v2896_v58 }
 0x284   :  { %15221 = vmatpush3.bf16.msra.mxu0 %v16577_v62  ;;  %11893 = vmatmul.mubr.bf16.vlgmr.msra.gmra.mrb[76].mxu1 %v2849_v0  ;;  %v16615_v62 = vld [vmem:[%s20916_s1 + $0x1550] sm:$0xff]  }
 0x285   :  { %15222 = vmatprep.subr.bf16.mxu0 %v16579_v1  ;;  %15243 = vmatpush3.bf16.msra.mxu1 %v16578_v63  ;;  %v16616_v63 = vld [vmem:[%s20916_s1 + $0x15d0] sm:$0xff]  }
 0x286   :  { %15244 = vmatprep.subr.bf16.mxu1 %v16580_v2  ;;  %11932 = vmatprep.mubr.bf16.mxu0 %v2889_v51  ;;  %v16617_v0 = vld [vmem:[%s20916_s1 + $0x1510] sm:$0xff]   ;;  %v16619_v2 = vld [vmem:[%s20916_s1 + $0x1558] sm:$0xff]  }
 0x287   :  { %11972 = vmatprep.mubr.bf16.mxu1 %v2899_v56  ;;  %v16618_v1 = vld [vmem:[%s20916_s1 + $0x1590] sm:$0xff]   ;;  %v16654_v51 = vld [vmem:[%s20916_s1 + $0x1618] sm:$0xff]   ;;  %v16659_v56 = vld [vmem:[%s20916_s1 + $0x16a0] sm:$0xff]  }
 0x288   :  { %15223 = vmatpush3.bf16.msra.mxu0 %v16581_v3  ;;  %v16620_v3 = vld [vmem:[%s20916_s1 + $0x15d8] sm:$0xff]  }
 0x289   :  { %15224 = vmatprep.subr.bf16.mxu0 %v16583_v5  ;;  %15245 = vmatpush3.bf16.msra.mxu1 %v16582_v4  ;;  %v16621_v4 = vld [vmem:[%s20916_s1 + $0x1518] sm:$0xff]  }
 0x28a   :  { %15246 = vmatprep.subr.bf16.mxu1 %v16584_v6  ;;  %v16622_v5 = vld [vmem:[%s20916_s1 + $0x1598] sm:$0xff]   ;;  %v16623_v6 = vld [vmem:[%s20916_s1 + $0x1560] sm:$0xff]  }
 0x28c   :  { %15225 = vmatpush3.bf16.msra.mxu0 %v16585_v7  ;;  %v16624_v7 = vld [vmem:[%s20916_s1 + $0x15e0] sm:$0xff]  }
 0x28d   :  { %15226 = vmatprep.subr.bf16.mxu0 %v16587_v9  ;;  %15247 = vmatpush3.bf16.msra.mxu1 %v16586_v8  ;;  %v16625_v8 = vld [vmem:[%s20916_s1 + $0x1520] sm:$0xff]  }
 0x28e   :  { %15248 = vmatprep.subr.bf16.mxu1 %v16588_v10  ;;  %v16626_v9 = vld [vmem:[%s20916_s1 + $0x15a0] sm:$0xff]   ;;  %v16627_v10 = vld [vmem:[%s20916_s1 + $0x1568] sm:$0xff]  }
 0x290   :  { %15227 = vmatpush3.bf16.msra.mxu0 %v16589_v11  ;;  %v16628_v11 = vld [vmem:[%s20916_s1 + $0x15e8] sm:$0xff]  }
 0x291   :  { %15228 = vmatprep.subr.bf16.mxu0 %v16591_v13  ;;  %15249 = vmatpush3.bf16.msra.mxu1 %v16590_v12  ;;  %v16629_v13 = vld [vmem:[%s20916_s1 + $0x1528] sm:$0xff]  }
 0x292   :  { %15250 = vmatprep.subr.bf16.mxu1 %v16592_v14 }
 0x294   :  { %15229 = vmatpush3.bf16.msra.mxu0 %v16593_v15  ;;  %v16630_v15 = vld [vmem:[%s20916_s1 + $0x15a8] sm:$0xff]  }
 0x295   :  { %15230 = vmatprep.subr.bf16.mxu0 %v16595_v17  ;;  %15251 = vmatpush3.bf16.msra.mxu1 %v16594_v16 }
 0x296   :  { %v14928_v19 = vpop.f32.mrb[52].mxu0  ;;  %15252 = vmatprep.subr.bf16.mxu1 %v16596_v18 }
 0x297   :  { %v14929_v21 = vpop.f32.mrb[53].mxu0  ;;  %v14950_v23 = vpop.f32.mrb[52].mxu1 }
 0x298   :  { %v14930_v24 = vadd.f32 %v14929_v21, %v14928_v19  ;;  %v14931_v25 = vpop.f32.mrb[54].mxu0  ;;  %v14951_v26 = vpop.f32.mrb[53].mxu1  ;;  %15231 = vmatpush3.bf16.msra.mxu0 %v16597_v20  ;;  %v16631_v19 = vld [vmem:[%s20916_s1 + $0x1570] sm:$0xff]  }
 0x299   :  { %v14932_v28 = vpop.f32.mrb[55].mxu0  ;;  %v14952_v31 = vadd.f32 %v14951_v26, %v14950_v23  ;;  %v14953_v32 = vpop.f32.mrb[54].mxu1  ;;  %15232 = vmatprep.subr.bf16.mxu0 %v16599_v22  ;;  %15253 = vmatpush3.bf16.msra.mxu1 %v16598_v27  ;;  %v16632_v20 = vld [vmem:[%s20916_s1 + $0x15f0] sm:$0xff]  }
 0x29a   :  { %v11375_v30 = vadd.f32 %v14930_v24, %v19203_v54  ;;  %v14954_v34 = vpop.f32.mrb[55].mxu1  ;;  %15254 = vmatprep.subr.bf16.mxu1 %v16600_v29  ;;  %v2897_v54 = vcombine.high %v2875_v47, %v2875_v47  ;;  %v16633_v26 = vld [vmem:[%s20916_s1 + $0x1530] sm:$0xff]   ;;  %v16637_v32 = vld [vmem:[%s20916_s1 + $0x1538] sm:$0xff]  }
 0x29b   :  { %v16634_v28 = vld [vmem:[%s20916_s1 + $0x15b0] sm:$0xff]   ;;  %v2882_v34 = vrot.slane %v19330_v49, %v17206_v35  ;;  %v16652_v49 = vld [vmem:[%s20916_s1 + $0x1658] sm:$0xff]  }
 0x29c   :  { %v19304_v37 = vadd.f32 %v14952_v31, %v11375_v30  ;;  %15233 = vmatpush3.bf16.msra.mxu0 %v16601_v33  ;;  %v16635_v30 = vld [vmem:[%s20916_s1 + $0x1578] sm:$0xff]  }
 0x29d   :  { %15234 = vmatprep.subr.bf16.mxu0 %v16603_v36  ;;  %15255 = vmatpush3.bf16.msra.mxu1 %v16602_v38  ;;  %v16636_v31 = vld [vmem:[%s20916_s1 + $0x15f8] sm:$0xff]   ;;  %v16640_v36 = vld [vmem:[%s20916_s1 + $0x1640] sm:$0xff]  }
 0x29e   :  { %15256 = vmatprep.subr.bf16.mxu1 %v16604_v39  ;;  %v16638_v33 = vld [vmem:[%s20916_s1 + $0x15b8] sm:$0xff]   ;;  %v16642_v38 = vld [vmem:[%s20916_s1 + $0x1600] sm:$0xff]  }
 0x29f   :  { %v16643_v39 = vld [vmem:[%s20916_s1 + $0x1680] sm:$0xff]  }
 0x2a0   :  { %15235 = vmatpush3.bf16.msra.mxu0 %v16605_v40  ;;  %v2898_v40 = vcombine.high %v2882_v34, %v2882_v34 }
 0x2a1   :  { %15264 = vmatprep.subr.bf16.mxu0 %v16607_v43  ;;  %15257 = vmatpush3.bf16.msra.mxu1 %v16606_v45  ;;  %v16646_v43 = vld [vmem:[%s20916_s1 + $0x1608] sm:$0xff]   ;;  %v16648_v45 = vld [vmem:[%s20916_s1 + $0x1650] sm:$0xff]  }
 0x2a2   :  { %15286 = vmatprep.subr.bf16.mxu1 %v16608_v48  ;;  %v16651_v48 = vld [vmem:[%s20916_s1 + $0x1690] sm:$0xff]  }
 0x2a3   :  { %11933 = vmatmul.mubr.bf16.vlgmr.msra.gmra.mrb[80].mxu0 %v2875_v47  ;;  %v16650_v47 = vld [vmem:[%s20916_s1 + $0x1610] sm:$0xff]  }
 0x2a4   :  { %15265 = vmatpush3.bf16.msra.mxu0 %v16609_v50  ;;  %11973 = vmatmul.mubr.bf16.vlgmr.msra.gmra.mrb[80].mxu1 %v2897_v54  ;;  %v16653_v50 = vld [vmem:[%s20916_s1 + $0x16d8] sm:$0xff]   ;;  %v16657_v54 = vld [vmem:[%s20916_s1 + $0x16e0] sm:$0xff]  }
 0x2a5   :  { %15266 = vmatprep.subr.bf16.mxu0 %v16611_v55  ;;  %15287 = vmatpush3.bf16.msra.mxu1 %v16610_v52  ;;  %v16655_v52 = vld [vmem:[%s20916_s1 + $0x1698] sm:$0xff]   ;;  %v16658_v55 = vld [vmem:[%s20916_s1 + $0x1620] sm:$0xff]  }
 0x2a6   :  { %12012 = vmatprep.mubr.bf16.mxu0 %v2896_v58  ;;  %15288 = vmatprep.subr.bf16.mxu1 %v16612_v57  ;;  %v16660_v57 = vld [vmem:[%s20916_s1 + $0x1668] sm:$0xff]  }
 0x2a7   :  { %12052 = vmatprep.mubr.bf16.mxu1 %v2900_v61  ;;  %v16661_v58 = vld [vmem:[%s20916_s1 + $0x16e8] sm:$0xff]  }
 0x2a8   :  { %15267 = vmatpush3.bf16.msra.mxu0 %v16613_v59 }
 0x2a9   :  { %15268 = vmatprep.subr.bf16.mxu0 %v16615_v62  ;;  %15289 = vmatpush3.bf16.msra.mxu1 %v16614_v60  ;;  %v16662_v60 = vld [vmem:[%s20916_s1 + $0x1628] sm:$0xff]   ;;  %v16664_v62 = vld [vmem:[%s20916_s1 + $0x1670] sm:$0xff]  }
 0x2aa   :  { %15290 = vmatprep.subr.bf16.mxu1 %v16616_v63 }
 0x2ac   :  { %15269 = vmatpush3.bf16.msra.mxu0 %v16617_v0 }
 0x2ad   :  { %15270 = vmatprep.subr.bf16.mxu0 %v16619_v2  ;;  %15291 = vmatpush3.bf16.msra.mxu1 %v16618_v1 }
 0x2ae   :  { %15292 = vmatprep.subr.bf16.mxu1 %v16620_v3  ;;  %v16663_v3 = vld [vmem:[%s20916_s1 + $0x16a8] sm:$0xff]  }
 0x2b0   :  { %15271 = vmatpush3.bf16.msra.mxu0 %v16621_v4 }
 0x2b1   :  { %15272 = vmatprep.subr.bf16.mxu0 %v16623_v6  ;;  %15293 = vmatpush3.bf16.msra.mxu1 %v16622_v5  ;;  %v16665_v5 = vld [vmem:[%s20916_s1 + $0x16f0] sm:$0xff]  }
 0x2b2   :  { %15294 = vmatprep.subr.bf16.mxu1 %v16624_v7 }
 0x2b4   :  { %15273 = vmatpush3.bf16.msra.mxu0 %v16625_v8 }
 0x2b5   :  { %15274 = vmatprep.subr.bf16.mxu0 %v16627_v10  ;;  %15295 = vmatpush3.bf16.msra.mxu1 %v16626_v9  ;;  %v16666_v9 = vld [vmem:[%s20916_s1 + $0x1630] sm:$0xff]  }
 0x2b6   :  { %v14972_v12 = vpop.f32.mrb[56].mxu0  ;;  %15296 = vmatprep.subr.bf16.mxu1 %v16628_v11  ;;  %v16668_v11 = vld [vmem:[%s20916_s1 + $0x1678] sm:$0xff]  }
 0x2b7   :  { %v14973_v14 = vpop.f32.mrb[57].mxu0  ;;  %v14994_v16 = vpop.f32.mrb[56].mxu1 }
 0x2b8   :  { %v14974_v17 = vadd.f32 %v14973_v14, %v14972_v12  ;;  %v14975_v18 = vpop.f32.mrb[58].mxu0  ;;  %v14995_v21 = vpop.f32.mrb[57].mxu1  ;;  %15275 = vmatpush3.bf16.msra.mxu0 %v16629_v13  ;;  %v16667_v13 = vld [vmem:[%s20916_s1 + $0x16b0] sm:$0xff]   ;;  %v16669_v14 = vld [vmem:[%s20916_s1 + $0x16f8] sm:$0xff]  }
 0x2b9   :  { %v14976_v22 = vpop.f32.mrb[59].mxu0  ;;  %v14996_v24 = vadd.f32 %v14995_v21, %v14994_v16  ;;  %v14997_v25 = vpop.f32.mrb[58].mxu1  ;;  %15276 = vmatprep.subr.bf16.mxu0 %v16631_v19  ;;  %15297 = vmatpush3.bf16.msra.mxu1 %v16630_v15  ;;  %v16670_v15 = vld [vmem:[%s20916_s1 + $0x1638] sm:$0xff]   ;;  %v16672_v18 = vld [vmem:[%s20916_s1 + $0x1740] sm:$0xff]  }
 0x2ba   :  { %v11455_v23 = vadd.f32 %v14974_v17, %v19304_v37  ;;  %v14998_v27 = vpop.f32.mrb[59].mxu1  ;;  %15298 = vmatprep.subr.bf16.mxu1 %v16632_v20  ;;  %v16641_v37 = vld [vmem:[%s20916_s1 + $0x16c0] sm:$0xff]   ;;  %v26_v16 = vld [vmem:[%s20917_s0 + $0x58] sm:$0xff] }
 0x2bb   :  { %v2908_v17 = vrot.slane %v26_v16, %v17206_v35  ;;  %v2901_v19 = vcombine.high %v26_v16, %v26_v16  ;;  %v16671_v20 = vld [vmem:[%s20916_s1 + $0x16b8] sm:$0xff]   ;;  %v16674_v25 = vld [vmem:[%s20916_s1 + $0x1700] sm:$0xff]   ;;  %v16709_v16 = vld [vmem:[%s20916_s1 + $0x1848] sm:$0xff]  }
 0x2bc   :  { %v19415_v29 = vadd.f32 %v14996_v24, %v11455_v23  ;;  %15277 = vmatpush3.bf16.msra.mxu0 %v16633_v26  ;;  %v16673_v23 = vld [vmem:[%s20916_s1 + $0x17c0] sm:$0xff]  }
 0x2bd   :  { %15278 = vmatprep.subr.bf16.mxu0 %v16635_v30  ;;  %15299 = vmatpush3.bf16.msra.mxu1 %v16634_v28  ;;  %v2916_v21 = vcombine.high %v2908_v17, %v2908_v17  ;;  %v2924_v22 = vrot.slane %v2908_v17, %v17206_v35  ;;  %v19542_v24 = vrot.slane %v2901_v19, %v17206_v35  ;;  %v16675_v27 = vld [vmem:[%s20916_s1 + $0x1780] sm:$0xff]   ;;  %v16676_v30 = vld [vmem:[%s20916_s1 + $0x1748] sm:$0xff]  }
 0x2be   :  { %15300 = vmatprep.subr.bf16.mxu1 %v16636_v31  ;;  %v16710_v17 = vld [vmem:[%s20916_s1 + $0x18c8] sm:$0xff]  }
 0x2bf   :  { %v2938_v26 = vrot.slane %v2916_v21, %v17206_v35  ;;  %v2917_v28 = vcombine.high %v19542_v24, %v19542_v24  ;;  %v16712_v19 = vld [vmem:[%s20916_s1 + $0x1888] sm:$0xff]   ;;  %v16714_v21 = vld [vmem:[%s20916_s1 + $0x18d0] sm:$0xff]  }
 0x2c0   :  { %15279 = vmatpush3.bf16.msra.mxu0 %v16637_v32  ;;  %v16677_v32 = vld [vmem:[%s20916_s1 + $0x17c8] sm:$0xff]  }
 0x2c1   :  { %15308 = vmatprep.subr.bf16.mxu0 %v16640_v36  ;;  %15301 = vmatpush3.bf16.msra.mxu1 %v16638_v33  ;;  %v2948_v31 = vcombine.high %v2938_v26, %v2938_v26  ;;  %v2945_v33 = vrot.slane %v2917_v28, %v17206_v35  ;;  %v16679_v36 = vld [vmem:[%s20916_s1 + $0x1788] sm:$0xff]   ;;  %v16721_v28 = vld [vmem:[%s20916_s1 + $0x1860] sm:$0xff]  }
 0x2c2   :  { %15330 = vmatprep.subr.bf16.mxu1 %v16641_v37 }
 0x2c3   :  { %12013 = vmatmul.mubr.bf16.vlgmr.msra.gmra.mrb[84].mxu0 %v2882_v34  ;;  %v16678_v34 = vld [vmem:[%s20916_s1 + $0x1708] sm:$0xff]   ;;  %v2949_v37 = vcombine.high %v2945_v33, %v2945_v33 }
 0x2c4   :  { %15309 = vmatpush3.bf16.msra.mxu0 %v16642_v38  ;;  %12053 = vmatmul.mubr.bf16.vlgmr.msra.gmra.mrb[84].mxu1 %v2898_v40  ;;  %v16680_v38 = vld [vmem:[%s20916_s1 + $0x1750] sm:$0xff]  }
 0x2c5   :  { %15310 = vmatprep.subr.bf16.mxu0 %v16644_v41  ;;  %15331 = vmatpush3.bf16.msra.mxu1 %v16643_v39  ;;  %v16681_v39 = vld [vmem:[%s20916_s1 + $0x17d0] sm:$0xff]  }
 0x2c6   :  { %15332 = vmatprep.subr.bf16.mxu1 %v16645_v42  ;;  %12092 = vmatprep.mubr.bf16.mxu0 %v2938_v26  ;;  %v16682_v40 = vld [vmem:[%s20916_s1 + $0x1710] sm:$0xff]   ;;  %v16684_v42 = vld [vmem:[%s20916_s1 + $0x1758] sm:$0xff]  }
 0x2c7   :  { %12132 = vmatprep.mubr.bf16.mxu1 %v2948_v31  ;;  %v16683_v41 = vld [vmem:[%s20916_s1 + $0x1790] sm:$0xff]   ;;  %v16719_v26 = vld [vmem:[%s20916_s1 + $0x1818] sm:$0xff]   ;;  %v16724_v31 = vld [vmem:[%s20916_s1 + $0x18a0] sm:$0xff]  }
 0x2c8   :  { %15311 = vmatpush3.bf16.msra.mxu0 %v16646_v43  ;;  %v16685_v43 = vld [vmem:[%s20916_s1 + $0x17d8] sm:$0xff]  }
 0x2c9   :  { %15312 = vmatprep.subr.bf16.mxu0 %v16648_v45  ;;  %15333 = vmatpush3.bf16.msra.mxu1 %v16647_v44  ;;  %v16686_v44 = vld [vmem:[%s20916_s1 + $0x1718] sm:$0xff]  }
 0x2ca   :  { %15334 = vmatprep.subr.bf16.mxu1 %v16649_v46  ;;  %v16687_v45 = vld [vmem:[%s20916_s1 + $0x1798] sm:$0xff]   ;;  %v16688_v46 = vld [vmem:[%s20916_s1 + $0x1760] sm:$0xff]  }
 0x2cc   :  { %15313 = vmatpush3.bf16.msra.mxu0 %v16650_v47  ;;  %v16689_v47 = vld [vmem:[%s20916_s1 + $0x17e0] sm:$0xff]  }
 0x2cd   :  { %15314 = vmatprep.subr.bf16.mxu0 %v16652_v49  ;;  %15335 = vmatpush3.bf16.msra.mxu1 %v16651_v48  ;;  %v16690_v48 = vld [vmem:[%s20916_s1 + $0x1720] sm:$0xff]  }
 0x2ce   :  { %15336 = vmatprep.subr.bf16.mxu1 %v16653_v50  ;;  %v16691_v49 = vld [vmem:[%s20916_s1 + $0x17a0] sm:$0xff]   ;;  %v16692_v50 = vld [vmem:[%s20916_s1 + $0x1768] sm:$0xff]  }
 0x2d0   :  { %15315 = vmatpush3.bf16.msra.mxu0 %v16654_v51  ;;  %v16693_v51 = vld [vmem:[%s20916_s1 + $0x17e8] sm:$0xff]  }
 0x2d1   :  { %15316 = vmatprep.subr.bf16.mxu0 %v16656_v53  ;;  %15337 = vmatpush3.bf16.msra.mxu1 %v16655_v52  ;;  %v16694_v53 = vld [vmem:[%s20916_s1 + $0x1728] sm:$0xff]  }
 0x2d2   :  { %15338 = vmatprep.subr.bf16.mxu1 %v16657_v54 }
 0x2d4   :  { %15317 = vmatpush3.bf16.msra.mxu0 %v16658_v55  ;;  %v16695_v55 = vld [vmem:[%s20916_s1 + $0x17a8] sm:$0xff]  }
 0x2d5   :  { %15318 = vmatprep.subr.bf16.mxu0 %v16660_v57  ;;  %15339 = vmatpush3.bf16.msra.mxu1 %v16659_v56 }
 0x2d6   :  { %v15016_v59 = vpop.f32.mrb[60].mxu0  ;;  %15340 = vmatprep.subr.bf16.mxu1 %v16661_v58 }
 0x2d7   :  { %v15017_v61 = vpop.f32.mrb[61].mxu0  ;;  %v15038_v63 = vpop.f32.mrb[60].mxu1 }
 0x2d8   :  { %v15018_v0 = vadd.f32 %v15017_v61, %v15016_v59  ;;  %v15019_v1 = vpop.f32.mrb[62].mxu0  ;;  %v15039_v2 = vpop.f32.mrb[61].mxu1  ;;  %15319 = vmatpush3.bf16.msra.mxu0 %v16662_v60  ;;  %v16696_v59 = vld [vmem:[%s20916_s1 + $0x1770] sm:$0xff]  }
 0x2d9   :  { %v15020_v4 = vpop.f32.mrb[63].mxu0  ;;  %v15040_v7 = vadd.f32 %v15039_v2, %v15038_v63  ;;  %v15041_v8 = vpop.f32.mrb[62].mxu1  ;;  %15320 = vmatprep.subr.bf16.mxu0 %v16664_v62  ;;  %15341 = vmatpush3.bf16.msra.mxu1 %v16663_v3  ;;  %v16697_v60 = vld [vmem:[%s20916_s1 + $0x17f0] sm:$0xff]  }
 0x2da   :  { %v11535_v6 = vadd.f32 %v15018_v0, %v19415_v29  ;;  %v15042_v10 = vpop.f32.mrb[63].mxu1  ;;  %15342 = vmatprep.subr.bf16.mxu1 %v16665_v5  ;;  %v2946_v29 = vcombine.high %v2924_v22, %v2924_v22  ;;  %v16698_v2 = vld [vmem:[%s20916_s1 + $0x1730] sm:$0xff]   ;;  %v16702_v8 = vld [vmem:[%s20916_s1 + $0x1738] sm:$0xff]  }
 0x2db   :  { %v16699_v4 = vld [vmem:[%s20916_s1 + $0x17b0] sm:$0xff]   ;;  %v2931_v10 = vrot.slane %v19542_v24, %v17206_v35  ;;  %v16717_v24 = vld [vmem:[%s20916_s1 + $0x1858] sm:$0xff]  }
 0x2dc   :  { %v19516_v12 = vadd.f32 %v15040_v7, %v11535_v6  ;;  %15321 = vmatpush3.bf16.msra.mxu0 %v16666_v9  ;;  %v16700_v6 = vld [vmem:[%s20916_s1 + $0x1778] sm:$0xff]  }
 0x2dd   :  { %15322 = vmatprep.subr.bf16.mxu0 %v16668_v11  ;;  %15343 = vmatpush3.bf16.msra.mxu1 %v16667_v13  ;;  %v16701_v7 = vld [vmem:[%s20916_s1 + $0x17f8] sm:$0xff]   ;;  %v16705_v11 = vld [vmem:[%s20916_s1 + $0x1840] sm:$0xff]  }
 0x2de   :  { %15344 = vmatprep.subr.bf16.mxu1 %v16669_v14  ;;  %v16703_v9 = vld [vmem:[%s20916_s1 + $0x17b8] sm:$0xff]   ;;  %v16707_v13 = vld [vmem:[%s20916_s1 + $0x1800] sm:$0xff]  }
 0x2df   :  { %v16708_v14 = vld [vmem:[%s20916_s1 + $0x1880] sm:$0xff]  }
 0x2e0   :  { %15323 = vmatpush3.bf16.msra.mxu0 %v16670_v15  ;;  %v2947_v15 = vcombine.high %v2931_v10, %v2931_v10 }
 0x2e1   :  { %15352 = vmatprep.subr.bf16.mxu0 %v16672_v18  ;;  %15345 = vmatpush3.bf16.msra.mxu1 %v16671_v20  ;;  %v16711_v18 = vld [vmem:[%s20916_s1 + $0x1808] sm:$0xff]   ;;  %v16713_v20 = vld [vmem:[%s20916_s1 + $0x1850] sm:$0xff]  }
 0x2e2   :  { %15374 = vmatprep.subr.bf16.mxu1 %v16673_v23  ;;  %v16716_v23 = vld [vmem:[%s20916_s1 + $0x1890] sm:$0xff]  }
 0x2e3   :  { %12093 = vmatmul.mubr.bf16.vlgmr.msra.gmra.mrb[88].mxu0 %v2924_v22  ;;  %v16715_v22 = vld [vmem:[%s20916_s1 + $0x1810] sm:$0xff]  }
 0x2e4   :  { %15353 = vmatpush3.bf16.msra.mxu0 %v16674_v25  ;;  %12133 = vmatmul.mubr.bf16.vlgmr.msra.gmra.mrb[88].mxu1 %v2946_v29  ;;  %v16718_v25 = vld [vmem:[%s20916_s1 + $0x18d8] sm:$0xff]   ;;  %v16722_v29 = vld [vmem:[%s20916_s1 + $0x18e0] sm:$0xff]  }
 0x2e5   :  { %15354 = vmatprep.subr.bf16.mxu0 %v16676_v30  ;;  %15375 = vmatpush3.bf16.msra.mxu1 %v16675_v27  ;;  %v16720_v27 = vld [vmem:[%s20916_s1 + $0x1898] sm:$0xff]   ;;  %v16723_v30 = vld [vmem:[%s20916_s1 + $0x1820] sm:$0xff]  }
 0x2e6   :  { %12172 = vmatprep.mubr.bf16.mxu0 %v2945_v33  ;;  %15376 = vmatprep.subr.bf16.mxu1 %v16677_v32  ;;  %v16725_v32 = vld [vmem:[%s20916_s1 + $0x1868] sm:$0xff]  }
 0x2e7   :  { %12212 = vmatprep.mubr.bf16.mxu1 %v2949_v37  ;;  %v16726_v33 = vld [vmem:[%s20916_s1 + $0x18e8] sm:$0xff]  }
 0x2e8   :  { %15355 = vmatpush3.bf16.msra.mxu0 %v16678_v34 }
 0x2e9   :  { %15356 = vmatprep.subr.bf16.mxu0 %v16680_v38  ;;  %15377 = vmatpush3.bf16.msra.mxu1 %v16679_v36  ;;  %v16727_v36 = vld [vmem:[%s20916_s1 + $0x1828] sm:$0xff]   ;;  %v16729_v38 = vld [vmem:[%s20916_s1 + $0x1870] sm:$0xff]  }
 0x2ea   :  { %15378 = vmatprep.subr.bf16.mxu1 %v16681_v39 }
 0x2ec   :  { %15357 = vmatpush3.bf16.msra.mxu0 %v16682_v40 }
 0x2ed   :  { %15358 = vmatprep.subr.bf16.mxu0 %v16684_v42  ;;  %15379 = vmatpush3.bf16.msra.mxu1 %v16683_v41 }
 0x2ee   :  { %15380 = vmatprep.subr.bf16.mxu1 %v16685_v43  ;;  %v16728_v43 = vld [vmem:[%s20916_s1 + $0x18a8] sm:$0xff]  }
 0x2f0   :  { %15359 = vmatpush3.bf16.msra.mxu0 %v16686_v44 }
 0x2f1   :  { %15360 = vmatprep.subr.bf16.mxu0 %v16688_v46  ;;  %15381 = vmatpush3.bf16.msra.mxu1 %v16687_v45  ;;  %v16730_v45 = vld [vmem:[%s20916_s1 + $0x18f0] sm:$0xff]  }
 0x2f2   :  { %15382 = vmatprep.subr.bf16.mxu1 %v16689_v47 }
 0x2f4   :  { %15361 = vmatpush3.bf16.msra.mxu0 %v16690_v48 }
 0x2f5   :  { %15362 = vmatprep.subr.bf16.mxu0 %v16692_v50  ;;  %15383 = vmatpush3.bf16.msra.mxu1 %v16691_v49  ;;  %v16731_v49 = vld [vmem:[%s20916_s1 + $0x1830] sm:$0xff]  }
 0x2f6   :  { %v15060_v52 = vpop.f32.mrb[64].mxu0  ;;  %15384 = vmatprep.subr.bf16.mxu1 %v16693_v51  ;;  %v16733_v51 = vld [vmem:[%s20916_s1 + $0x1878] sm:$0xff]  }
 0x2f7   :  { %v15061_v54 = vpop.f32.mrb[65].mxu0  ;;  %v15082_v56 = vpop.f32.mrb[64].mxu1 }
 0x2f8   :  { %v15062_v57 = vadd.f32 %v15061_v54, %v15060_v52  ;;  %v15063_v58 = vpop.f32.mrb[66].mxu0  ;;  %v15083_v61 = vpop.f32.mrb[65].mxu1  ;;  %15363 = vmatpush3.bf16.msra.mxu0 %v16694_v53  ;;  %v16732_v53 = vld [vmem:[%s20916_s1 + $0x18b0] sm:$0xff]   ;;  %v16734_v54 = vld [vmem:[%s20916_s1 + $0x18f8] sm:$0xff]  }
 0x2f9   :  { %v15064_v62 = vpop.f32.mrb[67].mxu0  ;;  %v15084_v0 = vadd.f32 %v15083_v61, %v15082_v56  ;;  %v15085_v1 = vpop.f32.mrb[66].mxu1  ;;  %15364 = vmatprep.subr.bf16.mxu0 %v16696_v59  ;;  %15385 = vmatpush3.bf16.msra.mxu1 %v16695_v55  ;;  %v16735_v55 = vld [vmem:[%s20916_s1 + $0x1838] sm:$0xff]   ;;  %v27_v56 = vld [vmem:[%s20917_s0 + $0x60] sm:$0xff] }
 0x2fa   :  { %v11615_v63 = vadd.f32 %v15062_v57, %v19516_v12  ;;  %v15086_v3 = vpop.f32.mrb[67].mxu1  ;;  %15386 = vmatprep.subr.bf16.mxu1 %v16697_v60  ;;  %v16706_v12 = vld [vmem:[%s20916_s1 + $0x18c0] sm:$0xff]   ;;  %v2957_v57 = vrot.slane %v27_v56, %v17206_v35  ;;  %v2950_v59 = vcombine.high %v27_v56, %v27_v56  ;;  %v16736_v60 = vld [vmem:[%s20916_s1 + $0x18b8] sm:$0xff]   ;;  %v16774_v56 = vld [vmem:[%s20916_s1 + $0x1a48] sm:$0xff]  }
 0x2fb   :  { %v16737_v58 = vld [vmem:[%s20916_s1 + $0x1940] sm:$0xff]  }
 0x2fc   :  { %v19627_v5 = vadd.f32 %v15084_v0, %v11615_v63  ;;  %15365 = vmatpush3.bf16.msra.mxu0 %v16698_v2  ;;  %v2965_v61 = vcombine.high %v2957_v57, %v2957_v57  ;;  %v2973_v62 = vrot.slane %v2957_v57, %v17206_v35  ;;  %v16738_v63 = vld [vmem:[%s20916_s1 + $0x19c0] sm:$0xff]   ;;  %v19754_v0 = vrot.slane %v2950_v59, %v17206_v35  ;;  %v16775_v57 = vld [vmem:[%s20916_s1 + $0x1ac8] sm:$0xff]  }
 0x2fd   :  { %15366 = vmatprep.subr.bf16.mxu0 %v16700_v6  ;;  %15387 = vmatpush3.bf16.msra.mxu1 %v16699_v4  ;;  %v16739_v1 = vld [vmem:[%s20916_s1 + $0x1900] sm:$0xff]   ;;  %v16741_v6 = vld [vmem:[%s20916_s1 + $0x1948] sm:$0xff]  }
 0x2fe   :  { %15388 = vmatprep.subr.bf16.mxu1 %v16701_v7  ;;  %v2987_v2 = vrot.slane %v2965_v61, %v17206_v35  ;;  %v16740_v3 = vld [vmem:[%s20916_s1 + $0x1980] sm:$0xff]   ;;  %v2966_v4 = vcombine.high %v19754_v0, %v19754_v0  ;;  %v16777_v59 = vld [vmem:[%s20916_s1 + $0x1a88] sm:$0xff]   ;;  %v16779_v61 = vld [vmem:[%s20916_s1 + $0x1ad0] sm:$0xff]  }
 0x300   :  { %15367 = vmatpush3.bf16.msra.mxu0 %v16702_v8  ;;  %v2997_v7 = vcombine.high %v2987_v2, %v2987_v2  ;;  %v16742_v8 = vld [vmem:[%s20916_s1 + $0x19c8] sm:$0xff]  }
 0x301   :  { %15396 = vmatprep.subr.bf16.mxu0 %v16705_v11  ;;  %15389 = vmatpush3.bf16.msra.mxu1 %v16703_v9  ;;  %v2994_v9 = vrot.slane %v2966_v4, %v17206_v35  ;;  %v16744_v11 = vld [vmem:[%s20916_s1 + $0x1988] sm:$0xff]   ;;  %v16786_v4 = vld [vmem:[%s20916_s1 + $0x1a60] sm:$0xff]  }
 0x302   :  { %15418 = vmatprep.subr.bf16.mxu1 %v16706_v12 }
 0x303   :  { %12173 = vmatmul.mubr.bf16.vlgmr.msra.gmra.mrb[92].mxu0 %v2931_v10  ;;  %v16743_v10 = vld [vmem:[%s20916_s1 + $0x1908] sm:$0xff]   ;;  %v2998_v12 = vcombine.high %v2994_v9, %v2994_v9 }
 0x304   :  { %15397 = vmatpush3.bf16.msra.mxu0 %v16707_v13  ;;  %12213 = vmatmul.mubr.bf16.vlgmr.msra.gmra.mrb[92].mxu1 %v2947_v15  ;;  %v16745_v13 = vld [vmem:[%s20916_s1 + $0x1950] sm:$0xff]  }
 0x305   :  { %15398 = vmatprep.subr.bf16.mxu0 %v16709_v16  ;;  %15419 = vmatpush3.bf16.msra.mxu1 %v16708_v14  ;;  %v16746_v14 = vld [vmem:[%s20916_s1 + $0x19d0] sm:$0xff]  }
 0x306   :  { %15420 = vmatprep.subr.bf16.mxu1 %v16710_v17  ;;  %12252 = vmatprep.mubr.bf16.mxu0 %v2987_v2  ;;  %v16747_v15 = vld [vmem:[%s20916_s1 + $0x1910] sm:$0xff]   ;;  %v16749_v17 = vld [vmem:[%s20916_s1 + $0x1958] sm:$0xff]  }
 0x307   :  { %12292 = vmatprep.mubr.bf16.mxu1 %v2997_v7  ;;  %v16748_v16 = vld [vmem:[%s20916_s1 + $0x1990] sm:$0xff]   ;;  %v16784_v2 = vld [vmem:[%s20916_s1 + $0x1a18] sm:$0xff]   ;;  %v16789_v7 = vld [vmem:[%s20916_s1 + $0x1aa0] sm:$0xff]  }
 0x308   :  { %15399 = vmatpush3.bf16.msra.mxu0 %v16711_v18  ;;  %v16750_v18 = vld [vmem:[%s20916_s1 + $0x19d8] sm:$0xff]  }
 0x309   :  { %15400 = vmatprep.subr.bf16.mxu0 %v16713_v20  ;;  %15421 = vmatpush3.bf16.msra.mxu1 %v16712_v19  ;;  %v16751_v19 = vld [vmem:[%s20916_s1 + $0x1918] sm:$0xff]  }
 0x30a   :  { %15422 = vmatprep.subr.bf16.mxu1 %v16714_v21  ;;  %v16752_v20 = vld [vmem:[%s20916_s1 + $0x1998] sm:$0xff]   ;;  %v16753_v21 = vld [vmem:[%s20916_s1 + $0x1960] sm:$0xff]  }
 0x30c   :  { %15401 = vmatpush3.bf16.msra.mxu0 %v16715_v22  ;;  %v16754_v22 = vld [vmem:[%s20916_s1 + $0x19e0] sm:$0xff]  }
 0x30d   :  { %15402 = vmatprep.subr.bf16.mxu0 %v16717_v24  ;;  %15423 = vmatpush3.bf16.msra.mxu1 %v16716_v23  ;;  %v16755_v23 = vld [vmem:[%s20916_s1 + $0x1920] sm:$0xff]  }
 0x30e   :  { %15424 = vmatprep.subr.bf16.mxu1 %v16718_v25  ;;  %v16756_v24 = vld [vmem:[%s20916_s1 + $0x19a0] sm:$0xff]   ;;  %v16757_v25 = vld [vmem:[%s20916_s1 + $0x1968] sm:$0xff]  }
 0x310   :  { %15403 = vmatpush3.bf16.msra.mxu0 %v16719_v26  ;;  %v16758_v26 = vld [vmem:[%s20916_s1 + $0x19e8] sm:$0xff]  }
 0x311   :  { %15404 = vmatprep.subr.bf16.mxu0 %v16721_v28  ;;  %15425 = vmatpush3.bf16.msra.mxu1 %v16720_v27  ;;  %v16759_v28 = vld [vmem:[%s20916_s1 + $0x1928] sm:$0xff]  }
 0x312   :  { %15426 = vmatprep.subr.bf16.mxu1 %v16722_v29 }
 0x314   :  { %15405 = vmatpush3.bf16.msra.mxu0 %v16723_v30  ;;  %v16760_v30 = vld [vmem:[%s20916_s1 + $0x19a8] sm:$0xff]  }
 0x315   :  { %15406 = vmatprep.subr.bf16.mxu0 %v16725_v32  ;;  %15427 = vmatpush3.bf16.msra.mxu1 %v16724_v31 }
 0x316   :  { %v15104_v34 = vpop.f32.mrb[68].mxu0  ;;  %15428 = vmatprep.subr.bf16.mxu1 %v16726_v33 }
 0x317   :  { %v15105_v37 = vpop.f32.mrb[69].mxu0  ;;  %v15126_v39 = vpop.f32.mrb[68].mxu1 }
 0x318   :  { %v15106_v40 = vadd.f32 %v15105_v37, %v15104_v34  ;;  %v15107_v41 = vpop.f32.mrb[70].mxu0  ;;  %v15127_v42 = vpop.f32.mrb[69].mxu1  ;;  %15407 = vmatpush3.bf16.msra.mxu0 %v16727_v36  ;;  %v16761_v34 = vld [vmem:[%s20916_s1 + $0x1970] sm:$0xff]  }
 0x319   :  { %v15108_v44 = vpop.f32.mrb[71].mxu0  ;;  %v15128_v47 = vadd.f32 %v15127_v42, %v15126_v39  ;;  %v15129_v48 = vpop.f32.mrb[70].mxu1  ;;  %15408 = vmatprep.subr.bf16.mxu0 %v16729_v38  ;;  %15429 = vmatpush3.bf16.msra.mxu1 %v16728_v43  ;;  %v16762_v36 = vld [vmem:[%s20916_s1 + $0x19f0] sm:$0xff]  }
 0x31a   :  { %v11695_v46 = vadd.f32 %v15106_v40, %v19627_v5  ;;  %v15130_v50 = vpop.f32.mrb[71].mxu1  ;;  %15430 = vmatprep.subr.bf16.mxu1 %v16730_v45  ;;  %v2995_v5 = vcombine.high %v2973_v62, %v2973_v62  ;;  %v16763_v42 = vld [vmem:[%s20916_s1 + $0x1930] sm:$0xff]   ;;  %v16767_v48 = vld [vmem:[%s20916_s1 + $0x1938] sm:$0xff]  }
 0x31b   :  { %v16764_v44 = vld [vmem:[%s20916_s1 + $0x19b0] sm:$0xff]   ;;  %v2980_v50 = vrot.slane %v19754_v0, %v17206_v35  ;;  %v16782_v0 = vld [vmem:[%s20916_s1 + $0x1a58] sm:$0xff]  }
 0x31c   :  { %v19728_v52 = vadd.f32 %v15128_v47, %v11695_v46  ;;  %15409 = vmatpush3.bf16.msra.mxu0 %v16731_v49  ;;  %v16765_v46 = vld [vmem:[%s20916_s1 + $0x1978] sm:$0xff]  }
 0x31d   :  { %15410 = vmatprep.subr.bf16.mxu0 %v16733_v51  ;;  %15431 = vmatpush3.bf16.msra.mxu1 %v16732_v53  ;;  %v16766_v47 = vld [vmem:[%s20916_s1 + $0x19f8] sm:$0xff]   ;;  %v16770_v51 = vld [vmem:[%s20916_s1 + $0x1a40] sm:$0xff]  }
 0x31e   :  { %15432 = vmatprep.subr.bf16.mxu1 %v16734_v54  ;;  %v16768_v49 = vld [vmem:[%s20916_s1 + $0x19b8] sm:$0xff]   ;;  %v16772_v53 = vld [vmem:[%s20916_s1 + $0x1a00] sm:$0xff]  }
 0x31f   :  { %v16773_v54 = vld [vmem:[%s20916_s1 + $0x1a80] sm:$0xff]  }
 0x320   :  { %15411 = vmatpush3.bf16.msra.mxu0 %v16735_v55  ;;  %v2996_v55 = vcombine.high %v2980_v50, %v2980_v50 }
 0x321   :  { %15440 = vmatprep.subr.bf16.mxu0 %v16737_v58  ;;  %15433 = vmatpush3.bf16.msra.mxu1 %v16736_v60  ;;  %v16776_v58 = vld [vmem:[%s20916_s1 + $0x1a08] sm:$0xff]   ;;  %v16778_v60 = vld [vmem:[%s20916_s1 + $0x1a50] sm:$0xff]  }
 0x322   :  { %15462 = vmatprep.subr.bf16.mxu1 %v16738_v63  ;;  %v16781_v63 = vld [vmem:[%s20916_s1 + $0x1a90] sm:$0xff]  }
 0x323   :  { %12253 = vmatmul.mubr.bf16.vlgmr.msra.gmra.mrb[96].mxu0 %v2973_v62  ;;  %v16780_v62 = vld [vmem:[%s20916_s1 + $0x1a10] sm:$0xff]  }
 0x324   :  { %15441 = vmatpush3.bf16.msra.mxu0 %v16739_v1  ;;  %12293 = vmatmul.mubr.bf16.vlgmr.msra.gmra.mrb[96].mxu1 %v2995_v5  ;;  %v16783_v1 = vld [vmem:[%s20916_s1 + $0x1ad8] sm:$0xff]   ;;  %v16787_v5 = vld [vmem:[%s20916_s1 + $0x1ae0] sm:$0xff]  }
 0x325   :  { %15442 = vmatprep.subr.bf16.mxu0 %v16741_v6  ;;  %15463 = vmatpush3.bf16.msra.mxu1 %v16740_v3  ;;  %v16785_v3 = vld [vmem:[%s20916_s1 + $0x1a98] sm:$0xff]   ;;  %v16788_v6 = vld [vmem:[%s20916_s1 + $0x1a20] sm:$0xff]  }
 0x326   :  { %12332 = vmatprep.mubr.bf16.mxu0 %v2994_v9  ;;  %15464 = vmatprep.subr.bf16.mxu1 %v16742_v8  ;;  %v16790_v8 = vld [vmem:[%s20916_s1 + $0x1a68] sm:$0xff]  }
 0x327   :  { %12372 = vmatprep.mubr.bf16.mxu1 %v2998_v12  ;;  %v16791_v9 = vld [vmem:[%s20916_s1 + $0x1ae8] sm:$0xff]  }
 0x328   :  { %15443 = vmatpush3.bf16.msra.mxu0 %v16743_v10 }
 0x329   :  { %15444 = vmatprep.subr.bf16.mxu0 %v16745_v13  ;;  %15465 = vmatpush3.bf16.msra.mxu1 %v16744_v11  ;;  %v16792_v11 = vld [vmem:[%s20916_s1 + $0x1a28] sm:$0xff]   ;;  %v16794_v13 = vld [vmem:[%s20916_s1 + $0x1a70] sm:$0xff]  }
 0x32a   :  { %15466 = vmatprep.subr.bf16.mxu1 %v16746_v14 }
 0x32c   :  { %15445 = vmatpush3.bf16.msra.mxu0 %v16747_v15 }
 0x32d   :  { %15446 = vmatprep.subr.bf16.mxu0 %v16749_v17  ;;  %15467 = vmatpush3.bf16.msra.mxu1 %v16748_v16 }
 0x32e   :  { %15468 = vmatprep.subr.bf16.mxu1 %v16750_v18  ;;  %v16793_v18 = vld [vmem:[%s20916_s1 + $0x1aa8] sm:$0xff]  }
 0x330   :  { %15447 = vmatpush3.bf16.msra.mxu0 %v16751_v19 }
 0x331   :  { %15448 = vmatprep.subr.bf16.mxu0 %v16753_v21  ;;  %15469 = vmatpush3.bf16.msra.mxu1 %v16752_v20  ;;  %v16795_v20 = vld [vmem:[%s20916_s1 + $0x1af0] sm:$0xff]  }
 0x332   :  { %15470 = vmatprep.subr.bf16.mxu1 %v16754_v22 }
 0x334   :  { %15449 = vmatpush3.bf16.msra.mxu0 %v16755_v23 }
 0x335   :  { %15450 = vmatprep.subr.bf16.mxu0 %v16757_v25  ;;  %15471 = vmatpush3.bf16.msra.mxu1 %v16756_v24  ;;  %v16796_v24 = vld [vmem:[%s20916_s1 + $0x1a30] sm:$0xff]  }
 0x336   :  { %v15148_v27 = vpop.f32.mrb[72].mxu0  ;;  %15472 = vmatprep.subr.bf16.mxu1 %v16758_v26  ;;  %v16798_v26 = vld [vmem:[%s20916_s1 + $0x1a78] sm:$0xff]  }
 0x337   :  { %v15149_v29 = vpop.f32.mrb[73].mxu0  ;;  %v15170_v31 = vpop.f32.mrb[72].mxu1 }
 0x338   :  { %v15150_v32 = vadd.f32 %v15149_v29, %v15148_v27  ;;  %v15151_v33 = vpop.f32.mrb[74].mxu0  ;;  %v15171_v37 = vpop.f32.mrb[73].mxu1  ;;  %15451 = vmatpush3.bf16.msra.mxu0 %v16759_v28  ;;  %v16797_v28 = vld [vmem:[%s20916_s1 + $0x1ab0] sm:$0xff]   ;;  %v16799_v29 = vld [vmem:[%s20916_s1 + $0x1af8] sm:$0xff]  }
 0x339   :  { %v15152_v38 = vpop.f32.mrb[75].mxu0  ;;  %v15172_v40 = vadd.f32 %v15171_v37, %v15170_v31  ;;  %v15173_v41 = vpop.f32.mrb[74].mxu1  ;;  %15452 = vmatprep.subr.bf16.mxu0 %v16761_v34  ;;  %15473 = vmatpush3.bf16.msra.mxu1 %v16760_v30  ;;  %v16800_v30 = vld [vmem:[%s20916_s1 + $0x1a38] sm:$0xff]   ;;  %v28_v31 = vld [vmem:[%s20917_s0 + $0x68] sm:$0xff]  ;;  %v16802_v33 = vld [vmem:[%s20916_s1 + $0x1b40] sm:$0xff]  }
 0x33a   :  { %v11775_v39 = vadd.f32 %v15150_v32, %v19728_v52  ;;  %v15174_v43 = vpop.f32.mrb[75].mxu1  ;;  %15474 = vmatprep.subr.bf16.mxu1 %v16762_v36  ;;  %v16771_v52 = vld [vmem:[%s20916_s1 + $0x1ac0] sm:$0xff]   ;;  %v3006_v32 = vrot.slane %v28_v31, %v17206_v35  ;;  %v2999_v34 = vcombine.high %v28_v31, %v28_v31  ;;  %v16801_v36 = vld [vmem:[%s20916_s1 + $0x1ab8] sm:$0xff]   ;;  %v16839_v31 = vld [vmem:[%s20916_s1 + $0x1c48] sm:$0xff]  }
 0x33b   :  { %v16804_v41 = vld [vmem:[%s20916_s1 + $0x1b00] sm:$0xff]  }
 0x33c   :  { %v19839_v45 = vadd.f32 %v15172_v40, %v11775_v39  ;;  %15453 = vmatpush3.bf16.msra.mxu0 %v16763_v42  ;;  %v3014_v37 = vcombine.high %v3006_v32, %v3006_v32  ;;  %v3022_v38 = vrot.slane %v3006_v32, %v17206_v35  ;;  %v16803_v39 = vld [vmem:[%s20916_s1 + $0x1bc0] sm:$0xff]   ;;  %v19966_v40 = vrot.slane %v2999_v34, %v17206_v35  ;;  %v16840_v32 = vld [vmem:[%s20916_s1 + $0x1cc8] sm:$0xff]  }
 0x33d   :  { %15454 = vmatprep.subr.bf16.mxu0 %v16765_v46  ;;  %15475 = vmatpush3.bf16.msra.mxu1 %v16764_v44  ;;  %v16805_v43 = vld [vmem:[%s20916_s1 + $0x1b80] sm:$0xff]   ;;  %v16806_v46 = vld [vmem:[%s20916_s1 + $0x1b48] sm:$0xff]  }
 0x33e   :  { %15476 = vmatprep.subr.bf16.mxu1 %v16766_v47  ;;  %v3036_v42 = vrot.slane %v3014_v37, %v17206_v35  ;;  %v3015_v44 = vcombine.high %v19966_v40, %v19966_v40  ;;  %v16842_v34 = vld [vmem:[%s20916_s1 + $0x1c88] sm:$0xff]   ;;  %v16844_v37 = vld [vmem:[%s20916_s1 + $0x1cd0] sm:$0xff]  }
 0x340   :  { %15455 = vmatpush3.bf16.msra.mxu0 %v16767_v48  ;;  %v3046_v47 = vcombine.high %v3036_v42, %v3036_v42  ;;  %v16807_v48 = vld [vmem:[%s20916_s1 + $0x1bc8] sm:$0xff]  }
 0x341   :  { %15484 = vmatprep.subr.bf16.mxu0 %v16770_v51  ;;  %15477 = vmatpush3.bf16.msra.mxu1 %v16768_v49  ;;  %v3043_v49 = vrot.slane %v3015_v44, %v17206_v35  ;;  %v16809_v51 = vld [vmem:[%s20916_s1 + $0x1b88] sm:$0xff]   ;;  %v16851_v44 = vld [vmem:[%s20916_s1 + $0x1c60] sm:$0xff]  }
 0x342   :  { %15506 = vmatprep.subr.bf16.mxu1 %v16771_v52 }
 0x343   :  { %12333 = vmatmul.mubr.bf16.vlgmr.msra.gmra.mrb[100].mxu0 %v2980_v50  ;;  %v16808_v50 = vld [vmem:[%s20916_s1 + $0x1b08] sm:$0xff]   ;;  %v3047_v52 = vcombine.high %v3043_v49, %v3043_v49 }
 0x344   :  { %15485 = vmatpush3.bf16.msra.mxu0 %v16772_v53  ;;  %12373 = vmatmul.mubr.bf16.vlgmr.msra.gmra.mrb[100].mxu1 %v2996_v55  ;;  %v16810_v53 = vld [vmem:[%s20916_s1 + $0x1b50] sm:$0xff]  }
 0x345   :  { %15486 = vmatprep.subr.bf16.mxu0 %v16774_v56  ;;  %15507 = vmatpush3.bf16.msra.mxu1 %v16773_v54  ;;  %v16811_v54 = vld [vmem:[%s20916_s1 + $0x1bd0] sm:$0xff]  }
 0x346   :  { %15508 = vmatprep.subr.bf16.mxu1 %v16775_v57  ;;  %12412 = vmatprep.mubr.bf16.mxu0 %v3036_v42  ;;  %v16812_v55 = vld [vmem:[%s20916_s1 + $0x1b10] sm:$0xff]   ;;  %v16814_v57 = vld [vmem:[%s20916_s1 + $0x1b58] sm:$0xff]  }
 0x347   :  { %12452 = vmatprep.mubr.bf16.mxu1 %v3046_v47  ;;  %v16813_v56 = vld [vmem:[%s20916_s1 + $0x1b90] sm:$0xff]   ;;  %v16849_v42 = vld [vmem:[%s20916_s1 + $0x1c18] sm:$0xff]   ;;  %v16854_v47 = vld [vmem:[%s20916_s1 + $0x1ca0] sm:$0xff]  }
 0x348   :  { %15487 = vmatpush3.bf16.msra.mxu0 %v16776_v58  ;;  %v16815_v58 = vld [vmem:[%s20916_s1 + $0x1bd8] sm:$0xff]  }
 0x349   :  { %15488 = vmatprep.subr.bf16.mxu0 %v16778_v60  ;;  %15509 = vmatpush3.bf16.msra.mxu1 %v16777_v59  ;;  %v16816_v59 = vld [vmem:[%s20916_s1 + $0x1b18] sm:$0xff]  }
 0x34a   :  { %15510 = vmatprep.subr.bf16.mxu1 %v16779_v61  ;;  %v16817_v60 = vld [vmem:[%s20916_s1 + $0x1b98] sm:$0xff]   ;;  %v16818_v61 = vld [vmem:[%s20916_s1 + $0x1b60] sm:$0xff]  }
 0x34c   :  { %15489 = vmatpush3.bf16.msra.mxu0 %v16780_v62  ;;  %v16819_v62 = vld [vmem:[%s20916_s1 + $0x1be0] sm:$0xff]  }
 0x34d   :  { %15490 = vmatprep.subr.bf16.mxu0 %v16782_v0  ;;  %15511 = vmatpush3.bf16.msra.mxu1 %v16781_v63  ;;  %v16820_v63 = vld [vmem:[%s20916_s1 + $0x1b20] sm:$0xff]  }
 0x34e   :  { %15512 = vmatprep.subr.bf16.mxu1 %v16783_v1  ;;  %v16821_v0 = vld [vmem:[%s20916_s1 + $0x1ba0] sm:$0xff]   ;;  %v16822_v1 = vld [vmem:[%s20916_s1 + $0x1b68] sm:$0xff]  }
 0x350   :  { %15491 = vmatpush3.bf16.msra.mxu0 %v16784_v2  ;;  %v16823_v2 = vld [vmem:[%s20916_s1 + $0x1be8] sm:$0xff]  }
 0x351   :  { %15492 = vmatprep.subr.bf16.mxu0 %v16786_v4  ;;  %15513 = vmatpush3.bf16.msra.mxu1 %v16785_v3  ;;  %v16824_v4 = vld [vmem:[%s20916_s1 + $0x1b28] sm:$0xff]  }
 0x352   :  { %15514 = vmatprep.subr.bf16.mxu1 %v16787_v5 }
 0x354   :  { %15493 = vmatpush3.bf16.msra.mxu0 %v16788_v6  ;;  %v16825_v6 = vld [vmem:[%s20916_s1 + $0x1ba8] sm:$0xff]  }
 0x355   :  { %15494 = vmatprep.subr.bf16.mxu0 %v16790_v8  ;;  %15515 = vmatpush3.bf16.msra.mxu1 %v16789_v7 }
 0x356   :  { %v15192_v10 = vpop.f32.mrb[76].mxu0  ;;  %15516 = vmatprep.subr.bf16.mxu1 %v16791_v9 }
 0x357   :  { %v15193_v12 = vpop.f32.mrb[77].mxu0  ;;  %v15214_v14 = vpop.f32.mrb[76].mxu1 }
 0x358   :  { %v15194_v15 = vadd.f32 %v15193_v12, %v15192_v10  ;;  %v15195_v16 = vpop.f32.mrb[78].mxu0  ;;  %v15215_v17 = vpop.f32.mrb[77].mxu1  ;;  %15495 = vmatpush3.bf16.msra.mxu0 %v16792_v11  ;;  %v16826_v10 = vld [vmem:[%s20916_s1 + $0x1b70] sm:$0xff]  }
 0x359   :  { %v15196_v19 = vpop.f32.mrb[79].mxu0  ;;  %v15216_v22 = vadd.f32 %v15215_v17, %v15214_v14  ;;  %v15217_v23 = vpop.f32.mrb[78].mxu1  ;;  %15496 = vmatprep.subr.bf16.mxu0 %v16794_v13  ;;  %15517 = vmatpush3.bf16.msra.mxu1 %v16793_v18  ;;  %v16827_v11 = vld [vmem:[%s20916_s1 + $0x1bf0] sm:$0xff]  }
 0x35a   :  { %v11855_v21 = vadd.f32 %v15194_v15, %v19839_v45  ;;  %v15218_v25 = vpop.f32.mrb[79].mxu1  ;;  %15518 = vmatprep.subr.bf16.mxu1 %v16795_v20  ;;  %v3044_v45 = vcombine.high %v3022_v38, %v3022_v38  ;;  %v16828_v17 = vld [vmem:[%s20916_s1 + $0x1b30] sm:$0xff]   ;;  %v16832_v23 = vld [vmem:[%s20916_s1 + $0x1b38] sm:$0xff]  }
 0x35b   :  { %v16829_v19 = vld [vmem:[%s20916_s1 + $0x1bb0] sm:$0xff]   ;;  %v3029_v25 = vrot.slane %v19966_v40, %v17206_v35  ;;  %v16847_v40 = vld [vmem:[%s20916_s1 + $0x1c58] sm:$0xff]  }
 0x35c   :  { %v19940_v27 = vadd.f32 %v15216_v22, %v11855_v21  ;;  %15497 = vmatpush3.bf16.msra.mxu0 %v16796_v24  ;;  %v16830_v21 = vld [vmem:[%s20916_s1 + $0x1b78] sm:$0xff]  }
 0x35d   :  { %15498 = vmatprep.subr.bf16.mxu0 %v16798_v26  ;;  %15519 = vmatpush3.bf16.msra.mxu1 %v16797_v28  ;;  %v16831_v22 = vld [vmem:[%s20916_s1 + $0x1bf8] sm:$0xff]   ;;  %v16835_v26 = vld [vmem:[%s20916_s1 + $0x1c40] sm:$0xff]  }
 0x35e   :  { %15520 = vmatprep.subr.bf16.mxu1 %v16799_v29  ;;  %v16833_v24 = vld [vmem:[%s20916_s1 + $0x1bb8] sm:$0xff]   ;;  %v16837_v28 = vld [vmem:[%s20916_s1 + $0x1c00] sm:$0xff]  }
 0x35f   :  { %v16838_v29 = vld [vmem:[%s20916_s1 + $0x1c80] sm:$0xff]  }
 0x360   :  { %15499 = vmatpush3.bf16.msra.mxu0 %v16800_v30  ;;  %v3045_v30 = vcombine.high %v3029_v25, %v3029_v25 }
 0x361   :  { %15528 = vmatprep.subr.bf16.mxu0 %v16802_v33  ;;  %15521 = vmatpush3.bf16.msra.mxu1 %v16801_v36  ;;  %v16841_v33 = vld [vmem:[%s20916_s1 + $0x1c08] sm:$0xff]   ;;  %v16843_v36 = vld [vmem:[%s20916_s1 + $0x1c50] sm:$0xff]  }
 0x362   :  { %15550 = vmatprep.subr.bf16.mxu1 %v16803_v39  ;;  %v16846_v39 = vld [vmem:[%s20916_s1 + $0x1c90] sm:$0xff]  }
 0x363   :  { %12413 = vmatmul.mubr.bf16.vlgmr.msra.gmra.mrb[104].mxu0 %v3022_v38  ;;  %v16845_v38 = vld [vmem:[%s20916_s1 + $0x1c10] sm:$0xff]  }
 0x364   :  { %15529 = vmatpush3.bf16.msra.mxu0 %v16804_v41  ;;  %12453 = vmatmul.mubr.bf16.vlgmr.msra.gmra.mrb[104].mxu1 %v3044_v45  ;;  %v16848_v41 = vld [vmem:[%s20916_s1 + $0x1cd8] sm:$0xff]   ;;  %v16852_v45 = vld [vmem:[%s20916_s1 + $0x1ce0] sm:$0xff]  }
 0x365   :  { %15530 = vmatprep.subr.bf16.mxu0 %v16806_v46  ;;  %15551 = vmatpush3.bf16.msra.mxu1 %v16805_v43  ;;  %v16850_v43 = vld [vmem:[%s20916_s1 + $0x1c98] sm:$0xff]   ;;  %v16853_v46 = vld [vmem:[%s20916_s1 + $0x1c20] sm:$0xff]  }
 0x366   :  { %12492 = vmatprep.mubr.bf16.mxu0 %v3043_v49  ;;  %15552 = vmatprep.subr.bf16.mxu1 %v16807_v48  ;;  %v16855_v48 = vld [vmem:[%s20916_s1 + $0x1c68] sm:$0xff]  }
 0x367   :  { %12532 = vmatprep.mubr.bf16.mxu1 %v3047_v52  ;;  %v16856_v49 = vld [vmem:[%s20916_s1 + $0x1ce8] sm:$0xff]  }
 0x368   :  { %15531 = vmatpush3.bf16.msra.mxu0 %v16808_v50 }
 0x369   :  { %15532 = vmatprep.subr.bf16.mxu0 %v16810_v53  ;;  %15553 = vmatpush3.bf16.msra.mxu1 %v16809_v51  ;;  %v16857_v51 = vld [vmem:[%s20916_s1 + $0x1c28] sm:$0xff]   ;;  %v16859_v53 = vld [vmem:[%s20916_s1 + $0x1c70] sm:$0xff]  }
 0x36a   :  { %15554 = vmatprep.subr.bf16.mxu1 %v16811_v54 }
 0x36c   :  { %15533 = vmatpush3.bf16.msra.mxu0 %v16812_v55 }
 0x36d   :  { %15534 = vmatprep.subr.bf16.mxu0 %v16814_v57  ;;  %15555 = vmatpush3.bf16.msra.mxu1 %v16813_v56 }
 0x36e   :  { %15556 = vmatprep.subr.bf16.mxu1 %v16815_v58  ;;  %v16858_v58 = vld [vmem:[%s20916_s1 + $0x1ca8] sm:$0xff]  }
 0x370   :  { %15535 = vmatpush3.bf16.msra.mxu0 %v16816_v59 }
 0x371   :  { %15536 = vmatprep.subr.bf16.mxu0 %v16818_v61  ;;  %15557 = vmatpush3.bf16.msra.mxu1 %v16817_v60  ;;  %v16860_v60 = vld [vmem:[%s20916_s1 + $0x1cf0] sm:$0xff]  }
 0x372   :  { %15558 = vmatprep.subr.bf16.mxu1 %v16819_v62 }
 0x374   :  { %15537 = vmatpush3.bf16.msra.mxu0 %v16820_v63 }
 0x375   :  { %15538 = vmatprep.subr.bf16.mxu0 %v16822_v1  ;;  %15559 = vmatpush3.bf16.msra.mxu1 %v16821_v0  ;;  %v16861_v0 = vld [vmem:[%s20916_s1 + $0x1c30] sm:$0xff]  }
 0x376   :  { %v15236_v3 = vpop.f32.mrb[80].mxu0  ;;  %15560 = vmatprep.subr.bf16.mxu1 %v16823_v2  ;;  %v16863_v2 = vld [vmem:[%s20916_s1 + $0x1c78] sm:$0xff]  }
 0x377   :  { %v15237_v5 = vpop.f32.mrb[81].mxu0  ;;  %v15258_v7 = vpop.f32.mrb[80].mxu1 }
 0x378   :  { %v15238_v8 = vadd.f32 %v15237_v5, %v15236_v3  ;;  %v15239_v9 = vpop.f32.mrb[82].mxu0  ;;  %v15259_v12 = vpop.f32.mrb[81].mxu1  ;;  %15539 = vmatpush3.bf16.msra.mxu0 %v16824_v4  ;;  %v16862_v4 = vld [vmem:[%s20916_s1 + $0x1cb0] sm:$0xff]   ;;  %v16864_v5 = vld [vmem:[%s20916_s1 + $0x1cf8] sm:$0xff]  }
 0x379   :  { %v15240_v13 = vpop.f32.mrb[83].mxu0  ;;  %v15260_v15 = vadd.f32 %v15259_v12, %v15258_v7  ;;  %v15261_v16 = vpop.f32.mrb[82].mxu1  ;;  %15540 = vmatprep.subr.bf16.mxu0 %v16826_v10  ;;  %15561 = vmatpush3.bf16.msra.mxu1 %v16825_v6  ;;  %v16865_v6 = vld [vmem:[%s20916_s1 + $0x1c38] sm:$0xff]   ;;  %v29_v7 = vld [vmem:[%s20917_s0 + $0x70] sm:$0xff]  ;;  %v16867_v9 = vld [vmem:[%s20916_s1 + $0x1d40] sm:$0xff]  }
 0x37a   :  { %v11935_v14 = vadd.f32 %v15238_v8, %v19940_v27  ;;  %v15262_v18 = vpop.f32.mrb[83].mxu1  ;;  %15562 = vmatprep.subr.bf16.mxu1 %v16827_v11  ;;  %v16836_v27 = vld [vmem:[%s20916_s1 + $0x1cc0] sm:$0xff]   ;;  %v3055_v8 = vrot.slane %v29_v7, %v17206_v35  ;;  %v3048_v10 = vcombine.high %v29_v7, %v29_v7  ;;  %v16866_v11 = vld [vmem:[%s20916_s1 + $0x1cb8] sm:$0xff]   ;;  %v16904_v7 = vld [vmem:[%s20916_s1 + $0x1e48] sm:$0xff]  }
 0x37b   :  { %v16869_v16 = vld [vmem:[%s20916_s1 + $0x1d00] sm:$0xff]  }
 0x37c   :  { %v20051_v20 = vadd.f32 %v15260_v15, %v11935_v14  ;;  %15541 = vmatpush3.bf16.msra.mxu0 %v16828_v17  ;;  %v3063_v12 = vcombine.high %v3055_v8, %v3055_v8  ;;  %v3071_v13 = vrot.slane %v3055_v8, %v17206_v35  ;;  %v16868_v14 = vld [vmem:[%s20916_s1 + $0x1dc0] sm:$0xff]   ;;  %v20178_v15 = vrot.slane %v3048_v10, %v17206_v35  ;;  %v16905_v8 = vld [vmem:[%s20916_s1 + $0x1ec8] sm:$0xff]  }
 0x37d   :  { %15542 = vmatprep.subr.bf16.mxu0 %v16830_v21  ;;  %15563 = vmatpush3.bf16.msra.mxu1 %v16829_v19  ;;  %v16870_v18 = vld [vmem:[%s20916_s1 + $0x1d80] sm:$0xff]   ;;  %v16871_v21 = vld [vmem:[%s20916_s1 + $0x1d48] sm:$0xff]  }
 0x37e   :  { %15564 = vmatprep.subr.bf16.mxu1 %v16831_v22  ;;  %v3085_v17 = vrot.slane %v3063_v12, %v17206_v35  ;;  %v3064_v19 = vcombine.high %v20178_v15, %v20178_v15  ;;  %v16907_v10 = vld [vmem:[%s20916_s1 + $0x1e88] sm:$0xff]   ;;  %v16909_v12 = vld [vmem:[%s20916_s1 + $0x1ed0] sm:$0xff]  }
 0x380   :  { %15543 = vmatpush3.bf16.msra.mxu0 %v16832_v23  ;;  %v3095_v22 = vcombine.high %v3085_v17, %v3085_v17  ;;  %v16872_v23 = vld [vmem:[%s20916_s1 + $0x1dc8] sm:$0xff]  }
 0x381   :  { %15572 = vmatprep.subr.bf16.mxu0 %v16835_v26  ;;  %15565 = vmatpush3.bf16.msra.mxu1 %v16833_v24  ;;  %v3092_v24 = vrot.slane %v3064_v19, %v17206_v35  ;;  %v16874_v26 = vld [vmem:[%s20916_s1 + $0x1d88] sm:$0xff]   ;;  %v16916_v19 = vld [vmem:[%s20916_s1 + $0x1e60] sm:$0xff]  }
 0x382   :  { %15594 = vmatprep.subr.bf16.mxu1 %v16836_v27 }
 0x383   :  { %12493 = vmatmul.mubr.bf16.vlgmr.msra.gmra.mrb[108].mxu0 %v3029_v25  ;;  %v16873_v25 = vld [vmem:[%s20916_s1 + $0x1d08] sm:$0xff]   ;;  %v3096_v27 = vcombine.high %v3092_v24, %v3092_v24 }
 0x384   :  { %15573 = vmatpush3.bf16.msra.mxu0 %v16837_v28  ;;  %12533 = vmatmul.mubr.bf16.vlgmr.msra.gmra.mrb[108].mxu1 %v3045_v30  ;;  %v16875_v28 = vld [vmem:[%s20916_s1 + $0x1d50] sm:$0xff]  }
 0x385   :  { %15574 = vmatprep.subr.bf16.mxu0 %v16839_v31  ;;  %15595 = vmatpush3.bf16.msra.mxu1 %v16838_v29  ;;  %v16876_v29 = vld [vmem:[%s20916_s1 + $0x1dd0] sm:$0xff]  }
 0x386   :  { %15596 = vmatprep.subr.bf16.mxu1 %v16840_v32  ;;  %12572 = vmatprep.mubr.bf16.mxu0 %v3085_v17  ;;  %v16877_v30 = vld [vmem:[%s20916_s1 + $0x1d10] sm:$0xff]   ;;  %v16879_v32 = vld [vmem:[%s20916_s1 + $0x1d58] sm:$0xff]  }
 0x387   :  { %12612 = vmatprep.mubr.bf16.mxu1 %v3095_v22  ;;  %v16878_v31 = vld [vmem:[%s20916_s1 + $0x1d90] sm:$0xff]   ;;  %v16914_v17 = vld [vmem:[%s20916_s1 + $0x1e18] sm:$0xff]   ;;  %v16919_v22 = vld [vmem:[%s20916_s1 + $0x1ea0] sm:$0xff]  }
 0x388   :  { %15575 = vmatpush3.bf16.msra.mxu0 %v16841_v33  ;;  %v16880_v33 = vld [vmem:[%s20916_s1 + $0x1dd8] sm:$0xff]  }
 0x389   :  { %15576 = vmatprep.subr.bf16.mxu0 %v16843_v36  ;;  %15597 = vmatpush3.bf16.msra.mxu1 %v16842_v34  ;;  %v16881_v34 = vld [vmem:[%s20916_s1 + $0x1d18] sm:$0xff]  }
 0x38a   :  { %15598 = vmatprep.subr.bf16.mxu1 %v16844_v37  ;;  %v16882_v36 = vld [vmem:[%s20916_s1 + $0x1d98] sm:$0xff]   ;;  %v16883_v37 = vld [vmem:[%s20916_s1 + $0x1d60] sm:$0xff]  }
 0x38c   :  { %15577 = vmatpush3.bf16.msra.mxu0 %v16845_v38  ;;  %v16884_v38 = vld [vmem:[%s20916_s1 + $0x1de0] sm:$0xff]  }
 0x38d   :  { %15578 = vmatprep.subr.bf16.mxu0 %v16847_v40  ;;  %15599 = vmatpush3.bf16.msra.mxu1 %v16846_v39  ;;  %v16885_v39 = vld [vmem:[%s20916_s1 + $0x1d20] sm:$0xff]  }
 0x38e   :  { %15600 = vmatprep.subr.bf16.mxu1 %v16848_v41  ;;  %v16886_v40 = vld [vmem:[%s20916_s1 + $0x1da0] sm:$0xff]   ;;  %v16887_v41 = vld [vmem:[%s20916_s1 + $0x1d68] sm:$0xff]  }
 0x390   :  { %15579 = vmatpush3.bf16.msra.mxu0 %v16849_v42  ;;  %v16888_v42 = vld [vmem:[%s20916_s1 + $0x1de8] sm:$0xff]  }
 0x391   :  { %15580 = vmatprep.subr.bf16.mxu0 %v16851_v44  ;;  %15601 = vmatpush3.bf16.msra.mxu1 %v16850_v43  ;;  %v16889_v44 = vld [vmem:[%s20916_s1 + $0x1d28] sm:$0xff]  }
 0x392   :  { %15602 = vmatprep.subr.bf16.mxu1 %v16852_v45 }
 0x394   :  { %15581 = vmatpush3.bf16.msra.mxu0 %v16853_v46  ;;  %v16890_v46 = vld [vmem:[%s20916_s1 + $0x1da8] sm:$0xff]  }
 0x395   :  { %15582 = vmatprep.subr.bf16.mxu0 %v16855_v48  ;;  %15603 = vmatpush3.bf16.msra.mxu1 %v16854_v47 }
 0x396   :  { %v15280_v50 = vpop.f32.mrb[84].mxu0  ;;  %15604 = vmatprep.subr.bf16.mxu1 %v16856_v49 }
 0x397   :  { %v15281_v52 = vpop.f32.mrb[85].mxu0  ;;  %v15302_v54 = vpop.f32.mrb[84].mxu1 }
 0x398   :  { %v15282_v55 = vadd.f32 %v15281_v52, %v15280_v50  ;;  %v15283_v56 = vpop.f32.mrb[86].mxu0  ;;  %v15303_v57 = vpop.f32.mrb[85].mxu1  ;;  %15583 = vmatpush3.bf16.msra.mxu0 %v16857_v51  ;;  %v16891_v50 = vld [vmem:[%s20916_s1 + $0x1d70] sm:$0xff]  }
 0x399   :  { %v15284_v59 = vpop.f32.mrb[87].mxu0  ;;  %v15304_v62 = vadd.f32 %v15303_v57, %v15302_v54  ;;  %v15305_v63 = vpop.f32.mrb[86].mxu1  ;;  %15584 = vmatprep.subr.bf16.mxu0 %v16859_v53  ;;  %15605 = vmatpush3.bf16.msra.mxu1 %v16858_v58  ;;  %v16892_v51 = vld [vmem:[%s20916_s1 + $0x1df0] sm:$0xff]  }
 0x39a   :  { %v12015_v61 = vadd.f32 %v15282_v55, %v20051_v20  ;;  %v15306_v1 = vpop.f32.mrb[87].mxu1  ;;  %15606 = vmatprep.subr.bf16.mxu1 %v16860_v60  ;;  %v3093_v20 = vcombine.high %v3071_v13, %v3071_v13  ;;  %v16893_v57 = vld [vmem:[%s20916_s1 + $0x1d30] sm:$0xff]   ;;  %v16897_v63 = vld [vmem:[%s20916_s1 + $0x1d38] sm:$0xff]  }
 0x39b   :  { %v16894_v59 = vld [vmem:[%s20916_s1 + $0x1db0] sm:$0xff]   ;;  %v3078_v1 = vrot.slane %v20178_v15, %v17206_v35  ;;  %v16912_v15 = vld [vmem:[%s20916_s1 + $0x1e58] sm:$0xff]  }
 0x39c   :  { %v20152_v3 = vadd.f32 %v15304_v62, %v12015_v61  ;;  %15585 = vmatpush3.bf16.msra.mxu0 %v16861_v0  ;;  %v16895_v61 = vld [vmem:[%s20916_s1 + $0x1d78] sm:$0xff]  }
 0x39d   :  { %15586 = vmatprep.subr.bf16.mxu0 %v16863_v2  ;;  %15607 = vmatpush3.bf16.msra.mxu1 %v16862_v4  ;;  %v16896_v62 = vld [vmem:[%s20916_s1 + $0x1df8] sm:$0xff]   ;;  %v16900_v2 = vld [vmem:[%s20916_s1 + $0x1e40] sm:$0xff]  }
 0x39e   :  { %15608 = vmatprep.subr.bf16.mxu1 %v16864_v5  ;;  %v16898_v0 = vld [vmem:[%s20916_s1 + $0x1db8] sm:$0xff]   ;;  %v16902_v4 = vld [vmem:[%s20916_s1 + $0x1e00] sm:$0xff]  }
 0x39f   :  { %v16903_v5 = vld [vmem:[%s20916_s1 + $0x1e80] sm:$0xff]  }
 0x3a0   :  { %15587 = vmatpush3.bf16.msra.mxu0 %v16865_v6  ;;  %v3094_v6 = vcombine.high %v3078_v1, %v3078_v1 }
 0x3a1   :  { %15616 = vmatprep.subr.bf16.mxu0 %v16867_v9  ;;  %15609 = vmatpush3.bf16.msra.mxu1 %v16866_v11  ;;  %v16906_v9 = vld [vmem:[%s20916_s1 + $0x1e08] sm:$0xff]   ;;  %v16908_v11 = vld [vmem:[%s20916_s1 + $0x1e50] sm:$0xff]  }
 0x3a2   :  { %15638 = vmatprep.subr.bf16.mxu1 %v16868_v14  ;;  %v16911_v14 = vld [vmem:[%s20916_s1 + $0x1e90] sm:$0xff]  }
 0x3a3   :  { %12573 = vmatmul.mubr.bf16.vlgmr.msra.gmra.mrb[112].mxu0 %v3071_v13  ;;  %v16910_v13 = vld [vmem:[%s20916_s1 + $0x1e10] sm:$0xff]  }
 0x3a4   :  { %15617 = vmatpush3.bf16.msra.mxu0 %v16869_v16  ;;  %12613 = vmatmul.mubr.bf16.vlgmr.msra.gmra.mrb[112].mxu1 %v3093_v20  ;;  %v16913_v16 = vld [vmem:[%s20916_s1 + $0x1ed8] sm:$0xff]   ;;  %v16917_v20 = vld [vmem:[%s20916_s1 + $0x1ee0] sm:$0xff]  }
 0x3a5   :  { %15618 = vmatprep.subr.bf16.mxu0 %v16871_v21  ;;  %15639 = vmatpush3.bf16.msra.mxu1 %v16870_v18  ;;  %v16915_v18 = vld [vmem:[%s20916_s1 + $0x1e98] sm:$0xff]   ;;  %v16918_v21 = vld [vmem:[%s20916_s1 + $0x1e20] sm:$0xff]  }
 0x3a6   :  { %12652 = vmatprep.mubr.bf16.mxu0 %v3092_v24  ;;  %15640 = vmatprep.subr.bf16.mxu1 %v16872_v23  ;;  %v16920_v23 = vld [vmem:[%s20916_s1 + $0x1e68] sm:$0xff]  }
 0x3a7   :  { %12692 = vmatprep.mubr.bf16.mxu1 %v3096_v27  ;;  %v16921_v24 = vld [vmem:[%s20916_s1 + $0x1ee8] sm:$0xff]  }
 0x3a8   :  { %15619 = vmatpush3.bf16.msra.mxu0 %v16873_v25 }
 0x3a9   :  { %15620 = vmatprep.subr.bf16.mxu0 %v16875_v28  ;;  %15641 = vmatpush3.bf16.msra.mxu1 %v16874_v26  ;;  %v16922_v26 = vld [vmem:[%s20916_s1 + $0x1e28] sm:$0xff]   ;;  %v16924_v28 = vld [vmem:[%s20916_s1 + $0x1e70] sm:$0xff]  }
 0x3aa   :  { %15642 = vmatprep.subr.bf16.mxu1 %v16876_v29 }
 0x3ac   :  { %15621 = vmatpush3.bf16.msra.mxu0 %v16877_v30 }
 0x3ad   :  { %15622 = vmatprep.subr.bf16.mxu0 %v16879_v32  ;;  %15643 = vmatpush3.bf16.msra.mxu1 %v16878_v31 }
 0x3ae   :  { %15644 = vmatprep.subr.bf16.mxu1 %v16880_v33  ;;  %v16923_v33 = vld [vmem:[%s20916_s1 + $0x1ea8] sm:$0xff]  }
 0x3b0   :  { %15623 = vmatpush3.bf16.msra.mxu0 %v16881_v34 }
 0x3b1   :  { %15624 = vmatprep.subr.bf16.mxu0 %v16883_v37  ;;  %15645 = vmatpush3.bf16.msra.mxu1 %v16882_v36  ;;  %v16925_v36 = vld [vmem:[%s20916_s1 + $0x1ef0] sm:$0xff]  }
 0x3b2   :  { %15646 = vmatprep.subr.bf16.mxu1 %v16884_v38 }
 0x3b4   :  { %15625 = vmatpush3.bf16.msra.mxu0 %v16885_v39 }
 0x3b5   :  { %15626 = vmatprep.subr.bf16.mxu0 %v16887_v41  ;;  %15647 = vmatpush3.bf16.msra.mxu1 %v16886_v40  ;;  %v16926_v40 = vld [vmem:[%s20916_s1 + $0x1e30] sm:$0xff]  }
 0x3b6   :  { %v15324_v43 = vpop.f32.mrb[88].mxu0  ;;  %15648 = vmatprep.subr.bf16.mxu1 %v16888_v42  ;;  %v16928_v42 = vld [vmem:[%s20916_s1 + $0x1e78] sm:$0xff]  }
 0x3b7   :  { %v15325_v45 = vpop.f32.mrb[89].mxu0  ;;  %v15346_v47 = vpop.f32.mrb[88].mxu1 }
 0x3b8   :  { %v15326_v48 = vadd.f32 %v15325_v45, %v15324_v43  ;;  %v15327_v49 = vpop.f32.mrb[90].mxu0  ;;  %v15347_v52 = vpop.f32.mrb[89].mxu1  ;;  %15627 = vmatpush3.bf16.msra.mxu0 %v16889_v44  ;;  %v16927_v44 = vld [vmem:[%s20916_s1 + $0x1eb0] sm:$0xff]   ;;  %v16929_v45 = vld [vmem:[%s20916_s1 + $0x1ef8] sm:$0xff]  }
 0x3b9   :  { %v15328_v53 = vpop.f32.mrb[91].mxu0  ;;  %v15348_v55 = vadd.f32 %v15347_v52, %v15346_v47  ;;  %v15349_v56 = vpop.f32.mrb[90].mxu1  ;;  %15628 = vmatprep.subr.bf16.mxu0 %v16891_v50  ;;  %15649 = vmatpush3.bf16.msra.mxu1 %v16890_v46  ;;  %v16930_v46 = vld [vmem:[%s20916_s1 + $0x1e38] sm:$0xff]   ;;  %v16932_v49 = vld [vmem:[%s20916_s1 + $0x1f40] sm:$0xff]  }
 0x3ba   :  { %v12095_v54 = vadd.f32 %v15326_v48, %v20152_v3  ;;  %v15350_v58 = vpop.f32.mrb[91].mxu1  ;;  %15650 = vmatprep.subr.bf16.mxu1 %v16892_v51  ;;  %v16901_v3 = vld [vmem:[%s20916_s1 + $0x1ec0] sm:$0xff]   ;;  %v30_v47 = vld [vmem:[%s20917_s0 + $0x78] sm:$0xff] }
 0x3bb   :  { %v3104_v48 = vrot.slane %v30_v47, %v17206_v35  ;;  %v3097_v50 = vcombine.high %v30_v47, %v30_v47  ;;  %v16931_v51 = vld [vmem:[%s20916_s1 + $0x1eb8] sm:$0xff]   ;;  %v16934_v56 = vld [vmem:[%s20916_s1 + $0x1f00] sm:$0xff]   ;;  %v16969_v47 = vld [vmem:[%s20916_s1 + $0x2048] sm:$0xff]  }
 0x3bc   :  { %v20263_v60 = vadd.f32 %v15348_v55, %v12095_v54  ;;  %15629 = vmatpush3.bf16.msra.mxu0 %v16893_v57  ;;  %v16933_v54 = vld [vmem:[%s20916_s1 + $0x1fc0] sm:$0xff]  }
 0x3bd   :  { %15630 = vmatprep.subr.bf16.mxu0 %v16895_v61  ;;  %15651 = vmatpush3.bf16.msra.mxu1 %v16894_v59  ;;  %v3112_v52 = vcombine.high %v3104_v48, %v3104_v48  ;;  %v3120_v53 = vrot.slane %v3104_v48, %v17206_v35  ;;  %v20390_v55 = vrot.slane %v3097_v50, %v17206_v35  ;;  %v16935_v58 = vld [vmem:[%s20916_s1 + $0x1f80] sm:$0xff]   ;;  %v16936_v61 = vld [vmem:[%s20916_s1 + $0x1f48] sm:$0xff]  }
 0x3be   :  { %15652 = vmatprep.subr.bf16.mxu1 %v16896_v62  ;;  %v16970_v48 = vld [vmem:[%s20916_s1 + $0x20c8] sm:$0xff]  }
 0x3bf   :  { %v3134_v57 = vrot.slane %v3112_v52, %v17206_v35  ;;  %v3113_v59 = vcombine.high %v20390_v55, %v20390_v55  ;;  %v16972_v50 = vld [vmem:[%s20916_s1 + $0x2088] sm:$0xff]   ;;  %v16974_v52 = vld [vmem:[%s20916_s1 + $0x20d0] sm:$0xff]  }
 0x3c0   :  { %15631 = vmatpush3.bf16.msra.mxu0 %v16897_v63  ;;  %v16937_v63 = vld [vmem:[%s20916_s1 + $0x1fc8] sm:$0xff]  }
 0x3c1   :  { %15660 = vmatprep.subr.bf16.mxu0 %v16900_v2  ;;  %15653 = vmatpush3.bf16.msra.mxu1 %v16898_v0  ;;  %v3144_v62 = vcombine.high %v3134_v57, %v3134_v57  ;;  %v3141_v0 = vrot.slane %v3113_v59, %v17206_v35  ;;  %v16939_v2 = vld [vmem:[%s20916_s1 + $0x1f88] sm:$0xff]   ;;  %v16981_v59 = vld [vmem:[%s20916_s1 + $0x2060] sm:$0xff]  }
 0x3c2   :  { %15682 = vmatprep.subr.bf16.mxu1 %v16901_v3 }
 0x3c3   :  { %12653 = vmatmul.mubr.bf16.vlgmr.msra.gmra.mrb[116].mxu0 %v3078_v1  ;;  %v16938_v1 = vld [vmem:[%s20916_s1 + $0x1f08] sm:$0xff]   ;;  %v3145_v3 = vcombine.high %v3141_v0, %v3141_v0 }
 0x3c4   :  { %15661 = vmatpush3.bf16.msra.mxu0 %v16902_v4  ;;  %12693 = vmatmul.mubr.bf16.vlgmr.msra.gmra.mrb[116].mxu1 %v3094_v6  ;;  %v16940_v4 = vld [vmem:[%s20916_s1 + $0x1f50] sm:$0xff]  }
 0x3c5   :  { %15662 = vmatprep.subr.bf16.mxu0 %v16904_v7  ;;  %15683 = vmatpush3.bf16.msra.mxu1 %v16903_v5  ;;  %v16941_v5 = vld [vmem:[%s20916_s1 + $0x1fd0] sm:$0xff]  }
 0x3c6   :  { %15684 = vmatprep.subr.bf16.mxu1 %v16905_v8  ;;  %12732 = vmatprep.mubr.bf16.mxu0 %v3134_v57  ;;  %v16942_v6 = vld [vmem:[%s20916_s1 + $0x1f10] sm:$0xff]   ;;  %v16944_v8 = vld [vmem:[%s20916_s1 + $0x1f58] sm:$0xff]  }
 0x3c7   :  { %12772 = vmatprep.mubr.bf16.mxu1 %v3144_v62  ;;  %v16943_v7 = vld [vmem:[%s20916_s1 + $0x1f90] sm:$0xff]   ;;  %v16979_v57 = vld [vmem:[%s20916_s1 + $0x2018] sm:$0xff]   ;;  %v16984_v62 = vld [vmem:[%s20916_s1 + $0x20a0] sm:$0xff]  }
 0x3c8   :  { %15663 = vmatpush3.bf16.msra.mxu0 %v16906_v9  ;;  %v16945_v9 = vld [vmem:[%s20916_s1 + $0x1fd8] sm:$0xff]  }
 0x3c9   :  { %15664 = vmatprep.subr.bf16.mxu0 %v16908_v11  ;;  %15685 = vmatpush3.bf16.msra.mxu1 %v16907_v10  ;;  %v16946_v10 = vld [vmem:[%s20916_s1 + $0x1f18] sm:$0xff]  }
 0x3ca   :  { %15686 = vmatprep.subr.bf16.mxu1 %v16909_v12  ;;  %v16947_v11 = vld [vmem:[%s20916_s1 + $0x1f98] sm:$0xff]   ;;  %v16948_v12 = vld [vmem:[%s20916_s1 + $0x1f60] sm:$0xff]  }
 0x3cc   :  { %15665 = vmatpush3.bf16.msra.mxu0 %v16910_v13  ;;  %v16949_v13 = vld [vmem:[%s20916_s1 + $0x1fe0] sm:$0xff]  }
 0x3cd   :  { %15666 = vmatprep.subr.bf16.mxu0 %v16912_v15  ;;  %15687 = vmatpush3.bf16.msra.mxu1 %v16911_v14  ;;  %v16950_v14 = vld [vmem:[%s20916_s1 + $0x1f20] sm:$0xff]  }
 0x3ce   :  { %15688 = vmatprep.subr.bf16.mxu1 %v16913_v16  ;;  %v16951_v15 = vld [vmem:[%s20916_s1 + $0x1fa0] sm:$0xff]   ;;  %v16952_v16 = vld [vmem:[%s20916_s1 + $0x1f68] sm:$0xff]  }
 0x3d0   :  { %15667 = vmatpush3.bf16.msra.mxu0 %v16914_v17  ;;  %v16953_v17 = vld [vmem:[%s20916_s1 + $0x1fe8] sm:$0xff]  }
 0x3d1   :  { %15668 = vmatprep.subr.bf16.mxu0 %v16916_v19  ;;  %15689 = vmatpush3.bf16.msra.mxu1 %v16915_v18  ;;  %v16954_v19 = vld [vmem:[%s20916_s1 + $0x1f28] sm:$0xff]  }
 0x3d2   :  { %15690 = vmatprep.subr.bf16.mxu1 %v16917_v20 }
 0x3d4   :  { %15669 = vmatpush3.bf16.msra.mxu0 %v16918_v21  ;;  %v16955_v21 = vld [vmem:[%s20916_s1 + $0x1fa8] sm:$0xff]  }
 0x3d5   :  { %15670 = vmatprep.subr.bf16.mxu0 %v16920_v23  ;;  %15691 = vmatpush3.bf16.msra.mxu1 %v16919_v22 }
 0x3d6   :  { %v15368_v25 = vpop.f32.mrb[92].mxu0  ;;  %15692 = vmatprep.subr.bf16.mxu1 %v16921_v24 }
 0x3d7   :  { %v15369_v27 = vpop.f32.mrb[93].mxu0  ;;  %v15390_v29 = vpop.f32.mrb[92].mxu1 }
 0x3d8   :  { %v15370_v30 = vadd.f32 %v15369_v27, %v15368_v25  ;;  %v15371_v31 = vpop.f32.mrb[94].mxu0  ;;  %v15391_v32 = vpop.f32.mrb[93].mxu1  ;;  %15671 = vmatpush3.bf16.msra.mxu0 %v16922_v26  ;;  %v16956_v25 = vld [vmem:[%s20916_s1 + $0x1f70] sm:$0xff]  }
 0x3d9   :  { %v15372_v34 = vpop.f32.mrb[95].mxu0  ;;  %v15392_v38 = vadd.f32 %v15391_v32, %v15390_v29  ;;  %v15393_v39 = vpop.f32.mrb[94].mxu1  ;;  %15672 = vmatprep.subr.bf16.mxu0 %v16924_v28  ;;  %15693 = vmatpush3.bf16.msra.mxu1 %v16923_v33  ;;  %v16957_v26 = vld [vmem:[%s20916_s1 + $0x1ff0] sm:$0xff]  }
 0x3da   :  { %v12175_v37 = vadd.f32 %v15370_v30, %v20263_v60  ;;  %v15394_v41 = vpop.f32.mrb[95].mxu1  ;;  %15694 = vmatprep.subr.bf16.mxu1 %v16925_v36  ;;  %v3142_v60 = vcombine.high %v3120_v53, %v3120_v53  ;;  %v16958_v32 = vld [vmem:[%s20916_s1 + $0x1f30] sm:$0xff]   ;;  %v16962_v39 = vld [vmem:[%s20916_s1 + $0x1f38] sm:$0xff]  }
 0x3db   :  { %v16959_v34 = vld [vmem:[%s20916_s1 + $0x1fb0] sm:$0xff]   ;;  %v3127_v41 = vrot.slane %v20390_v55, %v17206_v35  ;;  %v16977_v55 = vld [vmem:[%s20916_s1 + $0x2058] sm:$0xff]  }
 0x3dc   :  { %v20364_v43 = vadd.f32 %v15392_v38, %v12175_v37  ;;  %15673 = vmatpush3.bf16.msra.mxu0 %v16926_v40  ;;  %v16960_v37 = vld [vmem:[%s20916_s1 + $0x1f78] sm:$0xff]  }
 0x3dd   :  { %15674 = vmatprep.subr.bf16.mxu0 %v16928_v42  ;;  %15695 = vmatpush3.bf16.msra.mxu1 %v16927_v44  ;;  %v16961_v38 = vld [vmem:[%s20916_s1 + $0x1ff8] sm:$0xff]   ;;  %v16965_v42 = vld [vmem:[%s20916_s1 + $0x2040] sm:$0xff]  }
 0x3de   :  { %15696 = vmatprep.subr.bf16.mxu1 %v16929_v45  ;;  %v16963_v40 = vld [vmem:[%s20916_s1 + $0x1fb8] sm:$0xff]   ;;  %v16967_v44 = vld [vmem:[%s20916_s1 + $0x2000] sm:$0xff]  }
 0x3df   :  { %v16968_v45 = vld [vmem:[%s20916_s1 + $0x2080] sm:$0xff]  }
 0x3e0   :  { %15675 = vmatpush3.bf16.msra.mxu0 %v16930_v46  ;;  %v3143_v46 = vcombine.high %v3127_v41, %v3127_v41 }
 0x3e1   :  { %15704 = vmatprep.subr.bf16.mxu0 %v16932_v49  ;;  %15697 = vmatpush3.bf16.msra.mxu1 %v16931_v51  ;;  %v16971_v49 = vld [vmem:[%s20916_s1 + $0x2008] sm:$0xff]   ;;  %v16973_v51 = vld [vmem:[%s20916_s1 + $0x2050] sm:$0xff]  }
 0x3e2   :  { %15726 = vmatprep.subr.bf16.mxu1 %v16933_v54  ;;  %v16976_v54 = vld [vmem:[%s20916_s1 + $0x2090] sm:$0xff]  }
 0x3e3   :  { %12733 = vmatmul.mubr.bf16.vlgmr.msra.gmra.mrb[120].mxu0 %v3120_v53  ;;  %v16975_v53 = vld [vmem:[%s20916_s1 + $0x2010] sm:$0xff]  }
 0x3e4   :  { %15705 = vmatpush3.bf16.msra.mxu0 %v16934_v56  ;;  %12773 = vmatmul.mubr.bf16.vlgmr.msra.gmra.mrb[120].mxu1 %v3142_v60  ;;  %v16978_v56 = vld [vmem:[%s20916_s1 + $0x20d8] sm:$0xff]   ;;  %v16982_v60 = vld [vmem:[%s20916_s1 + $0x20e0] sm:$0xff]  }
 0x3e5   :  { %15706 = vmatprep.subr.bf16.mxu0 %v16936_v61  ;;  %15727 = vmatpush3.bf16.msra.mxu1 %v16935_v58  ;;  %v16980_v58 = vld [vmem:[%s20916_s1 + $0x2098] sm:$0xff]   ;;  %v16983_v61 = vld [vmem:[%s20916_s1 + $0x2020] sm:$0xff]  }
 0x3e6   :  { %12812 = vmatprep.mubr.bf16.mxu0 %v3141_v0  ;;  %15728 = vmatprep.subr.bf16.mxu1 %v16937_v63  ;;  %v16985_v63 = vld [vmem:[%s20916_s1 + $0x2068] sm:$0xff]  }
 0x3e7   :  { %12852 = vmatprep.mubr.bf16.mxu1 %v3145_v3  ;;  %v16986_v0 = vld [vmem:[%s20916_s1 + $0x20e8] sm:$0xff]  }
 0x3e8   :  { %15707 = vmatpush3.bf16.msra.mxu0 %v16938_v1 }
 0x3e9   :  { %15708 = vmatprep.subr.bf16.mxu0 %v16940_v4  ;;  %15729 = vmatpush3.bf16.msra.mxu1 %v16939_v2  ;;  %v16987_v2 = vld [vmem:[%s20916_s1 + $0x2028] sm:$0xff]   ;;  %v16989_v4 = vld [vmem:[%s20916_s1 + $0x2070] sm:$0xff]  }
 0x3ea   :  { %15730 = vmatprep.subr.bf16.mxu1 %v16941_v5 }
 0x3ec   :  { %15709 = vmatpush3.bf16.msra.mxu0 %v16942_v6 }
 0x3ed   :  { %15710 = vmatprep.subr.bf16.mxu0 %v16944_v8  ;;  %15731 = vmatpush3.bf16.msra.mxu1 %v16943_v7 }
 0x3ee   :  { %15732 = vmatprep.subr.bf16.mxu1 %v16945_v9  ;;  %v16988_v9 = vld [vmem:[%s20916_s1 + $0x20a8] sm:$0xff]  }
 0x3f0   :  { %15711 = vmatpush3.bf16.msra.mxu0 %v16946_v10 }
 0x3f1   :  { %15712 = vmatprep.subr.bf16.mxu0 %v16948_v12  ;;  %15733 = vmatpush3.bf16.msra.mxu1 %v16947_v11  ;;  %v16990_v11 = vld [vmem:[%s20916_s1 + $0x20f0] sm:$0xff]  }
 0x3f2   :  { %15734 = vmatprep.subr.bf16.mxu1 %v16949_v13 }
 0x3f4   :  { %15713 = vmatpush3.bf16.msra.mxu0 %v16950_v14 }
 0x3f5   :  { %15714 = vmatprep.subr.bf16.mxu0 %v16952_v16  ;;  %15735 = vmatpush3.bf16.msra.mxu1 %v16951_v15  ;;  %v16991_v15 = vld [vmem:[%s20916_s1 + $0x2030] sm:$0xff]  }
 0x3f6   :  { %v15412_v18 = vpop.f32.mrb[96].mxu0  ;;  %15736 = vmatprep.subr.bf16.mxu1 %v16953_v17  ;;  %v16993_v17 = vld [vmem:[%s20916_s1 + $0x2078] sm:$0xff]  }
 0x3f7   :  { %v15413_v20 = vpop.f32.mrb[97].mxu0  ;;  %v15434_v22 = vpop.f32.mrb[96].mxu1 }
 0x3f8   :  { %v15414_v23 = vadd.f32 %v15413_v20, %v15412_v18  ;;  %v15415_v24 = vpop.f32.mrb[98].mxu0  ;;  %v15435_v27 = vpop.f32.mrb[97].mxu1  ;;  %15715 = vmatpush3.bf16.msra.mxu0 %v16954_v19  ;;  %v16992_v19 = vld [vmem:[%s20916_s1 + $0x20b0] sm:$0xff]   ;;  %v16994_v20 = vld [vmem:[%s20916_s1 + $0x20f8] sm:$0xff]  }
 0x3f9   :  { %v15416_v28 = vpop.f32.mrb[99].mxu0  ;;  %v15436_v30 = vadd.f32 %v15435_v27, %v15434_v22  ;;  %v15437_v31 = vpop.f32.mrb[98].mxu1  ;;  %15716 = vmatprep.subr.bf16.mxu0 %v16956_v25  ;;  %15737 = vmatpush3.bf16.msra.mxu1 %v16955_v21  ;;  %v16995_v21 = vld [vmem:[%s20916_s1 + $0x2038] sm:$0xff]   ;;  %v31_v22 = vld [vmem:[%s20917_s0 + $0x80] sm:$0xff] }
 0x3fa   :  { %v12255_v29 = vadd.f32 %v15414_v23, %v20364_v43  ;;  %v15438_v33 = vpop.f32.mrb[99].mxu1  ;;  %15738 = vmatprep.subr.bf16.mxu1 %v16957_v26  ;;  %v16966_v43 = vld [vmem:[%s20916_s1 + $0x20c0] sm:$0xff]   ;;  %v3153_v23 = vrot.slane %v31_v22, %v17206_v35  ;;  %v3146_v25 = vcombine.high %v31_v22, %v31_v22  ;;  %v16996_v26 = vld [vmem:[%s20916_s1 + $0x20b8] sm:$0xff]   ;;  %v17034_v22 = vld [vmem:[%s20916_s1 + $0x2248] sm:$0xff]  }
 0x3fb   :  { %v16997_v24 = vld [vmem:[%s20916_s1 + $0x2140] sm:$0xff]  }
 0x3fc   :  { %v20475_v36 = vadd.f32 %v15436_v30, %v12255_v29  ;;  %15717 = vmatpush3.bf16.msra.mxu0 %v16958_v32  ;;  %v3161_v27 = vcombine.high %v3153_v23, %v3153_v23  ;;  %v3169_v28 = vrot.slane %v3153_v23, %v17206_v35  ;;  %v16998_v29 = vld [vmem:[%s20916_s1 + $0x21c0] sm:$0xff]   ;;  %v20602_v30 = vrot.slane %v3146_v25, %v17206_v35  ;;  %v17035_v23 = vld [vmem:[%s20916_s1 + $0x22c8] sm:$0xff]  }
 0x3fd   :  { %15718 = vmatprep.subr.bf16.mxu0 %v16960_v37  ;;  %15739 = vmatpush3.bf16.msra.mxu1 %v16959_v34  ;;  %v16999_v31 = vld [vmem:[%s20916_s1 + $0x2100] sm:$0xff]   ;;  %v17001_v37 = vld [vmem:[%s20916_s1 + $0x2148] sm:$0xff]  }
 0x3fe   :  { %15740 = vmatprep.subr.bf16.mxu1 %v16961_v38  ;;  %v3183_v32 = vrot.slane %v3161_v27, %v17206_v35  ;;  %v17000_v33 = vld [vmem:[%s20916_s1 + $0x2180] sm:$0xff]   ;;  %v3162_v34 = vcombine.high %v20602_v30, %v20602_v30  ;;  %v17037_v25 = vld [vmem:[%s20916_s1 + $0x2288] sm:$0xff]   ;;  %v17039_v27 = vld [vmem:[%s20916_s1 + $0x22d0] sm:$0xff]  }
 0x400   :  { %15719 = vmatpush3.bf16.msra.mxu0 %v16962_v39  ;;  %v3193_v38 = vcombine.high %v3183_v32, %v3183_v32  ;;  %v17002_v39 = vld [vmem:[%s20916_s1 + $0x21c8] sm:$0xff]  }
 0x401   :  { %15748 = vmatprep.subr.bf16.mxu0 %v16965_v42  ;;  %15741 = vmatpush3.bf16.msra.mxu1 %v16963_v40  ;;  %v3190_v40 = vrot.slane %v3162_v34, %v17206_v35  ;;  %v17004_v42 = vld [vmem:[%s20916_s1 + $0x2188] sm:$0xff]   ;;  %v17046_v34 = vld [vmem:[%s20916_s1 + $0x2260] sm:$0xff]  }
 0x402   :  { %15770 = vmatprep.subr.bf16.mxu1 %v16966_v43 }
 0x403   :  { %12813 = vmatmul.mubr.bf16.vlgmr.msra.gmra.mrb[124].mxu0 %v3127_v41  ;;  %v17003_v41 = vld [vmem:[%s20916_s1 + $0x2108] sm:$0xff]   ;;  %v3194_v43 = vcombine.high %v3190_v40, %v3190_v40 }
 0x404   :  { %15749 = vmatpush3.bf16.msra.mxu0 %v16967_v44  ;;  %12853 = vmatmul.mubr.bf16.vlgmr.msra.gmra.mrb[124].mxu1 %v3143_v46  ;;  %v17005_v44 = vld [vmem:[%s20916_s1 + $0x2150] sm:$0xff]  }
 0x405   :  { %15750 = vmatprep.subr.bf16.mxu0 %v16969_v47  ;;  %15771 = vmatpush3.bf16.msra.mxu1 %v16968_v45  ;;  %v17006_v45 = vld [vmem:[%s20916_s1 + $0x21d0] sm:$0xff]  }
 0x406   :  { %15772 = vmatprep.subr.bf16.mxu1 %v16970_v48  ;;  %12892 = vmatprep.mubr.bf16.mxu0 %v3183_v32  ;;  %v17007_v46 = vld [vmem:[%s20916_s1 + $0x2110] sm:$0xff]   ;;  %v17009_v48 = vld [vmem:[%s20916_s1 + $0x2158] sm:$0xff]  }
 0x407   :  { %12932 = vmatprep.mubr.bf16.mxu1 %v3193_v38  ;;  %v17008_v47 = vld [vmem:[%s20916_s1 + $0x2190] sm:$0xff]   ;;  %v17044_v32 = vld [vmem:[%s20916_s1 + $0x2218] sm:$0xff]   ;;  %v17049_v38 = vld [vmem:[%s20916_s1 + $0x22a0] sm:$0xff]  }
 0x408   :  { %15751 = vmatpush3.bf16.msra.mxu0 %v16971_v49  ;;  %v17010_v49 = vld [vmem:[%s20916_s1 + $0x21d8] sm:$0xff]  }
 0x409   :  { %15752 = vmatprep.subr.bf16.mxu0 %v16973_v51  ;;  %15773 = vmatpush3.bf16.msra.mxu1 %v16972_v50  ;;  %v17011_v50 = vld [vmem:[%s20916_s1 + $0x2118] sm:$0xff]  }
 0x40a   :  { %15774 = vmatprep.subr.bf16.mxu1 %v16974_v52  ;;  %v17012_v51 = vld [vmem:[%s20916_s1 + $0x2198] sm:$0xff]   ;;  %v17013_v52 = vld [vmem:[%s20916_s1 + $0x2160] sm:$0xff]  }
 0x40c   :  { %15753 = vmatpush3.bf16.msra.mxu0 %v16975_v53  ;;  %v17014_v53 = vld [vmem:[%s20916_s1 + $0x21e0] sm:$0xff]  }
 0x40d   :  { %15754 = vmatprep.subr.bf16.mxu0 %v16977_v55  ;;  %15775 = vmatpush3.bf16.msra.mxu1 %v16976_v54  ;;  %v17015_v54 = vld [vmem:[%s20916_s1 + $0x2120] sm:$0xff]  }
 0x40e   :  { %15776 = vmatprep.subr.bf16.mxu1 %v16978_v56  ;;  %v17016_v55 = vld [vmem:[%s20916_s1 + $0x21a0] sm:$0xff]   ;;  %v17017_v56 = vld [vmem:[%s20916_s1 + $0x2168] sm:$0xff]  }
 0x410   :  { %15755 = vmatpush3.bf16.msra.mxu0 %v16979_v57  ;;  %v17018_v57 = vld [vmem:[%s20916_s1 + $0x21e8] sm:$0xff]  }
 0x411   :  { %15756 = vmatprep.subr.bf16.mxu0 %v16981_v59  ;;  %15777 = vmatpush3.bf16.msra.mxu1 %v16980_v58  ;;  %v17019_v59 = vld [vmem:[%s20916_s1 + $0x2128] sm:$0xff]  }
 0x412   :  { %15778 = vmatprep.subr.bf16.mxu1 %v16982_v60 }
 0x414   :  { %15757 = vmatpush3.bf16.msra.mxu0 %v16983_v61  ;;  %v17020_v61 = vld [vmem:[%s20916_s1 + $0x21a8] sm:$0xff]  }
 0x415   :  { %15758 = vmatprep.subr.bf16.mxu0 %v16985_v63  ;;  %15779 = vmatpush3.bf16.msra.mxu1 %v16984_v62 }
 0x416   :  { %v15456_v1 = vpop.f32.mrb[100].mxu0  ;;  %15780 = vmatprep.subr.bf16.mxu1 %v16986_v0 }
 0x417   :  { %v15457_v3 = vpop.f32.mrb[101].mxu0  ;;  %v15478_v5 = vpop.f32.mrb[100].mxu1 }
 0x418   :  { %v15458_v6 = vadd.f32 %v15457_v3, %v15456_v1  ;;  %v15459_v7 = vpop.f32.mrb[102].mxu0  ;;  %v15479_v8 = vpop.f32.mrb[101].mxu1  ;;  %15759 = vmatpush3.bf16.msra.mxu0 %v16987_v2  ;;  %v17021_v1 = vld [vmem:[%s20916_s1 + $0x2170] sm:$0xff]  }
 0x419   :  { %v15460_v10 = vpop.f32.mrb[103].mxu0  ;;  %v15480_v13 = vadd.f32 %v15479_v8, %v15478_v5  ;;  %v15481_v14 = vpop.f32.mrb[102].mxu1  ;;  %15760 = vmatprep.subr.bf16.mxu0 %v16989_v4  ;;  %15781 = vmatpush3.bf16.msra.mxu1 %v16988_v9  ;;  %v17022_v2 = vld [vmem:[%s20916_s1 + $0x21f0] sm:$0xff]  }
 0x41a   :  { %v12335_v12 = vadd.f32 %v15458_v6, %v20475_v36  ;;  %v15482_v16 = vpop.f32.mrb[103].mxu1  ;;  %15782 = vmatprep.subr.bf16.mxu1 %v16990_v11  ;;  %v3191_v36 = vcombine.high %v3169_v28, %v3169_v28  ;;  %v17023_v8 = vld [vmem:[%s20916_s1 + $0x2130] sm:$0xff]   ;;  %v17027_v14 = vld [vmem:[%s20916_s1 + $0x2138] sm:$0xff]  }
 0x41b   :  { %v17024_v10 = vld [vmem:[%s20916_s1 + $0x21b0] sm:$0xff]   ;;  %v3176_v16 = vrot.slane %v20602_v30, %v17206_v35  ;;  %v17042_v30 = vld [vmem:[%s20916_s1 + $0x2258] sm:$0xff]  }
 0x41c   :  { %v20576_v18 = vadd.f32 %v15480_v13, %v12335_v12  ;;  %15761 = vmatpush3.bf16.msra.mxu0 %v16991_v15  ;;  %v17025_v12 = vld [vmem:[%s20916_s1 + $0x2178] sm:$0xff]  }
 0x41d   :  { %15762 = vmatprep.subr.bf16.mxu0 %v16993_v17  ;;  %15783 = vmatpush3.bf16.msra.mxu1 %v16992_v19  ;;  %v17026_v13 = vld [vmem:[%s20916_s1 + $0x21f8] sm:$0xff]   ;;  %v17030_v17 = vld [vmem:[%s20916_s1 + $0x2240] sm:$0xff]  }
 0x41e   :  { %15784 = vmatprep.subr.bf16.mxu1 %v16994_v20  ;;  %v17028_v15 = vld [vmem:[%s20916_s1 + $0x21b8] sm:$0xff]   ;;  %v17032_v19 = vld [vmem:[%s20916_s1 + $0x2200] sm:$0xff]  }
 0x41f   :  { %v17033_v20 = vld [vmem:[%s20916_s1 + $0x2280] sm:$0xff]  }
 0x420   :  { %15763 = vmatpush3.bf16.msra.mxu0 %v16995_v21  ;;  %v3192_v21 = vcombine.high %v3176_v16, %v3176_v16 }
 0x421   :  { %15792 = vmatprep.subr.bf16.mxu0 %v16997_v24  ;;  %15785 = vmatpush3.bf16.msra.mxu1 %v16996_v26  ;;  %v17036_v24 = vld [vmem:[%s20916_s1 + $0x2208] sm:$0xff]   ;;  %v17038_v26 = vld [vmem:[%s20916_s1 + $0x2250] sm:$0xff]  }
 0x422   :  { %15814 = vmatprep.subr.bf16.mxu1 %v16998_v29  ;;  %v17041_v29 = vld [vmem:[%s20916_s1 + $0x2290] sm:$0xff]  }
 0x423   :  { %12893 = vmatmul.mubr.bf16.vlgmr.msra.gmra.mrb[128].mxu0 %v3169_v28  ;;  %v17040_v28 = vld [vmem:[%s20916_s1 + $0x2210] sm:$0xff]  }
 0x424   :  { %15793 = vmatpush3.bf16.msra.mxu0 %v16999_v31  ;;  %12933 = vmatmul.mubr.bf16.vlgmr.msra.gmra.mrb[128].mxu1 %v3191_v36  ;;  %v17043_v31 = vld [vmem:[%s20916_s1 + $0x22d8] sm:$0xff]   ;;  %v17047_v36 = vld [vmem:[%s20916_s1 + $0x22e0] sm:$0xff]  }
 0x425   :  { %15794 = vmatprep.subr.bf16.mxu0 %v17001_v37  ;;  %15815 = vmatpush3.bf16.msra.mxu1 %v17000_v33  ;;  %v17045_v33 = vld [vmem:[%s20916_s1 + $0x2298] sm:$0xff]   ;;  %v17048_v37 = vld [vmem:[%s20916_s1 + $0x2220] sm:$0xff]  }
 0x426   :  { %12972 = vmatprep.mubr.bf16.mxu0 %v3190_v40  ;;  %15816 = vmatprep.subr.bf16.mxu1 %v17002_v39  ;;  %v17050_v39 = vld [vmem:[%s20916_s1 + $0x2268] sm:$0xff]  }
 0x427   :  { %13012 = vmatprep.mubr.bf16.mxu1 %v3194_v43  ;;  %v17051_v40 = vld [vmem:[%s20916_s1 + $0x22e8] sm:$0xff]  }
 0x428   :  { %15795 = vmatpush3.bf16.msra.mxu0 %v17003_v41 }
 0x429   :  { %15796 = vmatprep.subr.bf16.mxu0 %v17005_v44  ;;  %15817 = vmatpush3.bf16.msra.mxu1 %v17004_v42  ;;  %v17052_v42 = vld [vmem:[%s20916_s1 + $0x2228] sm:$0xff]   ;;  %v17054_v44 = vld [vmem:[%s20916_s1 + $0x2270] sm:$0xff]  }
 0x42a   :  { %15818 = vmatprep.subr.bf16.mxu1 %v17006_v45 }
 0x42c   :  { %15797 = vmatpush3.bf16.msra.mxu0 %v17007_v46 }
 0x42d   :  { %15798 = vmatprep.subr.bf16.mxu0 %v17009_v48  ;;  %15819 = vmatpush3.bf16.msra.mxu1 %v17008_v47 }
 0x42e   :  { %15820 = vmatprep.subr.bf16.mxu1 %v17010_v49  ;;  %v17053_v49 = vld [vmem:[%s20916_s1 + $0x22a8] sm:$0xff]  }
 0x430   :  { %15799 = vmatpush3.bf16.msra.mxu0 %v17011_v50 }
 0x431   :  { %15800 = vmatprep.subr.bf16.mxu0 %v17013_v52  ;;  %15821 = vmatpush3.bf16.msra.mxu1 %v17012_v51  ;;  %v17055_v51 = vld [vmem:[%s20916_s1 + $0x22f0] sm:$0xff]  }
 0x432   :  { %15822 = vmatprep.subr.bf16.mxu1 %v17014_v53 }
 0x434   :  { %15801 = vmatpush3.bf16.msra.mxu0 %v17015_v54 }
 0x435   :  { %15802 = vmatprep.subr.bf16.mxu0 %v17017_v56  ;;  %15823 = vmatpush3.bf16.msra.mxu1 %v17016_v55  ;;  %v17056_v55 = vld [vmem:[%s20916_s1 + $0x2230] sm:$0xff]  }
 0x436   :  { %v15500_v58 = vpop.f32.mrb[104].mxu0  ;;  %15824 = vmatprep.subr.bf16.mxu1 %v17018_v57  ;;  %v17058_v57 = vld [vmem:[%s20916_s1 + $0x2278] sm:$0xff]  }
 0x437   :  { %v15501_v60 = vpop.f32.mrb[105].mxu0  ;;  %v15522_v62 = vpop.f32.mrb[104].mxu1 }
 0x438   :  { %v15502_v63 = vadd.f32 %v15501_v60, %v15500_v58  ;;  %v15503_v0 = vpop.f32.mrb[106].mxu0  ;;  %v15523_v3 = vpop.f32.mrb[105].mxu1  ;;  %15803 = vmatpush3.bf16.msra.mxu0 %v17019_v59  ;;  %v17057_v59 = vld [vmem:[%s20916_s1 + $0x22b0] sm:$0xff]   ;;  %v17059_v60 = vld [vmem:[%s20916_s1 + $0x22f8] sm:$0xff]  }
 0x439   :  { %v15504_v4 = vpop.f32.mrb[107].mxu0  ;;  %v15524_v6 = vadd.f32 %v15523_v3, %v15522_v62  ;;  %v15525_v7 = vpop.f32.mrb[106].mxu1  ;;  %15804 = vmatprep.subr.bf16.mxu0 %v17021_v1  ;;  %15825 = vmatpush3.bf16.msra.mxu1 %v17020_v61  ;;  %v17060_v61 = vld [vmem:[%s20916_s1 + $0x2238] sm:$0xff]   ;;  %v32_v62 = vld [vmem:[%s20917_s0 + $0x88] sm:$0xff]  ;;  %v17062_v0 = vld [vmem:[%s20916_s1 + $0x2340] sm:$0xff]  }
 0x43a   :  { %v12415_v5 = vadd.f32 %v15502_v63, %v20576_v18  ;;  %v15526_v9 = vpop.f32.mrb[107].mxu1  ;;  %15826 = vmatprep.subr.bf16.mxu1 %v17022_v2  ;;  %v17031_v18 = vld [vmem:[%s20916_s1 + $0x22c0] sm:$0xff]   ;;  %v3202_v63 = vrot.slane %v32_v62, %v17206_v35  ;;  %v3195_v1 = vcombine.high %v32_v62, %v32_v62  ;;  %v17061_v2 = vld [vmem:[%s20916_s1 + $0x22b8] sm:$0xff]  }
 0x43c   :  { %v20687_v11 = vadd.f32 %v15524_v6, %v12415_v5  ;;  %15805 = vmatpush3.bf16.msra.mxu0 %v17023_v8  ;;  %v3210_v3 = vcombine.high %v3202_v63, %v3202_v63  ;;  %v3218_v4 = vrot.slane %v3202_v63, %v17206_v35  ;;  %v17063_v5 = vld [vmem:[%s20916_s1 + $0x23c0] sm:$0xff]   ;;  %v20814_v6 = vrot.slane %v3195_v1, %v17206_v35 }
 0x43d   :  { %15806 = vmatprep.subr.bf16.mxu0 %v17025_v12  ;;  %15827 = vmatpush3.bf16.msra.mxu1 %v17024_v10  ;;  %v17064_v8 = vld [vmem:[%s20916_s1 + $0x2300] sm:$0xff]  }
 0x43e   :  { %15828 = vmatprep.subr.bf16.mxu1 %v17026_v13  ;;  %v3232_v7 = vrot.slane %v3210_v3, %v17206_v35  ;;  %v3211_v9 = vcombine.high %v20814_v6, %v20814_v6  ;;  %v3240_v10 = vcombine.high %v3218_v4, %v3218_v4  ;;  %v17065_v13 = vld [vmem:[%s20916_s1 + $0x2380] sm:$0xff]  }
 0x440   :  { %15807 = vmatpush3.bf16.msra.mxu0 %v17027_v14  ;;  %v3242_v12 = vcombine.high %v3232_v7, %v3232_v7  ;;  %v3239_v14 = vrot.slane %v3211_v9, %v17206_v35 }
 0x441   :  { %15836 = vmatprep.subr.bf16.mxu0 %v17030_v17  ;;  %15829 = vmatpush3.bf16.msra.mxu1 %v17028_v15  ;;  %v17067_v15 = vld [vmem:[%s20916_s1 + $0x23c8] sm:$0xff]  }
 0x442   :  { %15858 = vmatprep.subr.bf16.mxu1 %v17031_v18  ;;  %v3243_v17 = vcombine.high %v3239_v14, %v3239_v14  ;;  %v17070_v18 = vld [vmem:[%s20916_s1 + $0x2350] sm:$0xff]  }
 0x443   :  { %12973 = vmatmul.mubr.bf16.vlgmr.msra.gmra.mrb[132].mxu0 %v3176_v16  ;;  %v17068_v16 = vld [vmem:[%s20916_s1 + $0x2308] sm:$0xff]  }
 0x444   :  { %15837 = vmatpush3.bf16.msra.mxu0 %v17032_v19  ;;  %13013 = vmatmul.mubr.bf16.vlgmr.msra.gmra.mrb[132].mxu1 %v3192_v21  ;;  %v17069_v19 = vld [vmem:[%s20916_s1 + $0x2388] sm:$0xff]   ;;  %v17072_v21 = vld [vmem:[%s20916_s1 + $0x2310] sm:$0xff]  }
 0x445   :  { %15838 = vmatprep.subr.bf16.mxu0 %v17034_v22  ;;  %15859 = vmatpush3.bf16.msra.mxu1 %v17033_v20  ;;  %v17071_v20 = vld [vmem:[%s20916_s1 + $0x23d0] sm:$0xff]   ;;  %v17074_v22 = vld [vmem:[%s20916_s1 + $0x2358] sm:$0xff]  }
 0x446   :  { %15860 = vmatprep.subr.bf16.mxu1 %v17035_v23  ;;  %13052 = vmatprep.mubr.bf16.mxu0 %v3232_v7  ;;  %v17073_v23 = vld [vmem:[%s20916_s1 + $0x2390] sm:$0xff]  }
 0x447   :  { %13092 = vmatprep.mubr.bf16.mxu1 %v3242_v12 }
 0x448   :  { %15839 = vmatpush3.bf16.msra.mxu0 %v17036_v24  ;;  %v17075_v24 = vld [vmem:[%s20916_s1 + $0x23d8] sm:$0xff]  }
 0x449   :  { %15840 = vmatprep.subr.bf16.mxu0 %v17038_v26  ;;  %15861 = vmatpush3.bf16.msra.mxu1 %v17037_v25  ;;  %v17076_v25 = vld [vmem:[%s20916_s1 + $0x2318] sm:$0xff]   ;;  %v17078_v26 = vld [vmem:[%s20916_s1 + $0x2360] sm:$0xff]  }
 0x44a   :  { %15862 = vmatprep.subr.bf16.mxu1 %v17039_v27  ;;  %v17077_v27 = vld [vmem:[%s20916_s1 + $0x2398] sm:$0xff]  }
 0x44c   :  { %15841 = vmatpush3.bf16.msra.mxu0 %v17040_v28  ;;  %v17079_v28 = vld [vmem:[%s20916_s1 + $0x23e0] sm:$0xff]  }
 0x44d   :  { %15842 = vmatprep.subr.bf16.mxu0 %v17042_v30  ;;  %15863 = vmatpush3.bf16.msra.mxu1 %v17041_v29  ;;  %v17080_v29 = vld [vmem:[%s20916_s1 + $0x2320] sm:$0xff]   ;;  %v17082_v30 = vld [vmem:[%s20916_s1 + $0x2368] sm:$0xff]  }
 0x44e   :  { %15864 = vmatprep.subr.bf16.mxu1 %v17043_v31  ;;  %v17081_v31 = vld [vmem:[%s20916_s1 + $0x23a0] sm:$0xff]  }
 0x450   :  { %15843 = vmatpush3.bf16.msra.mxu0 %v17044_v32 }
 0x451   :  { %15844 = vmatprep.subr.bf16.mxu0 %v17046_v34  ;;  %15865 = vmatpush3.bf16.msra.mxu1 %v17045_v33  ;;  %v17083_v33 = vld [vmem:[%s20916_s1 + $0x23e8] sm:$0xff]  }
 0x452   :  { %15866 = vmatprep.subr.bf16.mxu1 %v17047_v36  ;;  %v17084_v36 = vld [vmem:[%s20916_s1 + $0x2328] sm:$0xff]  }
 0x454   :  { %15845 = vmatpush3.bf16.msra.mxu0 %v17048_v37 }
 0x455   :  { %15846 = vmatprep.subr.bf16.mxu0 %v17050_v39  ;;  %15867 = vmatpush3.bf16.msra.mxu1 %v17049_v38 }
 0x456   :  { %v15544_v41 = vpop.f32.mrb[108].mxu0  ;;  %15868 = vmatprep.subr.bf16.mxu1 %v17051_v40  ;;  %v17085_v40 = vld [vmem:[%s20916_s1 + $0x23a8] sm:$0xff]  }
 0x457   :  { %v15545_v43 = vpop.f32.mrb[109].mxu0  ;;  %v15566_v45 = vpop.f32.mrb[108].mxu1 }
 0x458   :  { %v15546_v46 = vadd.f32 %v15545_v43, %v15544_v41  ;;  %v15547_v47 = vpop.f32.mrb[110].mxu0  ;;  %v15567_v48 = vpop.f32.mrb[109].mxu1  ;;  %15847 = vmatpush3.bf16.msra.mxu0 %v17052_v42  ;;  %v17086_v41 = vld [vmem:[%s20916_s1 + $0x2370] sm:$0xff]  }
 0x459   :  { %v15548_v50 = vpop.f32.mrb[111].mxu0  ;;  %v15568_v53 = vadd.f32 %v15567_v48, %v15566_v45  ;;  %v15569_v54 = vpop.f32.mrb[110].mxu1  ;;  %15848 = vmatprep.subr.bf16.mxu0 %v17054_v44  ;;  %15869 = vmatpush3.bf16.msra.mxu1 %v17053_v49  ;;  %v17087_v47 = vld [vmem:[%s20916_s1 + $0x23f0] sm:$0xff]  }
 0x45a   :  { %v12495_v52 = vadd.f32 %v15546_v46, %v20687_v11  ;;  %v15570_v56 = vpop.f32.mrb[111].mxu1  ;;  %15870 = vmatprep.subr.bf16.mxu1 %v17055_v51  ;;  %v17066_v11 = vld [vmem:[%s20916_s1 + $0x2348] sm:$0xff]   ;;  %v17088_v49 = vld [vmem:[%s20916_s1 + $0x2330] sm:$0xff]   ;;  %v17090_v51 = vld [vmem:[%s20916_s1 + $0x2378] sm:$0xff]  }
 0x45b   :  { %v17092_v54 = vld [vmem:[%s20916_s1 + $0x2338] sm:$0xff]  }
 0x45c   :  { %v20788_v58 = vadd.f32 %v15568_v53, %v12495_v52  ;;  %15849 = vmatpush3.bf16.msra.mxu0 %v17056_v55  ;;  %v17089_v52 = vld [vmem:[%s20916_s1 + $0x23b0] sm:$0xff]   ;;  %v17091_v53 = vld [vmem:[%s20916_s1 + $0x23f8] sm:$0xff]   ;;  %v3225_v55 = vrot.slane %v20814_v6, %v17206_v35 }
 0x45d   :  { %15850 = vmatprep.subr.bf16.mxu0 %v17058_v57  ;;  %15871 = vmatpush3.bf16.msra.mxu1 %v17057_v59  ;;  %v17093_v56 = vld [vmem:[%s20916_s1 + $0x23b8] sm:$0xff]  }
 0x45e   :  { %15872 = vmatprep.subr.bf16.mxu1 %v17059_v60  ;;  %v3241_v57 = vcombine.high %v3225_v55, %v3225_v55 }
 0x460   :  { %15851 = vmatpush3.bf16.msra.mxu0 %v17060_v61 }
 0x461   :  { %15880 = vmatprep.subr.bf16.mxu0 %v17062_v0  ;;  %15873 = vmatpush3.bf16.msra.mxu1 %v17061_v2 }
 0x462   :  { %15902 = vmatprep.subr.bf16.mxu1 %v17063_v5 }
 0x463   :  { %13053 = vmatmul.mubr.bf16.vlgmr.msra.gmra.mrb[136].mxu0 %v3218_v4 }
 0x464   :  { %15881 = vmatpush3.bf16.msra.mxu0 %v17064_v8  ;;  %13093 = vmatmul.mubr.bf16.vlgmr.msra.gmra.mrb[136].mxu1 %v3240_v10 }
 0x465   :  { %15882 = vmatprep.subr.bf16.mxu0 %v17066_v11  ;;  %15903 = vmatpush3.bf16.msra.mxu1 %v17065_v13 }
 0x466   :  { %13132 = vmatprep.mubr.bf16.mxu0 %v3239_v14  ;;  %15904 = vmatprep.subr.bf16.mxu1 %v17067_v15 }
 0x467   :  { %13172 = vmatprep.mubr.bf16.mxu1 %v3243_v17 }
 0x468   :  { %15883 = vmatpush3.bf16.msra.mxu0 %v17068_v16 }
 0x469   :  { %15884 = vmatprep.subr.bf16.mxu0 %v17070_v18  ;;  %15905 = vmatpush3.bf16.msra.mxu1 %v17069_v19 }
 0x46a   :  { %15906 = vmatprep.subr.bf16.mxu1 %v17071_v20 }
 0x46c   :  { %15885 = vmatpush3.bf16.msra.mxu0 %v17072_v21 }
 0x46d   :  { %15886 = vmatprep.subr.bf16.mxu0 %v17074_v22  ;;  %15907 = vmatpush3.bf16.msra.mxu1 %v17073_v23 }
 0x46e   :  { %15908 = vmatprep.subr.bf16.mxu1 %v17075_v24 }
 0x470   :  { %15887 = vmatpush3.bf16.msra.mxu0 %v17076_v25 }
 0x471   :  { %15888 = vmatprep.subr.bf16.mxu0 %v17078_v26  ;;  %15909 = vmatpush3.bf16.msra.mxu1 %v17077_v27 }
 0x472   :  { %15910 = vmatprep.subr.bf16.mxu1 %v17079_v28 }
 0x474   :  { %15889 = vmatpush3.bf16.msra.mxu0 %v17080_v29 }
 0x475   :  { %15890 = vmatprep.subr.bf16.mxu0 %v17082_v30  ;;  %15911 = vmatpush3.bf16.msra.mxu1 %v17081_v31 }
 0x476   :  { %v15588_v32 = vpop.f32.mrb[112].mxu0  ;;  %15912 = vmatprep.subr.bf16.mxu1 %v17083_v33 }
 0x477   :  { %v15589_v34 = vpop.f32.mrb[113].mxu0  ;;  %v15610_v37 = vpop.f32.mrb[112].mxu1 }
 0x478   :  { %v15590_v38 = vadd.f32 %v15589_v34, %v15588_v32  ;;  %v15591_v39 = vpop.f32.mrb[114].mxu0  ;;  %v15611_v42 = vpop.f32.mrb[113].mxu1  ;;  %15891 = vmatpush3.bf16.msra.mxu0 %v17084_v36 }
 0x479   :  { %v15592_v43 = vpop.f32.mrb[115].mxu0  ;;  %v15612_v45 = vadd.f32 %v15611_v42, %v15610_v37  ;;  %v15613_v46 = vpop.f32.mrb[114].mxu1  ;;  %15892 = vmatprep.subr.bf16.mxu0 %v17086_v41  ;;  %15913 = vmatpush3.bf16.msra.mxu1 %v17085_v40 }
 0x47a   :  { %v12575_v44 = vadd.f32 %v15590_v38, %v20788_v58  ;;  %v15614_v48 = vpop.f32.mrb[115].mxu1  ;;  %15914 = vmatprep.subr.bf16.mxu1 %v17087_v47 }
 0x47c   :  { %v12615_v50 = vadd.f32 %v15612_v45, %v12575_v44  ;;  %15893 = vmatpush3.bf16.msra.mxu0 %v17088_v49 }
 0x47d   :  { %15894 = vmatprep.subr.bf16.mxu0 %v17090_v51  ;;  %15915 = vmatpush3.bf16.msra.mxu1 %v17089_v52 }
 0x47e   :  { %15916 = vmatprep.subr.bf16.mxu1 %v17091_v53 }
 0x480   :  { %15895 = vmatpush3.bf16.msra.mxu0 %v17092_v54 }
 0x481   :  { %15917 = vmatpush3.bf16.msra.mxu1 %v17093_v56 }
 0x483   :  { %13133 = vmatmul.mubr.bf16.vlgmr.msra.gmra.mrb[140].mxu0 %v3225_v55 }
 0x484   :  { %13173 = vmatmul.mubr.bf16.vlgmr.msra.gmra.mrb[140].mxu1 %v3241_v57 }
 0x496   :  { %v15632_v58 = vpop.f32.mrb[116].mxu0 }
 0x497   :  { %v15633_v59 = vpop.f32.mrb[117].mxu0  ;;  %v15654_v60 = vpop.f32.mrb[116].mxu1 }
 0x498   :  { %v15634_v61 = vadd.f32 %v15633_v59, %v15632_v58  ;;  %v15635_v62 = vpop.f32.mrb[118].mxu0  ;;  %v15655_v63 = vpop.f32.mrb[117].mxu1 }
 0x499   :  { %v15636_v0 = vpop.f32.mrb[119].mxu0  ;;  %v15656_v35 = vadd.f32 %v15655_v63, %v15654_v60  ;;  %v15657_v2 = vpop.f32.mrb[118].mxu1 }
 0x49a   :  { %v12655_v1 = vadd.f32 %v15634_v61, %v12615_v50  ;;  %v15658_v3 = vpop.f32.mrb[119].mxu1 }
 0x49c   :  { %v12695_v4 = vadd.f32 %v15656_v35, %v12655_v1 }
 0x4b6   :  { %v15676_v5 = vpop.f32.mrb[120].mxu0 }
 0x4b7   :  { %v15677_v6 = vpop.f32.mrb[121].mxu0  ;;  %v15698_v7 = vpop.f32.mrb[120].mxu1 }
 0x4b8   :  { %v15678_v8 = vadd.f32 %v15677_v6, %v15676_v5  ;;  %v15679_v9 = vpop.f32.mrb[122].mxu0  ;;  %v15699_v10 = vpop.f32.mrb[121].mxu1 }
 0x4b9   :  { %v15680_v11 = vpop.f32.mrb[123].mxu0  ;;  %v15700_v13 = vadd.f32 %v15699_v10, %v15698_v7  ;;  %v15701_v14 = vpop.f32.mrb[122].mxu1 }
 0x4ba   :  { %v12735_v12 = vadd.f32 %v15678_v8, %v12695_v4  ;;  %v15702_v15 = vpop.f32.mrb[123].mxu1 }
 0x4bc   :  { %v12775_v16 = vadd.f32 %v15700_v13, %v12735_v12 }
 0x4d6   :  { %v15720_v17 = vpop.f32.mrb[124].mxu0 }
 0x4d7   :  { %v15721_v18 = vpop.f32.mrb[125].mxu0  ;;  %v15742_v19 = vpop.f32.mrb[124].mxu1 }
 0x4d8   :  { %v15722_v20 = vadd.f32 %v15721_v18, %v15720_v17  ;;  %v15723_v21 = vpop.f32.mrb[126].mxu0  ;;  %v15743_v22 = vpop.f32.mrb[125].mxu1 }
 0x4d9   :  { %v15724_v23 = vpop.f32.mrb[127].mxu0  ;;  %v15744_v25 = vadd.f32 %v15743_v22, %v15742_v19  ;;  %v15745_v26 = vpop.f32.mrb[126].mxu1 }
 0x4da   :  { %v12815_v24 = vadd.f32 %v15722_v20, %v12775_v16  ;;  %v15746_v27 = vpop.f32.mrb[127].mxu1 }
 0x4dc   :  { %v12855_v28 = vadd.f32 %v15744_v25, %v12815_v24 }
 0x4f6   :  { %v15764_v29 = vpop.f32.mrb[128].mxu0 }
 0x4f7   :  { %v15765_v30 = vpop.f32.mrb[129].mxu0  ;;  %v15786_v31 = vpop.f32.mrb[128].mxu1 }
 0x4f8   :  { %v15766_v32 = vadd.f32 %v15765_v30, %v15764_v29  ;;  %v15767_v33 = vpop.f32.mrb[130].mxu0  ;;  %v15787_v34 = vpop.f32.mrb[129].mxu1 }
 0x4f9   :  { %v15768_v36 = vpop.f32.mrb[131].mxu0  ;;  %v15788_v38 = vadd.f32 %v15787_v34, %v15786_v31  ;;  %v15789_v39 = vpop.f32.mrb[130].mxu1 }
 0x4fa   :  { %v12895_v37 = vadd.f32 %v15766_v32, %v12855_v28  ;;  %v15790_v40 = vpop.f32.mrb[131].mxu1 }
 0x4fc   :  { %v12935_v41 = vadd.f32 %v15788_v38, %v12895_v37 }
 0x516   :  { %v15808_v42 = vpop.f32.mrb[132].mxu0 }
 0x517   :  { %v15809_v43 = vpop.f32.mrb[133].mxu0  ;;  %v15830_v44 = vpop.f32.mrb[132].mxu1 }
 0x518   :  { %v15810_v45 = vadd.f32 %v15809_v43, %v15808_v42  ;;  %v15811_v46 = vpop.f32.mrb[134].mxu0  ;;  %v15831_v47 = vpop.f32.mrb[133].mxu1 }
 0x519   :  { %v15812_v48 = vpop.f32.mrb[135].mxu0  ;;  %v15832_v50 = vadd.f32 %v15831_v47, %v15830_v44  ;;  %v15833_v51 = vpop.f32.mrb[134].mxu1 }
 0x51a   :  { %v12975_v49 = vadd.f32 %v15810_v45, %v12935_v41  ;;  %v15834_v52 = vpop.f32.mrb[135].mxu1 }
 0x51c   :  { %v13015_v53 = vadd.f32 %v15832_v50, %v12975_v49 }
 0x536   :  { %v15852_v54 = vpop.f32.mrb[136].mxu0 }
 0x537   :  { %v15853_v55 = vpop.f32.mrb[137].mxu0  ;;  %v15874_v56 = vpop.f32.mrb[136].mxu1 }
 0x538   :  { %v15854_v57 = vadd.f32 %v15853_v55, %v15852_v54  ;;  %v15855_v58 = vpop.f32.mrb[138].mxu0  ;;  %v15875_v59 = vpop.f32.mrb[137].mxu1 }
 0x539   :  { %v15856_v60 = vpop.f32.mrb[139].mxu0  ;;  %v15876_v62 = vadd.f32 %v15875_v59, %v15874_v56  ;;  %v15877_v63 = vpop.f32.mrb[138].mxu1 }
 0x53a   :  { %v13055_v61 = vadd.f32 %v15854_v57, %v13015_v53  ;;  %v15878_v0 = vpop.f32.mrb[139].mxu1 }
 0x53c   :  { %v13095_v1 = vadd.f32 %v15876_v62, %v13055_v61 }
 0x556   :  { %v15896_v35 = vpop.f32.mrb[140].mxu0 }
 0x557   :  { %v15897_v2 = vpop.f32.mrb[141].mxu0  ;;  %v15918_v3 = vpop.f32.mrb[140].mxu1 }
 0x558   :  { %v15898_v4 = vadd.f32 %v15897_v2, %v15896_v35  ;;  %v15899_v5 = vpop.f32.mrb[142].mxu0  ;;  %v15919_v6 = vpop.f32.mrb[141].mxu1 }
 0x559   :  { %v15900_v7 = vpop.f32.mrb[143].mxu0  ;;  %v15920_v9 = vadd.f32 %v15919_v6, %v15918_v3  ;;  %v15921_v10 = vpop.f32.mrb[142].mxu1 }
 0x55a   :  { %v13135_v8 = vadd.f32 %v15898_v4, %v13095_v1  ;;  %v15922_v11 = vpop.f32.mrb[143].mxu1 }
 0x55c   :  { %v13175_v12 = vadd.f32 %v15920_v9, %v13135_v8 }
 0x55e   :  { %v13180_v13 = vmax.f32 %v13175_v12, 0.0 }
 0x560   :  { %v13181_v14 = vpack.c.bf16 %v13180_v13, %v13180_v13 }
 0x562   :  { %13182 = vst [vmem:[%s20919_s3] sm:$0x1] %v13181_v14 }

</bundles_post_ra>
